<compile_context>
chip_gen: v7x
topology: tpu7x:2x2x1
jax: 0.10.0
libtpu: 0.0.40
codegen_flags: <defaults>
</compile_context>

<pallas_src>
import numpy as np

import jax
import jax.numpy as jnp
from jax.experimental import pallas as pl
from jax.experimental.pallas import tpu as pltpu


# --------------------------- weight -> matrix packing ---------------------------


def _conv_geom(n_in, k, stride, pad, mode):
    """Selection matrices for a direct conv along one spatial axis.
    G[kk, o, i] = 1 iff padded index o*stride+kk reads source index i."""
    n_out = (n_in + 2 * pad - k) // stride + 1
    G = np.zeros((k, n_out, n_in), np.float32)
    for kk in range(k):
        for o in range(n_out):
            r = o * stride + kk - pad
            if mode == "reflect":
                i = -r if r < 0 else (2 * n_in - 2 - r if r >= n_in else r)
            else:  # zero padding
                i = r if 0 <= r < n_in else -1
            if i >= 0:
                G[kk, o, i] = 1.0
    return G, n_out


def _tconv_geom(n_in, k=3, stride=2, pad=1, out_pad=1):
    """Selection matrices for ConvTranspose (k=3, s=2, p=1, op=1) along one axis.
    G[kk, o, i] = 1 iff output index o receives input index i through tap kk (o == i*s - p + kk)."""
    n_out = (n_in - 1) * stride - 2 * pad + k + out_pad
    G = np.zeros((k, n_out, n_in), np.float32)
    for kk in range(k):
        for i in range(n_in):
            o = i * stride - pad + kk
            if 0 <= o < n_out:
                G[kk, o, i] = 1.0
    return G, n_out


def _layer_arrays(w4, h_in, w_in, k, stride, pad, mode, transposed):
    """w4: weights as (kh, kw, cin, cout).
    Returns P: (k, oh, h_in) row-selection stack, A: (k, w_in*cin, ow*cout) fused
    column-selection x channel-mixing stack, plus output spatial dims."""
    if transposed:
        Ph, oh = _tconv_geom(h_in)
        Pw, ow = _tconv_geom(w_in)
    else:
        Ph, oh = _conv_geom(h_in, k, stride, pad, mode)
        Pw, ow = _conv_geom(w_in, k, stride, pad, mode)
    cin, cout = w4.shape[2], w4.shape[3]
    # A[kh][iw*cin+ci, ow*cout+co] = sum_kw Pw[kw, ow, iw] * w4[kh, kw, ci, co]
    a5 = jnp.einsum("koi,hkcd->hicod", jnp.asarray(Pw), w4)
    A = a5.reshape(k, w_in * cin, ow * cout)
    return jnp.asarray(Ph), A, oh, ow


def _inorm_mat(ow, c, oh):
    """(ow*c, ow*c) matrix: row_sum @ M = per-channel spatial mean, broadcast back to lanes."""
    n = ow * c
    j = np.arange(n)
    m = (j[:, None] % c == j[None, :] % c).astype(np.float32) / float(oh * ow)
    return jnp.asarray(m)


def _pack_network(params, H, W):
    assert H % 4 == 0 and W % 4 == 0, "spatial dims must be divisible by 4"
    ngf = params["c1_w"].shape[0]
    out_ch = params["co_w"].shape[0]
    n_blocks = len(params["res"])

    def conv_w(wp):   # Conv2d (cout, cin, kh, kw) -> (kh, kw, cin, cout)
        return jnp.transpose(wp.astype(jnp.float32), (2, 3, 1, 0))

    def tconv_w(wt):  # ConvTranspose2d (cin, cout, kh, kw) -> (kh, kw, cin, cout)
        return jnp.transpose(wt.astype(jnp.float32), (2, 3, 0, 1))

    # NOTE: bias before InstanceNorm(affine=False) is an exact no-op (mean subtraction cancels
    # it) -> skipped for all normalized layers; only the final conv keeps its bias.
    P1, A1, h1, w1 = _layer_arrays(conv_w(params["c1_w"]), H, W, 7, 1, 3, "reflect", False)
    P2, A2, h2, w2 = _layer_arrays(conv_w(params["c2_w"]), h1, w1, 3, 2, 1, "zero", False)
    P3, A3, h3, w3 = _layer_arrays(conv_w(params["c3_w"]), h2, w2, 3, 2, 1, "zero", False)

    # Residual blocks: identical geometry -> one shared P, all A taps stacked along axis 0.
    Pr, res_A = None, []
    for r in params["res"]:
        Pr, Ar1, _, _ = _layer_arrays(conv_w(r["w1"]), h3, w3, 3, 1, 1, "reflect", False)
        _,  Ar2, _, _ = _layer_arrays(conv_w(r["w2"]), h3, w3, 3, 1, 1, "reflect", False)
        res_A += [Ar1, Ar2]
    Ar = jnp.concatenate(res_A, axis=0)          # (2*n_blocks*3, w3*4ngf, w3*4ngf)

    Pt1, At1, h4, w4 = _layer_arrays(tconv_w(params["t1_w"]), h3, w3, 3, 2, 1, None, True)
    Pt2, At2, h5, w5 = _layer_arrays(tconv_w(params["t2_w"]), h4, w4, 3, 2, 1, None, True)
    Po, Ao, h6, w6 = _layer_arrays(conv_w(params["co_w"]), h5, w5, 7, 1, 3, "reflect", False)
    assert (h6, w6) == (H, W)

    M0 = _inorm_mat(W, ngf, H)                   # HxW,     C = ngf
    M1 = _inorm_mat(W // 2, 2 * ngf, H // 2)     # H/2xW/2, C = 2ngf
    M2 = _inorm_mat(W // 4, 4 * ngf, H // 4)     # H/4xW/4, C = 4ngf
    bias = jnp.tile(params["co_b"].astype(jnp.float32), W).reshape(1, W * out_ch)

    arrays = [P1, A1, P2, A2, P3, A3, Pr, Ar,
              Pt1, At1, Pt2, At2, Po, Ao, M0, M1, M2, bias]
    return arrays, n_blocks, out_ch


# --------------------------------- the kernel -----------------------------------


def _build_kernel(n_blocks):
    def kernel(x_ref,
               p1, a1, p2, a2, p3, a3,
               pr, ar,
               pt1, at1, pt2, at2,
               po, ao,
               m0, m1, m2, bias_ref,
               o_ref):

        def conv(x, p_ref, a_of, k):
            acc = None
            for kk in range(k):
                t = jnp.dot(p_ref[kk], x, preferred_element_type=jnp.float32)
                t = jnp.dot(t, a_of(kk), preferred_element_type=jnp.float32)
                acc = t if acc is None else acc + t
            return acc

        def inorm(x, m_ref):
            # InstanceNorm2d(affine=False), biased variance, eps=1e-5, two-pass stats.
            mmat = m_ref[...]
            mean = jnp.dot(jnp.sum(x, axis=0, keepdims=True), mmat,
                           preferred_element_type=jnp.float32)
            d = x - mean
            var = jnp.dot(jnp.sum(d * d, axis=0, keepdims=True), mmat,
                          preferred_element_type=jnp.float32)
            return d * jax.lax.rsqrt(var + 1e-5)

        relu = lambda v: jnp.maximum(v, 0.0)

        h = x_ref[0]                                                  # (H, W*Cin)
        h = relu(inorm(conv(h, p1, lambda kk: a1[kk], 7), m0))        # 7x7 reflect conv
        h = relu(inorm(conv(h, p2, lambda kk: a2[kk], 3), m1))        # 3x3 s2 conv
        h = relu(inorm(conv(h, p3, lambda kk: a3[kk], 3), m2))        # 3x3 s2 conv
        for b in range(n_blocks):                                     # residual blocks
            r = relu(inorm(conv(h, pr, lambda kk, li=2 * b: ar[3 * li + kk], 3), m2))
            r = inorm(conv(r, pr, lambda kk, li=2 * b + 1: ar[3 * li + kk], 3), m2)
            h = h + r                                                 # (dropout disabled)
        h = relu(inorm(conv(h, pt1, lambda kk: at1[kk], 3), m1))      # transposed conv 1
        h = relu(inorm(conv(h, pt2, lambda kk: at2[kk], 3), m0))      # transposed conv 2
        h = conv(h, po, lambda kk: ao[kk], 7) + bias_ref[...]         # final 7x7 conv + bias
        o_ref[0] = jnp.tanh(h)

    return kernel


# ------------------------------- public wrapper ----------------------------------


def resnet_forward(params, x_nchw):
    """x_nchw: (N, Cin, H, W) -> (N, out_ch, H, W). Matches Resnet.forward (inference)."""
    N, cin, H, W = x_nchw.shape
    arrays, n_blocks, out_ch = _pack_network(params, H, W)
    x2d = jnp.transpose(x_nchw, (0, 2, 3, 1)).astype(jnp.float32).reshape(N, H, W * cin)

    in_specs = [pl.BlockSpec((1, H, W * cin), lambda n: (n, 0, 0))]
    for a in arrays:  # weight-derived matrices: constant blocks, DMA'd into VMEM once
        in_specs.append(pl.BlockSpec(a.shape, (lambda n, _z=(0,) * a.ndim: _z)))

    out = pl.pallas_call(
        _build_kernel(n_blocks),
        out_shape=jax.ShapeDtypeStruct((N, H, W * out_ch), jnp.float32),
        grid=(N,),
        in_specs=in_specs,
        out_specs=pl.BlockSpec((1, H, W * out_ch), lambda n: (n, 0, 0)),
        compiler_params=pltpu.CompilerParams(dimension_semantics=("parallel",)),
    )(x2d, *arrays)
    return jnp.transpose(out.reshape(N, H, W, out_ch), (0, 3, 1, 2))


# ------------------------------- parameters --------------------------------------


def make_params(key, inp_ch=3, ngf=8, out_ch=3, n_blocks=6):
    def conv_w(kk, cout, cin, ks):
        return jax.random.normal(kk, (cout, cin, ks, ks), jnp.float32) * 0.05

    def tconv_w(kk, cin, cout, ks):
        return jax.random.normal(kk, (cin, cout, ks, ks), jnp.float32) * 0.05

    keys = jax.random.split(key, 8 + 2 * n_blocks)
    p = {}
    p["c1_w"], p["c1_b"] = conv_w(keys[0], ngf, inp_ch, 7), jnp.zeros((ngf,), jnp.float32)
    p["c2_w"], p["c2_b"] = conv_w(keys[1], 2 * ngf, ngf, 3), jnp.zeros((2 * ngf,), jnp.float32)
    p["c3_w"], p["c3_b"] = conv_w(keys[2], 4 * ngf, 2 * ngf, 3), jnp.zeros((4 * ngf,), jnp.float32)
    p["res"] = []
    for i in range(n_blocks):
        p["res"].append(dict(
            w1=conv_w(keys[3 + 2 * i], 4 * ngf, 4 * ngf, 3), b1=jnp.zeros((4 * ngf,), jnp.float32),
            w2=conv_w(keys[4 + 2 * i], 4 * ngf, 4 * ngf, 3), b2=jnp.zeros((4 * ngf,), jnp.float32),
        ))
    o = 3 + 2 * n_blocks
    p["t1_w"], p["t1_b"] = tconv_w(keys[o], 4 * ngf, 2 * ngf, 3), jnp.zeros((2 * ngf,), jnp.float32)
    p["t2_w"], p["t2_b"] = tconv_w(keys[o + 1], 2 * ngf, ngf, 3), jnp.zeros((ngf,), jnp.float32)
    p["co_w"], p["co_b"] = conv_w(keys[o + 2], out_ch, ngf, 7), jnp.zeros((out_ch,), jnp.float32)
    return p


if __name__ == "__main__":
    key = jax.random.PRNGKey(0)
    pkey, xkey = jax.random.split(key)
    params = make_params(pkey, inp_ch=3, ngf=8, out_ch=3, n_blocks=6)
    x = jax.random.normal(xkey, (2, 3, 16, 16), jnp.float32)
    fwd = jax.jit(resnet_forward)
    y = fwd(params, x)
    jax.block_until_ready(y)
    assert y.shape == (2, 3, 16, 16), y.shape
    assert bool(jnp.all(jnp.isfinite(y)))
    print("KERNEL_OK")
</pallas_src>

<mosaic_0001>
module attributes {stable_mosaic.version = 11 : i64} {
  func.func @kernel(%arg0: i32, %arg1: memref<1x16x48xf32, #tpu.memory_space<vmem>>, %arg2: memref<7x16x16xf32, #tpu.memory_space<vmem>>, %arg3: memref<7x48x128xf32, #tpu.memory_space<vmem>>, %arg4: memref<3x8x16xf32, #tpu.memory_space<vmem>>, %arg5: memref<3x128x128xf32, #tpu.memory_space<vmem>>, %arg6: memref<3x4x8xf32, #tpu.memory_space<vmem>>, %arg7: memref<3x128x128xf32, #tpu.memory_space<vmem>>, %arg8: memref<3x4x4xf32, #tpu.memory_space<vmem>>, %arg9: memref<36x128x128xf32, #tpu.memory_space<vmem>>, %arg10: memref<3x8x4xf32, #tpu.memory_space<vmem>>, %arg11: memref<3x128x128xf32, #tpu.memory_space<vmem>>, %arg12: memref<3x16x8xf32, #tpu.memory_space<vmem>>, %arg13: memref<3x128x128xf32, #tpu.memory_space<vmem>>, %arg14: memref<7x16x16xf32, #tpu.memory_space<vmem>>, %arg15: memref<7x128x48xf32, #tpu.memory_space<vmem>>, %arg16: memref<128x128xf32, #tpu.memory_space<vmem>>, %arg17: memref<128x128xf32, #tpu.memory_space<vmem>>, %arg18: memref<128x128xf32, #tpu.memory_space<vmem>>, %arg19: memref<1x48xf32, #tpu.memory_space<vmem>>, %arg20: memref<1x16x48xf32, #tpu.memory_space<vmem>>) attributes {dimension_semantics = [#tpu.dimension_semantics<parallel>], iteration_bounds = array<i64: 2>, scalar_prefetch = 0 : i64, scratch_operands = 0 : i64, tpu.core_type = #tpu.core_type<tc>, window_params = [{transform_indices = @transform_0, window_bounds = array<i64: 1, 16, 48>}, {pipeline_mode = #tpu.pipeline_mode<synchronous>, transform_indices = @transform_1, window_bounds = array<i64: 7, 16, 16>}, {pipeline_mode = #tpu.pipeline_mode<synchronous>, transform_indices = @transform_2, window_bounds = array<i64: 7, 48, 128>}, {pipeline_mode = #tpu.pipeline_mode<synchronous>, transform_indices = @transform_3, window_bounds = array<i64: 3, 8, 16>}, {pipeline_mode = #tpu.pipeline_mode<synchronous>, transform_indices = @transform_4, window_bounds = array<i64: 3, 128, 128>}, {pipeline_mode = #tpu.pipeline_mode<synchronous>, transform_indices = @transform_5, window_bounds = array<i64: 3, 4, 8>}, {pipeline_mode = #tpu.pipeline_mode<synchronous>, transform_indices = @transform_6, window_bounds = array<i64: 3, 128, 128>}, {pipeline_mode = #tpu.pipeline_mode<synchronous>, transform_indices = @transform_7, window_bounds = array<i64: 3, 4, 4>}, {pipeline_mode = #tpu.pipeline_mode<synchronous>, transform_indices = @transform_8, window_bounds = array<i64: 36, 128, 128>}, {pipeline_mode = #tpu.pipeline_mode<synchronous>, transform_indices = @transform_9, window_bounds = array<i64: 3, 8, 4>}, {pipeline_mode = #tpu.pipeline_mode<synchronous>, transform_indices = @transform_10, window_bounds = array<i64: 3, 128, 128>}, {pipeline_mode = #tpu.pipeline_mode<synchronous>, transform_indices = @transform_11, window_bounds = array<i64: 3, 16, 8>}, {pipeline_mode = #tpu.pipeline_mode<synchronous>, transform_indices = @transform_12, window_bounds = array<i64: 3, 128, 128>}, {pipeline_mode = #tpu.pipeline_mode<synchronous>, transform_indices = @transform_13, window_bounds = array<i64: 7, 16, 16>}, {pipeline_mode = #tpu.pipeline_mode<synchronous>, transform_indices = @transform_14, window_bounds = array<i64: 7, 128, 48>}, {pipeline_mode = #tpu.pipeline_mode<synchronous>, transform_indices = @transform_15, window_bounds = array<i64: 128, 128>}, {pipeline_mode = #tpu.pipeline_mode<synchronous>, transform_indices = @transform_16, window_bounds = array<i64: 128, 128>}, {pipeline_mode = #tpu.pipeline_mode<synchronous>, transform_indices = @transform_17, window_bounds = array<i64: 128, 128>}, {pipeline_mode = #tpu.pipeline_mode<synchronous>, transform_indices = @transform_18, window_bounds = array<i64: 1, 48>}, {transform_indices = @transform_19, window_bounds = array<i64: 1, 16, 48>}]} {
    %c0 = arith.constant 0 : index
    %c0_0 = arith.constant 0 : index
    %c0_1 = arith.constant 0 : index
    %0 = vector.load %arg1[%c0, %c0_0, %c0_1] : memref<1x16x48xf32, #tpu.memory_space<vmem>>, vector<1x16x48xf32>
    %1 = vector.shape_cast %0 : vector<1x16x48xf32> to vector<16x48xf32>
    %c0_2 = arith.constant 0 : index
    %c0_3 = arith.constant 0 : index
    %c0_4 = arith.constant 0 : index
    %2 = vector.load %arg2[%c0_2, %c0_3, %c0_4] : memref<7x16x16xf32, #tpu.memory_space<vmem>>, vector<1x16x16xf32>
    %3 = vector.shape_cast %2 : vector<1x16x16xf32> to vector<16x16xf32>
    %cst = arith.constant dense<0.000000e+00> : vector<16x48xf32>
    %4 = tpu.matmul %3, %1, %cst {dimension_numbers = #tpu.dot_dimension_numbers<[1], [0], [0], [1], [0, 0, 1, 1], [], []>} : vector<16x16xf32>, vector<16x48xf32>, vector<16x48xf32> -> vector<16x48xf32>
    %c0_5 = arith.constant 0 : index
    %c0_6 = arith.constant 0 : index
    %c0_7 = arith.constant 0 : index
    %5 = vector.load %arg3[%c0_5, %c0_6, %c0_7] : memref<7x48x128xf32, #tpu.memory_space<vmem>>, vector<1x48x128xf32>
    %6 = vector.shape_cast %5 : vector<1x48x128xf32> to vector<48x128xf32>
    %cst_8 = arith.constant dense<0.000000e+00> : vector<16x128xf32>
    %7 = tpu.matmul %4, %6, %cst_8 {dimension_numbers = #tpu.dot_dimension_numbers<[1], [0], [0], [1], [0, 0, 1, 1], [], []>} : vector<16x48xf32>, vector<48x128xf32>, vector<16x128xf32> -> vector<16x128xf32>
    %c1 = arith.constant 1 : index
    %c0_9 = arith.constant 0 : index
    %c0_10 = arith.constant 0 : index
    %8 = vector.load %arg2[%c1, %c0_9, %c0_10] : memref<7x16x16xf32, #tpu.memory_space<vmem>>, vector<1x16x16xf32>
    %9 = vector.shape_cast %8 : vector<1x16x16xf32> to vector<16x16xf32>
    %cst_11 = arith.constant dense<0.000000e+00> : vector<16x48xf32>
    %10 = tpu.matmul %9, %1, %cst_11 {dimension_numbers = #tpu.dot_dimension_numbers<[1], [0], [0], [1], [0, 0, 1, 1], [], []>} : vector<16x16xf32>, vector<16x48xf32>, vector<16x48xf32> -> vector<16x48xf32>
    %c1_12 = arith.constant 1 : index
    %c0_13 = arith.constant 0 : index
    %c0_14 = arith.constant 0 : index
    %11 = vector.load %arg3[%c1_12, %c0_13, %c0_14] : memref<7x48x128xf32, #tpu.memory_space<vmem>>, vector<1x48x128xf32>
    %12 = vector.shape_cast %11 : vector<1x48x128xf32> to vector<48x128xf32>
    %cst_15 = arith.constant dense<0.000000e+00> : vector<16x128xf32>
    %13 = tpu.matmul %10, %12, %cst_15 {dimension_numbers = #tpu.dot_dimension_numbers<[1], [0], [0], [1], [0, 0, 1, 1], [], []>} : vector<16x48xf32>, vector<48x128xf32>, vector<16x128xf32> -> vector<16x128xf32>
    %14 = arith.addf %7, %13 : vector<16x128xf32>
    %c2 = arith.constant 2 : index
    %c0_16 = arith.constant 0 : index
    %c0_17 = arith.constant 0 : index
    %15 = vector.load %arg2[%c2, %c0_16, %c0_17] : memref<7x16x16xf32, #tpu.memory_space<vmem>>, vector<1x16x16xf32>
    %16 = vector.shape_cast %15 : vector<1x16x16xf32> to vector<16x16xf32>
    %cst_18 = arith.constant dense<0.000000e+00> : vector<16x48xf32>
    %17 = tpu.matmul %16, %1, %cst_18 {dimension_numbers = #tpu.dot_dimension_numbers<[1], [0], [0], [1], [0, 0, 1, 1], [], []>} : vector<16x16xf32>, vector<16x48xf32>, vector<16x48xf32> -> vector<16x48xf32>
    %c2_19 = arith.constant 2 : index
    %c0_20 = arith.constant 0 : index
    %c0_21 = arith.constant 0 : index
    %18 = vector.load %arg3[%c2_19, %c0_20, %c0_21] : memref<7x48x128xf32, #tpu.memory_space<vmem>>, vector<1x48x128xf32>
    %19 = vector.shape_cast %18 : vector<1x48x128xf32> to vector<48x128xf32>
    %cst_22 = arith.constant dense<0.000000e+00> : vector<16x128xf32>
    %20 = tpu.matmul %17, %19, %cst_22 {dimension_numbers = #tpu.dot_dimension_numbers<[1], [0], [0], [1], [0, 0, 1, 1], [], []>} : vector<16x48xf32>, vector<48x128xf32>, vector<16x128xf32> -> vector<16x128xf32>
    %21 = arith.addf %14, %20 : vector<16x128xf32>
    %c3 = arith.constant 3 : index
    %c0_23 = arith.constant 0 : index
    %c0_24 = arith.constant 0 : index
    %22 = vector.load %arg2[%c3, %c0_23, %c0_24] : memref<7x16x16xf32, #tpu.memory_space<vmem>>, vector<1x16x16xf32>
    %23 = vector.shape_cast %22 : vector<1x16x16xf32> to vector<16x16xf32>
    %cst_25 = arith.constant dense<0.000000e+00> : vector<16x48xf32>
    %24 = tpu.matmul %23, %1, %cst_25 {dimension_numbers = #tpu.dot_dimension_numbers<[1], [0], [0], [1], [0, 0, 1, 1], [], []>} : vector<16x16xf32>, vector<16x48xf32>, vector<16x48xf32> -> vector<16x48xf32>
    %c3_26 = arith.constant 3 : index
    %c0_27 = arith.constant 0 : index
    %c0_28 = arith.constant 0 : index
    %25 = vector.load %arg3[%c3_26, %c0_27, %c0_28] : memref<7x48x128xf32, #tpu.memory_space<vmem>>, vector<1x48x128xf32>
    %26 = vector.shape_cast %25 : vector<1x48x128xf32> to vector<48x128xf32>
    %cst_29 = arith.constant dense<0.000000e+00> : vector<16x128xf32>
    %27 = tpu.matmul %24, %26, %cst_29 {dimension_numbers = #tpu.dot_dimension_numbers<[1], [0], [0], [1], [0, 0, 1, 1], [], []>} : vector<16x48xf32>, vector<48x128xf32>, vector<16x128xf32> -> vector<16x128xf32>
    %28 = arith.addf %21, %27 : vector<16x128xf32>
    %c4 = arith.constant 4 : index
    %c0_30 = arith.constant 0 : index
    %c0_31 = arith.constant 0 : index
    %29 = vector.load %arg2[%c4, %c0_30, %c0_31] : memref<7x16x16xf32, #tpu.memory_space<vmem>>, vector<1x16x16xf32>
    %30 = vector.shape_cast %29 : vector<1x16x16xf32> to vector<16x16xf32>
    %cst_32 = arith.constant dense<0.000000e+00> : vector<16x48xf32>
    %31 = tpu.matmul %30, %1, %cst_32 {dimension_numbers = #tpu.dot_dimension_numbers<[1], [0], [0], [1], [0, 0, 1, 1], [], []>} : vector<16x16xf32>, vector<16x48xf32>, vector<16x48xf32> -> vector<16x48xf32>
    %c4_33 = arith.constant 4 : index
    %c0_34 = arith.constant 0 : index
    %c0_35 = arith.constant 0 : index
    %32 = vector.load %arg3[%c4_33, %c0_34, %c0_35] : memref<7x48x128xf32, #tpu.memory_space<vmem>>, vector<1x48x128xf32>
    %33 = vector.shape_cast %32 : vector<1x48x128xf32> to vector<48x128xf32>
    %cst_36 = arith.constant dense<0.000000e+00> : vector<16x128xf32>
    %34 = tpu.matmul %31, %33, %cst_36 {dimension_numbers = #tpu.dot_dimension_numbers<[1], [0], [0], [1], [0, 0, 1, 1], [], []>} : vector<16x48xf32>, vector<48x128xf32>, vector<16x128xf32> -> vector<16x128xf32>
    %35 = arith.addf %28, %34 : vector<16x128xf32>
    %c5 = arith.constant 5 : index
    %c0_37 = arith.constant 0 : index
    %c0_38 = arith.constant 0 : index
    %36 = vector.load %arg2[%c5, %c0_37, %c0_38] : memref<7x16x16xf32, #tpu.memory_space<vmem>>, vector<1x16x16xf32>
    %37 = vector.shape_cast %36 : vector<1x16x16xf32> to vector<16x16xf32>
    %cst_39 = arith.constant dense<0.000000e+00> : vector<16x48xf32>
    %38 = tpu.matmul %37, %1, %cst_39 {dimension_numbers = #tpu.dot_dimension_numbers<[1], [0], [0], [1], [0, 0, 1, 1], [], []>} : vector<16x16xf32>, vector<16x48xf32>, vector<16x48xf32> -> vector<16x48xf32>
    %c5_40 = arith.constant 5 : index
    %c0_41 = arith.constant 0 : index
    %c0_42 = arith.constant 0 : index
    %39 = vector.load %arg3[%c5_40, %c0_41, %c0_42] : memref<7x48x128xf32, #tpu.memory_space<vmem>>, vector<1x48x128xf32>
    %40 = vector.shape_cast %39 : vector<1x48x128xf32> to vector<48x128xf32>
    %cst_43 = arith.constant dense<0.000000e+00> : vector<16x128xf32>
    %41 = tpu.matmul %38, %40, %cst_43 {dimension_numbers = #tpu.dot_dimension_numbers<[1], [0], [0], [1], [0, 0, 1, 1], [], []>} : vector<16x48xf32>, vector<48x128xf32>, vector<16x128xf32> -> vector<16x128xf32>
    %42 = arith.addf %35, %41 : vector<16x128xf32>
    %c6 = arith.constant 6 : index
    %c0_44 = arith.constant 0 : index
    %c0_45 = arith.constant 0 : index
    %43 = vector.load %arg2[%c6, %c0_44, %c0_45] : memref<7x16x16xf32, #tpu.memory_space<vmem>>, vector<1x16x16xf32>
    %44 = vector.shape_cast %43 : vector<1x16x16xf32> to vector<16x16xf32>
    %cst_46 = arith.constant dense<0.000000e+00> : vector<16x48xf32>
    %45 = tpu.matmul %44, %1, %cst_46 {dimension_numbers = #tpu.dot_dimension_numbers<[1], [0], [0], [1], [0, 0, 1, 1], [], []>} : vector<16x16xf32>, vector<16x48xf32>, vector<16x48xf32> -> vector<16x48xf32>
    %c6_47 = arith.constant 6 : index
    %c0_48 = arith.constant 0 : index
    %c0_49 = arith.constant 0 : index
    %46 = vector.load %arg3[%c6_47, %c0_48, %c0_49] : memref<7x48x128xf32, #tpu.memory_space<vmem>>, vector<1x48x128xf32>
    %47 = vector.shape_cast %46 : vector<1x48x128xf32> to vector<48x128xf32>
    %cst_50 = arith.constant dense<0.000000e+00> : vector<16x128xf32>
    %48 = tpu.matmul %45, %47, %cst_50 {dimension_numbers = #tpu.dot_dimension_numbers<[1], [0], [0], [1], [0, 0, 1, 1], [], []>} : vector<16x48xf32>, vector<48x128xf32>, vector<16x128xf32> -> vector<16x128xf32>
    %49 = arith.addf %42, %48 : vector<16x128xf32>
    %c0_51 = arith.constant 0 : index
    %c0_52 = arith.constant 0 : index
    %50 = vector.load %arg16[%c0_51, %c0_52] : memref<128x128xf32, #tpu.memory_space<vmem>>, vector<128x128xf32>
    %cst_53 = arith.constant dense<0.000000e+00> : vector<128xf32>
    %51 = vector.multi_reduction <add>, %49, %cst_53 [0] : vector<16x128xf32> to vector<128xf32>
    %52 = vector.shape_cast %51 : vector<128xf32> to vector<1x128xf32>
    %cst_54 = arith.constant dense<0.000000e+00> : vector<1x128xf32>
    %53 = tpu.matmul %52, %50, %cst_54 {dimension_numbers = #tpu.dot_dimension_numbers<[1], [0], [0], [1], [0, 0, 1, 1], [], []>} : vector<1x128xf32>, vector<128x128xf32>, vector<1x128xf32> -> vector<1x128xf32>
    %54 = vector.broadcast %53 : vector<1x128xf32> to vector<16x128xf32>
    %55 = arith.subf %49, %54 : vector<16x128xf32>
    %56 = arith.mulf %55, %55 : vector<16x128xf32>
    %cst_55 = arith.constant dense<0.000000e+00> : vector<128xf32>
    %57 = vector.multi_reduction <add>, %56, %cst_55 [0] : vector<16x128xf32> to vector<128xf32>
    %58 = vector.shape_cast %57 : vector<128xf32> to vector<1x128xf32>
    %cst_56 = arith.constant dense<0.000000e+00> : vector<1x128xf32>
    %59 = tpu.matmul %58, %50, %cst_56 {dimension_numbers = #tpu.dot_dimension_numbers<[1], [0], [0], [1], [0, 0, 1, 1], [], []>} : vector<1x128xf32>, vector<128x128xf32>, vector<1x128xf32> -> vector<1x128xf32>
    %cst_57 = arith.constant 9.99999974E-6 : f32
    %60 = vector.broadcast %cst_57 : f32 to vector<1x128xf32>
    %61 = arith.addf %59, %60 : vector<1x128xf32>
    %62 = math.rsqrt %61 : vector<1x128xf32>
    %63 = vector.broadcast %62 : vector<1x128xf32> to vector<16x128xf32>
    %64 = arith.mulf %55, %63 : vector<16x128xf32>
    %cst_58 = arith.constant 0.000000e+00 : f32
    %65 = vector.broadcast %cst_58 : f32 to vector<16x128xf32>
    %66 = arith.maximumf %64, %65 : vector<16x128xf32>
    %c0_59 = arith.constant 0 : index
    %c0_60 = arith.constant 0 : index
    %c0_61 = arith.constant 0 : index
    %67 = vector.load %arg4[%c0_59, %c0_60, %c0_61] : memref<3x8x16xf32, #tpu.memory_space<vmem>>, vector<1x8x16xf32>
    %68 = vector.shape_cast %67 : vector<1x8x16xf32> to vector<8x16xf32>
    %cst_62 = arith.constant dense<0.000000e+00> : vector<8x128xf32>
    %69 = tpu.matmul %68, %66, %cst_62 {dimension_numbers = #tpu.dot_dimension_numbers<[1], [0], [0], [1], [0, 0, 1, 1], [], []>} : vector<8x16xf32>, vector<16x128xf32>, vector<8x128xf32> -> vector<8x128xf32>
    %c0_63 = arith.constant 0 : index
    %c0_64 = arith.constant 0 : index
    %c0_65 = arith.constant 0 : index
    %70 = vector.load %arg5[%c0_63, %c0_64, %c0_65] : memref<3x128x128xf32, #tpu.memory_space<vmem>>, vector<1x128x128xf32>
    %71 = vector.shape_cast %70 : vector<1x128x128xf32> to vector<128x128xf32>
    %cst_66 = arith.constant dense<0.000000e+00> : vector<8x128xf32>
    %72 = tpu.matmul %69, %71, %cst_66 {dimension_numbers = #tpu.dot_dimension_numbers<[1], [0], [0], [1], [0, 0, 1, 1], [], []>} : vector<8x128xf32>, vector<128x128xf32>, vector<8x128xf32> -> vector<8x128xf32>
    %c1_67 = arith.constant 1 : index
    %c0_68 = arith.constant 0 : index
    %c0_69 = arith.constant 0 : index
    %73 = vector.load %arg4[%c1_67, %c0_68, %c0_69] : memref<3x8x16xf32, #tpu.memory_space<vmem>>, vector<1x8x16xf32>
    %74 = vector.shape_cast %73 : vector<1x8x16xf32> to vector<8x16xf32>
    %cst_70 = arith.constant dense<0.000000e+00> : vector<8x128xf32>
    %75 = tpu.matmul %74, %66, %cst_70 {dimension_numbers = #tpu.dot_dimension_numbers<[1], [0], [0], [1], [0, 0, 1, 1], [], []>} : vector<8x16xf32>, vector<16x128xf32>, vector<8x128xf32> -> vector<8x128xf32>
    %c1_71 = arith.constant 1 : index
    %c0_72 = arith.constant 0 : index
    %c0_73 = arith.constant 0 : index
    %76 = vector.load %arg5[%c1_71, %c0_72, %c0_73] : memref<3x128x128xf32, #tpu.memory_space<vmem>>, vector<1x128x128xf32>
    %77 = vector.shape_cast %76 : vector<1x128x128xf32> to vector<128x128xf32>
    %cst_74 = arith.constant dense<0.000000e+00> : vector<8x128xf32>
    %78 = tpu.matmul %75, %77, %cst_74 {dimension_numbers = #tpu.dot_dimension_numbers<[1], [0], [0], [1], [0, 0, 1, 1], [], []>} : vector<8x128xf32>, vector<128x128xf32>, vector<8x128xf32> -> vector<8x128xf32>
    %79 = arith.addf %72, %78 : vector<8x128xf32>
    %c2_75 = arith.constant 2 : index
    %c0_76 = arith.constant 0 : index
    %c0_77 = arith.constant 0 : index
    %80 = vector.load %arg4[%c2_75, %c0_76, %c0_77] : memref<3x8x16xf32, #tpu.memory_space<vmem>>, vector<1x8x16xf32>
    %81 = vector.shape_cast %80 : vector<1x8x16xf32> to vector<8x16xf32>
    %cst_78 = arith.constant dense<0.000000e+00> : vector<8x128xf32>
    %82 = tpu.matmul %81, %66, %cst_78 {dimension_numbers = #tpu.dot_dimension_numbers<[1], [0], [0], [1], [0, 0, 1, 1], [], []>} : vector<8x16xf32>, vector<16x128xf32>, vector<8x128xf32> -> vector<8x128xf32>
    %c2_79 = arith.constant 2 : index
    %c0_80 = arith.constant 0 : index
    %c0_81 = arith.constant 0 : index
    %83 = vector.load %arg5[%c2_79, %c0_80, %c0_81] : memref<3x128x128xf32, #tpu.memory_space<vmem>>, vector<1x128x128xf32>
    %84 = vector.shape_cast %83 : vector<1x128x128xf32> to vector<128x128xf32>
    %cst_82 = arith.constant dense<0.000000e+00> : vector<8x128xf32>
    %85 = tpu.matmul %82, %84, %cst_82 {dimension_numbers = #tpu.dot_dimension_numbers<[1], [0], [0], [1], [0, 0, 1, 1], [], []>} : vector<8x128xf32>, vector<128x128xf32>, vector<8x128xf32> -> vector<8x128xf32>
    %86 = arith.addf %79, %85 : vector<8x128xf32>
    %c0_83 = arith.constant 0 : index
    %c0_84 = arith.constant 0 : index
    %87 = vector.load %arg17[%c0_83, %c0_84] : memref<128x128xf32, #tpu.memory_space<vmem>>, vector<128x128xf32>
    %cst_85 = arith.constant dense<0.000000e+00> : vector<128xf32>
    %88 = vector.multi_reduction <add>, %86, %cst_85 [0] : vector<8x128xf32> to vector<128xf32>
    %89 = vector.shape_cast %88 : vector<128xf32> to vector<1x128xf32>
    %cst_86 = arith.constant dense<0.000000e+00> : vector<1x128xf32>
    %90 = tpu.matmul %89, %87, %cst_86 {dimension_numbers = #tpu.dot_dimension_numbers<[1], [0], [0], [1], [0, 0, 1, 1], [], []>} : vector<1x128xf32>, vector<128x128xf32>, vector<1x128xf32> -> vector<1x128xf32>
    %91 = vector.broadcast %90 : vector<1x128xf32> to vector<8x128xf32>
    %92 = arith.subf %86, %91 : vector<8x128xf32>
    %93 = arith.mulf %92, %92 : vector<8x128xf32>
    %cst_87 = arith.constant dense<0.000000e+00> : vector<128xf32>
    %94 = vector.multi_reduction <add>, %93, %cst_87 [0] : vector<8x128xf32> to vector<128xf32>
    %95 = vector.shape_cast %94 : vector<128xf32> to vector<1x128xf32>
    %cst_88 = arith.constant dense<0.000000e+00> : vector<1x128xf32>
    %96 = tpu.matmul %95, %87, %cst_88 {dimension_numbers = #tpu.dot_dimension_numbers<[1], [0], [0], [1], [0, 0, 1, 1], [], []>} : vector<1x128xf32>, vector<128x128xf32>, vector<1x128xf32> -> vector<1x128xf32>
    %cst_89 = arith.constant 9.99999974E-6 : f32
    %97 = vector.broadcast %cst_89 : f32 to vector<1x128xf32>
    %98 = arith.addf %96, %97 : vector<1x128xf32>
    %99 = math.rsqrt %98 : vector<1x128xf32>
    %100 = vector.broadcast %99 : vector<1x128xf32> to vector<8x128xf32>
    %101 = arith.mulf %92, %100 : vector<8x128xf32>
    %cst_90 = arith.constant 0.000000e+00 : f32
    %102 = vector.broadcast %cst_90 : f32 to vector<8x128xf32>
    %103 = arith.maximumf %101, %102 : vector<8x128xf32>
    %c0_91 = arith.constant 0 : index
    %c0_92 = arith.constant 0 : index
    %c0_93 = arith.constant 0 : index
    %104 = vector.load %arg6[%c0_91, %c0_92, %c0_93] : memref<3x4x8xf32, #tpu.memory_space<vmem>>, vector<1x4x8xf32>
    %105 = vector.shape_cast %104 : vector<1x4x8xf32> to vector<4x8xf32>
    %cst_94 = arith.constant dense<0.000000e+00> : vector<4x128xf32>
    %106 = tpu.matmul %105, %103, %cst_94 {dimension_numbers = #tpu.dot_dimension_numbers<[1], [0], [0], [1], [0, 0, 1, 1], [], []>} : vector<4x8xf32>, vector<8x128xf32>, vector<4x128xf32> -> vector<4x128xf32>
    %c0_95 = arith.constant 0 : index
    %c0_96 = arith.constant 0 : index
    %c0_97 = arith.constant 0 : index
    %107 = vector.load %arg7[%c0_95, %c0_96, %c0_97] : memref<3x128x128xf32, #tpu.memory_space<vmem>>, vector<1x128x128xf32>
    %108 = vector.shape_cast %107 : vector<1x128x128xf32> to vector<128x128xf32>
    %cst_98 = arith.constant dense<0.000000e+00> : vector<4x128xf32>
    %109 = tpu.matmul %106, %108, %cst_98 {dimension_numbers = #tpu.dot_dimension_numbers<[1], [0], [0], [1], [0, 0, 1, 1], [], []>} : vector<4x128xf32>, vector<128x128xf32>, vector<4x128xf32> -> vector<4x128xf32>
    %c1_99 = arith.constant 1 : index
    %c0_100 = arith.constant 0 : index
    %c0_101 = arith.constant 0 : index
    %110 = vector.load %arg6[%c1_99, %c0_100, %c0_101] : memref<3x4x8xf32, #tpu.memory_space<vmem>>, vector<1x4x8xf32>
    %111 = vector.shape_cast %110 : vector<1x4x8xf32> to vector<4x8xf32>
    %cst_102 = arith.constant dense<0.000000e+00> : vector<4x128xf32>
    %112 = tpu.matmul %111, %103, %cst_102 {dimension_numbers = #tpu.dot_dimension_numbers<[1], [0], [0], [1], [0, 0, 1, 1], [], []>} : vector<4x8xf32>, vector<8x128xf32>, vector<4x128xf32> -> vector<4x128xf32>
    %c1_103 = arith.constant 1 : index
    %c0_104 = arith.constant 0 : index
    %c0_105 = arith.constant 0 : index
    %113 = vector.load %arg7[%c1_103, %c0_104, %c0_105] : memref<3x128x128xf32, #tpu.memory_space<vmem>>, vector<1x128x128xf32>
    %114 = vector.shape_cast %113 : vector<1x128x128xf32> to vector<128x128xf32>
    %cst_106 = arith.constant dense<0.000000e+00> : vector<4x128xf32>
    %115 = tpu.matmul %112, %114, %cst_106 {dimension_numbers = #tpu.dot_dimension_numbers<[1], [0], [0], [1], [0, 0, 1, 1], [], []>} : vector<4x128xf32>, vector<128x128xf32>, vector<4x128xf32> -> vector<4x128xf32>
    %116 = arith.addf %109, %115 : vector<4x128xf32>
    %c2_107 = arith.constant 2 : index
    %c0_108 = arith.constant 0 : index
    %c0_109 = arith.constant 0 : index
    %117 = vector.load %arg6[%c2_107, %c0_108, %c0_109] : memref<3x4x8xf32, #tpu.memory_space<vmem>>, vector<1x4x8xf32>
    %118 = vector.shape_cast %117 : vector<1x4x8xf32> to vector<4x8xf32>
    %cst_110 = arith.constant dense<0.000000e+00> : vector<4x128xf32>
    %119 = tpu.matmul %118, %103, %cst_110 {dimension_numbers = #tpu.dot_dimension_numbers<[1], [0], [0], [1], [0, 0, 1, 1], [], []>} : vector<4x8xf32>, vector<8x128xf32>, vector<4x128xf32> -> vector<4x128xf32>
    %c2_111 = arith.constant 2 : index
    %c0_112 = arith.constant 0 : index
    %c0_113 = arith.constant 0 : index
    %120 = vector.load %arg7[%c2_111, %c0_112, %c0_113] : memref<3x128x128xf32, #tpu.memory_space<vmem>>, vector<1x128x128xf32>
    %121 = vector.shape_cast %120 : vector<1x128x128xf32> to vector<128x128xf32>
    %cst_114 = arith.constant dense<0.000000e+00> : vector<4x128xf32>
    %122 = tpu.matmul %119, %121, %cst_114 {dimension_numbers = #tpu.dot_dimension_numbers<[1], [0], [0], [1], [0, 0, 1, 1], [], []>} : vector<4x128xf32>, vector<128x128xf32>, vector<4x128xf32> -> vector<4x128xf32>
    %123 = arith.addf %116, %122 : vector<4x128xf32>
    %c0_115 = arith.constant 0 : index
    %c0_116 = arith.constant 0 : index
    %124 = vector.load %arg18[%c0_115, %c0_116] : memref<128x128xf32, #tpu.memory_space<vmem>>, vector<128x128xf32>
    %cst_117 = arith.constant dense<0.000000e+00> : vector<128xf32>
    %125 = vector.multi_reduction <add>, %123, %cst_117 [0] : vector<4x128xf32> to vector<128xf32>
    %126 = vector.shape_cast %125 : vector<128xf32> to vector<1x128xf32>
    %cst_118 = arith.constant dense<0.000000e+00> : vector<1x128xf32>
    %127 = tpu.matmul %126, %124, %cst_118 {dimension_numbers = #tpu.dot_dimension_numbers<[1], [0], [0], [1], [0, 0, 1, 1], [], []>} : vector<1x128xf32>, vector<128x128xf32>, vector<1x128xf32> -> vector<1x128xf32>
    %128 = vector.broadcast %127 : vector<1x128xf32> to vector<4x128xf32>
    %129 = arith.subf %123, %128 : vector<4x128xf32>
    %130 = arith.mulf %129, %129 : vector<4x128xf32>
    %cst_119 = arith.constant dense<0.000000e+00> : vector<128xf32>
    %131 = vector.multi_reduction <add>, %130, %cst_119 [0] : vector<4x128xf32> to vector<128xf32>
    %132 = vector.shape_cast %131 : vector<128xf32> to vector<1x128xf32>
    %cst_120 = arith.constant dense<0.000000e+00> : vector<1x128xf32>
    %133 = tpu.matmul %132, %124, %cst_120 {dimension_numbers = #tpu.dot_dimension_numbers<[1], [0], [0], [1], [0, 0, 1, 1], [], []>} : vector<1x128xf32>, vector<128x128xf32>, vector<1x128xf32> -> vector<1x128xf32>
    %cst_121 = arith.constant 9.99999974E-6 : f32
    %134 = vector.broadcast %cst_121 : f32 to vector<1x128xf32>
    %135 = arith.addf %133, %134 : vector<1x128xf32>
    %136 = math.rsqrt %135 : vector<1x128xf32>
    %137 = vector.broadcast %136 : vector<1x128xf32> to vector<4x128xf32>
    %138 = arith.mulf %129, %137 : vector<4x128xf32>
    %cst_122 = arith.constant 0.000000e+00 : f32
    %139 = vector.broadcast %cst_122 : f32 to vector<4x128xf32>
    %140 = arith.maximumf %138, %139 : vector<4x128xf32>
    %c0_123 = arith.constant 0 : index
    %c0_124 = arith.constant 0 : index
    %c0_125 = arith.constant 0 : index
    %141 = vector.load %arg8[%c0_123, %c0_124, %c0_125] : memref<3x4x4xf32, #tpu.memory_space<vmem>>, vector<1x4x4xf32>
    %142 = vector.shape_cast %141 : vector<1x4x4xf32> to vector<4x4xf32>
    %cst_126 = arith.constant dense<0.000000e+00> : vector<4x128xf32>
    %143 = tpu.matmul %142, %140, %cst_126 {dimension_numbers = #tpu.dot_dimension_numbers<[1], [0], [0], [1], [0, 0, 1, 1], [], []>} : vector<4x4xf32>, vector<4x128xf32>, vector<4x128xf32> -> vector<4x128xf32>
    %c0_127 = arith.constant 0 : index
    %c0_128 = arith.constant 0 : index
    %c0_129 = arith.constant 0 : index
    %144 = vector.load %arg9[%c0_127, %c0_128, %c0_129] : memref<36x128x128xf32, #tpu.memory_space<vmem>>, vector<1x128x128xf32>
    %145 = vector.shape_cast %144 : vector<1x128x128xf32> to vector<128x128xf32>
    %cst_130 = arith.constant dense<0.000000e+00> : vector<4x128xf32>
    %146 = tpu.matmul %143, %145, %cst_130 {dimension_numbers = #tpu.dot_dimension_numbers<[1], [0], [0], [1], [0, 0, 1, 1], [], []>} : vector<4x128xf32>, vector<128x128xf32>, vector<4x128xf32> -> vector<4x128xf32>
    %c1_131 = arith.constant 1 : index
    %c0_132 = arith.constant 0 : index
    %c0_133 = arith.constant 0 : index
    %147 = vector.load %arg8[%c1_131, %c0_132, %c0_133] : memref<3x4x4xf32, #tpu.memory_space<vmem>>, vector<1x4x4xf32>
    %148 = vector.shape_cast %147 : vector<1x4x4xf32> to vector<4x4xf32>
    %cst_134 = arith.constant dense<0.000000e+00> : vector<4x128xf32>
    %149 = tpu.matmul %148, %140, %cst_134 {dimension_numbers = #tpu.dot_dimension_numbers<[1], [0], [0], [1], [0, 0, 1, 1], [], []>} : vector<4x4xf32>, vector<4x128xf32>, vector<4x128xf32> -> vector<4x128xf32>
    %c1_135 = arith.constant 1 : index
    %c0_136 = arith.constant 0 : index
    %c0_137 = arith.constant 0 : index
    %150 = vector.load %arg9[%c1_135, %c0_136, %c0_137] : memref<36x128x128xf32, #tpu.memory_space<vmem>>, vector<1x128x128xf32>
    %151 = vector.shape_cast %150 : vector<1x128x128xf32> to vector<128x128xf32>
    %cst_138 = arith.constant dense<0.000000e+00> : vector<4x128xf32>
    %152 = tpu.matmul %149, %151, %cst_138 {dimension_numbers = #tpu.dot_dimension_numbers<[1], [0], [0], [1], [0, 0, 1, 1], [], []>} : vector<4x128xf32>, vector<128x128xf32>, vector<4x128xf32> -> vector<4x128xf32>
    %153 = arith.addf %146, %152 : vector<4x128xf32>
    %c2_139 = arith.constant 2 : index
    %c0_140 = arith.constant 0 : index
    %c0_141 = arith.constant 0 : index
    %154 = vector.load %arg8[%c2_139, %c0_140, %c0_141] : memref<3x4x4xf32, #tpu.memory_space<vmem>>, vector<1x4x4xf32>
    %155 = vector.shape_cast %154 : vector<1x4x4xf32> to vector<4x4xf32>
    %cst_142 = arith.constant dense<0.000000e+00> : vector<4x128xf32>
    %156 = tpu.matmul %155, %140, %cst_142 {dimension_numbers = #tpu.dot_dimension_numbers<[1], [0], [0], [1], [0, 0, 1, 1], [], []>} : vector<4x4xf32>, vector<4x128xf32>, vector<4x128xf32> -> vector<4x128xf32>
    %c2_143 = arith.constant 2 : index
    %c0_144 = arith.constant 0 : index
    %c0_145 = arith.constant 0 : index
    %157 = vector.load %arg9[%c2_143, %c0_144, %c0_145] : memref<36x128x128xf32, #tpu.memory_space<vmem>>, vector<1x128x128xf32>
    %158 = vector.shape_cast %157 : vector<1x128x128xf32> to vector<128x128xf32>
    %cst_146 = arith.constant dense<0.000000e+00> : vector<4x128xf32>
    %159 = tpu.matmul %156, %158, %cst_146 {dimension_numbers = #tpu.dot_dimension_numbers<[1], [0], [0], [1], [0, 0, 1, 1], [], []>} : vector<4x128xf32>, vector<128x128xf32>, vector<4x128xf32> -> vector<4x128xf32>
    %160 = arith.addf %153, %159 : vector<4x128xf32>
    %c0_147 = arith.constant 0 : index
    %c0_148 = arith.constant 0 : index
    %161 = vector.load %arg18[%c0_147, %c0_148] : memref<128x128xf32, #tpu.memory_space<vmem>>, vector<128x128xf32>
    %cst_149 = arith.constant dense<0.000000e+00> : vector<128xf32>
    %162 = vector.multi_reduction <add>, %160, %cst_149 [0] : vector<4x128xf32> to vector<128xf32>
    %163 = vector.shape_cast %162 : vector<128xf32> to vector<1x128xf32>
    %cst_150 = arith.constant dense<0.000000e+00> : vector<1x128xf32>
    %164 = tpu.matmul %163, %161, %cst_150 {dimension_numbers = #tpu.dot_dimension_numbers<[1], [0], [0], [1], [0, 0, 1, 1], [], []>} : vector<1x128xf32>, vector<128x128xf32>, vector<1x128xf32> -> vector<1x128xf32>
    %165 = vector.broadcast %164 : vector<1x128xf32> to vector<4x128xf32>
    %166 = arith.subf %160, %165 : vector<4x128xf32>
    %167 = arith.mulf %166, %166 : vector<4x128xf32>
    %cst_151 = arith.constant dense<0.000000e+00> : vector<128xf32>
    %168 = vector.multi_reduction <add>, %167, %cst_151 [0] : vector<4x128xf32> to vector<128xf32>
    %169 = vector.shape_cast %168 : vector<128xf32> to vector<1x128xf32>
    %cst_152 = arith.constant dense<0.000000e+00> : vector<1x128xf32>
    %170 = tpu.matmul %169, %161, %cst_152 {dimension_numbers = #tpu.dot_dimension_numbers<[1], [0], [0], [1], [0, 0, 1, 1], [], []>} : vector<1x128xf32>, vector<128x128xf32>, vector<1x128xf32> -> vector<1x128xf32>
    %cst_153 = arith.constant 9.99999974E-6 : f32
    %171 = vector.broadcast %cst_153 : f32 to vector<1x128xf32>
    %172 = arith.addf %170, %171 : vector<1x128xf32>
    %173 = math.rsqrt %172 : vector<1x128xf32>
    %174 = vector.broadcast %173 : vector<1x128xf32> to vector<4x128xf32>
    %175 = arith.mulf %166, %174 : vector<4x128xf32>
    %cst_154 = arith.constant 0.000000e+00 : f32
    %176 = vector.broadcast %cst_154 : f32 to vector<4x128xf32>
    %177 = arith.maximumf %175, %176 : vector<4x128xf32>
    %c0_155 = arith.constant 0 : index
    %c0_156 = arith.constant 0 : index
    %c0_157 = arith.constant 0 : index
    %178 = vector.load %arg8[%c0_155, %c0_156, %c0_157] : memref<3x4x4xf32, #tpu.memory_space<vmem>>, vector<1x4x4xf32>
    %179 = vector.shape_cast %178 : vector<1x4x4xf32> to vector<4x4xf32>
    %cst_158 = arith.constant dense<0.000000e+00> : vector<4x128xf32>
    %180 = tpu.matmul %179, %177, %cst_158 {dimension_numbers = #tpu.dot_dimension_numbers<[1], [0], [0], [1], [0, 0, 1, 1], [], []>} : vector<4x4xf32>, vector<4x128xf32>, vector<4x128xf32> -> vector<4x128xf32>
    %c3_159 = arith.constant 3 : index
    %c0_160 = arith.constant 0 : index
    %c0_161 = arith.constant 0 : index
    %181 = vector.load %arg9[%c3_159, %c0_160, %c0_161] : memref<36x128x128xf32, #tpu.memory_space<vmem>>, vector<1x128x128xf32>
    %182 = vector.shape_cast %181 : vector<1x128x128xf32> to vector<128x128xf32>
    %cst_162 = arith.constant dense<0.000000e+00> : vector<4x128xf32>
    %183 = tpu.matmul %180, %182, %cst_162 {dimension_numbers = #tpu.dot_dimension_numbers<[1], [0], [0], [1], [0, 0, 1, 1], [], []>} : vector<4x128xf32>, vector<128x128xf32>, vector<4x128xf32> -> vector<4x128xf32>
    %c1_163 = arith.constant 1 : index
    %c0_164 = arith.constant 0 : index
    %c0_165 = arith.constant 0 : index
    %184 = vector.load %arg8[%c1_163, %c0_164, %c0_165] : memref<3x4x4xf32, #tpu.memory_space<vmem>>, vector<1x4x4xf32>
    %185 = vector.shape_cast %184 : vector<1x4x4xf32> to vector<4x4xf32>
    %cst_166 = arith.constant dense<0.000000e+00> : vector<4x128xf32>
    %186 = tpu.matmul %185, %177, %cst_166 {dimension_numbers = #tpu.dot_dimension_numbers<[1], [0], [0], [1], [0, 0, 1, 1], [], []>} : vector<4x4xf32>, vector<4x128xf32>, vector<4x128xf32> -> vector<4x128xf32>
    %c4_167 = arith.constant 4 : index
    %c0_168 = arith.constant 0 : index
    %c0_169 = arith.constant 0 : index
    %187 = vector.load %arg9[%c4_167, %c0_168, %c0_169] : memref<36x128x128xf32, #tpu.memory_space<vmem>>, vector<1x128x128xf32>
    %188 = vector.shape_cast %187 : vector<1x128x128xf32> to vector<128x128xf32>
    %cst_170 = arith.constant dense<0.000000e+00> : vector<4x128xf32>
    %189 = tpu.matmul %186, %188, %cst_170 {dimension_numbers = #tpu.dot_dimension_numbers<[1], [0], [0], [1], [0, 0, 1, 1], [], []>} : vector<4x128xf32>, vector<128x128xf32>, vector<4x128xf32> -> vector<4x128xf32>
    %190 = arith.addf %183, %189 : vector<4x128xf32>
    %c2_171 = arith.constant 2 : index
    %c0_172 = arith.constant 0 : index
    %c0_173 = arith.constant 0 : index
    %191 = vector.load %arg8[%c2_171, %c0_172, %c0_173] : memref<3x4x4xf32, #tpu.memory_space<vmem>>, vector<1x4x4xf32>
    %192 = vector.shape_cast %191 : vector<1x4x4xf32> to vector<4x4xf32>
    %cst_174 = arith.constant dense<0.000000e+00> : vector<4x128xf32>
    %193 = tpu.matmul %192, %177, %cst_174 {dimension_numbers = #tpu.dot_dimension_numbers<[1], [0], [0], [1], [0, 0, 1, 1], [], []>} : vector<4x4xf32>, vector<4x128xf32>, vector<4x128xf32> -> vector<4x128xf32>
    %c5_175 = arith.constant 5 : index
    %c0_176 = arith.constant 0 : index
    %c0_177 = arith.constant 0 : index
    %194 = vector.load %arg9[%c5_175, %c0_176, %c0_177] : memref<36x128x128xf32, #tpu.memory_space<vmem>>, vector<1x128x128xf32>
    %195 = vector.shape_cast %194 : vector<1x128x128xf32> to vector<128x128xf32>
    %cst_178 = arith.constant dense<0.000000e+00> : vector<4x128xf32>
    %196 = tpu.matmul %193, %195, %cst_178 {dimension_numbers = #tpu.dot_dimension_numbers<[1], [0], [0], [1], [0, 0, 1, 1], [], []>} : vector<4x128xf32>, vector<128x128xf32>, vector<4x128xf32> -> vector<4x128xf32>
    %197 = arith.addf %190, %196 : vector<4x128xf32>
    %c0_179 = arith.constant 0 : index
    %c0_180 = arith.constant 0 : index
    %198 = vector.load %arg18[%c0_179, %c0_180] : memref<128x128xf32, #tpu.memory_space<vmem>>, vector<128x128xf32>
    %cst_181 = arith.constant dense<0.000000e+00> : vector<128xf32>
    %199 = vector.multi_reduction <add>, %197, %cst_181 [0] : vector<4x128xf32> to vector<128xf32>
    %200 = vector.shape_cast %199 : vector<128xf32> to vector<1x128xf32>
    %cst_182 = arith.constant dense<0.000000e+00> : vector<1x128xf32>
    %201 = tpu.matmul %200, %198, %cst_182 {dimension_numbers = #tpu.dot_dimension_numbers<[1], [0], [0], [1], [0, 0, 1, 1], [], []>} : vector<1x128xf32>, vector<128x128xf32>, vector<1x128xf32> -> vector<1x128xf32>
    %202 = vector.broadcast %201 : vector<1x128xf32> to vector<4x128xf32>
    %203 = arith.subf %197, %202 : vector<4x128xf32>
    %204 = arith.mulf %203, %203 : vector<4x128xf32>
    %cst_183 = arith.constant dense<0.000000e+00> : vector<128xf32>
    %205 = vector.multi_reduction <add>, %204, %cst_183 [0] : vector<4x128xf32> to vector<128xf32>
    %206 = vector.shape_cast %205 : vector<128xf32> to vector<1x128xf32>
    %cst_184 = arith.constant dense<0.000000e+00> : vector<1x128xf32>
    %207 = tpu.matmul %206, %198, %cst_184 {dimension_numbers = #tpu.dot_dimension_numbers<[1], [0], [0], [1], [0, 0, 1, 1], [], []>} : vector<1x128xf32>, vector<128x128xf32>, vector<1x128xf32> -> vector<1x128xf32>
    %cst_185 = arith.constant 9.99999974E-6 : f32
    %208 = vector.broadcast %cst_185 : f32 to vector<1x128xf32>
    %209 = arith.addf %207, %208 : vector<1x128xf32>
    %210 = math.rsqrt %209 : vector<1x128xf32>
    %211 = vector.broadcast %210 : vector<1x128xf32> to vector<4x128xf32>
    %212 = arith.mulf %203, %211 : vector<4x128xf32>
    %213 = arith.addf %140, %212 : vector<4x128xf32>
    %c0_186 = arith.constant 0 : index
    %c0_187 = arith.constant 0 : index
    %c0_188 = arith.constant 0 : index
    %214 = vector.load %arg8[%c0_186, %c0_187, %c0_188] : memref<3x4x4xf32, #tpu.memory_space<vmem>>, vector<1x4x4xf32>
    %215 = vector.shape_cast %214 : vector<1x4x4xf32> to vector<4x4xf32>
    %cst_189 = arith.constant dense<0.000000e+00> : vector<4x128xf32>
    %216 = tpu.matmul %215, %213, %cst_189 {dimension_numbers = #tpu.dot_dimension_numbers<[1], [0], [0], [1], [0, 0, 1, 1], [], []>} : vector<4x4xf32>, vector<4x128xf32>, vector<4x128xf32> -> vector<4x128xf32>
    %c6_190 = arith.constant 6 : index
    %c0_191 = arith.constant 0 : index
    %c0_192 = arith.constant 0 : index
    %217 = vector.load %arg9[%c6_190, %c0_191, %c0_192] : memref<36x128x128xf32, #tpu.memory_space<vmem>>, vector<1x128x128xf32>
    %218 = vector.shape_cast %217 : vector<1x128x128xf32> to vector<128x128xf32>
    %cst_193 = arith.constant dense<0.000000e+00> : vector<4x128xf32>
    %219 = tpu.matmul %216, %218, %cst_193 {dimension_numbers = #tpu.dot_dimension_numbers<[1], [0], [0], [1], [0, 0, 1, 1], [], []>} : vector<4x128xf32>, vector<128x128xf32>, vector<4x128xf32> -> vector<4x128xf32>
    %c1_194 = arith.constant 1 : index
    %c0_195 = arith.constant 0 : index
    %c0_196 = arith.constant 0 : index
    %220 = vector.load %arg8[%c1_194, %c0_195, %c0_196] : memref<3x4x4xf32, #tpu.memory_space<vmem>>, vector<1x4x4xf32>
    %221 = vector.shape_cast %220 : vector<1x4x4xf32> to vector<4x4xf32>
    %cst_197 = arith.constant dense<0.000000e+00> : vector<4x128xf32>
    %222 = tpu.matmul %221, %213, %cst_197 {dimension_numbers = #tpu.dot_dimension_numbers<[1], [0], [0], [1], [0, 0, 1, 1], [], []>} : vector<4x4xf32>, vector<4x128xf32>, vector<4x128xf32> -> vector<4x128xf32>
    %c7 = arith.constant 7 : index
    %c0_198 = arith.constant 0 : index
    %c0_199 = arith.constant 0 : index
    %223 = vector.load %arg9[%c7, %c0_198, %c0_199] : memref<36x128x128xf32, #tpu.memory_space<vmem>>, vector<1x128x128xf32>
    %224 = vector.shape_cast %223 : vector<1x128x128xf32> to vector<128x128xf32>
    %cst_200 = arith.constant dense<0.000000e+00> : vector<4x128xf32>
    %225 = tpu.matmul %222, %224, %cst_200 {dimension_numbers = #tpu.dot_dimension_numbers<[1], [0], [0], [1], [0, 0, 1, 1], [], []>} : vector<4x128xf32>, vector<128x128xf32>, vector<4x128xf32> -> vector<4x128xf32>
    %226 = arith.addf %219, %225 : vector<4x128xf32>
    %c2_201 = arith.constant 2 : index
    %c0_202 = arith.constant 0 : index
    %c0_203 = arith.constant 0 : index
    %227 = vector.load %arg8[%c2_201, %c0_202, %c0_203] : memref<3x4x4xf32, #tpu.memory_space<vmem>>, vector<1x4x4xf32>
    %228 = vector.shape_cast %227 : vector<1x4x4xf32> to vector<4x4xf32>
    %cst_204 = arith.constant dense<0.000000e+00> : vector<4x128xf32>
    %229 = tpu.matmul %228, %213, %cst_204 {dimension_numbers = #tpu.dot_dimension_numbers<[1], [0], [0], [1], [0, 0, 1, 1], [], []>} : vector<4x4xf32>, vector<4x128xf32>, vector<4x128xf32> -> vector<4x128xf32>
    %c8 = arith.constant 8 : index
    %c0_205 = arith.constant 0 : index
    %c0_206 = arith.constant 0 : index
    %230 = vector.load %arg9[%c8, %c0_205, %c0_206] : memref<36x128x128xf32, #tpu.memory_space<vmem>>, vector<1x128x128xf32>
    %231 = vector.shape_cast %230 : vector<1x128x128xf32> to vector<128x128xf32>
    %cst_207 = arith.constant dense<0.000000e+00> : vector<4x128xf32>
    %232 = tpu.matmul %229, %231, %cst_207 {dimension_numbers = #tpu.dot_dimension_numbers<[1], [0], [0], [1], [0, 0, 1, 1], [], []>} : vector<4x128xf32>, vector<128x128xf32>, vector<4x128xf32> -> vector<4x128xf32>
    %233 = arith.addf %226, %232 : vector<4x128xf32>
    %c0_208 = arith.constant 0 : index
    %c0_209 = arith.constant 0 : index
    %234 = vector.load %arg18[%c0_208, %c0_209] : memref<128x128xf32, #tpu.memory_space<vmem>>, vector<128x128xf32>
    %cst_210 = arith.constant dense<0.000000e+00> : vector<128xf32>
    %235 = vector.multi_reduction <add>, %233, %cst_210 [0] : vector<4x128xf32> to vector<128xf32>
    %236 = vector.shape_cast %235 : vector<128xf32> to vector<1x128xf32>
    %cst_211 = arith.constant dense<0.000000e+00> : vector<1x128xf32>
    %237 = tpu.matmul %236, %234, %cst_211 {dimension_numbers = #tpu.dot_dimension_numbers<[1], [0], [0], [1], [0, 0, 1, 1], [], []>} : vector<1x128xf32>, vector<128x128xf32>, vector<1x128xf32> -> vector<1x128xf32>
    %238 = vector.broadcast %237 : vector<1x128xf32> to vector<4x128xf32>
    %239 = arith.subf %233, %238 : vector<4x128xf32>
    %240 = arith.mulf %239, %239 : vector<4x128xf32>
    %cst_212 = arith.constant dense<0.000000e+00> : vector<128xf32>
    %241 = vector.multi_reduction <add>, %240, %cst_212 [0] : vector<4x128xf32> to vector<128xf32>
    %242 = vector.shape_cast %241 : vector<128xf32> to vector<1x128xf32>
    %cst_213 = arith.constant dense<0.000000e+00> : vector<1x128xf32>
    %243 = tpu.matmul %242, %234, %cst_213 {dimension_numbers = #tpu.dot_dimension_numbers<[1], [0], [0], [1], [0, 0, 1, 1], [], []>} : vector<1x128xf32>, vector<128x128xf32>, vector<1x128xf32> -> vector<1x128xf32>
    %cst_214 = arith.constant 9.99999974E-6 : f32
    %244 = vector.broadcast %cst_214 : f32 to vector<1x128xf32>
    %245 = arith.addf %243, %244 : vector<1x128xf32>
    %246 = math.rsqrt %245 : vector<1x128xf32>
    %247 = vector.broadcast %246 : vector<1x128xf32> to vector<4x128xf32>
    %248 = arith.mulf %239, %247 : vector<4x128xf32>
    %cst_215 = arith.constant 0.000000e+00 : f32
    %249 = vector.broadcast %cst_215 : f32 to vector<4x128xf32>
    %250 = arith.maximumf %248, %249 : vector<4x128xf32>
    %c0_216 = arith.constant 0 : index
    %c0_217 = arith.constant 0 : index
    %c0_218 = arith.constant 0 : index
    %251 = vector.load %arg8[%c0_216, %c0_217, %c0_218] : memref<3x4x4xf32, #tpu.memory_space<vmem>>, vector<1x4x4xf32>
    %252 = vector.shape_cast %251 : vector<1x4x4xf32> to vector<4x4xf32>
    %cst_219 = arith.constant dense<0.000000e+00> : vector<4x128xf32>
    %253 = tpu.matmul %252, %250, %cst_219 {dimension_numbers = #tpu.dot_dimension_numbers<[1], [0], [0], [1], [0, 0, 1, 1], [], []>} : vector<4x4xf32>, vector<4x128xf32>, vector<4x128xf32> -> vector<4x128xf32>
    %c9 = arith.constant 9 : index
    %c0_220 = arith.constant 0 : index
    %c0_221 = arith.constant 0 : index
    %254 = vector.load %arg9[%c9, %c0_220, %c0_221] : memref<36x128x128xf32, #tpu.memory_space<vmem>>, vector<1x128x128xf32>
    %255 = vector.shape_cast %254 : vector<1x128x128xf32> to vector<128x128xf32>
    %cst_222 = arith.constant dense<0.000000e+00> : vector<4x128xf32>
    %256 = tpu.matmul %253, %255, %cst_222 {dimension_numbers = #tpu.dot_dimension_numbers<[1], [0], [0], [1], [0, 0, 1, 1], [], []>} : vector<4x128xf32>, vector<128x128xf32>, vector<4x128xf32> -> vector<4x128xf32>
    %c1_223 = arith.constant 1 : index
    %c0_224 = arith.constant 0 : index
    %c0_225 = arith.constant 0 : index
    %257 = vector.load %arg8[%c1_223, %c0_224, %c0_225] : memref<3x4x4xf32, #tpu.memory_space<vmem>>, vector<1x4x4xf32>
    %258 = vector.shape_cast %257 : vector<1x4x4xf32> to vector<4x4xf32>
    %cst_226 = arith.constant dense<0.000000e+00> : vector<4x128xf32>
    %259 = tpu.matmul %258, %250, %cst_226 {dimension_numbers = #tpu.dot_dimension_numbers<[1], [0], [0], [1], [0, 0, 1, 1], [], []>} : vector<4x4xf32>, vector<4x128xf32>, vector<4x128xf32> -> vector<4x128xf32>
    %c10 = arith.constant 10 : index
    %c0_227 = arith.constant 0 : index
    %c0_228 = arith.constant 0 : index
    %260 = vector.load %arg9[%c10, %c0_227, %c0_228] : memref<36x128x128xf32, #tpu.memory_space<vmem>>, vector<1x128x128xf32>
    %261 = vector.shape_cast %260 : vector<1x128x128xf32> to vector<128x128xf32>
    %cst_229 = arith.constant dense<0.000000e+00> : vector<4x128xf32>
    %262 = tpu.matmul %259, %261, %cst_229 {dimension_numbers = #tpu.dot_dimension_numbers<[1], [0], [0], [1], [0, 0, 1, 1], [], []>} : vector<4x128xf32>, vector<128x128xf32>, vector<4x128xf32> -> vector<4x128xf32>
    %263 = arith.addf %256, %262 : vector<4x128xf32>
    %c2_230 = arith.constant 2 : index
    %c0_231 = arith.constant 0 : index
    %c0_232 = arith.constant 0 : index
    %264 = vector.load %arg8[%c2_230, %c0_231, %c0_232] : memref<3x4x4xf32, #tpu.memory_space<vmem>>, vector<1x4x4xf32>
    %265 = vector.shape_cast %264 : vector<1x4x4xf32> to vector<4x4xf32>
    %cst_233 = arith.constant dense<0.000000e+00> : vector<4x128xf32>
    %266 = tpu.matmul %265, %250, %cst_233 {dimension_numbers = #tpu.dot_dimension_numbers<[1], [0], [0], [1], [0, 0, 1, 1], [], []>} : vector<4x4xf32>, vector<4x128xf32>, vector<4x128xf32> -> vector<4x128xf32>
    %c11 = arith.constant 11 : index
    %c0_234 = arith.constant 0 : index
    %c0_235 = arith.constant 0 : index
    %267 = vector.load %arg9[%c11, %c0_234, %c0_235] : memref<36x128x128xf32, #tpu.memory_space<vmem>>, vector<1x128x128xf32>
    %268 = vector.shape_cast %267 : vector<1x128x128xf32> to vector<128x128xf32>
    %cst_236 = arith.constant dense<0.000000e+00> : vector<4x128xf32>
    %269 = tpu.matmul %266, %268, %cst_236 {dimension_numbers = #tpu.dot_dimension_numbers<[1], [0], [0], [1], [0, 0, 1, 1], [], []>} : vector<4x128xf32>, vector<128x128xf32>, vector<4x128xf32> -> vector<4x128xf32>
    %270 = arith.addf %263, %269 : vector<4x128xf32>
    %c0_237 = arith.constant 0 : index
    %c0_238 = arith.constant 0 : index
    %271 = vector.load %arg18[%c0_237, %c0_238] : memref<128x128xf32, #tpu.memory_space<vmem>>, vector<128x128xf32>
    %cst_239 = arith.constant dense<0.000000e+00> : vector<128xf32>
    %272 = vector.multi_reduction <add>, %270, %cst_239 [0] : vector<4x128xf32> to vector<128xf32>
    %273 = vector.shape_cast %272 : vector<128xf32> to vector<1x128xf32>
    %cst_240 = arith.constant dense<0.000000e+00> : vector<1x128xf32>
    %274 = tpu.matmul %273, %271, %cst_240 {dimension_numbers = #tpu.dot_dimension_numbers<[1], [0], [0], [1], [0, 0, 1, 1], [], []>} : vector<1x128xf32>, vector<128x128xf32>, vector<1x128xf32> -> vector<1x128xf32>
    %275 = vector.broadcast %274 : vector<1x128xf32> to vector<4x128xf32>
    %276 = arith.subf %270, %275 : vector<4x128xf32>
    %277 = arith.mulf %276, %276 : vector<4x128xf32>
    %cst_241 = arith.constant dense<0.000000e+00> : vector<128xf32>
    %278 = vector.multi_reduction <add>, %277, %cst_241 [0] : vector<4x128xf32> to vector<128xf32>
    %279 = vector.shape_cast %278 : vector<128xf32> to vector<1x128xf32>
    %cst_242 = arith.constant dense<0.000000e+00> : vector<1x128xf32>
    %280 = tpu.matmul %279, %271, %cst_242 {dimension_numbers = #tpu.dot_dimension_numbers<[1], [0], [0], [1], [0, 0, 1, 1], [], []>} : vector<1x128xf32>, vector<128x128xf32>, vector<1x128xf32> -> vector<1x128xf32>
    %cst_243 = arith.constant 9.99999974E-6 : f32
    %281 = vector.broadcast %cst_243 : f32 to vector<1x128xf32>
    %282 = arith.addf %280, %281 : vector<1x128xf32>
    %283 = math.rsqrt %282 : vector<1x128xf32>
    %284 = vector.broadcast %283 : vector<1x128xf32> to vector<4x128xf32>
    %285 = arith.mulf %276, %284 : vector<4x128xf32>
    %286 = arith.addf %213, %285 : vector<4x128xf32>
    %c0_244 = arith.constant 0 : index
    %c0_245 = arith.constant 0 : index
    %c0_246 = arith.constant 0 : index
    %287 = vector.load %arg8[%c0_244, %c0_245, %c0_246] : memref<3x4x4xf32, #tpu.memory_space<vmem>>, vector<1x4x4xf32>
    %288 = vector.shape_cast %287 : vector<1x4x4xf32> to vector<4x4xf32>
    %cst_247 = arith.constant dense<0.000000e+00> : vector<4x128xf32>
    %289 = tpu.matmul %288, %286, %cst_247 {dimension_numbers = #tpu.dot_dimension_numbers<[1], [0], [0], [1], [0, 0, 1, 1], [], []>} : vector<4x4xf32>, vector<4x128xf32>, vector<4x128xf32> -> vector<4x128xf32>
    %c12 = arith.constant 12 : index
    %c0_248 = arith.constant 0 : index
    %c0_249 = arith.constant 0 : index
    %290 = vector.load %arg9[%c12, %c0_248, %c0_249] : memref<36x128x128xf32, #tpu.memory_space<vmem>>, vector<1x128x128xf32>
    %291 = vector.shape_cast %290 : vector<1x128x128xf32> to vector<128x128xf32>
    %cst_250 = arith.constant dense<0.000000e+00> : vector<4x128xf32>
    %292 = tpu.matmul %289, %291, %cst_250 {dimension_numbers = #tpu.dot_dimension_numbers<[1], [0], [0], [1], [0, 0, 1, 1], [], []>} : vector<4x128xf32>, vector<128x128xf32>, vector<4x128xf32> -> vector<4x128xf32>
    %c1_251 = arith.constant 1 : index
    %c0_252 = arith.constant 0 : index
    %c0_253 = arith.constant 0 : index
    %293 = vector.load %arg8[%c1_251, %c0_252, %c0_253] : memref<3x4x4xf32, #tpu.memory_space<vmem>>, vector<1x4x4xf32>
    %294 = vector.shape_cast %293 : vector<1x4x4xf32> to vector<4x4xf32>
    %cst_254 = arith.constant dense<0.000000e+00> : vector<4x128xf32>
    %295 = tpu.matmul %294, %286, %cst_254 {dimension_numbers = #tpu.dot_dimension_numbers<[1], [0], [0], [1], [0, 0, 1, 1], [], []>} : vector<4x4xf32>, vector<4x128xf32>, vector<4x128xf32> -> vector<4x128xf32>
    %c13 = arith.constant 13 : index
    %c0_255 = arith.constant 0 : index
    %c0_256 = arith.constant 0 : index
    %296 = vector.load %arg9[%c13, %c0_255, %c0_256] : memref<36x128x128xf32, #tpu.memory_space<vmem>>, vector<1x128x128xf32>
    %297 = vector.shape_cast %296 : vector<1x128x128xf32> to vector<128x128xf32>
    %cst_257 = arith.constant dense<0.000000e+00> : vector<4x128xf32>
    %298 = tpu.matmul %295, %297, %cst_257 {dimension_numbers = #tpu.dot_dimension_numbers<[1], [0], [0], [1], [0, 0, 1, 1], [], []>} : vector<4x128xf32>, vector<128x128xf32>, vector<4x128xf32> -> vector<4x128xf32>
    %299 = arith.addf %292, %298 : vector<4x128xf32>
    %c2_258 = arith.constant 2 : index
    %c0_259 = arith.constant 0 : index
    %c0_260 = arith.constant 0 : index
    %300 = vector.load %arg8[%c2_258, %c0_259, %c0_260] : memref<3x4x4xf32, #tpu.memory_space<vmem>>, vector<1x4x4xf32>
    %301 = vector.shape_cast %300 : vector<1x4x4xf32> to vector<4x4xf32>
    %cst_261 = arith.constant dense<0.000000e+00> : vector<4x128xf32>
    %302 = tpu.matmul %301, %286, %cst_261 {dimension_numbers = #tpu.dot_dimension_numbers<[1], [0], [0], [1], [0, 0, 1, 1], [], []>} : vector<4x4xf32>, vector<4x128xf32>, vector<4x128xf32> -> vector<4x128xf32>
    %c14 = arith.constant 14 : index
    %c0_262 = arith.constant 0 : index
    %c0_263 = arith.constant 0 : index
    %303 = vector.load %arg9[%c14, %c0_262, %c0_263] : memref<36x128x128xf32, #tpu.memory_space<vmem>>, vector<1x128x128xf32>
    %304 = vector.shape_cast %303 : vector<1x128x128xf32> to vector<128x128xf32>
    %cst_264 = arith.constant dense<0.000000e+00> : vector<4x128xf32>
    %305 = tpu.matmul %302, %304, %cst_264 {dimension_numbers = #tpu.dot_dimension_numbers<[1], [0], [0], [1], [0, 0, 1, 1], [], []>} : vector<4x128xf32>, vector<128x128xf32>, vector<4x128xf32> -> vector<4x128xf32>
    %306 = arith.addf %299, %305 : vector<4x128xf32>
    %c0_265 = arith.constant 0 : index
    %c0_266 = arith.constant 0 : index
    %307 = vector.load %arg18[%c0_265, %c0_266] : memref<128x128xf32, #tpu.memory_space<vmem>>, vector<128x128xf32>
    %cst_267 = arith.constant dense<0.000000e+00> : vector<128xf32>
    %308 = vector.multi_reduction <add>, %306, %cst_267 [0] : vector<4x128xf32> to vector<128xf32>
    %309 = vector.shape_cast %308 : vector<128xf32> to vector<1x128xf32>
    %cst_268 = arith.constant dense<0.000000e+00> : vector<1x128xf32>
    %310 = tpu.matmul %309, %307, %cst_268 {dimension_numbers = #tpu.dot_dimension_numbers<[1], [0], [0], [1], [0, 0, 1, 1], [], []>} : vector<1x128xf32>, vector<128x128xf32>, vector<1x128xf32> -> vector<1x128xf32>
    %311 = vector.broadcast %310 : vector<1x128xf32> to vector<4x128xf32>
    %312 = arith.subf %306, %311 : vector<4x128xf32>
    %313 = arith.mulf %312, %312 : vector<4x128xf32>
    %cst_269 = arith.constant dense<0.000000e+00> : vector<128xf32>
    %314 = vector.multi_reduction <add>, %313, %cst_269 [0] : vector<4x128xf32> to vector<128xf32>
    %315 = vector.shape_cast %314 : vector<128xf32> to vector<1x128xf32>
    %cst_270 = arith.constant dense<0.000000e+00> : vector<1x128xf32>
    %316 = tpu.matmul %315, %307, %cst_270 {dimension_numbers = #tpu.dot_dimension_numbers<[1], [0], [0], [1], [0, 0, 1, 1], [], []>} : vector<1x128xf32>, vector<128x128xf32>, vector<1x128xf32> -> vector<1x128xf32>
    %cst_271 = arith.constant 9.99999974E-6 : f32
    %317 = vector.broadcast %cst_271 : f32 to vector<1x128xf32>
    %318 = arith.addf %316, %317 : vector<1x128xf32>
    %319 = math.rsqrt %318 : vector<1x128xf32>
    %320 = vector.broadcast %319 : vector<1x128xf32> to vector<4x128xf32>
    %321 = arith.mulf %312, %320 : vector<4x128xf32>
    %cst_272 = arith.constant 0.000000e+00 : f32
    %322 = vector.broadcast %cst_272 : f32 to vector<4x128xf32>
    %323 = arith.maximumf %321, %322 : vector<4x128xf32>
    %c0_273 = arith.constant 0 : index
    %c0_274 = arith.constant 0 : index
    %c0_275 = arith.constant 0 : index
    %324 = vector.load %arg8[%c0_273, %c0_274, %c0_275] : memref<3x4x4xf32, #tpu.memory_space<vmem>>, vector<1x4x4xf32>
    %325 = vector.shape_cast %324 : vector<1x4x4xf32> to vector<4x4xf32>
    %cst_276 = arith.constant dense<0.000000e+00> : vector<4x128xf32>
    %326 = tpu.matmul %325, %323, %cst_276 {dimension_numbers = #tpu.dot_dimension_numbers<[1], [0], [0], [1], [0, 0, 1, 1], [], []>} : vector<4x4xf32>, vector<4x128xf32>, vector<4x128xf32> -> vector<4x128xf32>
    %c15 = arith.constant 15 : index
    %c0_277 = arith.constant 0 : index
    %c0_278 = arith.constant 0 : index
    %327 = vector.load %arg9[%c15, %c0_277, %c0_278] : memref<36x128x128xf32, #tpu.memory_space<vmem>>, vector<1x128x128xf32>
    %328 = vector.shape_cast %327 : vector<1x128x128xf32> to vector<128x128xf32>
    %cst_279 = arith.constant dense<0.000000e+00> : vector<4x128xf32>
    %329 = tpu.matmul %326, %328, %cst_279 {dimension_numbers = #tpu.dot_dimension_numbers<[1], [0], [0], [1], [0, 0, 1, 1], [], []>} : vector<4x128xf32>, vector<128x128xf32>, vector<4x128xf32> -> vector<4x128xf32>
    %c1_280 = arith.constant 1 : index
    %c0_281 = arith.constant 0 : index
    %c0_282 = arith.constant 0 : index
    %330 = vector.load %arg8[%c1_280, %c0_281, %c0_282] : memref<3x4x4xf32, #tpu.memory_space<vmem>>, vector<1x4x4xf32>
    %331 = vector.shape_cast %330 : vector<1x4x4xf32> to vector<4x4xf32>
    %cst_283 = arith.constant dense<0.000000e+00> : vector<4x128xf32>
    %332 = tpu.matmul %331, %323, %cst_283 {dimension_numbers = #tpu.dot_dimension_numbers<[1], [0], [0], [1], [0, 0, 1, 1], [], []>} : vector<4x4xf32>, vector<4x128xf32>, vector<4x128xf32> -> vector<4x128xf32>
    %c16 = arith.constant 16 : index
    %c0_284 = arith.constant 0 : index
    %c0_285 = arith.constant 0 : index
    %333 = vector.load %arg9[%c16, %c0_284, %c0_285] : memref<36x128x128xf32, #tpu.memory_space<vmem>>, vector<1x128x128xf32>
    %334 = vector.shape_cast %333 : vector<1x128x128xf32> to vector<128x128xf32>
    %cst_286 = arith.constant dense<0.000000e+00> : vector<4x128xf32>
    %335 = tpu.matmul %332, %334, %cst_286 {dimension_numbers = #tpu.dot_dimension_numbers<[1], [0], [0], [1], [0, 0, 1, 1], [], []>} : vector<4x128xf32>, vector<128x128xf32>, vector<4x128xf32> -> vector<4x128xf32>
    %336 = arith.addf %329, %335 : vector<4x128xf32>
    %c2_287 = arith.constant 2 : index
    %c0_288 = arith.constant 0 : index
    %c0_289 = arith.constant 0 : index
    %337 = vector.load %arg8[%c2_287, %c0_288, %c0_289] : memref<3x4x4xf32, #tpu.memory_space<vmem>>, vector<1x4x4xf32>
    %338 = vector.shape_cast %337 : vector<1x4x4xf32> to vector<4x4xf32>
    %cst_290 = arith.constant dense<0.000000e+00> : vector<4x128xf32>
    %339 = tpu.matmul %338, %323, %cst_290 {dimension_numbers = #tpu.dot_dimension_numbers<[1], [0], [0], [1], [0, 0, 1, 1], [], []>} : vector<4x4xf32>, vector<4x128xf32>, vector<4x128xf32> -> vector<4x128xf32>
    %c17 = arith.constant 17 : index
    %c0_291 = arith.constant 0 : index
    %c0_292 = arith.constant 0 : index
    %340 = vector.load %arg9[%c17, %c0_291, %c0_292] : memref<36x128x128xf32, #tpu.memory_space<vmem>>, vector<1x128x128xf32>
    %341 = vector.shape_cast %340 : vector<1x128x128xf32> to vector<128x128xf32>
    %cst_293 = arith.constant dense<0.000000e+00> : vector<4x128xf32>
    %342 = tpu.matmul %339, %341, %cst_293 {dimension_numbers = #tpu.dot_dimension_numbers<[1], [0], [0], [1], [0, 0, 1, 1], [], []>} : vector<4x128xf32>, vector<128x128xf32>, vector<4x128xf32> -> vector<4x128xf32>
    %343 = arith.addf %336, %342 : vector<4x128xf32>
    %c0_294 = arith.constant 0 : index
    %c0_295 = arith.constant 0 : index
    %344 = vector.load %arg18[%c0_294, %c0_295] : memref<128x128xf32, #tpu.memory_space<vmem>>, vector<128x128xf32>
    %cst_296 = arith.constant dense<0.000000e+00> : vector<128xf32>
    %345 = vector.multi_reduction <add>, %343, %cst_296 [0] : vector<4x128xf32> to vector<128xf32>
    %346 = vector.shape_cast %345 : vector<128xf32> to vector<1x128xf32>
    %cst_297 = arith.constant dense<0.000000e+00> : vector<1x128xf32>
    %347 = tpu.matmul %346, %344, %cst_297 {dimension_numbers = #tpu.dot_dimension_numbers<[1], [0], [0], [1], [0, 0, 1, 1], [], []>} : vector<1x128xf32>, vector<128x128xf32>, vector<1x128xf32> -> vector<1x128xf32>
    %348 = vector.broadcast %347 : vector<1x128xf32> to vector<4x128xf32>
    %349 = arith.subf %343, %348 : vector<4x128xf32>
    %350 = arith.mulf %349, %349 : vector<4x128xf32>
    %cst_298 = arith.constant dense<0.000000e+00> : vector<128xf32>
    %351 = vector.multi_reduction <add>, %350, %cst_298 [0] : vector<4x128xf32> to vector<128xf32>
    %352 = vector.shape_cast %351 : vector<128xf32> to vector<1x128xf32>
    %cst_299 = arith.constant dense<0.000000e+00> : vector<1x128xf32>
    %353 = tpu.matmul %352, %344, %cst_299 {dimension_numbers = #tpu.dot_dimension_numbers<[1], [0], [0], [1], [0, 0, 1, 1], [], []>} : vector<1x128xf32>, vector<128x128xf32>, vector<1x128xf32> -> vector<1x128xf32>
    %cst_300 = arith.constant 9.99999974E-6 : f32
    %354 = vector.broadcast %cst_300 : f32 to vector<1x128xf32>
    %355 = arith.addf %353, %354 : vector<1x128xf32>
    %356 = math.rsqrt %355 : vector<1x128xf32>
    %357 = vector.broadcast %356 : vector<1x128xf32> to vector<4x128xf32>
    %358 = arith.mulf %349, %357 : vector<4x128xf32>
    %359 = arith.addf %286, %358 : vector<4x128xf32>
    %c0_301 = arith.constant 0 : index
    %c0_302 = arith.constant 0 : index
    %c0_303 = arith.constant 0 : index
    %360 = vector.load %arg8[%c0_301, %c0_302, %c0_303] : memref<3x4x4xf32, #tpu.memory_space<vmem>>, vector<1x4x4xf32>
    %361 = vector.shape_cast %360 : vector<1x4x4xf32> to vector<4x4xf32>
    %cst_304 = arith.constant dense<0.000000e+00> : vector<4x128xf32>
    %362 = tpu.matmul %361, %359, %cst_304 {dimension_numbers = #tpu.dot_dimension_numbers<[1], [0], [0], [1], [0, 0, 1, 1], [], []>} : vector<4x4xf32>, vector<4x128xf32>, vector<4x128xf32> -> vector<4x128xf32>
    %c18 = arith.constant 18 : index
    %c0_305 = arith.constant 0 : index
    %c0_306 = arith.constant 0 : index
    %363 = vector.load %arg9[%c18, %c0_305, %c0_306] : memref<36x128x128xf32, #tpu.memory_space<vmem>>, vector<1x128x128xf32>
    %364 = vector.shape_cast %363 : vector<1x128x128xf32> to vector<128x128xf32>
    %cst_307 = arith.constant dense<0.000000e+00> : vector<4x128xf32>
    %365 = tpu.matmul %362, %364, %cst_307 {dimension_numbers = #tpu.dot_dimension_numbers<[1], [0], [0], [1], [0, 0, 1, 1], [], []>} : vector<4x128xf32>, vector<128x128xf32>, vector<4x128xf32> -> vector<4x128xf32>
    %c1_308 = arith.constant 1 : index
    %c0_309 = arith.constant 0 : index
    %c0_310 = arith.constant 0 : index
    %366 = vector.load %arg8[%c1_308, %c0_309, %c0_310] : memref<3x4x4xf32, #tpu.memory_space<vmem>>, vector<1x4x4xf32>
    %367 = vector.shape_cast %366 : vector<1x4x4xf32> to vector<4x4xf32>
    %cst_311 = arith.constant dense<0.000000e+00> : vector<4x128xf32>
    %368 = tpu.matmul %367, %359, %cst_311 {dimension_numbers = #tpu.dot_dimension_numbers<[1], [0], [0], [1], [0, 0, 1, 1], [], []>} : vector<4x4xf32>, vector<4x128xf32>, vector<4x128xf32> -> vector<4x128xf32>
    %c19 = arith.constant 19 : index
    %c0_312 = arith.constant 0 : index
    %c0_313 = arith.constant 0 : index
    %369 = vector.load %arg9[%c19, %c0_312, %c0_313] : memref<36x128x128xf32, #tpu.memory_space<vmem>>, vector<1x128x128xf32>
    %370 = vector.shape_cast %369 : vector<1x128x128xf32> to vector<128x128xf32>
    %cst_314 = arith.constant dense<0.000000e+00> : vector<4x128xf32>
    %371 = tpu.matmul %368, %370, %cst_314 {dimension_numbers = #tpu.dot_dimension_numbers<[1], [0], [0], [1], [0, 0, 1, 1], [], []>} : vector<4x128xf32>, vector<128x128xf32>, vector<4x128xf32> -> vector<4x128xf32>
    %372 = arith.addf %365, %371 : vector<4x128xf32>
    %c2_315 = arith.constant 2 : index
    %c0_316 = arith.constant 0 : index
    %c0_317 = arith.constant 0 : index
    %373 = vector.load %arg8[%c2_315, %c0_316, %c0_317] : memref<3x4x4xf32, #tpu.memory_space<vmem>>, vector<1x4x4xf32>
    %374 = vector.shape_cast %373 : vector<1x4x4xf32> to vector<4x4xf32>
    %cst_318 = arith.constant dense<0.000000e+00> : vector<4x128xf32>
    %375 = tpu.matmul %374, %359, %cst_318 {dimension_numbers = #tpu.dot_dimension_numbers<[1], [0], [0], [1], [0, 0, 1, 1], [], []>} : vector<4x4xf32>, vector<4x128xf32>, vector<4x128xf32> -> vector<4x128xf32>
    %c20 = arith.constant 20 : index
    %c0_319 = arith.constant 0 : index
    %c0_320 = arith.constant 0 : index
    %376 = vector.load %arg9[%c20, %c0_319, %c0_320] : memref<36x128x128xf32, #tpu.memory_space<vmem>>, vector<1x128x128xf32>
    %377 = vector.shape_cast %376 : vector<1x128x128xf32> to vector<128x128xf32>
    %cst_321 = arith.constant dense<0.000000e+00> : vector<4x128xf32>
    %378 = tpu.matmul %375, %377, %cst_321 {dimension_numbers = #tpu.dot_dimension_numbers<[1], [0], [0], [1], [0, 0, 1, 1], [], []>} : vector<4x128xf32>, vector<128x128xf32>, vector<4x128xf32> -> vector<4x128xf32>
    %379 = arith.addf %372, %378 : vector<4x128xf32>
    %c0_322 = arith.constant 0 : index
    %c0_323 = arith.constant 0 : index
    %380 = vector.load %arg18[%c0_322, %c0_323] : memref<128x128xf32, #tpu.memory_space<vmem>>, vector<128x128xf32>
    %cst_324 = arith.constant dense<0.000000e+00> : vector<128xf32>
    %381 = vector.multi_reduction <add>, %379, %cst_324 [0] : vector<4x128xf32> to vector<128xf32>
    %382 = vector.shape_cast %381 : vector<128xf32> to vector<1x128xf32>
    %cst_325 = arith.constant dense<0.000000e+00> : vector<1x128xf32>
    %383 = tpu.matmul %382, %380, %cst_325 {dimension_numbers = #tpu.dot_dimension_numbers<[1], [0], [0], [1], [0, 0, 1, 1], [], []>} : vector<1x128xf32>, vector<128x128xf32>, vector<1x128xf32> -> vector<1x128xf32>
    %384 = vector.broadcast %383 : vector<1x128xf32> to vector<4x128xf32>
    %385 = arith.subf %379, %384 : vector<4x128xf32>
    %386 = arith.mulf %385, %385 : vector<4x128xf32>
    %cst_326 = arith.constant dense<0.000000e+00> : vector<128xf32>
    %387 = vector.multi_reduction <add>, %386, %cst_326 [0] : vector<4x128xf32> to vector<128xf32>
    %388 = vector.shape_cast %387 : vector<128xf32> to vector<1x128xf32>
    %cst_327 = arith.constant dense<0.000000e+00> : vector<1x128xf32>
    %389 = tpu.matmul %388, %380, %cst_327 {dimension_numbers = #tpu.dot_dimension_numbers<[1], [0], [0], [1], [0, 0, 1, 1], [], []>} : vector<1x128xf32>, vector<128x128xf32>, vector<1x128xf32> -> vector<1x128xf32>
    %cst_328 = arith.constant 9.99999974E-6 : f32
    %390 = vector.broadcast %cst_328 : f32 to vector<1x128xf32>
    %391 = arith.addf %389, %390 : vector<1x128xf32>
    %392 = math.rsqrt %391 : vector<1x128xf32>
    %393 = vector.broadcast %392 : vector<1x128xf32> to vector<4x128xf32>
    %394 = arith.mulf %385, %393 : vector<4x128xf32>
    %cst_329 = arith.constant 0.000000e+00 : f32
    %395 = vector.broadcast %cst_329 : f32 to vector<4x128xf32>
    %396 = arith.maximumf %394, %395 : vector<4x128xf32>
    %c0_330 = arith.constant 0 : index
    %c0_331 = arith.constant 0 : index
    %c0_332 = arith.constant 0 : index
    %397 = vector.load %arg8[%c0_330, %c0_331, %c0_332] : memref<3x4x4xf32, #tpu.memory_space<vmem>>, vector<1x4x4xf32>
    %398 = vector.shape_cast %397 : vector<1x4x4xf32> to vector<4x4xf32>
    %cst_333 = arith.constant dense<0.000000e+00> : vector<4x128xf32>
    %399 = tpu.matmul %398, %396, %cst_333 {dimension_numbers = #tpu.dot_dimension_numbers<[1], [0], [0], [1], [0, 0, 1, 1], [], []>} : vector<4x4xf32>, vector<4x128xf32>, vector<4x128xf32> -> vector<4x128xf32>
    %c21 = arith.constant 21 : index
    %c0_334 = arith.constant 0 : index
    %c0_335 = arith.constant 0 : index
    %400 = vector.load %arg9[%c21, %c0_334, %c0_335] : memref<36x128x128xf32, #tpu.memory_space<vmem>>, vector<1x128x128xf32>
    %401 = vector.shape_cast %400 : vector<1x128x128xf32> to vector<128x128xf32>
    %cst_336 = arith.constant dense<0.000000e+00> : vector<4x128xf32>
    %402 = tpu.matmul %399, %401, %cst_336 {dimension_numbers = #tpu.dot_dimension_numbers<[1], [0], [0], [1], [0, 0, 1, 1], [], []>} : vector<4x128xf32>, vector<128x128xf32>, vector<4x128xf32> -> vector<4x128xf32>
    %c1_337 = arith.constant 1 : index
    %c0_338 = arith.constant 0 : index
    %c0_339 = arith.constant 0 : index
    %403 = vector.load %arg8[%c1_337, %c0_338, %c0_339] : memref<3x4x4xf32, #tpu.memory_space<vmem>>, vector<1x4x4xf32>
    %404 = vector.shape_cast %403 : vector<1x4x4xf32> to vector<4x4xf32>
    %cst_340 = arith.constant dense<0.000000e+00> : vector<4x128xf32>
    %405 = tpu.matmul %404, %396, %cst_340 {dimension_numbers = #tpu.dot_dimension_numbers<[1], [0], [0], [1], [0, 0, 1, 1], [], []>} : vector<4x4xf32>, vector<4x128xf32>, vector<4x128xf32> -> vector<4x128xf32>
    %c22 = arith.constant 22 : index
    %c0_341 = arith.constant 0 : index
    %c0_342 = arith.constant 0 : index
    %406 = vector.load %arg9[%c22, %c0_341, %c0_342] : memref<36x128x128xf32, #tpu.memory_space<vmem>>, vector<1x128x128xf32>
    %407 = vector.shape_cast %406 : vector<1x128x128xf32> to vector<128x128xf32>
    %cst_343 = arith.constant dense<0.000000e+00> : vector<4x128xf32>
    %408 = tpu.matmul %405, %407, %cst_343 {dimension_numbers = #tpu.dot_dimension_numbers<[1], [0], [0], [1], [0, 0, 1, 1], [], []>} : vector<4x128xf32>, vector<128x128xf32>, vector<4x128xf32> -> vector<4x128xf32>
    %409 = arith.addf %402, %408 : vector<4x128xf32>
    %c2_344 = arith.constant 2 : index
    %c0_345 = arith.constant 0 : index
    %c0_346 = arith.constant 0 : index
    %410 = vector.load %arg8[%c2_344, %c0_345, %c0_346] : memref<3x4x4xf32, #tpu.memory_space<vmem>>, vector<1x4x4xf32>
    %411 = vector.shape_cast %410 : vector<1x4x4xf32> to vector<4x4xf32>
    %cst_347 = arith.constant dense<0.000000e+00> : vector<4x128xf32>
    %412 = tpu.matmul %411, %396, %cst_347 {dimension_numbers = #tpu.dot_dimension_numbers<[1], [0], [0], [1], [0, 0, 1, 1], [], []>} : vector<4x4xf32>, vector<4x128xf32>, vector<4x128xf32> -> vector<4x128xf32>
    %c23 = arith.constant 23 : index
    %c0_348 = arith.constant 0 : index
    %c0_349 = arith.constant 0 : index
    %413 = vector.load %arg9[%c23, %c0_348, %c0_349] : memref<36x128x128xf32, #tpu.memory_space<vmem>>, vector<1x128x128xf32>
    %414 = vector.shape_cast %413 : vector<1x128x128xf32> to vector<128x128xf32>
    %cst_350 = arith.constant dense<0.000000e+00> : vector<4x128xf32>
    %415 = tpu.matmul %412, %414, %cst_350 {dimension_numbers = #tpu.dot_dimension_numbers<[1], [0], [0], [1], [0, 0, 1, 1], [], []>} : vector<4x128xf32>, vector<128x128xf32>, vector<4x128xf32> -> vector<4x128xf32>
    %416 = arith.addf %409, %415 : vector<4x128xf32>
    %c0_351 = arith.constant 0 : index
    %c0_352 = arith.constant 0 : index
    %417 = vector.load %arg18[%c0_351, %c0_352] : memref<128x128xf32, #tpu.memory_space<vmem>>, vector<128x128xf32>
    %cst_353 = arith.constant dense<0.000000e+00> : vector<128xf32>
    %418 = vector.multi_reduction <add>, %416, %cst_353 [0] : vector<4x128xf32> to vector<128xf32>
    %419 = vector.shape_cast %418 : vector<128xf32> to vector<1x128xf32>
    %cst_354 = arith.constant dense<0.000000e+00> : vector<1x128xf32>
    %420 = tpu.matmul %419, %417, %cst_354 {dimension_numbers = #tpu.dot_dimension_numbers<[1], [0], [0], [1], [0, 0, 1, 1], [], []>} : vector<1x128xf32>, vector<128x128xf32>, vector<1x128xf32> -> vector<1x128xf32>
    %421 = vector.broadcast %420 : vector<1x128xf32> to vector<4x128xf32>
    %422 = arith.subf %416, %421 : vector<4x128xf32>
    %423 = arith.mulf %422, %422 : vector<4x128xf32>
    %cst_355 = arith.constant dense<0.000000e+00> : vector<128xf32>
    %424 = vector.multi_reduction <add>, %423, %cst_355 [0] : vector<4x128xf32> to vector<128xf32>
    %425 = vector.shape_cast %424 : vector<128xf32> to vector<1x128xf32>
    %cst_356 = arith.constant dense<0.000000e+00> : vector<1x128xf32>
    %426 = tpu.matmul %425, %417, %cst_356 {dimension_numbers = #tpu.dot_dimension_numbers<[1], [0], [0], [1], [0, 0, 1, 1], [], []>} : vector<1x128xf32>, vector<128x128xf32>, vector<1x128xf32> -> vector<1x128xf32>
    %cst_357 = arith.constant 9.99999974E-6 : f32
    %427 = vector.broadcast %cst_357 : f32 to vector<1x128xf32>
    %428 = arith.addf %426, %427 : vector<1x128xf32>
    %429 = math.rsqrt %428 : vector<1x128xf32>
    %430 = vector.broadcast %429 : vector<1x128xf32> to vector<4x128xf32>
    %431 = arith.mulf %422, %430 : vector<4x128xf32>
    %432 = arith.addf %359, %431 : vector<4x128xf32>
    %c0_358 = arith.constant 0 : index
    %c0_359 = arith.constant 0 : index
    %c0_360 = arith.constant 0 : index
    %433 = vector.load %arg8[%c0_358, %c0_359, %c0_360] : memref<3x4x4xf32, #tpu.memory_space<vmem>>, vector<1x4x4xf32>
    %434 = vector.shape_cast %433 : vector<1x4x4xf32> to vector<4x4xf32>
    %cst_361 = arith.constant dense<0.000000e+00> : vector<4x128xf32>
    %435 = tpu.matmul %434, %432, %cst_361 {dimension_numbers = #tpu.dot_dimension_numbers<[1], [0], [0], [1], [0, 0, 1, 1], [], []>} : vector<4x4xf32>, vector<4x128xf32>, vector<4x128xf32> -> vector<4x128xf32>
    %c24 = arith.constant 24 : index
    %c0_362 = arith.constant 0 : index
    %c0_363 = arith.constant 0 : index
    %436 = vector.load %arg9[%c24, %c0_362, %c0_363] : memref<36x128x128xf32, #tpu.memory_space<vmem>>, vector<1x128x128xf32>
    %437 = vector.shape_cast %436 : vector<1x128x128xf32> to vector<128x128xf32>
    %cst_364 = arith.constant dense<0.000000e+00> : vector<4x128xf32>
    %438 = tpu.matmul %435, %437, %cst_364 {dimension_numbers = #tpu.dot_dimension_numbers<[1], [0], [0], [1], [0, 0, 1, 1], [], []>} : vector<4x128xf32>, vector<128x128xf32>, vector<4x128xf32> -> vector<4x128xf32>
    %c1_365 = arith.constant 1 : index
    %c0_366 = arith.constant 0 : index
    %c0_367 = arith.constant 0 : index
    %439 = vector.load %arg8[%c1_365, %c0_366, %c0_367] : memref<3x4x4xf32, #tpu.memory_space<vmem>>, vector<1x4x4xf32>
    %440 = vector.shape_cast %439 : vector<1x4x4xf32> to vector<4x4xf32>
    %cst_368 = arith.constant dense<0.000000e+00> : vector<4x128xf32>
    %441 = tpu.matmul %440, %432, %cst_368 {dimension_numbers = #tpu.dot_dimension_numbers<[1], [0], [0], [1], [0, 0, 1, 1], [], []>} : vector<4x4xf32>, vector<4x128xf32>, vector<4x128xf32> -> vector<4x128xf32>
    %c25 = arith.constant 25 : index
    %c0_369 = arith.constant 0 : index
    %c0_370 = arith.constant 0 : index
    %442 = vector.load %arg9[%c25, %c0_369, %c0_370] : memref<36x128x128xf32, #tpu.memory_space<vmem>>, vector<1x128x128xf32>
    %443 = vector.shape_cast %442 : vector<1x128x128xf32> to vector<128x128xf32>
    %cst_371 = arith.constant dense<0.000000e+00> : vector<4x128xf32>
    %444 = tpu.matmul %441, %443, %cst_371 {dimension_numbers = #tpu.dot_dimension_numbers<[1], [0], [0], [1], [0, 0, 1, 1], [], []>} : vector<4x128xf32>, vector<128x128xf32>, vector<4x128xf32> -> vector<4x128xf32>
    %445 = arith.addf %438, %444 : vector<4x128xf32>
    %c2_372 = arith.constant 2 : index
    %c0_373 = arith.constant 0 : index
    %c0_374 = arith.constant 0 : index
    %446 = vector.load %arg8[%c2_372, %c0_373, %c0_374] : memref<3x4x4xf32, #tpu.memory_space<vmem>>, vector<1x4x4xf32>
    %447 = vector.shape_cast %446 : vector<1x4x4xf32> to vector<4x4xf32>
    %cst_375 = arith.constant dense<0.000000e+00> : vector<4x128xf32>
    %448 = tpu.matmul %447, %432, %cst_375 {dimension_numbers = #tpu.dot_dimension_numbers<[1], [0], [0], [1], [0, 0, 1, 1], [], []>} : vector<4x4xf32>, vector<4x128xf32>, vector<4x128xf32> -> vector<4x128xf32>
    %c26 = arith.constant 26 : index
    %c0_376 = arith.constant 0 : index
    %c0_377 = arith.constant 0 : index
    %449 = vector.load %arg9[%c26, %c0_376, %c0_377] : memref<36x128x128xf32, #tpu.memory_space<vmem>>, vector<1x128x128xf32>
    %450 = vector.shape_cast %449 : vector<1x128x128xf32> to vector<128x128xf32>
    %cst_378 = arith.constant dense<0.000000e+00> : vector<4x128xf32>
    %451 = tpu.matmul %448, %450, %cst_378 {dimension_numbers = #tpu.dot_dimension_numbers<[1], [0], [0], [1], [0, 0, 1, 1], [], []>} : vector<4x128xf32>, vector<128x128xf32>, vector<4x128xf32> -> vector<4x128xf32>
    %452 = arith.addf %445, %451 : vector<4x128xf32>
    %c0_379 = arith.constant 0 : index
    %c0_380 = arith.constant 0 : index
    %453 = vector.load %arg18[%c0_379, %c0_380] : memref<128x128xf32, #tpu.memory_space<vmem>>, vector<128x128xf32>
    %cst_381 = arith.constant dense<0.000000e+00> : vector<128xf32>
    %454 = vector.multi_reduction <add>, %452, %cst_381 [0] : vector<4x128xf32> to vector<128xf32>
    %455 = vector.shape_cast %454 : vector<128xf32> to vector<1x128xf32>
    %cst_382 = arith.constant dense<0.000000e+00> : vector<1x128xf32>
    %456 = tpu.matmul %455, %453, %cst_382 {dimension_numbers = #tpu.dot_dimension_numbers<[1], [0], [0], [1], [0, 0, 1, 1], [], []>} : vector<1x128xf32>, vector<128x128xf32>, vector<1x128xf32> -> vector<1x128xf32>
    %457 = vector.broadcast %456 : vector<1x128xf32> to vector<4x128xf32>
    %458 = arith.subf %452, %457 : vector<4x128xf32>
    %459 = arith.mulf %458, %458 : vector<4x128xf32>
    %cst_383 = arith.constant dense<0.000000e+00> : vector<128xf32>
    %460 = vector.multi_reduction <add>, %459, %cst_383 [0] : vector<4x128xf32> to vector<128xf32>
    %461 = vector.shape_cast %460 : vector<128xf32> to vector<1x128xf32>
    %cst_384 = arith.constant dense<0.000000e+00> : vector<1x128xf32>
    %462 = tpu.matmul %461, %453, %cst_384 {dimension_numbers = #tpu.dot_dimension_numbers<[1], [0], [0], [1], [0, 0, 1, 1], [], []>} : vector<1x128xf32>, vector<128x128xf32>, vector<1x128xf32> -> vector<1x128xf32>
    %cst_385 = arith.constant 9.99999974E-6 : f32
    %463 = vector.broadcast %cst_385 : f32 to vector<1x128xf32>
    %464 = arith.addf %462, %463 : vector<1x128xf32>
    %465 = math.rsqrt %464 : vector<1x128xf32>
    %466 = vector.broadcast %465 : vector<1x128xf32> to vector<4x128xf32>
    %467 = arith.mulf %458, %466 : vector<4x128xf32>
    %cst_386 = arith.constant 0.000000e+00 : f32
    %468 = vector.broadcast %cst_386 : f32 to vector<4x128xf32>
    %469 = arith.maximumf %467, %468 : vector<4x128xf32>
    %c0_387 = arith.constant 0 : index
    %c0_388 = arith.constant 0 : index
    %c0_389 = arith.constant 0 : index
    %470 = vector.load %arg8[%c0_387, %c0_388, %c0_389] : memref<3x4x4xf32, #tpu.memory_space<vmem>>, vector<1x4x4xf32>
    %471 = vector.shape_cast %470 : vector<1x4x4xf32> to vector<4x4xf32>
    %cst_390 = arith.constant dense<0.000000e+00> : vector<4x128xf32>
    %472 = tpu.matmul %471, %469, %cst_390 {dimension_numbers = #tpu.dot_dimension_numbers<[1], [0], [0], [1], [0, 0, 1, 1], [], []>} : vector<4x4xf32>, vector<4x128xf32>, vector<4x128xf32> -> vector<4x128xf32>
    %c27 = arith.constant 27 : index
    %c0_391 = arith.constant 0 : index
    %c0_392 = arith.constant 0 : index
    %473 = vector.load %arg9[%c27, %c0_391, %c0_392] : memref<36x128x128xf32, #tpu.memory_space<vmem>>, vector<1x128x128xf32>
    %474 = vector.shape_cast %473 : vector<1x128x128xf32> to vector<128x128xf32>
    %cst_393 = arith.constant dense<0.000000e+00> : vector<4x128xf32>
    %475 = tpu.matmul %472, %474, %cst_393 {dimension_numbers = #tpu.dot_dimension_numbers<[1], [0], [0], [1], [0, 0, 1, 1], [], []>} : vector<4x128xf32>, vector<128x128xf32>, vector<4x128xf32> -> vector<4x128xf32>
    %c1_394 = arith.constant 1 : index
    %c0_395 = arith.constant 0 : index
    %c0_396 = arith.constant 0 : index
    %476 = vector.load %arg8[%c1_394, %c0_395, %c0_396] : memref<3x4x4xf32, #tpu.memory_space<vmem>>, vector<1x4x4xf32>
    %477 = vector.shape_cast %476 : vector<1x4x4xf32> to vector<4x4xf32>
    %cst_397 = arith.constant dense<0.000000e+00> : vector<4x128xf32>
    %478 = tpu.matmul %477, %469, %cst_397 {dimension_numbers = #tpu.dot_dimension_numbers<[1], [0], [0], [1], [0, 0, 1, 1], [], []>} : vector<4x4xf32>, vector<4x128xf32>, vector<4x128xf32> -> vector<4x128xf32>
    %c28 = arith.constant 28 : index
    %c0_398 = arith.constant 0 : index
    %c0_399 = arith.constant 0 : index
    %479 = vector.load %arg9[%c28, %c0_398, %c0_399] : memref<36x128x128xf32, #tpu.memory_space<vmem>>, vector<1x128x128xf32>
    %480 = vector.shape_cast %479 : vector<1x128x128xf32> to vector<128x128xf32>
    %cst_400 = arith.constant dense<0.000000e+00> : vector<4x128xf32>
    %481 = tpu.matmul %478, %480, %cst_400 {dimension_numbers = #tpu.dot_dimension_numbers<[1], [0], [0], [1], [0, 0, 1, 1], [], []>} : vector<4x128xf32>, vector<128x128xf32>, vector<4x128xf32> -> vector<4x128xf32>
    %482 = arith.addf %475, %481 : vector<4x128xf32>
    %c2_401 = arith.constant 2 : index
    %c0_402 = arith.constant 0 : index
    %c0_403 = arith.constant 0 : index
    %483 = vector.load %arg8[%c2_401, %c0_402, %c0_403] : memref<3x4x4xf32, #tpu.memory_space<vmem>>, vector<1x4x4xf32>
    %484 = vector.shape_cast %483 : vector<1x4x4xf32> to vector<4x4xf32>
    %cst_404 = arith.constant dense<0.000000e+00> : vector<4x128xf32>
    %485 = tpu.matmul %484, %469, %cst_404 {dimension_numbers = #tpu.dot_dimension_numbers<[1], [0], [0], [1], [0, 0, 1, 1], [], []>} : vector<4x4xf32>, vector<4x128xf32>, vector<4x128xf32> -> vector<4x128xf32>
    %c29 = arith.constant 29 : index
    %c0_405 = arith.constant 0 : index
    %c0_406 = arith.constant 0 : index
    %486 = vector.load %arg9[%c29, %c0_405, %c0_406] : memref<36x128x128xf32, #tpu.memory_space<vmem>>, vector<1x128x128xf32>
    %487 = vector.shape_cast %486 : vector<1x128x128xf32> to vector<128x128xf32>
    %cst_407 = arith.constant dense<0.000000e+00> : vector<4x128xf32>
    %488 = tpu.matmul %485, %487, %cst_407 {dimension_numbers = #tpu.dot_dimension_numbers<[1], [0], [0], [1], [0, 0, 1, 1], [], []>} : vector<4x128xf32>, vector<128x128xf32>, vector<4x128xf32> -> vector<4x128xf32>
    %489 = arith.addf %482, %488 : vector<4x128xf32>
    %c0_408 = arith.constant 0 : index
    %c0_409 = arith.constant 0 : index
    %490 = vector.load %arg18[%c0_408, %c0_409] : memref<128x128xf32, #tpu.memory_space<vmem>>, vector<128x128xf32>
    %cst_410 = arith.constant dense<0.000000e+00> : vector<128xf32>
    %491 = vector.multi_reduction <add>, %489, %cst_410 [0] : vector<4x128xf32> to vector<128xf32>
    %492 = vector.shape_cast %491 : vector<128xf32> to vector<1x128xf32>
    %cst_411 = arith.constant dense<0.000000e+00> : vector<1x128xf32>
    %493 = tpu.matmul %492, %490, %cst_411 {dimension_numbers = #tpu.dot_dimension_numbers<[1], [0], [0], [1], [0, 0, 1, 1], [], []>} : vector<1x128xf32>, vector<128x128xf32>, vector<1x128xf32> -> vector<1x128xf32>
    %494 = vector.broadcast %493 : vector<1x128xf32> to vector<4x128xf32>
    %495 = arith.subf %489, %494 : vector<4x128xf32>
    %496 = arith.mulf %495, %495 : vector<4x128xf32>
    %cst_412 = arith.constant dense<0.000000e+00> : vector<128xf32>
    %497 = vector.multi_reduction <add>, %496, %cst_412 [0] : vector<4x128xf32> to vector<128xf32>
    %498 = vector.shape_cast %497 : vector<128xf32> to vector<1x128xf32>
    %cst_413 = arith.constant dense<0.000000e+00> : vector<1x128xf32>
    %499 = tpu.matmul %498, %490, %cst_413 {dimension_numbers = #tpu.dot_dimension_numbers<[1], [0], [0], [1], [0, 0, 1, 1], [], []>} : vector<1x128xf32>, vector<128x128xf32>, vector<1x128xf32> -> vector<1x128xf32>
    %cst_414 = arith.constant 9.99999974E-6 : f32
    %500 = vector.broadcast %cst_414 : f32 to vector<1x128xf32>
    %501 = arith.addf %499, %500 : vector<1x128xf32>
    %502 = math.rsqrt %501 : vector<1x128xf32>
    %503 = vector.broadcast %502 : vector<1x128xf32> to vector<4x128xf32>
    %504 = arith.mulf %495, %503 : vector<4x128xf32>
    %505 = arith.addf %432, %504 : vector<4x128xf32>
    %c0_415 = arith.constant 0 : index
    %c0_416 = arith.constant 0 : index
    %c0_417 = arith.constant 0 : index
    %506 = vector.load %arg8[%c0_415, %c0_416, %c0_417] : memref<3x4x4xf32, #tpu.memory_space<vmem>>, vector<1x4x4xf32>
    %507 = vector.shape_cast %506 : vector<1x4x4xf32> to vector<4x4xf32>
    %cst_418 = arith.constant dense<0.000000e+00> : vector<4x128xf32>
    %508 = tpu.matmul %507, %505, %cst_418 {dimension_numbers = #tpu.dot_dimension_numbers<[1], [0], [0], [1], [0, 0, 1, 1], [], []>} : vector<4x4xf32>, vector<4x128xf32>, vector<4x128xf32> -> vector<4x128xf32>
    %c30 = arith.constant 30 : index
    %c0_419 = arith.constant 0 : index
    %c0_420 = arith.constant 0 : index
    %509 = vector.load %arg9[%c30, %c0_419, %c0_420] : memref<36x128x128xf32, #tpu.memory_space<vmem>>, vector<1x128x128xf32>
    %510 = vector.shape_cast %509 : vector<1x128x128xf32> to vector<128x128xf32>
    %cst_421 = arith.constant dense<0.000000e+00> : vector<4x128xf32>
    %511 = tpu.matmul %508, %510, %cst_421 {dimension_numbers = #tpu.dot_dimension_numbers<[1], [0], [0], [1], [0, 0, 1, 1], [], []>} : vector<4x128xf32>, vector<128x128xf32>, vector<4x128xf32> -> vector<4x128xf32>
    %c1_422 = arith.constant 1 : index
    %c0_423 = arith.constant 0 : index
    %c0_424 = arith.constant 0 : index
    %512 = vector.load %arg8[%c1_422, %c0_423, %c0_424] : memref<3x4x4xf32, #tpu.memory_space<vmem>>, vector<1x4x4xf32>
    %513 = vector.shape_cast %512 : vector<1x4x4xf32> to vector<4x4xf32>
    %cst_425 = arith.constant dense<0.000000e+00> : vector<4x128xf32>
    %514 = tpu.matmul %513, %505, %cst_425 {dimension_numbers = #tpu.dot_dimension_numbers<[1], [0], [0], [1], [0, 0, 1, 1], [], []>} : vector<4x4xf32>, vector<4x128xf32>, vector<4x128xf32> -> vector<4x128xf32>
    %c31 = arith.constant 31 : index
    %c0_426 = arith.constant 0 : index
    %c0_427 = arith.constant 0 : index
    %515 = vector.load %arg9[%c31, %c0_426, %c0_427] : memref<36x128x128xf32, #tpu.memory_space<vmem>>, vector<1x128x128xf32>
    %516 = vector.shape_cast %515 : vector<1x128x128xf32> to vector<128x128xf32>
    %cst_428 = arith.constant dense<0.000000e+00> : vector<4x128xf32>
    %517 = tpu.matmul %514, %516, %cst_428 {dimension_numbers = #tpu.dot_dimension_numbers<[1], [0], [0], [1], [0, 0, 1, 1], [], []>} : vector<4x128xf32>, vector<128x128xf32>, vector<4x128xf32> -> vector<4x128xf32>
    %518 = arith.addf %511, %517 : vector<4x128xf32>
    %c2_429 = arith.constant 2 : index
    %c0_430 = arith.constant 0 : index
    %c0_431 = arith.constant 0 : index
    %519 = vector.load %arg8[%c2_429, %c0_430, %c0_431] : memref<3x4x4xf32, #tpu.memory_space<vmem>>, vector<1x4x4xf32>
    %520 = vector.shape_cast %519 : vector<1x4x4xf32> to vector<4x4xf32>
    %cst_432 = arith.constant dense<0.000000e+00> : vector<4x128xf32>
    %521 = tpu.matmul %520, %505, %cst_432 {dimension_numbers = #tpu.dot_dimension_numbers<[1], [0], [0], [1], [0, 0, 1, 1], [], []>} : vector<4x4xf32>, vector<4x128xf32>, vector<4x128xf32> -> vector<4x128xf32>
    %c32 = arith.constant 32 : index
    %c0_433 = arith.constant 0 : index
    %c0_434 = arith.constant 0 : index
    %522 = vector.load %arg9[%c32, %c0_433, %c0_434] : memref<36x128x128xf32, #tpu.memory_space<vmem>>, vector<1x128x128xf32>
    %523 = vector.shape_cast %522 : vector<1x128x128xf32> to vector<128x128xf32>
    %cst_435 = arith.constant dense<0.000000e+00> : vector<4x128xf32>
    %524 = tpu.matmul %521, %523, %cst_435 {dimension_numbers = #tpu.dot_dimension_numbers<[1], [0], [0], [1], [0, 0, 1, 1], [], []>} : vector<4x128xf32>, vector<128x128xf32>, vector<4x128xf32> -> vector<4x128xf32>
    %525 = arith.addf %518, %524 : vector<4x128xf32>
    %c0_436 = arith.constant 0 : index
    %c0_437 = arith.constant 0 : index
    %526 = vector.load %arg18[%c0_436, %c0_437] : memref<128x128xf32, #tpu.memory_space<vmem>>, vector<128x128xf32>
    %cst_438 = arith.constant dense<0.000000e+00> : vector<128xf32>
    %527 = vector.multi_reduction <add>, %525, %cst_438 [0] : vector<4x128xf32> to vector<128xf32>
    %528 = vector.shape_cast %527 : vector<128xf32> to vector<1x128xf32>
    %cst_439 = arith.constant dense<0.000000e+00> : vector<1x128xf32>
    %529 = tpu.matmul %528, %526, %cst_439 {dimension_numbers = #tpu.dot_dimension_numbers<[1], [0], [0], [1], [0, 0, 1, 1], [], []>} : vector<1x128xf32>, vector<128x128xf32>, vector<1x128xf32> -> vector<1x128xf32>
    %530 = vector.broadcast %529 : vector<1x128xf32> to vector<4x128xf32>
    %531 = arith.subf %525, %530 : vector<4x128xf32>
    %532 = arith.mulf %531, %531 : vector<4x128xf32>
    %cst_440 = arith.constant dense<0.000000e+00> : vector<128xf32>
    %533 = vector.multi_reduction <add>, %532, %cst_440 [0] : vector<4x128xf32> to vector<128xf32>
    %534 = vector.shape_cast %533 : vector<128xf32> to vector<1x128xf32>
    %cst_441 = arith.constant dense<0.000000e+00> : vector<1x128xf32>
    %535 = tpu.matmul %534, %526, %cst_441 {dimension_numbers = #tpu.dot_dimension_numbers<[1], [0], [0], [1], [0, 0, 1, 1], [], []>} : vector<1x128xf32>, vector<128x128xf32>, vector<1x128xf32> -> vector<1x128xf32>
    %cst_442 = arith.constant 9.99999974E-6 : f32
    %536 = vector.broadcast %cst_442 : f32 to vector<1x128xf32>
    %537 = arith.addf %535, %536 : vector<1x128xf32>
    %538 = math.rsqrt %537 : vector<1x128xf32>
    %539 = vector.broadcast %538 : vector<1x128xf32> to vector<4x128xf32>
    %540 = arith.mulf %531, %539 : vector<4x128xf32>
    %cst_443 = arith.constant 0.000000e+00 : f32
    %541 = vector.broadcast %cst_443 : f32 to vector<4x128xf32>
    %542 = arith.maximumf %540, %541 : vector<4x128xf32>
    %c0_444 = arith.constant 0 : index
    %c0_445 = arith.constant 0 : index
    %c0_446 = arith.constant 0 : index
    %543 = vector.load %arg8[%c0_444, %c0_445, %c0_446] : memref<3x4x4xf32, #tpu.memory_space<vmem>>, vector<1x4x4xf32>
    %544 = vector.shape_cast %543 : vector<1x4x4xf32> to vector<4x4xf32>
    %cst_447 = arith.constant dense<0.000000e+00> : vector<4x128xf32>
    %545 = tpu.matmul %544, %542, %cst_447 {dimension_numbers = #tpu.dot_dimension_numbers<[1], [0], [0], [1], [0, 0, 1, 1], [], []>} : vector<4x4xf32>, vector<4x128xf32>, vector<4x128xf32> -> vector<4x128xf32>
    %c33 = arith.constant 33 : index
    %c0_448 = arith.constant 0 : index
    %c0_449 = arith.constant 0 : index
    %546 = vector.load %arg9[%c33, %c0_448, %c0_449] : memref<36x128x128xf32, #tpu.memory_space<vmem>>, vector<1x128x128xf32>
    %547 = vector.shape_cast %546 : vector<1x128x128xf32> to vector<128x128xf32>
    %cst_450 = arith.constant dense<0.000000e+00> : vector<4x128xf32>
    %548 = tpu.matmul %545, %547, %cst_450 {dimension_numbers = #tpu.dot_dimension_numbers<[1], [0], [0], [1], [0, 0, 1, 1], [], []>} : vector<4x128xf32>, vector<128x128xf32>, vector<4x128xf32> -> vector<4x128xf32>
    %c1_451 = arith.constant 1 : index
    %c0_452 = arith.constant 0 : index
    %c0_453 = arith.constant 0 : index
    %549 = vector.load %arg8[%c1_451, %c0_452, %c0_453] : memref<3x4x4xf32, #tpu.memory_space<vmem>>, vector<1x4x4xf32>
    %550 = vector.shape_cast %549 : vector<1x4x4xf32> to vector<4x4xf32>
    %cst_454 = arith.constant dense<0.000000e+00> : vector<4x128xf32>
    %551 = tpu.matmul %550, %542, %cst_454 {dimension_numbers = #tpu.dot_dimension_numbers<[1], [0], [0], [1], [0, 0, 1, 1], [], []>} : vector<4x4xf32>, vector<4x128xf32>, vector<4x128xf32> -> vector<4x128xf32>
    %c34 = arith.constant 34 : index
    %c0_455 = arith.constant 0 : index
    %c0_456 = arith.constant 0 : index
    %552 = vector.load %arg9[%c34, %c0_455, %c0_456] : memref<36x128x128xf32, #tpu.memory_space<vmem>>, vector<1x128x128xf32>
    %553 = vector.shape_cast %552 : vector<1x128x128xf32> to vector<128x128xf32>
    %cst_457 = arith.constant dense<0.000000e+00> : vector<4x128xf32>
    %554 = tpu.matmul %551, %553, %cst_457 {dimension_numbers = #tpu.dot_dimension_numbers<[1], [0], [0], [1], [0, 0, 1, 1], [], []>} : vector<4x128xf32>, vector<128x128xf32>, vector<4x128xf32> -> vector<4x128xf32>
    %555 = arith.addf %548, %554 : vector<4x128xf32>
    %c2_458 = arith.constant 2 : index
    %c0_459 = arith.constant 0 : index
    %c0_460 = arith.constant 0 : index
    %556 = vector.load %arg8[%c2_458, %c0_459, %c0_460] : memref<3x4x4xf32, #tpu.memory_space<vmem>>, vector<1x4x4xf32>
    %557 = vector.shape_cast %556 : vector<1x4x4xf32> to vector<4x4xf32>
    %cst_461 = arith.constant dense<0.000000e+00> : vector<4x128xf32>
    %558 = tpu.matmul %557, %542, %cst_461 {dimension_numbers = #tpu.dot_dimension_numbers<[1], [0], [0], [1], [0, 0, 1, 1], [], []>} : vector<4x4xf32>, vector<4x128xf32>, vector<4x128xf32> -> vector<4x128xf32>
    %c35 = arith.constant 35 : index
    %c0_462 = arith.constant 0 : index
    %c0_463 = arith.constant 0 : index
    %559 = vector.load %arg9[%c35, %c0_462, %c0_463] : memref<36x128x128xf32, #tpu.memory_space<vmem>>, vector<1x128x128xf32>
    %560 = vector.shape_cast %559 : vector<1x128x128xf32> to vector<128x128xf32>
    %cst_464 = arith.constant dense<0.000000e+00> : vector<4x128xf32>
    %561 = tpu.matmul %558, %560, %cst_464 {dimension_numbers = #tpu.dot_dimension_numbers<[1], [0], [0], [1], [0, 0, 1, 1], [], []>} : vector<4x128xf32>, vector<128x128xf32>, vector<4x128xf32> -> vector<4x128xf32>
    %562 = arith.addf %555, %561 : vector<4x128xf32>
    %c0_465 = arith.constant 0 : index
    %c0_466 = arith.constant 0 : index
    %563 = vector.load %arg18[%c0_465, %c0_466] : memref<128x128xf32, #tpu.memory_space<vmem>>, vector<128x128xf32>
    %cst_467 = arith.constant dense<0.000000e+00> : vector<128xf32>
    %564 = vector.multi_reduction <add>, %562, %cst_467 [0] : vector<4x128xf32> to vector<128xf32>
    %565 = vector.shape_cast %564 : vector<128xf32> to vector<1x128xf32>
    %cst_468 = arith.constant dense<0.000000e+00> : vector<1x128xf32>
    %566 = tpu.matmul %565, %563, %cst_468 {dimension_numbers = #tpu.dot_dimension_numbers<[1], [0], [0], [1], [0, 0, 1, 1], [], []>} : vector<1x128xf32>, vector<128x128xf32>, vector<1x128xf32> -> vector<1x128xf32>
    %567 = vector.broadcast %566 : vector<1x128xf32> to vector<4x128xf32>
    %568 = arith.subf %562, %567 : vector<4x128xf32>
    %569 = arith.mulf %568, %568 : vector<4x128xf32>
    %cst_469 = arith.constant dense<0.000000e+00> : vector<128xf32>
    %570 = vector.multi_reduction <add>, %569, %cst_469 [0] : vector<4x128xf32> to vector<128xf32>
    %571 = vector.shape_cast %570 : vector<128xf32> to vector<1x128xf32>
    %cst_470 = arith.constant dense<0.000000e+00> : vector<1x128xf32>
    %572 = tpu.matmul %571, %563, %cst_470 {dimension_numbers = #tpu.dot_dimension_numbers<[1], [0], [0], [1], [0, 0, 1, 1], [], []>} : vector<1x128xf32>, vector<128x128xf32>, vector<1x128xf32> -> vector<1x128xf32>
    %cst_471 = arith.constant 9.99999974E-6 : f32
    %573 = vector.broadcast %cst_471 : f32 to vector<1x128xf32>
    %574 = arith.addf %572, %573 : vector<1x128xf32>
    %575 = math.rsqrt %574 : vector<1x128xf32>
    %576 = vector.broadcast %575 : vector<1x128xf32> to vector<4x128xf32>
    %577 = arith.mulf %568, %576 : vector<4x128xf32>
    %578 = arith.addf %505, %577 : vector<4x128xf32>
    %c0_472 = arith.constant 0 : index
    %c0_473 = arith.constant 0 : index
    %c0_474 = arith.constant 0 : index
    %579 = vector.load %arg10[%c0_472, %c0_473, %c0_474] : memref<3x8x4xf32, #tpu.memory_space<vmem>>, vector<1x8x4xf32>
    %580 = vector.shape_cast %579 : vector<1x8x4xf32> to vector<8x4xf32>
    %cst_475 = arith.constant dense<0.000000e+00> : vector<8x128xf32>
    %581 = tpu.matmul %580, %578, %cst_475 {dimension_numbers = #tpu.dot_dimension_numbers<[1], [0], [0], [1], [0, 0, 1, 1], [], []>} : vector<8x4xf32>, vector<4x128xf32>, vector<8x128xf32> -> vector<8x128xf32>
    %c0_476 = arith.constant 0 : index
    %c0_477 = arith.constant 0 : index
    %c0_478 = arith.constant 0 : index
    %582 = vector.load %arg11[%c0_476, %c0_477, %c0_478] : memref<3x128x128xf32, #tpu.memory_space<vmem>>, vector<1x128x128xf32>
    %583 = vector.shape_cast %582 : vector<1x128x128xf32> to vector<128x128xf32>
    %cst_479 = arith.constant dense<0.000000e+00> : vector<8x128xf32>
    %584 = tpu.matmul %581, %583, %cst_479 {dimension_numbers = #tpu.dot_dimension_numbers<[1], [0], [0], [1], [0, 0, 1, 1], [], []>} : vector<8x128xf32>, vector<128x128xf32>, vector<8x128xf32> -> vector<8x128xf32>
    %c1_480 = arith.constant 1 : index
    %c0_481 = arith.constant 0 : index
    %c0_482 = arith.constant 0 : index
    %585 = vector.load %arg10[%c1_480, %c0_481, %c0_482] : memref<3x8x4xf32, #tpu.memory_space<vmem>>, vector<1x8x4xf32>
    %586 = vector.shape_cast %585 : vector<1x8x4xf32> to vector<8x4xf32>
    %cst_483 = arith.constant dense<0.000000e+00> : vector<8x128xf32>
    %587 = tpu.matmul %586, %578, %cst_483 {dimension_numbers = #tpu.dot_dimension_numbers<[1], [0], [0], [1], [0, 0, 1, 1], [], []>} : vector<8x4xf32>, vector<4x128xf32>, vector<8x128xf32> -> vector<8x128xf32>
    %c1_484 = arith.constant 1 : index
    %c0_485 = arith.constant 0 : index
    %c0_486 = arith.constant 0 : index
    %588 = vector.load %arg11[%c1_484, %c0_485, %c0_486] : memref<3x128x128xf32, #tpu.memory_space<vmem>>, vector<1x128x128xf32>
    %589 = vector.shape_cast %588 : vector<1x128x128xf32> to vector<128x128xf32>
    %cst_487 = arith.constant dense<0.000000e+00> : vector<8x128xf32>
    %590 = tpu.matmul %587, %589, %cst_487 {dimension_numbers = #tpu.dot_dimension_numbers<[1], [0], [0], [1], [0, 0, 1, 1], [], []>} : vector<8x128xf32>, vector<128x128xf32>, vector<8x128xf32> -> vector<8x128xf32>
    %591 = arith.addf %584, %590 : vector<8x128xf32>
    %c2_488 = arith.constant 2 : index
    %c0_489 = arith.constant 0 : index
    %c0_490 = arith.constant 0 : index
    %592 = vector.load %arg10[%c2_488, %c0_489, %c0_490] : memref<3x8x4xf32, #tpu.memory_space<vmem>>, vector<1x8x4xf32>
    %593 = vector.shape_cast %592 : vector<1x8x4xf32> to vector<8x4xf32>
    %cst_491 = arith.constant dense<0.000000e+00> : vector<8x128xf32>
    %594 = tpu.matmul %593, %578, %cst_491 {dimension_numbers = #tpu.dot_dimension_numbers<[1], [0], [0], [1], [0, 0, 1, 1], [], []>} : vector<8x4xf32>, vector<4x128xf32>, vector<8x128xf32> -> vector<8x128xf32>
    %c2_492 = arith.constant 2 : index
    %c0_493 = arith.constant 0 : index
    %c0_494 = arith.constant 0 : index
    %595 = vector.load %arg11[%c2_492, %c0_493, %c0_494] : memref<3x128x128xf32, #tpu.memory_space<vmem>>, vector<1x128x128xf32>
    %596 = vector.shape_cast %595 : vector<1x128x128xf32> to vector<128x128xf32>
    %cst_495 = arith.constant dense<0.000000e+00> : vector<8x128xf32>
    %597 = tpu.matmul %594, %596, %cst_495 {dimension_numbers = #tpu.dot_dimension_numbers<[1], [0], [0], [1], [0, 0, 1, 1], [], []>} : vector<8x128xf32>, vector<128x128xf32>, vector<8x128xf32> -> vector<8x128xf32>
    %598 = arith.addf %591, %597 : vector<8x128xf32>
    %c0_496 = arith.constant 0 : index
    %c0_497 = arith.constant 0 : index
    %599 = vector.load %arg17[%c0_496, %c0_497] : memref<128x128xf32, #tpu.memory_space<vmem>>, vector<128x128xf32>
    %cst_498 = arith.constant dense<0.000000e+00> : vector<128xf32>
    %600 = vector.multi_reduction <add>, %598, %cst_498 [0] : vector<8x128xf32> to vector<128xf32>
    %601 = vector.shape_cast %600 : vector<128xf32> to vector<1x128xf32>
    %cst_499 = arith.constant dense<0.000000e+00> : vector<1x128xf32>
    %602 = tpu.matmul %601, %599, %cst_499 {dimension_numbers = #tpu.dot_dimension_numbers<[1], [0], [0], [1], [0, 0, 1, 1], [], []>} : vector<1x128xf32>, vector<128x128xf32>, vector<1x128xf32> -> vector<1x128xf32>
    %603 = vector.broadcast %602 : vector<1x128xf32> to vector<8x128xf32>
    %604 = arith.subf %598, %603 : vector<8x128xf32>
    %605 = arith.mulf %604, %604 : vector<8x128xf32>
    %cst_500 = arith.constant dense<0.000000e+00> : vector<128xf32>
    %606 = vector.multi_reduction <add>, %605, %cst_500 [0] : vector<8x128xf32> to vector<128xf32>
    %607 = vector.shape_cast %606 : vector<128xf32> to vector<1x128xf32>
    %cst_501 = arith.constant dense<0.000000e+00> : vector<1x128xf32>
    %608 = tpu.matmul %607, %599, %cst_501 {dimension_numbers = #tpu.dot_dimension_numbers<[1], [0], [0], [1], [0, 0, 1, 1], [], []>} : vector<1x128xf32>, vector<128x128xf32>, vector<1x128xf32> -> vector<1x128xf32>
    %cst_502 = arith.constant 9.99999974E-6 : f32
    %609 = vector.broadcast %cst_502 : f32 to vector<1x128xf32>
    %610 = arith.addf %608, %609 : vector<1x128xf32>
    %611 = math.rsqrt %610 : vector<1x128xf32>
    %612 = vector.broadcast %611 : vector<1x128xf32> to vector<8x128xf32>
    %613 = arith.mulf %604, %612 : vector<8x128xf32>
    %cst_503 = arith.constant 0.000000e+00 : f32
    %614 = vector.broadcast %cst_503 : f32 to vector<8x128xf32>
    %615 = arith.maximumf %613, %614 : vector<8x128xf32>
    %c0_504 = arith.constant 0 : index
    %c0_505 = arith.constant 0 : index
    %c0_506 = arith.constant 0 : index
    %616 = vector.load %arg12[%c0_504, %c0_505, %c0_506] : memref<3x16x8xf32, #tpu.memory_space<vmem>>, vector<1x16x8xf32>
    %617 = vector.shape_cast %616 : vector<1x16x8xf32> to vector<16x8xf32>
    %cst_507 = arith.constant dense<0.000000e+00> : vector<16x128xf32>
    %618 = tpu.matmul %617, %615, %cst_507 {dimension_numbers = #tpu.dot_dimension_numbers<[1], [0], [0], [1], [0, 0, 1, 1], [], []>} : vector<16x8xf32>, vector<8x128xf32>, vector<16x128xf32> -> vector<16x128xf32>
    %c0_508 = arith.constant 0 : index
    %c0_509 = arith.constant 0 : index
    %c0_510 = arith.constant 0 : index
    %619 = vector.load %arg13[%c0_508, %c0_509, %c0_510] : memref<3x128x128xf32, #tpu.memory_space<vmem>>, vector<1x128x128xf32>
    %620 = vector.shape_cast %619 : vector<1x128x128xf32> to vector<128x128xf32>
    %cst_511 = arith.constant dense<0.000000e+00> : vector<16x128xf32>
    %621 = tpu.matmul %618, %620, %cst_511 {dimension_numbers = #tpu.dot_dimension_numbers<[1], [0], [0], [1], [0, 0, 1, 1], [], []>} : vector<16x128xf32>, vector<128x128xf32>, vector<16x128xf32> -> vector<16x128xf32>
    %c1_512 = arith.constant 1 : index
    %c0_513 = arith.constant 0 : index
    %c0_514 = arith.constant 0 : index
    %622 = vector.load %arg12[%c1_512, %c0_513, %c0_514] : memref<3x16x8xf32, #tpu.memory_space<vmem>>, vector<1x16x8xf32>
    %623 = vector.shape_cast %622 : vector<1x16x8xf32> to vector<16x8xf32>
    %cst_515 = arith.constant dense<0.000000e+00> : vector<16x128xf32>
    %624 = tpu.matmul %623, %615, %cst_515 {dimension_numbers = #tpu.dot_dimension_numbers<[1], [0], [0], [1], [0, 0, 1, 1], [], []>} : vector<16x8xf32>, vector<8x128xf32>, vector<16x128xf32> -> vector<16x128xf32>
    %c1_516 = arith.constant 1 : index
    %c0_517 = arith.constant 0 : index
    %c0_518 = arith.constant 0 : index
    %625 = vector.load %arg13[%c1_516, %c0_517, %c0_518] : memref<3x128x128xf32, #tpu.memory_space<vmem>>, vector<1x128x128xf32>
    %626 = vector.shape_cast %625 : vector<1x128x128xf32> to vector<128x128xf32>
    %cst_519 = arith.constant dense<0.000000e+00> : vector<16x128xf32>
    %627 = tpu.matmul %624, %626, %cst_519 {dimension_numbers = #tpu.dot_dimension_numbers<[1], [0], [0], [1], [0, 0, 1, 1], [], []>} : vector<16x128xf32>, vector<128x128xf32>, vector<16x128xf32> -> vector<16x128xf32>
    %628 = arith.addf %621, %627 : vector<16x128xf32>
    %c2_520 = arith.constant 2 : index
    %c0_521 = arith.constant 0 : index
    %c0_522 = arith.constant 0 : index
    %629 = vector.load %arg12[%c2_520, %c0_521, %c0_522] : memref<3x16x8xf32, #tpu.memory_space<vmem>>, vector<1x16x8xf32>
    %630 = vector.shape_cast %629 : vector<1x16x8xf32> to vector<16x8xf32>
    %cst_523 = arith.constant dense<0.000000e+00> : vector<16x128xf32>
    %631 = tpu.matmul %630, %615, %cst_523 {dimension_numbers = #tpu.dot_dimension_numbers<[1], [0], [0], [1], [0, 0, 1, 1], [], []>} : vector<16x8xf32>, vector<8x128xf32>, vector<16x128xf32> -> vector<16x128xf32>
    %c2_524 = arith.constant 2 : index
    %c0_525 = arith.constant 0 : index
    %c0_526 = arith.constant 0 : index
    %632 = vector.load %arg13[%c2_524, %c0_525, %c0_526] : memref<3x128x128xf32, #tpu.memory_space<vmem>>, vector<1x128x128xf32>
    %633 = vector.shape_cast %632 : vector<1x128x128xf32> to vector<128x128xf32>
    %cst_527 = arith.constant dense<0.000000e+00> : vector<16x128xf32>
    %634 = tpu.matmul %631, %633, %cst_527 {dimension_numbers = #tpu.dot_dimension_numbers<[1], [0], [0], [1], [0, 0, 1, 1], [], []>} : vector<16x128xf32>, vector<128x128xf32>, vector<16x128xf32> -> vector<16x128xf32>
    %635 = arith.addf %628, %634 : vector<16x128xf32>
    %c0_528 = arith.constant 0 : index
    %c0_529 = arith.constant 0 : index
    %636 = vector.load %arg16[%c0_528, %c0_529] : memref<128x128xf32, #tpu.memory_space<vmem>>, vector<128x128xf32>
    %cst_530 = arith.constant dense<0.000000e+00> : vector<128xf32>
    %637 = vector.multi_reduction <add>, %635, %cst_530 [0] : vector<16x128xf32> to vector<128xf32>
    %638 = vector.shape_cast %637 : vector<128xf32> to vector<1x128xf32>
    %cst_531 = arith.constant dense<0.000000e+00> : vector<1x128xf32>
    %639 = tpu.matmul %638, %636, %cst_531 {dimension_numbers = #tpu.dot_dimension_numbers<[1], [0], [0], [1], [0, 0, 1, 1], [], []>} : vector<1x128xf32>, vector<128x128xf32>, vector<1x128xf32> -> vector<1x128xf32>
    %640 = vector.broadcast %639 : vector<1x128xf32> to vector<16x128xf32>
    %641 = arith.subf %635, %640 : vector<16x128xf32>
    %642 = arith.mulf %641, %641 : vector<16x128xf32>
    %cst_532 = arith.constant dense<0.000000e+00> : vector<128xf32>
    %643 = vector.multi_reduction <add>, %642, %cst_532 [0] : vector<16x128xf32> to vector<128xf32>
    %644 = vector.shape_cast %643 : vector<128xf32> to vector<1x128xf32>
    %cst_533 = arith.constant dense<0.000000e+00> : vector<1x128xf32>
    %645 = tpu.matmul %644, %636, %cst_533 {dimension_numbers = #tpu.dot_dimension_numbers<[1], [0], [0], [1], [0, 0, 1, 1], [], []>} : vector<1x128xf32>, vector<128x128xf32>, vector<1x128xf32> -> vector<1x128xf32>
    %cst_534 = arith.constant 9.99999974E-6 : f32
    %646 = vector.broadcast %cst_534 : f32 to vector<1x128xf32>
    %647 = arith.addf %645, %646 : vector<1x128xf32>
    %648 = math.rsqrt %647 : vector<1x128xf32>
    %649 = vector.broadcast %648 : vector<1x128xf32> to vector<16x128xf32>
    %650 = arith.mulf %641, %649 : vector<16x128xf32>
    %cst_535 = arith.constant 0.000000e+00 : f32
    %651 = vector.broadcast %cst_535 : f32 to vector<16x128xf32>
    %652 = arith.maximumf %650, %651 : vector<16x128xf32>
    %c0_536 = arith.constant 0 : index
    %c0_537 = arith.constant 0 : index
    %c0_538 = arith.constant 0 : index
    %653 = vector.load %arg14[%c0_536, %c0_537, %c0_538] : memref<7x16x16xf32, #tpu.memory_space<vmem>>, vector<1x16x16xf32>
    %654 = vector.shape_cast %653 : vector<1x16x16xf32> to vector<16x16xf32>
    %cst_539 = arith.constant dense<0.000000e+00> : vector<16x128xf32>
    %655 = tpu.matmul %654, %652, %cst_539 {dimension_numbers = #tpu.dot_dimension_numbers<[1], [0], [0], [1], [0, 0, 1, 1], [], []>} : vector<16x16xf32>, vector<16x128xf32>, vector<16x128xf32> -> vector<16x128xf32>
    %c0_540 = arith.constant 0 : index
    %c0_541 = arith.constant 0 : index
    %c0_542 = arith.constant 0 : index
    %656 = vector.load %arg15[%c0_540, %c0_541, %c0_542] : memref<7x128x48xf32, #tpu.memory_space<vmem>>, vector<1x128x48xf32>
    %657 = vector.shape_cast %656 : vector<1x128x48xf32> to vector<128x48xf32>
    %cst_543 = arith.constant dense<0.000000e+00> : vector<16x48xf32>
    %658 = tpu.matmul %655, %657, %cst_543 {dimension_numbers = #tpu.dot_dimension_numbers<[1], [0], [0], [1], [0, 0, 1, 1], [], []>} : vector<16x128xf32>, vector<128x48xf32>, vector<16x48xf32> -> vector<16x48xf32>
    %c1_544 = arith.constant 1 : index
    %c0_545 = arith.constant 0 : index
    %c0_546 = arith.constant 0 : index
    %659 = vector.load %arg14[%c1_544, %c0_545, %c0_546] : memref<7x16x16xf32, #tpu.memory_space<vmem>>, vector<1x16x16xf32>
    %660 = vector.shape_cast %659 : vector<1x16x16xf32> to vector<16x16xf32>
    %cst_547 = arith.constant dense<0.000000e+00> : vector<16x128xf32>
    %661 = tpu.matmul %660, %652, %cst_547 {dimension_numbers = #tpu.dot_dimension_numbers<[1], [0], [0], [1], [0, 0, 1, 1], [], []>} : vector<16x16xf32>, vector<16x128xf32>, vector<16x128xf32> -> vector<16x128xf32>
    %c1_548 = arith.constant 1 : index
    %c0_549 = arith.constant 0 : index
    %c0_550 = arith.constant 0 : index
    %662 = vector.load %arg15[%c1_548, %c0_549, %c0_550] : memref<7x128x48xf32, #tpu.memory_space<vmem>>, vector<1x128x48xf32>
    %663 = vector.shape_cast %662 : vector<1x128x48xf32> to vector<128x48xf32>
    %cst_551 = arith.constant dense<0.000000e+00> : vector<16x48xf32>
    %664 = tpu.matmul %661, %663, %cst_551 {dimension_numbers = #tpu.dot_dimension_numbers<[1], [0], [0], [1], [0, 0, 1, 1], [], []>} : vector<16x128xf32>, vector<128x48xf32>, vector<16x48xf32> -> vector<16x48xf32>
    %665 = arith.addf %658, %664 : vector<16x48xf32>
    %c2_552 = arith.constant 2 : index
    %c0_553 = arith.constant 0 : index
    %c0_554 = arith.constant 0 : index
    %666 = vector.load %arg14[%c2_552, %c0_553, %c0_554] : memref<7x16x16xf32, #tpu.memory_space<vmem>>, vector<1x16x16xf32>
    %667 = vector.shape_cast %666 : vector<1x16x16xf32> to vector<16x16xf32>
    %cst_555 = arith.constant dense<0.000000e+00> : vector<16x128xf32>
    %668 = tpu.matmul %667, %652, %cst_555 {dimension_numbers = #tpu.dot_dimension_numbers<[1], [0], [0], [1], [0, 0, 1, 1], [], []>} : vector<16x16xf32>, vector<16x128xf32>, vector<16x128xf32> -> vector<16x128xf32>
    %c2_556 = arith.constant 2 : index
    %c0_557 = arith.constant 0 : index
    %c0_558 = arith.constant 0 : index
    %669 = vector.load %arg15[%c2_556, %c0_557, %c0_558] : memref<7x128x48xf32, #tpu.memory_space<vmem>>, vector<1x128x48xf32>
    %670 = vector.shape_cast %669 : vector<1x128x48xf32> to vector<128x48xf32>
    %cst_559 = arith.constant dense<0.000000e+00> : vector<16x48xf32>
    %671 = tpu.matmul %668, %670, %cst_559 {dimension_numbers = #tpu.dot_dimension_numbers<[1], [0], [0], [1], [0, 0, 1, 1], [], []>} : vector<16x128xf32>, vector<128x48xf32>, vector<16x48xf32> -> vector<16x48xf32>
    %672 = arith.addf %665, %671 : vector<16x48xf32>
    %c3_560 = arith.constant 3 : index
    %c0_561 = arith.constant 0 : index
    %c0_562 = arith.constant 0 : index
    %673 = vector.load %arg14[%c3_560, %c0_561, %c0_562] : memref<7x16x16xf32, #tpu.memory_space<vmem>>, vector<1x16x16xf32>
    %674 = vector.shape_cast %673 : vector<1x16x16xf32> to vector<16x16xf32>
    %cst_563 = arith.constant dense<0.000000e+00> : vector<16x128xf32>
    %675 = tpu.matmul %674, %652, %cst_563 {dimension_numbers = #tpu.dot_dimension_numbers<[1], [0], [0], [1], [0, 0, 1, 1], [], []>} : vector<16x16xf32>, vector<16x128xf32>, vector<16x128xf32> -> vector<16x128xf32>
    %c3_564 = arith.constant 3 : index
    %c0_565 = arith.constant 0 : index
    %c0_566 = arith.constant 0 : index
    %676 = vector.load %arg15[%c3_564, %c0_565, %c0_566] : memref<7x128x48xf32, #tpu.memory_space<vmem>>, vector<1x128x48xf32>
    %677 = vector.shape_cast %676 : vector<1x128x48xf32> to vector<128x48xf32>
    %cst_567 = arith.constant dense<0.000000e+00> : vector<16x48xf32>
    %678 = tpu.matmul %675, %677, %cst_567 {dimension_numbers = #tpu.dot_dimension_numbers<[1], [0], [0], [1], [0, 0, 1, 1], [], []>} : vector<16x128xf32>, vector<128x48xf32>, vector<16x48xf32> -> vector<16x48xf32>
    %679 = arith.addf %672, %678 : vector<16x48xf32>
    %c4_568 = arith.constant 4 : index
    %c0_569 = arith.constant 0 : index
    %c0_570 = arith.constant 0 : index
    %680 = vector.load %arg14[%c4_568, %c0_569, %c0_570] : memref<7x16x16xf32, #tpu.memory_space<vmem>>, vector<1x16x16xf32>
    %681 = vector.shape_cast %680 : vector<1x16x16xf32> to vector<16x16xf32>
    %cst_571 = arith.constant dense<0.000000e+00> : vector<16x128xf32>
    %682 = tpu.matmul %681, %652, %cst_571 {dimension_numbers = #tpu.dot_dimension_numbers<[1], [0], [0], [1], [0, 0, 1, 1], [], []>} : vector<16x16xf32>, vector<16x128xf32>, vector<16x128xf32> -> vector<16x128xf32>
    %c4_572 = arith.constant 4 : index
    %c0_573 = arith.constant 0 : index
    %c0_574 = arith.constant 0 : index
    %683 = vector.load %arg15[%c4_572, %c0_573, %c0_574] : memref<7x128x48xf32, #tpu.memory_space<vmem>>, vector<1x128x48xf32>
    %684 = vector.shape_cast %683 : vector<1x128x48xf32> to vector<128x48xf32>
    %cst_575 = arith.constant dense<0.000000e+00> : vector<16x48xf32>
    %685 = tpu.matmul %682, %684, %cst_575 {dimension_numbers = #tpu.dot_dimension_numbers<[1], [0], [0], [1], [0, 0, 1, 1], [], []>} : vector<16x128xf32>, vector<128x48xf32>, vector<16x48xf32> -> vector<16x48xf32>
    %686 = arith.addf %679, %685 : vector<16x48xf32>
    %c5_576 = arith.constant 5 : index
    %c0_577 = arith.constant 0 : index
    %c0_578 = arith.constant 0 : index
    %687 = vector.load %arg14[%c5_576, %c0_577, %c0_578] : memref<7x16x16xf32, #tpu.memory_space<vmem>>, vector<1x16x16xf32>
    %688 = vector.shape_cast %687 : vector<1x16x16xf32> to vector<16x16xf32>
    %cst_579 = arith.constant dense<0.000000e+00> : vector<16x128xf32>
    %689 = tpu.matmul %688, %652, %cst_579 {dimension_numbers = #tpu.dot_dimension_numbers<[1], [0], [0], [1], [0, 0, 1, 1], [], []>} : vector<16x16xf32>, vector<16x128xf32>, vector<16x128xf32> -> vector<16x128xf32>
    %c5_580 = arith.constant 5 : index
    %c0_581 = arith.constant 0 : index
    %c0_582 = arith.constant 0 : index
    %690 = vector.load %arg15[%c5_580, %c0_581, %c0_582] : memref<7x128x48xf32, #tpu.memory_space<vmem>>, vector<1x128x48xf32>
    %691 = vector.shape_cast %690 : vector<1x128x48xf32> to vector<128x48xf32>
    %cst_583 = arith.constant dense<0.000000e+00> : vector<16x48xf32>
    %692 = tpu.matmul %689, %691, %cst_583 {dimension_numbers = #tpu.dot_dimension_numbers<[1], [0], [0], [1], [0, 0, 1, 1], [], []>} : vector<16x128xf32>, vector<128x48xf32>, vector<16x48xf32> -> vector<16x48xf32>
    %693 = arith.addf %686, %692 : vector<16x48xf32>
    %c6_584 = arith.constant 6 : index
    %c0_585 = arith.constant 0 : index
    %c0_586 = arith.constant 0 : index
    %694 = vector.load %arg14[%c6_584, %c0_585, %c0_586] : memref<7x16x16xf32, #tpu.memory_space<vmem>>, vector<1x16x16xf32>
    %695 = vector.shape_cast %694 : vector<1x16x16xf32> to vector<16x16xf32>
    %cst_587 = arith.constant dense<0.000000e+00> : vector<16x128xf32>
    %696 = tpu.matmul %695, %652, %cst_587 {dimension_numbers = #tpu.dot_dimension_numbers<[1], [0], [0], [1], [0, 0, 1, 1], [], []>} : vector<16x16xf32>, vector<16x128xf32>, vector<16x128xf32> -> vector<16x128xf32>
    %c6_588 = arith.constant 6 : index
    %c0_589 = arith.constant 0 : index
    %c0_590 = arith.constant 0 : index
    %697 = vector.load %arg15[%c6_588, %c0_589, %c0_590] : memref<7x128x48xf32, #tpu.memory_space<vmem>>, vector<1x128x48xf32>
    %698 = vector.shape_cast %697 : vector<1x128x48xf32> to vector<128x48xf32>
    %cst_591 = arith.constant dense<0.000000e+00> : vector<16x48xf32>
    %699 = tpu.matmul %696, %698, %cst_591 {dimension_numbers = #tpu.dot_dimension_numbers<[1], [0], [0], [1], [0, 0, 1, 1], [], []>} : vector<16x128xf32>, vector<128x48xf32>, vector<16x48xf32> -> vector<16x48xf32>
    %700 = arith.addf %693, %699 : vector<16x48xf32>
    %c0_592 = arith.constant 0 : index
    %c0_593 = arith.constant 0 : index
    %701 = vector.load %arg19[%c0_592, %c0_593] : memref<1x48xf32, #tpu.memory_space<vmem>>, vector<1x48xf32>
    %702 = vector.broadcast %701 : vector<1x48xf32> to vector<16x48xf32>
    %703 = arith.addf %700, %702 : vector<16x48xf32>
    %704 = math.tanh %703 : vector<16x48xf32>
    %c0_594 = arith.constant 0 : index
    %c0_595 = arith.constant 0 : index
    %c0_596 = arith.constant 0 : index
    %705 = vector.load %arg20[%c0_594, %c0_595, %c0_596] : memref<1x16x48xf32, #tpu.memory_space<vmem>>, vector<1x16x48xf32>
    %706 = vector.shape_cast %705 : vector<1x16x48xf32> to vector<16x48xf32>
    %707 = vector.shape_cast %704 : vector<16x48xf32> to vector<1x16x48xf32>
    tpu.vector_store %arg20[%c0_594, %c0_595, %c0_596], %707 {strides = array<i32>} : memref<1x16x48xf32, #tpu.memory_space<vmem>>, vector<1x16x48xf32>,
    return
  }
  func.func @transform_0(%arg0: i32) -> (i32, i32, i32) {
    %c0_i32 = arith.constant 0 : i32
    %c0_i32_0 = arith.constant 0 : i32
    %c0_i32_1 = arith.constant 0 : i32
    return %arg0, %c0_i32, %c0_i32_0 : i32, i32, i32
  }
  func.func @transform_1(%arg0: i32) -> (i32, i32, i32) {
    %c0_i32 = arith.constant 0 : i32
    %c0_i32_0 = arith.constant 0 : i32
    %c0_i32_1 = arith.constant 0 : i32
    %c0_i32_2 = arith.constant 0 : i32
    return %c0_i32, %c0_i32_0, %c0_i32_1 : i32, i32, i32
  }
  func.func @transform_2(%arg0: i32) -> (i32, i32, i32) {
    %c0_i32 = arith.constant 0 : i32
    %c0_i32_0 = arith.constant 0 : i32
    %c0_i32_1 = arith.constant 0 : i32
    %c0_i32_2 = arith.constant 0 : i32
    return %c0_i32, %c0_i32_0, %c0_i32_1 : i32, i32, i32
  }
  func.func @transform_3(%arg0: i32) -> (i32, i32, i32) {
    %c0_i32 = arith.constant 0 : i32
    %c0_i32_0 = arith.constant 0 : i32
    %c0_i32_1 = arith.constant 0 : i32
    %c0_i32_2 = arith.constant 0 : i32
    return %c0_i32, %c0_i32_0, %c0_i32_1 : i32, i32, i32
  }
  func.func @transform_4(%arg0: i32) -> (i32, i32, i32) {
    %c0_i32 = arith.constant 0 : i32
    %c0_i32_0 = arith.constant 0 : i32
    %c0_i32_1 = arith.constant 0 : i32
    %c0_i32_2 = arith.constant 0 : i32
    return %c0_i32, %c0_i32_0, %c0_i32_1 : i32, i32, i32
  }
  func.func @transform_5(%arg0: i32) -> (i32, i32, i32) {
    %c0_i32 = arith.constant 0 : i32
    %c0_i32_0 = arith.constant 0 : i32
    %c0_i32_1 = arith.constant 0 : i32
    %c0_i32_2 = arith.constant 0 : i32
    return %c0_i32, %c0_i32_0, %c0_i32_1 : i32, i32, i32
  }
  func.func @transform_6(%arg0: i32) -> (i32, i32, i32) {
    %c0_i32 = arith.constant 0 : i32
    %c0_i32_0 = arith.constant 0 : i32
    %c0_i32_1 = arith.constant 0 : i32
    %c0_i32_2 = arith.constant 0 : i32
    return %c0_i32, %c0_i32_0, %c0_i32_1 : i32, i32, i32
  }
  func.func @transform_7(%arg0: i32) -> (i32, i32, i32) {
    %c0_i32 = arith.constant 0 : i32
    %c0_i32_0 = arith.constant 0 : i32
    %c0_i32_1 = arith.constant 0 : i32
    %c0_i32_2 = arith.constant 0 : i32
    return %c0_i32, %c0_i32_0, %c0_i32_1 : i32, i32, i32
  }
  func.func @transform_8(%arg0: i32) -> (i32, i32, i32) {
    %c0_i32 = arith.constant 0 : i32
    %c0_i32_0 = arith.constant 0 : i32
    %c0_i32_1 = arith.constant 0 : i32
    %c0_i32_2 = arith.constant 0 : i32
    return %c0_i32, %c0_i32_0, %c0_i32_1 : i32, i32, i32
  }
  func.func @transform_9(%arg0: i32) -> (i32, i32, i32) {
    %c0_i32 = arith.constant 0 : i32
    %c0_i32_0 = arith.constant 0 : i32
    %c0_i32_1 = arith.constant 0 : i32
    %c0_i32_2 = arith.constant 0 : i32
    return %c0_i32, %c0_i32_0, %c0_i32_1 : i32, i32, i32
  }
  func.func @transform_10(%arg0: i32) -> (i32, i32, i32) {
    %c0_i32 = arith.constant 0 : i32
    %c0_i32_0 = arith.constant 0 : i32
    %c0_i32_1 = arith.constant 0 : i32
    %c0_i32_2 = arith.constant 0 : i32
    return %c0_i32, %c0_i32_0, %c0_i32_1 : i32, i32, i32
  }
  func.func @transform_11(%arg0: i32) -> (i32, i32, i32) {
    %c0_i32 = arith.constant 0 : i32
    %c0_i32_0 = arith.constant 0 : i32
    %c0_i32_1 = arith.constant 0 : i32
    %c0_i32_2 = arith.constant 0 : i32
    return %c0_i32, %c0_i32_0, %c0_i32_1 : i32, i32, i32
  }
  func.func @transform_12(%arg0: i32) -> (i32, i32, i32) {
    %c0_i32 = arith.constant 0 : i32
    %c0_i32_0 = arith.constant 0 : i32
    %c0_i32_1 = arith.constant 0 : i32
    %c0_i32_2 = arith.constant 0 : i32
    return %c0_i32, %c0_i32_0, %c0_i32_1 : i32, i32, i32
  }
  func.func @transform_13(%arg0: i32) -> (i32, i32, i32) {
    %c0_i32 = arith.constant 0 : i32
    %c0_i32_0 = arith.constant 0 : i32
    %c0_i32_1 = arith.constant 0 : i32
    %c0_i32_2 = arith.constant 0 : i32
    return %c0_i32, %c0_i32_0, %c0_i32_1 : i32, i32, i32
  }
  func.func @transform_14(%arg0: i32) -> (i32, i32, i32) {
    %c0_i32 = arith.constant 0 : i32
    %c0_i32_0 = arith.constant 0 : i32
    %c0_i32_1 = arith.constant 0 : i32
    %c0_i32_2 = arith.constant 0 : i32
    return %c0_i32, %c0_i32_0, %c0_i32_1 : i32, i32, i32
  }
  func.func @transform_15(%arg0: i32) -> (i32, i32) {
    %c0_i32 = arith.constant 0 : i32
    %c0_i32_0 = arith.constant 0 : i32
    %c0_i32_1 = arith.constant 0 : i32
    return %c0_i32, %c0_i32_0 : i32, i32
  }
  func.func @transform_16(%arg0: i32) -> (i32, i32) {
    %c0_i32 = arith.constant 0 : i32
    %c0_i32_0 = arith.constant 0 : i32
    %c0_i32_1 = arith.constant 0 : i32
    return %c0_i32, %c0_i32_0 : i32, i32
  }
  func.func @transform_17(%arg0: i32) -> (i32, i32) {
    %c0_i32 = arith.constant 0 : i32
    %c0_i32_0 = arith.constant 0 : i32
    %c0_i32_1 = arith.constant 0 : i32
    return %c0_i32, %c0_i32_0 : i32, i32
  }
  func.func @transform_18(%arg0: i32) -> (i32, i32) {
    %c0_i32 = arith.constant 0 : i32
    %c0_i32_0 = arith.constant 0 : i32
    %c0_i32_1 = arith.constant 0 : i32
    return %c0_i32, %c0_i32_0 : i32, i32
  }
  func.func @transform_19(%arg0: i32) -> (i32, i32, i32) {
    %c0_i32 = arith.constant 0 : i32
    %c0_i32_0 = arith.constant 0 : i32
    %c0_i32_1 = arith.constant 0 : i32
    return %arg0, %c0_i32, %c0_i32_0 : i32, i32, i32
  }
}

</mosaic_0001>

<bundles_post_ra>
// kernel: tile.8
= control target key start
LH: loop header
LB: loop body
LE: loop exit
PB: predicated region body
PF: predicated region fallthrough
CT: control target
= control target key end

     0   :  { %s28_s0 = inlined_call_operand.vmem [shape: f32[3], index: 0, kind: input, shape index: {}]   ;;  %s29_s1 = inlined_call_operand.vmem [shape: f32[16,3], index: 1, kind: output, shape index: {}]  }
   0x1   :  { %v4_v0 = vld [vmem:[%s28_s0] ss:$0 sm:$0xff] }
   0x2   :  { %5 = vst [vmem:[%s29_s1] sm:$0xff] %v4_v0  ;;  %8 = vst [vmem:[%s29_s1 + $0x8] sm:$0xff] %v4_v0 }

// kernel: tile.9
= control target key start
LH: loop header
LB: loop body
LE: loop exit
PB: predicated region body
PF: predicated region fallthrough
CT: control target
= control target key end

     0   :  { %s131_s10 = smov 45   ;;  %s132_s11 = smov 39   ;;  %vm3_vm0 = vcmask 23552   ;;  %vm9_vm1 = vcmask 392552   ;;  %vm15_vm2 = vcmask 367952   ;;  %vm21_vm3 = vcmask 343352   ;;  %s207_s0 = inlined_call_operand.vmem [shape: f32[16,3], index: 0, kind: input, shape index: {}]   ;;  %s208_s1 = inlined_call_operand.vmem [shape: f32[1,48], index: 1, kind: output, shape index: {}]  }
   0x1   :  { %v101_v0 = vld [vmem:[%s207_s0 + $0xf] sm:$0x1]   ;;  %v103_v1 = vld [vmem:[%s207_s0 + $0xd] sm:$0x1]   ;;  %v102_v2 = vld [vmem:[%s207_s0 + $0xe] sm:$0x1]  }
   0x2   :  { %7 = vrot.lane.b32.xlu0 %v101_v0, %s131_s10  ;;  %19 = vrot.lane.b32.xlu1 %v103_v1, %s132_s11  ;;  %v104_v3 = vld [vmem:[%s207_s0 + $0xc] sm:$0x1]   ;;  %s133_s16 = smov 42   ;;  %s134_s17 = smov 36   ;;  %v105_v4 = vld [vmem:[%s207_s0 + $0xb] sm:$0x1]  }
   0x3   :  { %v106_v5 = vld [vmem:[%s207_s0 + $0xa] sm:$0x1]   ;;  %v2_v6 = vld [vmem:[%s207_s0] sm:$0x1]   ;;  %s135_s24 = smov 33   ;;  %s136_s25 = smov 30  }
   0x4   :  { %4 = vst.msk [vmem:[#allocation0] sm:$0x1] %vm3_vm0, %v2_v6   ;;  %v107_v7 = vld [vmem:[%s207_s0 + $0x9] sm:$0x1]   ;;  %v108_v8 = vld [vmem:[%s207_s0 + $0x8] sm:$0x1]  }
   0x5   :  { %s137_s30 = smov 27   ;;  %s138_s2 = smov 24   ;;  %v109_v9 = vld [vmem:[%s207_s0 + $0x7] sm:$0x1]   ;;  %v110_v10 = vld [vmem:[%s207_s0 + $0x6] sm:$0x1]  }
   0x6   :  { %13 = vrot.lane.b32.xlu0 %v102_v2, %s133_s16  ;;  %25 = vrot.lane.b32.xlu1 %v104_v3, %s134_s17  ;;  %s139_s7 = smov 21   ;;  %s140_s8 = smov 18   ;;  %v111_v11 = vld [vmem:[%s207_s0 + $0x5] sm:$0x1]   ;;  %v112_v12 = vld [vmem:[%s207_s0 + $0x4] sm:$0x1]  }
   0x7   :  { %s141_s13 = smov 15   ;;  %s142_s14 = smov 12   ;;  %v113_v13 = vld [vmem:[%s207_s0 + $0x3] sm:$0x1]   ;;  %v114_v14 = vld [vmem:[%s207_s0 + $0x2] sm:$0x1]  }
   0x8   :  { %s143_s19 = smov 9   ;;  %s144_s20 = smov 6   ;;  %v115_v15 = vld [vmem:[%s207_s0 + $0x1] sm:$0x1]   ;;  %vm27_vm4 = vcmask 318752   ;;  %vm33_vm5 = vcmask 294152  }
   0x9   :  { %s145_s0 = smov 3   ;;  %vm39_vm6 = vcmask 269552   ;;  %vm45_vm7 = vcmask 244952   ;;  %vm51_vm8 = vcmask 220352   ;;  %vm57_vm9 = vcmask 195752  }
   0xa   :  { %31 = vrot.lane.b32.xlu0 %v105_v4, %s135_s24  ;;  %37 = vrot.lane.b32.xlu1 %v106_v5, %s136_s25  ;;  %vm63_vm10 = vcmask 171152   ;;  %vm69_vm11 = vcmask 146552   ;;  %vm75_vm12 = vcmask 121952   ;;  %vm81_vm13 = vcmask 97352  }
   0xb   :  { %vm87_vm14 = vcmask 72752   ;;  %vm93_vm15 = vcmask 48152  }
   0xe   :  { %43 = vrot.lane.b32.xlu0 %v107_v7, %s137_s30  ;;  %49 = vrot.lane.b32.xlu1 %v108_v8, %s138_s2 }
  0x12   :  { %55 = vrot.lane.b32.xlu0 %v109_v9, %s139_s7  ;;  %61 = vrot.lane.b32.xlu1 %v110_v10, %s140_s8 }
  0x16   :  { %67 = vrot.lane.b32.xlu0 %v111_v11, %s141_s13  ;;  %73 = vrot.lane.b32.xlu1 %v112_v12, %s142_s14 }
  0x1a   :  { %79 = vrot.lane.b32.xlu0 %v113_v13, %s143_s19  ;;  %85 = vrot.lane.b32.xlu1 %v114_v14, %s144_s20 }
  0x1e   :  { %91 = vrot.lane.b32.xlu0 %v115_v15, %s145_s0 }
  0x74   :  { %v8_v16 = vpop.permute.xlu0 %7   ;;  %v20_v17 = vpop.permute.xlu1 %19  }
  0x75   :  { %10 = vst.msk [vmem:[#allocation0] sm:$0x1] %vm9_vm1, %v8_v16  }
  0x78   :  { %v14_v18 = vpop.permute.xlu0 %13   ;;  %v26_v19 = vpop.permute.xlu1 %25  }
  0x79   :  { %16 = vst.msk [vmem:[#allocation0] sm:$0x1] %vm15_vm2, %v14_v18  }
  0x7a   :  { %22 = vst.msk [vmem:[#allocation0] sm:$0x1] %vm21_vm3, %v20_v17  }
  0x7b   :  { %28 = vst.msk [vmem:[#allocation0] sm:$0x1] %vm27_vm4, %v26_v19  }
  0x7c   :  { %v32_v20 = vpop.permute.xlu0 %31   ;;  %v38_v21 = vpop.permute.xlu1 %37  }
  0x7d   :  { %34 = vst.msk [vmem:[#allocation0] sm:$0x1] %vm33_vm5, %v32_v20  }
  0x7e   :  { %40 = vst.msk [vmem:[#allocation0] sm:$0x1] %vm39_vm6, %v38_v21  }
  0x80   :  { %v44_v22 = vpop.permute.xlu0 %43   ;;  %v50_v23 = vpop.permute.xlu1 %49  }
  0x81   :  { %46 = vst.msk [vmem:[#allocation0] sm:$0x1] %vm45_vm7, %v44_v22  }
  0x82   :  { %52 = vst.msk [vmem:[#allocation0] sm:$0x1] %vm51_vm8, %v50_v23  }
  0x84   :  { %v56_v24 = vpop.permute.xlu0 %55   ;;  %v62_v25 = vpop.permute.xlu1 %61  }
  0x85   :  { %58 = vst.msk [vmem:[#allocation0] sm:$0x1] %vm57_vm9, %v56_v24  }
  0x86   :  { %64 = vst.msk [vmem:[#allocation0] sm:$0x1] %vm63_vm10, %v62_v25  }
  0x88   :  { %v68_v26 = vpop.permute.xlu0 %67   ;;  %v74_v27 = vpop.permute.xlu1 %73  }
  0x89   :  { %70 = vst.msk [vmem:[#allocation0] sm:$0x1] %vm69_vm11, %v68_v26  }
  0x8a   :  { %76 = vst.msk [vmem:[#allocation0] sm:$0x1] %vm75_vm12, %v74_v27  }
  0x8c   :  { %v80_v28 = vpop.permute.xlu0 %79   ;;  %v86_v29 = vpop.permute.xlu1 %85  }
  0x8d   :  { %82 = vst.msk [vmem:[#allocation0] sm:$0x1] %vm81_vm13, %v80_v28  }
  0x8e   :  { %88 = vst.msk [vmem:[#allocation0] sm:$0x1] %vm87_vm14, %v86_v29  }
  0x90   :  { %v92_v30 = vpop.permute.xlu0 %91  }
  0x91   :  { %94 = vst.msk [vmem:[#allocation0] sm:$0x1] %vm93_vm15, %v92_v30  }
  0x98   :  { %v98_v31 = vld [vmem:[#allocation0] sm:$0x1] }
  0x99   :  { %100 = vst [vmem:[%s208_s1] sm:$0x1] %v98_v31 }

// kernel: resnet_forward.1
= control target key start
LH: loop header
LB: loop body
LE: loop exit
PB: predicated region body
PF: predicated region fallthrough
CT: control target
= control target key end

     0   :  { %s27367_s0 = inlined_call_operand.vmem [shape: f32[2,16,48], index: 0, kind: input, shape index: {}]   ;;  %s27368_s1 = inlined_call_operand.vmem [shape: f32[7,16,16], index: 1, kind: input, shape index: {}, may-alias: {1,13}]   ;;  %s27369_s2 = inlined_call_operand.vmem [shape: f32[7,48,128], index: 2, kind: input, shape index: {}]   ;;  %s27370_s3 = inlined_call_operand.vmem [shape: f32[3,8,16], index: 3, kind: input, shape index: {}]   ;;  %s27371_s4 = inlined_call_operand.vmem [shape: f32[3,128,128], index: 4, kind: input, shape index: {}]   ;;  %s27372_s5 = inlined_call_operand.vmem [shape: f32[3,4,8], index: 5, kind: input, shape index: {}]   ;;  %s27373_s6 = inlined_call_operand.vmem [shape: f32[3,128,128], index: 6, kind: input, shape index: {}]   ;;  %s27374_s7 = inlined_call_operand.vmem [shape: f32[3,4,4], index: 7, kind: input, shape index: {}]   ;;  %s27375_s8 = inlined_call_operand.vmem [shape: f32[36,128,128], index: 8, kind: input, shape index: {}]   ;;  %s27376_s9 = inlined_call_operand.vmem [shape: f32[3,8,4], index: 9, kind: input, shape index: {}]   ;;  %s27377_s10 = inlined_call_operand.vmem [shape: f32[3,128,128], index: 10, kind: input, shape index: {}]   ;;  %s27378_s11 = inlined_call_operand.vmem [shape: f32[3,16,8], index: 11, kind: input, shape index: {}]   ;;  %s27379_s12 = inlined_call_operand.vmem [shape: f32[3,128,128], index: 12, kind: input, shape index: {}]   ;;  %s27380_s13 = inlined_call_operand.vmem [shape: f32[7,16,16], index: 13, kind: input, shape index: {}, may-alias: {1,13}]   ;;  %s27381_s14 = inlined_call_operand.vmem [shape: f32[7,128,48], index: 14, kind: input, shape index: {}]   ;;  %s27382_s15 = inlined_call_operand.vmem [shape: f32[128,128], index: 15, kind: input, shape index: {}]   ;;  %s27383_s16 = inlined_call_operand.vmem [shape: f32[128,128], index: 16, kind: input, shape index: {}]   ;;  %s27384_s17 = inlined_call_operand.vmem [shape: f32[128,128], index: 17, kind: input, shape index: {}]   ;;  %s27385_s18 = inlined_call_operand.vmem [shape: f32[1,48], index: 18, kind: input, shape index: {}]   ;;  %s27386_s19 = inlined_call_operand.vmem [shape: f32[2,16,48], index: 19, kind: output, shape index: {}]  }
   0x1   :  { %27391 = sst [smem:[#allocation3_spill]] %s27367_s0  ;;  %s22645_s0 = smov 0  }
   0x2   :  { %27392 = sst [smem:[#allocation4_spill]] %s27368_s1 }
   0x3   :  { %27393 = sst [smem:[#allocation5_spill]] %s27369_s2 }
   0x4   :  { %27394 = sst [smem:[#allocation6_spill]] %s27370_s3 }
   0x5   :  { %27395 = sst [smem:[#allocation7_spill]] %s27386_s19 }
   0x6 LB: > { %27396 = sst [smem:[#allocation2_spill]] %s22540_s0  ;;  %s13720_s30 = sadd.s32 4294967295, %s22540_s0   ;;  %s22540_s0 = sphi %s22645_s0, %s29_s0  }
   0x7   : > { %p13724_p0 = scmp.ge.s32.totalorder %s22540_s0, 1  ;;  %p537_p1 = scmp.lt.s32.totalorder %s22540_s0, 3 }
   0x9   : > { %p538_p2 = pnand %p13724_p0, %p537_p1 }
   0xa   : > { %p593_p3 = scmp.lt.s32.totalorder (!%p538_p2), %s13720_s30, 1  ;;  %s27397_s1 = sld [smem:[#allocation4_spill]] (!%p538_p2)  ;;  %vm607_vm0 = vcmask (!%p538_p2), 130048   ;;  %v1819_v29 = vld [vmem:[%s27382_s15] sm:$0xff] (!%p538_p2)  ;;  %v1820_v30 = vld [vmem:[%s27382_s15 + $0x8] sm:$0xff] (!%p538_p2)  ;;  %v1821_v31 = vld [vmem:[%s27382_s15 + $0x10] sm:$0xff] (!%p538_p2) }
   0xb   : > { %541 = sbr.rel (%p538_p2) target bundleno = 17325 (0x43ad), region = 96  ;;  %s27398_s24 = sld [smem:[#allocation5_spill]] (!%p538_p2)  ;;  %v22542_v32 = vmov (!%p538_p2), 0.0|0.0   ;;  %v22751_v33 = vpack.c.bf16 (!%p538_p2), %v1820_v30, %v1819_v29  ;;  %v1822_v34 = vld [vmem:[%s27382_s15 + $0x18] sm:$0xff] (!%p538_p2)  ;;  %v1823_v36 = vld [vmem:[%s27382_s15 + $0x20] sm:$0xff] (!%p538_p2)  ;;  %v1824_v37 = vld [vmem:[%s27382_s15 + $0x28] sm:$0xff] (!%p538_p2) }
   0xc   : > { %s27399_s26 = sld [smem:[#allocation3_spill]] (!%p538_p2)  ;;  %v22757_v35 = vpack.c.bf16 (!%p538_p2), %v1822_v34, %v1821_v31  ;;  %v22767_v38 = vpack.c.bf16 (!%p538_p2), %v1824_v37, %v1823_v36  ;;  %v1825_v39 = vld [vmem:[%s27382_s15 + $0x30] sm:$0xff] (!%p538_p2)  ;;  %v1826_v40 = vld [vmem:[%s27382_s15 + $0x38] sm:$0xff] (!%p538_p2)  ;;  %vm786_vm1 = vcmask (!%p538_p2), 392192   ;;  %vm22543_vm2 = vmmov (!%p538_p2), 0   ;;  %s27400_s28 = sld [smem:[#allocation6_spill]] (!%p538_p2) }
   0xd   : > { %v22777_v41 = vpack.c.bf16 (!%p538_p2), %v1826_v40, %v1825_v39  ;;  %vm2673_vm3 = vcmask (!%p538_p2), 64512   ;;  %vm3174_vm4 = vcmask (!%p538_p2), 1043456   ;;  %vm3343_vm5 = vcmask (!%p538_p2), 31744   ;;  %s27401_s20 = sld [smem:[#allocation7_spill]] (!%p538_p2) }
  0x10   : > { %v605_v0 = vld [vmem:[%s27397_s1] sm:$0xff] (!%p538_p2)  ;;  %v606_v10 = vld [vmem:[%s27397_s1 + $0x8] sm:$0xff] (!%p538_p2)  ;;  %v13731_v11 = vld [vmem:[%s27397_s1 + $0x10] sm:$0xff] (!%p538_p2) }
  0x11   : > { %16463 = vmatprep.mubr.msk.f32.mxu1 (!%p538_p2), %vm607_vm0, %v605_v0  ;;  %v13735_v1 = vld [vmem:[%s27398_s24 + $0x30] sm:$0xff] (!%p538_p2)  ;;  %v13736_v2 = vld [vmem:[%s27398_s24 + $0x38] sm:$0xff] (!%p538_p2)  ;;  %v13737_v3 = vld [vmem:[%s27398_s24 + $0x40] sm:$0xff] (!%p538_p2) }
  0x12   : > { %s27404_s30 = smov (!%p593_p3, %s13720_s30), 1  ;;  %v13738_v4 = vld [vmem:[%s27398_s24 + $0x48] sm:$0xff]  ;;  %v20031_v7 = vpack.c.bf16 %v13736_v2, %v13735_v1  ;;  %v13732_v12 = vld [vmem:[%s27397_s1 + $0x18] sm:$0xff]  ;;  %v13745_v13 = vld [vmem:[%s27397_s1 + $0x20] sm:$0xff] }
  0x13   : > { %s14720_s22 = sshll.u32 %s27404_s30, 4  ;;  %v20035_v8 = vpack.c.bf16 %v13738_v4, %v13737_v3  ;;  %v13746_v14 = vld [vmem:[%s27397_s1 + $0x28] sm:$0xff]  ;;  %v13757_v15 = vld [vmem:[%s27397_s1 + $0x30] sm:$0xff]  ;;  %v13758_v16 = vld [vmem:[%s27397_s1 + $0x38] sm:$0xff] }
  0x14   : > { %s597_s27 = scalar_lea.vmem %s27399_s26, %s14720_s22  ;;  %20032 = vmatprep.subr.bf16.mxu0 %v20031_v7  ;;  %v13769_v17 = vld [vmem:[%s27397_s1 + $0x40] sm:$0xff]  ;;  %v13770_v18 = vld [vmem:[%s27397_s1 + $0x48] sm:$0xff]  ;;  %v13781_v19 = vld [vmem:[%s27397_s1 + $0x50] sm:$0xff]  ;;  %s602_s21 = scalar_lea.vmem %s27401_s20, %s14720_s22 }
  0x15   : > { %v603_v5 = vld [vmem:[%s597_s27] sm:$0xff]  ;;  %v604_v6 = vld [vmem:[%s597_s27 + $0x8] sm:$0xff]  ;;  %20034 = vmatpush3.bf16.msra.mxu0 %v20031_v7  ;;  %v13782_v20 = vld [vmem:[%s27397_s1 + $0x58] sm:$0xff] }
  0x16   : > { %v20023_v9 = vpack.c.bf16 %v604_v6, %v603_v5  ;;  %20036 = vmatprep.subr.bf16.mxu0 %v20035_v8  ;;  %v13793_v21 = vld [vmem:[%s27397_s1 + $0x60] sm:$0xff]  ;;  %v13794_v22 = vld [vmem:[%s27397_s1 + $0x68] sm:$0xff]  ;;  %v13739_v23 = vld [vmem:[%s27398_s24 + $0x50] sm:$0xff] }
  0x17   : > { %v13740_v24 = vld [vmem:[%s27398_s24 + $0x58] sm:$0xff]  ;;  %v689_v26 = vld [vmem:[%s27398_s24] sm:$0xff]  ;;  %v690_v27 = vld [vmem:[%s27398_s24 + $0x8] sm:$0xff] }
  0x18   : > { %20024 = vmatprep.subr.bf16.mxu1 %v20023_v9  ;;  %v20039_v25 = vpack.c.bf16 %v13740_v24, %v13739_v23  ;;  %v20043_v28 = vpack.c.bf16 %v690_v27, %v689_v26  ;;  %v691_v44 = vld [vmem:[%s27398_s24 + $0x10] sm:$0xff]  ;;  %v692_v45 = vld [vmem:[%s27398_s24 + $0x18] sm:$0xff]  ;;  %v693_v49 = vld [vmem:[%s27398_s24 + $0x20] sm:$0xff] }
  0x19   : > { %20026 = vmatpush3.bf16.msra.mxu1 %v20023_v9  ;;  %20038 = vmatpush3.bf16.msra.mxu0 %v20035_v8  ;;  %v20047_v48 = vpack.c.bf16 %v692_v45, %v691_v44  ;;  %v694_v50 = vld [vmem:[%s27398_s24 + $0x28] sm:$0xff]  ;;  %v13749_v54 = vld [vmem:[%s27398_s24 + $0x60] sm:$0xff]  ;;  %v13751_v59 = vld [vmem:[%s27398_s24 + $0x70] sm:$0xff] }
  0x1a   : > { %20028 = vmatprep.subr.bf16.mxu1 %v20023_v9  ;;  %20040 = vmatprep.subr.bf16.mxu0 %v20039_v25  ;;  %v20051_v52 = vpack.c.bf16 %v694_v50, %v693_v49  ;;  %v13750_v55 = vld [vmem:[%s27398_s24 + $0x68] sm:$0xff]  ;;  %v13752_v60 = vld [vmem:[%s27398_s24 + $0x78] sm:$0xff]  ;;  %v13753_v0 = vld [vmem:[%s27398_s24 + $0x80] sm:$0xff] }
  0x1b   : > { %v20059_v57 = vpack.c.bf16 %v13750_v55, %v13749_v54  ;;  %v20063_v62 = vpack.c.bf16 %v13752_v60, %v13751_v59  ;;  %v13754_v1 = vld [vmem:[%s27398_s24 + $0x88] sm:$0xff]  ;;  %v13761_v5 = vld [vmem:[%s27398_s24 + $0x90] sm:$0xff]  ;;  %v13762_v6 = vld [vmem:[%s27398_s24 + $0x98] sm:$0xff]  ;;  %v22544_v60 = vmov 0.0  }
  0x1c   : > { %16464 = vmatmul.mubr.msk.f32.vlgmr.msra.gmra.mrb[0].mxu1 %vm607_vm0, %v606_v10  ;;  %v20067_v3 = vpack.c.bf16 %v13754_v1, %v13753_v0  ;;  %v20075_v8 = vpack.c.bf16 %v13762_v6, %v13761_v5  ;;  %v13763_v10 = vld [vmem:[%s27398_s24 + $0xa0] sm:$0xff]  ;;  %v13778_v23 = vld [vmem:[%s27398_s24 + $0xe8] sm:$0xff]  ;;  %v13786_v26 = vld [vmem:[%s27398_s24 + $0xf8] sm:$0xff]  ;;  %v1912_v6 = vlaneseq }
  0x1d   : > { %20030 = vmatpush3.bf16.msra.mxu1 %v20023_v9  ;;  %16470 = vmatprep.mubr.msk.f32.mxu1 %vm607_vm0, %v13731_v11  ;;  %v13764_v11 = vld [vmem:[%s27398_s24 + $0xa8] sm:$0xff]  ;;  %v13789_v31 = vld [vmem:[%s27398_s24 + $0x110] sm:$0xff]  ;;  %v13790_v34 = vld [vmem:[%s27398_s24 + $0x118] sm:$0xff] }
  0x1e   : > { %20056 = vmatprep.subr.bf16.mxu1 %v20023_v9  ;;  %20042 = vmatpush3.bf16.msra.mxu0 %v20039_v25  ;;  %v13785_v25 = vld [vmem:[%s27398_s24 + $0xf0] sm:$0xff]  ;;  %v13788_v29 = vld [vmem:[%s27398_s24 + $0x108] sm:$0xff]  ;;  %v20115_v36 = vpack.c.bf16 %v13790_v34, %v13789_v31  ;;  %v13797_v37 = vld [vmem:[%s27398_s24 + $0x120] sm:$0xff] }
  0x1f   : > { %20044 = vmatprep.subr.bf16.mxu0 %v20043_v28  ;;  %v20107_v27 = vpack.c.bf16 %v13786_v26, %v13785_v25  ;;  %v13798_v39 = vld [vmem:[%s27398_s24 + $0x128] sm:$0xff]  ;;  %v13801_v45 = vld [vmem:[%s27398_s24 + $0x140] sm:$0xff] }
  0x20   : > { %16471 = vmatmul.mubr.msk.f32.vlgmr.msra.gmra.mrb[2].mxu1 %vm607_vm0, %v13732_v12  ;;  %v20079_v12 = vpack.c.bf16 %v13764_v11, %v13763_v10  ;;  %v20123_v40 = vpack.c.bf16 %v13798_v39, %v13797_v37  ;;  %v1828_v49 = vld [vmem:[%s27382_s15 + $0x48] sm:$0xff]  ;;  %v1831_v54 = vld [vmem:[%s27382_s15 + $0x60] sm:$0xff] }
  0x21   : > { %20058 = vmatpush3.bf16.msra.mxu1 %v20023_v9  ;;  %16507 = vmatprep.mubr.msk.f32.mxu1 %vm607_vm0, %v13745_v13  ;;  %v13765_v13 = vld [vmem:[%s27398_s24 + $0xb0] sm:$0xff]  ;;  %v1832_v55 = vld [vmem:[%s27382_s15 + $0x68] sm:$0xff]  ;;  %v13808_v34 = vld [vmem:[%s27371_s4 + $0x80] sm:$0xff] }
  0x22   : > { %20072 = vmatprep.subr.bf16.mxu1 %v20023_v9  ;;  %v13806_v39 = vld [vmem:[%s27400_s28 + $0x8] sm:$0xff] }
  0x24   : > { %16508 = vmatmul.mubr.msk.f32.vlgmr.msra.gmra.mrb[4].mxu1 %vm607_vm0, %v13746_v14  ;;  %v13766_v14 = vld [vmem:[%s27398_s24 + $0xb8] sm:$0xff] }
  0x25   : > { %20074 = vmatpush3.bf16.msra.mxu1 %v20023_v9  ;;  %16529 = vmatprep.mubr.msk.f32.mxu1 %vm607_vm0, %v13757_v15  ;;  %v20083_v15 = vpack.c.bf16 %v13766_v14, %v13765_v13 }
  0x26   : > { %20088 = vmatprep.subr.bf16.mxu1 %v20023_v9 }
  0x28   : > { %16530 = vmatmul.mubr.msk.f32.vlgmr.msra.gmra.mrb[6].mxu1 %vm607_vm0, %v13758_v16  ;;  %v13773_v16 = vld [vmem:[%s27398_s24 + $0xc0] sm:$0xff] }
  0x29   : > { %20090 = vmatpush3.bf16.msra.mxu1 %v20023_v9  ;;  %16551 = vmatprep.mubr.msk.f32.mxu1 %vm607_vm0, %v13769_v17  ;;  %v13774_v17 = vld [vmem:[%s27398_s24 + $0xc8] sm:$0xff] }
  0x2a   : > { %20104 = vmatprep.subr.bf16.mxu1 %v20023_v9 }
  0x2c   : > { %16552 = vmatmul.mubr.msk.f32.vlgmr.msra.gmra.mrb[8].mxu1 %vm607_vm0, %v13770_v18  ;;  %v20091_v18 = vpack.c.bf16 %v13774_v17, %v13773_v16 }
  0x2d   : > { %20106 = vmatpush3.bf16.msra.mxu1 %v20023_v9  ;;  %16573 = vmatprep.mubr.msk.f32.mxu1 %vm607_vm0, %v13781_v19  ;;  %v13775_v19 = vld [vmem:[%s27398_s24 + $0xd0] sm:$0xff] }
  0x2e   : > { %20120 = vmatprep.subr.bf16.mxu1 %v20023_v9 }
  0x30   : > { %16574 = vmatmul.mubr.msk.f32.vlgmr.msra.gmra.mrb[10].mxu1 %vm607_vm0, %v13782_v20  ;;  %v13776_v20 = vld [vmem:[%s27398_s24 + $0xd8] sm:$0xff] }
  0x31   : > { %20122 = vmatpush3.bf16.msra.mxu1 %v20023_v9  ;;  %16595 = vmatprep.mubr.msk.f32.mxu1 %vm607_vm0, %v13793_v21  ;;  %v20095_v21 = vpack.c.bf16 %v13776_v20, %v13775_v19 }
  0x32   : > { %20135 = vmatprep.subr.bf16.mxu1 %v22542_v32 }
  0x34   : > { %16596 = vmatmul.mubr.msk.f32.vlgmr.msra.gmra.mrb[12].mxu1 %vm607_vm0, %v13794_v22  ;;  %v13777_v22 = vld [vmem:[%s27398_s24 + $0xe0] sm:$0xff] }
  0x35   : > { %20137 = vmatpush3.bf16.msra.mxu1 %v22751_v33  ;;  %v20099_v24 = vpack.c.bf16 %v13778_v23, %v13777_v22  ;;  %16645 = vmatprep.mubr.msk.f32.mxu1 %vm22543_vm2, %v22544_v60 }
  0x36   : > { %20138 = vmatprep.subr.bf16.mxu1 %v22542_v32 }
  0x39   : > { %20140 = vmatpush3.bf16.msra.mxu1 %v22757_v35 }
  0x3a   : > { %20141 = vmatprep.subr.bf16.mxu1 %v22542_v32 }
  0x3d   : > { %20143 = vmatpush3.bf16.msra.mxu1 %v22767_v38 }
  0x3e   : > { %20144 = vmatprep.subr.bf16.mxu1 %v22542_v32 }
  0x41   : > { %20146 = vmatpush3.bf16.msra.mxu1 %v22777_v41 }
  0x42   : > { %20147 = vmatprep.subr.bf16.mxu1 %v22542_v32 }
  0xef   : > { %v16465_v42 = vpop.f32.mrb[0].mxu1 }
  0xf0   : > { %v680_v43 = vpop.f32.mrb[1].mxu1 }
  0xf3   : > { %v16472_v46 = vpop.f32.mrb[2].mxu1 }
  0xf4   : > { %v770_v47 = vpop.f32.mrb[3].mxu1 }
  0xf5   : > { %16485 = vmatprep.mubr.msk.f32.mxu0 %vm786_vm1, %v770_v47 }
  0xf6   : > { %16486 = vmatmul.mubr.msk.f32.vlgmr.msra.gmra.mrb[0].mxu0 %vm786_vm1, %v16472_v46  ;;  %v13802_v46 = vld [vmem:[%s27398_s24 + $0x148] sm:$0xff] }
  0xf7   : > { %20046 = vmatpush3.bf16.msra.mxu0 %v20043_v28  ;;  %16500 = vmatprep.mubr.msk.f32.mxu0 %vm786_vm1, %v680_v43  ;;  %v16509_v51 = vpop.f32.mrb[4].mxu1  ;;  %v13787_v28 = vld [vmem:[%s27398_s24 + $0x100] sm:$0xff]  ;;  %v13800_v43 = vld [vmem:[%s27398_s24 + $0x138] sm:$0xff]  ;;  %v20131_v47 = vpack.c.bf16 %v13802_v46, %v13801_v45 }
  0xf8   : > { %20048 = vmatprep.subr.bf16.mxu0 %v20047_v48  ;;  %v1024_v53 = vpop.f32.mrb[5].mxu1  ;;  %v20111_v30 = vpack.c.bf16 %v13788_v29, %v13787_v28  ;;  %v13812_v46 = vld [vmem:[%s27371_s4 + $0xa0] sm:$0xff] }
  0xfb   : > { %20050 = vmatpush3.bf16.msra.mxu0 %v20047_v48  ;;  %v16531_v56 = vpop.f32.mrb[6].mxu1  ;;  %v1827_v48 = vld [vmem:[%s27382_s15 + $0x40] sm:$0xff] }
  0xfc   : > { %20052 = vmatprep.subr.bf16.mxu0 %v20051_v52  ;;  %v1198_v58 = vpop.f32.mrb[7].mxu1  ;;  %v22911_v50 = vpack.c.bf16 %v1828_v49, %v1827_v48  ;;  %v13814_v49 = vld [vmem:[%s27371_s4 + $0xb0] sm:$0xff] }
  0xfe   : > { %20149 = vmatpush3.bf16.msra.mxu1 %v22911_v50 }
  0xff   : > { %20054 = vmatpush3.bf16.msra.mxu0 %v20051_v52  ;;  %v16553_v61 = vpop.f32.mrb[8].mxu1  ;;  %20150 = vmatprep.subr.bf16.mxu1 %v22542_v32  ;;  %v1830_v52 = vld [vmem:[%s27382_s15 + $0x58] sm:$0xff] }
 0x100   : > { %20060 = vmatprep.subr.bf16.mxu0 %v20059_v57  ;;  %v1372_v63 = vpop.f32.mrb[9].mxu1 }
 0x102   : > { %16501 = vmatmul.mubr.msk.f32.vlgmr.msra.gmra.mrb[0].mxu0 %vm786_vm1, %v16465_v42  ;;  %v13799_v42 = vld [vmem:[%s27398_s24 + $0x130] sm:$0xff] }
 0x103   : > { %20062 = vmatpush3.bf16.msra.mxu0 %v20059_v57  ;;  %16522 = vmatprep.mubr.msk.f32.mxu0 %vm786_vm1, %v1024_v53  ;;  %v22817_v2 = vpop.f32.mrb[10].mxu1  ;;  %v20127_v44 = vpack.c.bf16 %v13800_v43, %v13799_v42  ;;  %v1833_v57 = vld [vmem:[%s27382_s15 + $0x70] sm:$0xff] }
 0x104   : > { %20064 = vmatprep.subr.bf16.mxu0 %v20063_v62  ;;  %v1546_v4 = vpop.f32.mrb[11].mxu1  ;;  %v13810_v43 = vld [vmem:[%s27371_s4 + $0x90] sm:$0xff] }
 0x107   : > { %20066 = vmatpush3.bf16.msra.mxu0 %v20063_v62  ;;  %v22825_v7 = vpop.f32.mrb[12].mxu1 }
 0x108   : > { %20068 = vmatprep.subr.bf16.mxu0 %v20067_v3  ;;  %v1720_v9 = vpop.f32.mrb[13].mxu1 }
 0x10b   : > { %20070 = vmatpush3.bf16.msra.mxu0 %v20067_v3 }
 0x10c   : > { %20076 = vmatprep.subr.bf16.mxu0 %v20075_v8 }
 0x10e   : > { %16523 = vmatmul.mubr.msk.f32.vlgmr.msra.gmra.mrb[0].mxu0 %vm786_vm1, %v16509_v51  ;;  %v1829_v51 = vld [vmem:[%s27382_s15 + $0x50] sm:$0xff] }
 0x10f   : > { %20078 = vmatpush3.bf16.msra.mxu0 %v20075_v8  ;;  %16544 = vmatprep.mubr.msk.f32.mxu0 %vm786_vm1, %v1198_v58  ;;  %v22921_v53 = vpack.c.bf16 %v1830_v52, %v1829_v51  ;;  %v1834_v58 = vld [vmem:[%s27382_s15 + $0x78] sm:$0xff] }
 0x110   : > { %20080 = vmatprep.subr.bf16.mxu0 %v20079_v12  ;;  %v22941_v59 = vpack.c.bf16 %v1834_v58, %v1833_v57  ;;  %v13815_v51 = vld [vmem:[%s27371_s4 + $0xb8] sm:$0xff]  ;;  %v13818_v58 = vld [vmem:[%s27371_s4 + $0xd0] sm:$0xff] }
 0x111   : > { %20152 = vmatpush3.bf16.msra.mxu1 %v22921_v53  ;;  %v20199_v52 = vpack.c.bf16 %v13815_v51, %v13814_v49  ;;  %v13832_v49 = vld [vmem:[%s27371_s4 + $0x130] sm:$0xff]  ;;  %v13833_v51 = vld [vmem:[%s27371_s4 + $0x138] sm:$0xff] }
 0x112   : > { %20153 = vmatprep.subr.bf16.mxu1 %v22542_v32 }
 0x113   : > { %20082 = vmatpush3.bf16.msra.mxu0 %v20079_v12 }
 0x114   : > { %20084 = vmatprep.subr.bf16.mxu0 %v20083_v15 }
 0x117   : > { %20086 = vmatpush3.bf16.msra.mxu0 %v20083_v15 }
 0x118   : > { %20092 = vmatprep.subr.bf16.mxu0 %v20091_v18 }
 0x11a   : > { %16545 = vmatmul.mubr.msk.f32.vlgmr.msra.gmra.mrb[0].mxu0 %vm786_vm1, %v16531_v56  ;;  %v22931_v56 = vpack.c.bf16 %v1832_v55, %v1831_v54  ;;  %v13816_v54 = vld [vmem:[%s27371_s4 + $0xc0] sm:$0xff]  ;;  %v13817_v55 = vld [vmem:[%s27371_s4 + $0xc8] sm:$0xff] }
 0x11b   : > { %20094 = vmatpush3.bf16.msra.mxu0 %v20091_v18  ;;  %16566 = vmatprep.mubr.msk.f32.mxu0 %vm786_vm1, %v1372_v63  ;;  %v20202_v57 = vpack.c.bf16 %v13817_v55, %v13816_v54  ;;  %v13834_v54 = vld [vmem:[%s27371_s4 + $0x140] sm:$0xff]  ;;  %v13835_v55 = vld [vmem:[%s27371_s4 + $0x148] sm:$0xff] }
 0x11c   : > { %20096 = vmatprep.subr.bf16.mxu0 %v20095_v21  ;;  %20155 = vmatpush3.bf16.msra.mxu1 %v22931_v56 }
 0x11d   : > { %20156 = vmatprep.subr.bf16.mxu1 %v22542_v32 }
 0x11f   : > { %20098 = vmatpush3.bf16.msra.mxu0 %v20095_v21 }
 0x120   : > { %20100 = vmatprep.subr.bf16.mxu0 %v20099_v24  ;;  %20158 = vmatpush3.bf16.msra.mxu1 %v22941_v59 }
 0x121   : > { %20159 = vmatprep.subr.bf16.mxu1 %v22542_v32 }
 0x123   : > { %20102 = vmatpush3.bf16.msra.mxu0 %v20099_v24 }
 0x124   : > { %20108 = vmatprep.subr.bf16.mxu0 %v20107_v27 }
 0x126   : > { %16567 = vmatmul.mubr.msk.f32.vlgmr.msra.gmra.mrb[0].mxu0 %vm786_vm1, %v16553_v61 }
 0x127   : > { %20110 = vmatpush3.bf16.msra.mxu0 %v20107_v27  ;;  %16588 = vmatprep.mubr.msk.f32.mxu0 %vm786_vm1, %v1546_v4 }
 0x128   : > { %20112 = vmatprep.subr.bf16.mxu0 %v20111_v30 }
 0x12b   : > { %20114 = vmatpush3.bf16.msra.mxu0 %v20111_v30 }
 0x12c   : > { %20116 = vmatprep.subr.bf16.mxu0 %v20115_v36 }
 0x12f   : > { %20118 = vmatpush3.bf16.msra.mxu0 %v20115_v36  ;;  %v13809_v36 = vld [vmem:[%s27371_s4 + $0x88] sm:$0xff] }
 0x130   : > { %20124 = vmatprep.subr.bf16.mxu0 %v20123_v40  ;;  %v20190_v42 = vpack.c.bf16 %v13809_v36, %v13808_v34  ;;  %v2095_v34 = vld [vmem:[%s27371_s4 + $0x78] sm:$0xff] }
 0x132   : > { %16589 = vmatmul.mubr.msk.f32.vlgmr.msra.gmra.mrb[0].mxu0 %vm786_vm1, %v22817_v2 }
 0x133   : > { %20126 = vmatpush3.bf16.msra.mxu0 %v20123_v40  ;;  %16610 = vmatprep.mubr.msk.f32.mxu0 %vm786_vm1, %v1720_v9  ;;  %v2006_v40 = vld [vmem:[%s27400_s28] sm:$0xff] }
 0x134   : > { %20128 = vmatprep.subr.bf16.mxu0 %v20127_v44 }
 0x137   : > { %20130 = vmatpush3.bf16.msra.mxu0 %v20127_v44  ;;  %v13811_v44 = vld [vmem:[%s27371_s4 + $0x98] sm:$0xff] }
 0x138   : > { %20132 = vmatprep.subr.bf16.mxu0 %v20131_v47  ;;  %v20193_v45 = vpack.c.bf16 %v13811_v44, %v13810_v43  ;;  %v13828_v44 = vld [vmem:[%s27371_s4 + $0x110] sm:$0xff] }
 0x13b   : > { %20134 = vmatpush3.bf16.msra.mxu0 %v20131_v47  ;;  %v13813_v47 = vld [vmem:[%s27371_s4 + $0xa8] sm:$0xff] }
 0x13c   : > { %20183 = vmatprep.subr.bf16.mxu0 %v22542_v32  ;;  %v20196_v48 = vpack.c.bf16 %v13813_v47, %v13812_v46  ;;  %v13830_v46 = vld [vmem:[%s27371_s4 + $0x120] sm:$0xff]  ;;  %v13831_v47 = vld [vmem:[%s27371_s4 + $0x128] sm:$0xff] }
 0x13e   : > { %16611 = vmatmul.mubr.msk.f32.vlgmr.msra.gmra.mrb[0].mxu0 %vm786_vm1, %v22825_v7  ;;  %v1913_v7 = vshrl.u32 %v1912_v6, 7  ;;  %v2081_v6 = vld [vmem:[%s27371_s4 + $0x8] sm:$0xff] }
 0x13f   : > { %16687 = vmatprep.mubr.msk.f32.mxu0 %vm22543_vm2, %v22544_v60 }
 0x140   : > { %v22967_v8 = vsub.s32 0, %v1913_v7 }
 0x211   : > { %v16612_v61 = vpop.f32.mrb[0].mxu0 }
 0x212   : > { %v1808_v62 = vpop.f32.mrb[1].mxu0 }
 0x213   : > { %v1835_v63 = vadd.f32 %v16612_v61, %v1808_v62 }
 0x215   : > { %v1836_v0 = vrot.slane %v1835_v63, 4 }
 0x217   : > { %v1837_v1 = vadd.f32 %v1836_v0, %v1835_v63  ;;  %v13820_v63 = vld [vmem:[%s27371_s4 + $0xe0] sm:$0xff]  ;;  %v13821_v0 = vld [vmem:[%s27371_s4 + $0xe8] sm:$0xff] }
 0x219   : > { %v1838_v2 = vrot.slane %v1837_v1, 2 }
 0x21b   : > { %v1839_v3 = vadd.f32 %v1838_v2, %v1837_v1  ;;  %v20208_v1 = vpack.c.bf16 %v13821_v0, %v13820_v63  ;;  %v13822_v2 = vld [vmem:[%s27371_s4 + $0xf0] sm:$0xff]  ;;  %v13838_v63 = vld [vmem:[%s27371_s4 + $0x160] sm:$0xff]  ;;  %v13839_v0 = vld [vmem:[%s27371_s4 + $0x168] sm:$0xff] }
 0x21d   : > { %v1840_v4 = vrot.slane %v1839_v3, 1 }
 0x21f   : > { %v1841_v5 = vadd.f32 %v1840_v4, %v1839_v3  ;;  %v13823_v3 = vld [vmem:[%s27371_s4 + $0xf8] sm:$0xff] }
 0x220   : > { %v20211_v4 = vpack.c.bf16 %v13823_v3, %v13822_v2  ;;  %v13840_v2 = vld [vmem:[%s27371_s4 + $0x170] sm:$0xff]  ;;  %v13841_v3 = vld [vmem:[%s27371_s4 + $0x178] sm:$0xff] }
 0x221   : > { %16646 = vmatmul.mubr.f32.vlgmr.msra.gmra.mrb[14].mxu1 %v1841_v5  ;;  %v2080_v5 = vld [vmem:[%s27371_s4] sm:$0xff] }
 0x222   : > { %20161 = vmatpush3.bf16.msra.mxu1 %v22751_v33  ;;  %16680 = vmatprep.mubr.msk.f32.mxu1 %vm22543_vm2, %v22544_v60  ;;  %v20214_v7 = vpack.c.bf16 %v2081_v6, %v2080_v5  ;;  %v2491_v5 = vld [vmem:[%s27383_s16] sm:$0xff]  ;;  %v2492_v6 = vld [vmem:[%s27383_s16 + $0x8] sm:$0xff] }
 0x223   : > { %20162 = vmatprep.subr.bf16.mxu1 %v22542_v32 }
 0x226   : > { %20164 = vmatpush3.bf16.msra.mxu1 %v22757_v35 }
 0x227   : > { %20165 = vmatprep.subr.bf16.mxu1 %v22542_v32 }
 0x22a   : > { %20167 = vmatpush3.bf16.msra.mxu1 %v22767_v38 }
 0x22b   : > { %20168 = vmatprep.subr.bf16.mxu1 %v22542_v32 }
 0x22e   : > { %20170 = vmatpush3.bf16.msra.mxu1 %v22777_v41 }
 0x22f   : > { %20171 = vmatprep.subr.bf16.mxu1 %v22542_v32 }
 0x232   : > { %20173 = vmatpush3.bf16.msra.mxu1 %v22911_v50 }
 0x233   : > { %20174 = vmatprep.subr.bf16.mxu1 %v22542_v32 }
 0x236   : > { %20176 = vmatpush3.bf16.msra.mxu1 %v22921_v53 }
 0x237   : > { %20177 = vmatprep.subr.bf16.mxu1 %v22542_v32 }
 0x23a   : > { %20179 = vmatpush3.bf16.msra.mxu1 %v22931_v56 }
 0x23b   : > { %20180 = vmatprep.subr.bf16.mxu1 %v22542_v32 }
 0x23e   : > { %20182 = vmatpush3.bf16.msra.mxu1 %v22941_v59 }
 0x23f   : > { %20186 = vmatprep.subr.bf16.mxu1 %v22542_v32 }
 0x2f4   : > { %v1908_v9 = vpop.f32.mrb[14].mxu1 }
 0x2f5   : > { %v1915_v10 = vrot.slane %v1908_v9, %v22967_v8  ;;  %v16647_v11 = vpop.f32.mrb[15].mxu1  ;;  %v2082_v9 = vld [vmem:[%s27371_s4 + $0x10] sm:$0xff] }
 0x2f7   : > { %v1916_v12 = vsub.f32 %v1808_v62, %v1915_v10  ;;  %v1917_v13 = vsub.f32 %v16612_v61, %v1915_v10  ;;  %v13819_v61 = vld [vmem:[%s27371_s4 + $0xd8] sm:$0xff] }
 0x2f8   : > { %v20205_v62 = vpack.c.bf16 %v13819_v61, %v13818_v58  ;;  %v2083_v10 = vld [vmem:[%s27371_s4 + $0x18] sm:$0xff]  ;;  %v13836_v58 = vld [vmem:[%s27371_s4 + $0x150] sm:$0xff] }
 0x2f9   : > { %v1918_v14 = vmul.f32 %v1916_v12, %v1916_v12  ;;  %v1919_v15 = vmul.f32 %v1917_v13, %v1917_v13  ;;  %v13837_v61 = vld [vmem:[%s27371_s4 + $0x158] sm:$0xff] }
 0x2fb   : > { %v1920_v16 = vadd.f32 %v1919_v15, %v1918_v14  ;;  %v20217_v15 = vpack.c.bf16 %v2083_v10, %v2082_v9  ;;  %v2493_v9 = vld [vmem:[%s27383_s16 + $0x10] sm:$0xff]  ;;  %v2494_v10 = vld [vmem:[%s27383_s16 + $0x18] sm:$0xff] }
 0x2fd   : > { %v1921_v17 = vrot.slane %v1920_v16, 4 }
 0x2ff   : > { %v1922_v18 = vadd.f32 %v1921_v17, %v1920_v16  ;;  %v2084_v16 = vld [vmem:[%s27371_s4 + $0x20] sm:$0xff]  ;;  %v2085_v17 = vld [vmem:[%s27371_s4 + $0x28] sm:$0xff] }
 0x301   : > { %v1923_v19 = vrot.slane %v1922_v18, 2 }
 0x303   : > { %v1924_v20 = vadd.f32 %v1923_v19, %v1922_v18  ;;  %v20220_v18 = vpack.c.bf16 %v2085_v17, %v2084_v16  ;;  %v2086_v19 = vld [vmem:[%s27371_s4 + $0x30] sm:$0xff] }
 0x304   : > { %v2497_v17 = vld [vmem:[%s27383_s16 + $0x30] sm:$0xff] }
 0x305   : > { %v1925_v21 = vrot.slane %v1924_v20, 1 }
 0x307   : > { %v1926_v22 = vadd.f32 %v1925_v21, %v1924_v20  ;;  %v2087_v20 = vld [vmem:[%s27371_s4 + $0x38] sm:$0xff] }
 0x308   : > { %v20223_v21 = vpack.c.bf16 %v2087_v20, %v2086_v19  ;;  %v2499_v20 = vld [vmem:[%s27383_s16 + $0x40] sm:$0xff] }
 0x309   : > { %16681 = vmatmul.mubr.f32.vlgmr.msra.gmra.mrb[16].mxu1 %v1926_v22  ;;  %v2088_v22 = vld [vmem:[%s27371_s4 + $0x40] sm:$0xff] }
 0x30a   : > { %16694 = vmatprep.mubr.msk.f32.mxu1 %vm22543_vm2, %v22544_v60 }
 0x3dc   : > { %v1993_v23 = vpop.f32.mrb[16].mxu1 }
 0x3dd   : > { %v1994_v24 = vadd.f32 1e-05, %v1993_v23  ;;  %v16682_v25 = vpop.f32.mrb[17].mxu1  ;;  %v2089_v23 = vld [vmem:[%s27371_s4 + $0x48] sm:$0xff] }
 0x3de   : > { %v2090_v25 = vld [vmem:[%s27371_s4 + $0x50] sm:$0xff] }
 0x3df   : > { %22487 = vrsqrt.f32 %v1994_v24  ;;  %v20226_v24 = vpack.c.bf16 %v2089_v23, %v2088_v22  ;;  %v2501_v23 = vld [vmem:[%s27383_s16 + $0x50] sm:$0xff] }
 0x3e9   : > { %v22488_v26 = vpop.eup %22487 }
 0x3ea   : > { %v2001_v27 = vrot.slane %v22488_v26, %v22967_v8  ;;  %v2091_v26 = vld [vmem:[%s27371_s4 + $0x58] sm:$0xff] }
 0x3ec   : > { %v2002_v28 = vmul.f32 %v2001_v27, %v1916_v12  ;;  %v2003_v29 = vmul.f32 %v2001_v27, %v1917_v13  ;;  %v20229_v27 = vpack.c.bf16 %v2091_v26, %v2090_v25  ;;  %v2503_v26 = vld [vmem:[%s27383_s16 + $0x60] sm:$0xff] }
 0x3ee   : > { %v2004_v30 = vmax.f32 %v2002_v28, 0.0  ;;  %v2005_v31 = vmax.f32 %v2003_v29, 0.0  ;;  %v2092_v28 = vld [vmem:[%s27371_s4 + $0x60] sm:$0xff]  ;;  %v2093_v29 = vld [vmem:[%s27371_s4 + $0x68] sm:$0xff] }
 0x3f0   : > { %v22979_v37 = vpack.c.bf16 %v2005_v31, %v2004_v30  ;;  %v20232_v30 = vpack.c.bf16 %v2093_v29, %v2092_v28  ;;  %v2094_v31 = vld [vmem:[%s27371_s4 + $0x70] sm:$0xff] }
 0x3f1   : > { %v20235_v36 = vpack.c.bf16 %v2095_v34, %v2094_v31  ;;  %v2505_v29 = vld [vmem:[%s27383_s16 + $0x70] sm:$0xff] }
 0x3f2   : > { %20185 = vmatpush3.bf16.msra.mxu0 %v22979_v37  ;;  %20188 = vmatpush3.bf16.msra.mxu1 %v22979_v37 }
 0x3f3   : > { %20189 = vmatprep.subr.bf16.mxu1 %v22542_v32  ;;  %16959 = vmatprep.subr.mxu0 %v22544_v60 }
 0x3f5   : > { %16695 = vmatmul.mubr.msk.f32.vlgmr.msra.gmra.mrb[18].mxu1 %vm607_vm0, %v13806_v39  ;;  %16688 = vmatmul.mubr.msk.f32.vlgmr.msra.gmra.mrb[2].mxu0 %vm607_vm0, %v2006_v40  ;;  %v13826_v39 = vld [vmem:[%s27371_s4 + $0x100] sm:$0xff]  ;;  %v13827_v40 = vld [vmem:[%s27371_s4 + $0x108] sm:$0xff] }
 0x3f6   : > { %20191 = vmatpush3.bf16.msra.mxu1 %v20190_v42  ;;  %16729 = vmatprep.mubr.msk.f32.mxu1 %vm22543_vm2, %v22544_v60  ;;  %v13824_v42 = vld [vmem:[%s27400_s28 + $0x10] sm:$0xff]  ;;  %v20241_v43 = vpack.c.bf16 %v13827_v40, %v13826_v39 }
 0x3f7   : > { %20192 = vmatprep.subr.bf16.mxu1 %v22542_v32  ;;  %16961 = vmatprep.mubr.msk.f32.mxu0 %vm22543_vm2, %v22544_v60 }
 0x3fa   : > { %20194 = vmatpush3.bf16.msra.mxu1 %v20193_v45  ;;  %v13829_v45 = vld [vmem:[%s27371_s4 + $0x118] sm:$0xff] }
 0x3fb   : > { %20195 = vmatprep.subr.bf16.mxu1 %v22542_v32 }
 0x3fe   : > { %20197 = vmatpush3.bf16.msra.mxu1 %v20196_v48  ;;  %v20247_v48 = vpack.c.bf16 %v13831_v47, %v13830_v46 }
 0x3ff   : > { %20198 = vmatprep.subr.bf16.mxu1 %v22542_v32 }
 0x402   : > { %20200 = vmatpush3.bf16.msra.mxu1 %v20199_v52  ;;  %v20250_v52 = vpack.c.bf16 %v13833_v51, %v13832_v49 }
 0x403   : > { %20201 = vmatprep.subr.bf16.mxu1 %v22542_v32 }
 0x406   : > { %20203 = vmatpush3.bf16.msra.mxu1 %v20202_v57  ;;  %v20253_v57 = vpack.c.bf16 %v13835_v55, %v13834_v54 }
 0x407   : > { %20204 = vmatprep.subr.bf16.mxu1 %v22542_v32 }
 0x40a   : > { %20206 = vmatpush3.bf16.msra.mxu1 %v20205_v62  ;;  %v20256_v62 = vpack.c.bf16 %v13837_v61, %v13836_v58 }
 0x40b   : > { %20207 = vmatprep.subr.bf16.mxu1 %v22542_v32 }
 0x40e   : > { %20209 = vmatpush3.bf16.msra.mxu1 %v20208_v1  ;;  %v20259_v1 = vpack.c.bf16 %v13839_v0, %v13838_v63 }
 0x40f   : > { %20210 = vmatprep.subr.bf16.mxu1 %v22542_v32 }
 0x412   : > { %20212 = vmatpush3.bf16.msra.mxu1 %v20211_v4  ;;  %v20262_v4 = vpack.c.bf16 %v13841_v3, %v13840_v2 }
 0x413   : > { %20213 = vmatprep.subr.bf16.mxu1 %v22542_v32 }
 0x4c8   : > { %v2167_v11 = vpop.f32.mrb[18].mxu1  ;;  %v2076_v12 = vpop.f32.mrb[2].mxu0 }
 0x4c9   : > { %v16696_v13 = vpop.f32.mrb[19].mxu1  ;;  %16730 = vmatmul.mubr.f32.vlgmr.msra.gmra.mrb[20].mxu1 %v2167_v11  ;;  %v16689_v14 = vpop.f32.mrb[3].mxu0 }
 0x4ca   : > { %20215 = vmatpush3.bf16.msra.mxu1 %v20214_v7  ;;  %16764 = vmatprep.mubr.msk.f32.mxu1 %vm22543_vm2, %v22544_v60  ;;  %v23177_v7 = vpack.c.bf16 %v2492_v6, %v2491_v5  ;;  %v23186_v13 = vpack.c.bf16 %v2494_v10, %v2493_v9  ;;  %v2495_v14 = vld [vmem:[%s27383_s16 + $0x20] sm:$0xff]  ;;  %v13846_v6 = vld [vmem:[%s27373_s6 + $0x88] sm:$0xff] }
 0x4cb   : > { %20216 = vmatprep.subr.bf16.mxu1 %v22542_v32  ;;  %v13845_v5 = vld [vmem:[%s27373_s6 + $0x80] sm:$0xff]  ;;  %v13861_v9 = vld [vmem:[%s27372_s5 + $0x8] sm:$0xf] }
 0x4cc   : > { %v13843_v10 = vld [vmem:[%s27372_s5 + $0x4] sm:$0xf] }
 0x4ce   : > { %20218 = vmatpush3.bf16.msra.mxu1 %v20217_v15  ;;  %v2496_v15 = vld [vmem:[%s27383_s16 + $0x28] sm:$0xff] }
 0x4cf   : > { %20219 = vmatprep.subr.bf16.mxu1 %v22542_v32  ;;  %v23198_v16 = vpack.c.bf16 %v2496_v15, %v2495_v14  ;;  %v13848_v14 = vld [vmem:[%s27373_s6 + $0x98] sm:$0xff] }
 0x4d2   : > { %20221 = vmatpush3.bf16.msra.mxu1 %v20220_v18  ;;  %v2498_v18 = vld [vmem:[%s27383_s16 + $0x38] sm:$0xff] }
 0x4d3   : > { %20222 = vmatprep.subr.bf16.mxu1 %v22542_v32  ;;  %v23208_v19 = vpack.c.bf16 %v2498_v18, %v2497_v17  ;;  %v13849_v17 = vld [vmem:[%s27373_s6 + $0xa0] sm:$0xff]  ;;  %v13850_v18 = vld [vmem:[%s27373_s6 + $0xa8] sm:$0xff] }
 0x4d6   : > { %20224 = vmatpush3.bf16.msra.mxu1 %v20223_v21  ;;  %v2500_v21 = vld [vmem:[%s27383_s16 + $0x48] sm:$0xff] }
 0x4d7   : > { %20225 = vmatprep.subr.bf16.mxu1 %v22542_v32  ;;  %v23218_v22 = vpack.c.bf16 %v2500_v21, %v2499_v20  ;;  %v20319_v20 = vpack.c.bf16 %v13850_v18, %v13849_v17  ;;  %v13851_v21 = vld [vmem:[%s27373_s6 + $0xb0] sm:$0xff]  ;;  %v2751_v17 = vld [vmem:[%s27373_s6 + $0x20] sm:$0xff]  ;;  %v2752_v18 = vld [vmem:[%s27373_s6 + $0x28] sm:$0xff] }
 0x4da   : > { %20227 = vmatpush3.bf16.msra.mxu1 %v20226_v24  ;;  %v2502_v24 = vld [vmem:[%s27383_s16 + $0x58] sm:$0xff] }
 0x4db   : > { %20228 = vmatprep.subr.bf16.mxu1 %v22542_v32  ;;  %v23229_v25 = vpack.c.bf16 %v2502_v24, %v2501_v23  ;;  %v13852_v23 = vld [vmem:[%s27373_s6 + $0xb8] sm:$0xff] }
 0x4dc   : > { %v20322_v24 = vpack.c.bf16 %v13852_v23, %v13851_v21  ;;  %v2753_v21 = vld [vmem:[%s27373_s6 + $0x30] sm:$0xff]  ;;  %v2754_v23 = vld [vmem:[%s27373_s6 + $0x38] sm:$0xff] }
 0x4de   : > { %20230 = vmatpush3.bf16.msra.mxu1 %v20229_v27  ;;  %v2504_v27 = vld [vmem:[%s27383_s16 + $0x68] sm:$0xff] }
 0x4df   : > { %20231 = vmatprep.subr.bf16.mxu1 %v22542_v32  ;;  %v23239_v28 = vpack.c.bf16 %v2504_v27, %v2503_v26  ;;  %v13853_v26 = vld [vmem:[%s27373_s6 + $0xc0] sm:$0xff]  ;;  %v13854_v27 = vld [vmem:[%s27373_s6 + $0xc8] sm:$0xff] }
 0x4e2   : > { %20233 = vmatpush3.bf16.msra.mxu1 %v20232_v30  ;;  %v2506_v30 = vld [vmem:[%s27383_s16 + $0x78] sm:$0xff] }
 0x4e3   : > { %20234 = vmatprep.subr.bf16.mxu1 %v22542_v32  ;;  %v23249_v31 = vpack.c.bf16 %v2506_v30, %v2505_v29  ;;  %v20325_v29 = vpack.c.bf16 %v13854_v27, %v13853_v26  ;;  %v13855_v30 = vld [vmem:[%s27373_s6 + $0xd0] sm:$0xff]  ;;  %v2755_v26 = vld [vmem:[%s27373_s6 + $0x40] sm:$0xff]  ;;  %v2756_v27 = vld [vmem:[%s27373_s6 + $0x48] sm:$0xff] }
 0x4e6   : > { %20236 = vmatpush3.bf16.msra.mxu1 %v20235_v36 }
 0x4e7   : > { %20237 = vmatprep.subr.bf16.mxu1 %v22542_v32 }
 0x4e9   : > { %16765 = vmatmul.mubr.f32.vlgmr.msra.gmra.mrb[20].mxu1 %v2076_v12 }
 0x4ea   : > { %20239 = vmatpush3.bf16.msra.mxu1 %v22979_v37  ;;  %16771 = vmatprep.mubr.msk.f32.mxu1 %vm22543_vm2, %v22544_v60  ;;  %v20244_v37 = vpack.c.bf16 %v13829_v45, %v13828_v44 }
 0x4eb   : > { %20240 = vmatprep.subr.bf16.mxu1 %v22542_v32 }
 0x4ed   : > { %16772 = vmatmul.mubr.msk.f32.vlgmr.msra.gmra.mrb[22].mxu1 %vm607_vm0, %v13824_v42 }
 0x4ee   : > { %20242 = vmatpush3.bf16.msra.mxu1 %v20241_v43  ;;  %16806 = vmatprep.mubr.msk.f32.mxu1 %vm22543_vm2, %v22544_v60 }
 0x4ef   : > { %20243 = vmatprep.subr.bf16.mxu1 %v22542_v32 }
 0x4f2   : > { %20245 = vmatpush3.bf16.msra.mxu1 %v20244_v37 }
 0x4f3   : > { %20246 = vmatprep.subr.bf16.mxu1 %v22542_v32 }
 0x4f6   : > { %20248 = vmatpush3.bf16.msra.mxu1 %v20247_v48 }
 0x4f7   : > { %20249 = vmatprep.subr.bf16.mxu1 %v22542_v32 }
 0x4fa   : > { %20251 = vmatpush3.bf16.msra.mxu1 %v20250_v52 }
 0x4fb   : > { %20252 = vmatprep.subr.bf16.mxu1 %v22542_v32 }
 0x4fe   : > { %20254 = vmatpush3.bf16.msra.mxu1 %v20253_v57 }
 0x4ff   : > { %20255 = vmatprep.subr.bf16.mxu1 %v22542_v32 }
 0x502   : > { %20257 = vmatpush3.bf16.msra.mxu1 %v20256_v62 }
 0x503   : > { %20258 = vmatprep.subr.bf16.mxu1 %v22542_v32 }
 0x506   : > { %20260 = vmatpush3.bf16.msra.mxu1 %v20259_v1 }
 0x507   : > { %20261 = vmatprep.subr.bf16.mxu1 %v22542_v32 }
 0x50a   : > { %20263 = vmatpush3.bf16.msra.mxu1 %v20262_v4  ;;  %v2672_v4 = vld [vmem:[%s27372_s5] sm:$0xf] }
 0x50b   : > { %20264 = vmatprep.subr.bf16.mxu1 %v22542_v32 }
 0x5c0   : > { %v2399_v11 = vpop.f32.mrb[22].mxu1 }
 0x5c1   : > { %v16773_v12 = vpop.f32.mrb[23].mxu1  ;;  %16807 = vmatmul.mubr.f32.vlgmr.msra.gmra.mrb[20].mxu1 %v2399_v11  ;;  %v20313_v11 = vpack.c.bf16 %v13846_v6, %v13845_v5 }
 0x5c2   : > { %20266 = vmatpush3.bf16.msra.mxu1 %v23177_v7  ;;  %16841 = vmatprep.mubr.msk.f32.mxu1 %vm22543_vm2, %v22544_v60  ;;  %v13847_v12 = vld [vmem:[%s27373_s6 + $0x90] sm:$0xff] }
 0x5c3   : > { %20267 = vmatprep.subr.bf16.mxu1 %v22542_v32  ;;  %v20316_v15 = vpack.c.bf16 %v13848_v14, %v13847_v12 }
 0x5c6   : > { %20269 = vmatpush3.bf16.msra.mxu1 %v23186_v13 }
 0x5c7   : > { %20270 = vmatprep.subr.bf16.mxu1 %v22542_v32 }
 0x5ca   : > { %20272 = vmatpush3.bf16.msra.mxu1 %v23198_v16 }
 0x5cb   : > { %20273 = vmatprep.subr.bf16.mxu1 %v22542_v32 }
 0x5ce   : > { %20275 = vmatpush3.bf16.msra.mxu1 %v23208_v19 }
 0x5cf   : > { %20276 = vmatprep.subr.bf16.mxu1 %v22542_v32 }
 0x5d2   : > { %20278 = vmatpush3.bf16.msra.mxu1 %v23218_v22 }
 0x5d3   : > { %20279 = vmatprep.subr.bf16.mxu1 %v22542_v32 }
 0x5d6   : > { %20281 = vmatpush3.bf16.msra.mxu1 %v23229_v25 }
 0x5d7   : > { %20282 = vmatprep.subr.bf16.mxu1 %v22542_v32 }
 0x5da   : > { %20284 = vmatpush3.bf16.msra.mxu1 %v23239_v28 }
 0x5db   : > { %20285 = vmatprep.subr.bf16.mxu1 %v22542_v32 }
 0x5de   : > { %20287 = vmatpush3.bf16.msra.mxu1 %v23249_v31 }
 0x5df   : > { %20288 = vmatprep.subr.bf16.mxu1 %v22542_v32 }
 0x694   : > { %v2486_v34 = vpop.f32.mrb[20].mxu1 }
 0x695   : > { %v2507_v36 = vrot.slane %v2486_v34, 4  ;;  %v16808_v39 = vpop.f32.mrb[21].mxu1 }
 0x696   : > { %v13857_v39 = vld [vmem:[%s27373_s6 + $0xe0] sm:$0xff] }
 0x697   : > { %v2508_v40 = vadd.f32 %v2507_v36, %v2486_v34 }
 0x699   : > { %v2509_v42 = vrot.slane %v2508_v40, 2 }
 0x69b   : > { %v2510_v43 = vadd.f32 %v2509_v42, %v2508_v40  ;;  %v13858_v40 = vld [vmem:[%s27373_s6 + $0xe8] sm:$0xff] }
 0x69c   : > { %v20331_v42 = vpack.c.bf16 %v13858_v40, %v13857_v39  ;;  %v2759_v39 = vld [vmem:[%s27373_s6 + $0x60] sm:$0xff]  ;;  %v2760_v40 = vld [vmem:[%s27373_s6 + $0x68] sm:$0xff] }
 0x69d   : > { %v2511_v44 = vrot.slane %v2510_v43, 1 }
 0x69f   : > { %v2512_v45 = vadd.f32 %v2511_v44, %v2510_v43  ;;  %v13859_v43 = vld [vmem:[%s27373_s6 + $0xf0] sm:$0xff]  ;;  %v13860_v44 = vld [vmem:[%s27373_s6 + $0xf8] sm:$0xff] }
 0x6a1   : > { %16842 = vmatmul.mubr.f32.vlgmr.msra.gmra.mrb[24].mxu1 %v2512_v45  ;;  %v20334_v45 = vpack.c.bf16 %v13860_v44, %v13859_v43  ;;  %v2761_v43 = vld [vmem:[%s27373_s6 + $0x70] sm:$0xff]  ;;  %v2762_v44 = vld [vmem:[%s27373_s6 + $0x78] sm:$0xff] }
 0x6a2   : > { %20290 = vmatpush3.bf16.msra.mxu1 %v23177_v7  ;;  %16876 = vmatprep.mubr.msk.f32.mxu1 %vm22543_vm2, %v22544_v60 }
 0x6a3   : > { %20291 = vmatprep.subr.bf16.mxu1 %v22542_v32 }
 0x6a6   : > { %20293 = vmatpush3.bf16.msra.mxu1 %v23186_v13 }
 0x6a7   : > { %20294 = vmatprep.subr.bf16.mxu1 %v22542_v32 }
 0x6aa   : > { %20296 = vmatpush3.bf16.msra.mxu1 %v23198_v16 }
 0x6ab   : > { %20297 = vmatprep.subr.bf16.mxu1 %v22542_v32 }
 0x6ae   : > { %20299 = vmatpush3.bf16.msra.mxu1 %v23208_v19 }
 0x6af   : > { %20300 = vmatprep.subr.bf16.mxu1 %v22542_v32 }
 0x6b2   : > { %20302 = vmatpush3.bf16.msra.mxu1 %v23218_v22 }
 0x6b3   : > { %20303 = vmatprep.subr.bf16.mxu1 %v22542_v32 }
 0x6b6   : > { %20305 = vmatpush3.bf16.msra.mxu1 %v23229_v25 }
 0x6b7   : > { %20306 = vmatprep.subr.bf16.mxu1 %v22542_v32 }
 0x6ba   : > { %20308 = vmatpush3.bf16.msra.mxu1 %v23239_v28 }
 0x6bb   : > { %20309 = vmatprep.subr.bf16.mxu1 %v22542_v32 }
 0x6be   : > { %20311 = vmatpush3.bf16.msra.mxu1 %v23249_v31 }
 0x6bf   : > { %16879 = vmatprep.subr.mxu1 %v22544_v60 }
 0x774   : > { %v2579_v37 = vpop.f32.mrb[24].mxu1 }
 0x775   : > { %v2586_v46 = vrot.slane %v2579_v37, %v22967_v8  ;;  %v16843_v47 = vpop.f32.mrb[25].mxu1  ;;  %v3158_v37 = vld [vmem:[%s27384_s17] sm:$0xff] }
 0x776   : > { %v3160_v47 = vld [vmem:[%s27384_s17 + $0x10] sm:$0xff] }
 0x777   : > { %v2587_v48 = vsub.f32 %v2486_v34, %v2586_v46  ;;  %v13856_v34 = vld [vmem:[%s27373_s6 + $0xd8] sm:$0xff]  ;;  %v3159_v46 = vld [vmem:[%s27384_s17 + $0x8] sm:$0xff] }
 0x778   : > { %v20328_v36 = vpack.c.bf16 %v13856_v34, %v13855_v30  ;;  %v2757_v30 = vld [vmem:[%s27373_s6 + $0x50] sm:$0xff]  ;;  %v2758_v34 = vld [vmem:[%s27373_s6 + $0x58] sm:$0xff] }
 0x779   : > { %v2588_v49 = vmul.f32 %v2587_v48, %v2587_v48 }
 0x77b   : > { %v2589_v51 = vrot.slane %v2588_v49, 4 }
 0x77d   : > { %v2590_v52 = vadd.f32 %v2589_v51, %v2588_v49  ;;  %v3161_v49 = vld [vmem:[%s27384_s17 + $0x18] sm:$0xff] }
 0x77e   : > { %v23367_v51 = vpack.c.bf16 %v3161_v49, %v3160_v47  ;;  %v13865_v49 = vld [vmem:[%s27373_s6 + $0x110] sm:$0xff] }
 0x77f   : > { %v2591_v54 = vrot.slane %v2590_v52, 2 }
 0x781   : > { %v2592_v55 = vadd.f32 %v2591_v54, %v2590_v52  ;;  %v3162_v52 = vld [vmem:[%s27384_s17 + $0x20] sm:$0xff]  ;;  %v3163_v54 = vld [vmem:[%s27384_s17 + $0x28] sm:$0xff] }
 0x783   : > { %v2593_v57 = vrot.slane %v2592_v55, 1 }
 0x785   : > { %v2594_v58 = vadd.f32 %v2593_v57, %v2592_v55  ;;  %v23377_v55 = vpack.c.bf16 %v3163_v54, %v3162_v52  ;;  %v3164_v57 = vld [vmem:[%s27384_s17 + $0x30] sm:$0xff]  ;;  %v13866_v52 = vld [vmem:[%s27373_s6 + $0x118] sm:$0xff] }
 0x786   : > { %v20364_v54 = vpack.c.bf16 %v13866_v52, %v13865_v49 }
 0x787   : > { %16877 = vmatmul.mubr.f32.vlgmr.msra.gmra.mrb[26].mxu1 %v2594_v58  ;;  %v3165_v58 = vld [vmem:[%s27384_s17 + $0x38] sm:$0xff] }
 0x788   : > { %16881 = vmatprep.mubr.msk.f32.mxu1 %vm22543_vm2, %v22544_v60 }
 0x85a   : > { %v2661_v61 = vpop.f32.mrb[26].mxu1 }
 0x85b   : > { %v2662_v62 = vadd.f32 1e-05, %v2661_v61  ;;  %v16878_v63 = vpop.f32.mrb[27].mxu1  ;;  %v23387_v61 = vpack.c.bf16 %v3165_v58, %v3164_v57  ;;  %v13867_v57 = vld [vmem:[%s27373_s6 + $0x120] sm:$0xff]  ;;  %v13868_v58 = vld [vmem:[%s27373_s6 + $0x128] sm:$0xff] }
 0x85c   : > { %v3167_v63 = vld [vmem:[%s27384_s17 + $0x48] sm:$0xff] }
 0x85d   : > { %22489 = vrsqrt.f32 %v2662_v62  ;;  %v3166_v62 = vld [vmem:[%s27384_s17 + $0x40] sm:$0xff] }
 0x867   : > { %v22490_v0 = vpop.eup %22489 }
 0x868   : > { %v2669_v1 = vrot.slane %v22490_v0, %v22967_v8  ;;  %v23397_v0 = vpack.c.bf16 %v3167_v63, %v3166_v62  ;;  %v20367_v62 = vpack.c.bf16 %v13868_v58, %v13867_v57  ;;  %v13869_v63 = vld [vmem:[%s27373_s6 + $0x130] sm:$0xff] }
 0x86a   : > { %v2670_v2 = vmul.f32 %v2669_v1, %v2587_v48  ;;  %v23361_v48 = vpack.c.bf16 %v3159_v46, %v3158_v37  ;;  %v2747_v1 = vld [vmem:[%s27373_s6] sm:$0xff]  ;;  %v13864_v46 = vld [vmem:[%s27373_s6 + $0x108] sm:$0xff] }
 0x86b   : > { %v13863_v37 = vld [vmem:[%s27373_s6 + $0x100] sm:$0xff] }
 0x86c   : > { %v2671_v3 = vmax.f32 %v2670_v2, 0.0  ;;  %v2748_v2 = vld [vmem:[%s27373_s6 + $0x8] sm:$0xff]  ;;  %v20361_v47 = vpack.c.bf16 %v13864_v46, %v13863_v37 }
 0x86d   : > { %v20337_v5 = vpack.c.bf16 %v2748_v2, %v2747_v1  ;;  %v13870_v1 = vld [vmem:[%s27373_s6 + $0x138] sm:$0xff] }
 0x86e   : > { %16880 = vmatpush3.msra.mxu1 %v2671_v3  ;;  %16960 = vmatpush3.msra.mxu0 %v2671_v3  ;;  %v20370_v2 = vpack.c.bf16 %v13870_v1, %v13869_v63 }
 0x86f   : > { %16882 = vmatmul.mubr.msk.f32.vlgmr.msra.gmra.mrb[28].mxu1 %vm2673_vm3, %v2672_v4  ;;  %16884 = vmatprep.subr.mxu1 %v22544_v60 }
 0x870   : > { %16885 = vmatpush3.msra.mxu1 %v2671_v3  ;;  %16886 = vmatprep.mubr.msk.f32.mxu1 %vm22543_vm2, %v22544_v60 }
 0x871   : > { %16962 = vmatmul.mubr.msk.f32.vlgmr.msra.gmra.mrb[4].mxu0 %vm2673_vm3, %v13861_v9  ;;  %20312 = vmatprep.subr.bf16.mxu1 %v22542_v32  ;;  %v2749_v9 = vld [vmem:[%s27373_s6 + $0x10] sm:$0xff] }
 0x872   : > { %20384 = vmatprep.subr.bf16.mxu0 %v22542_v32  ;;  %17031 = vmatprep.mubr.msk.f32.mxu0 %vm22543_vm2, %v22544_v60 }
 0x873   : > { %16887 = vmatmul.mubr.msk.f32.vlgmr.msra.gmra.mrb[30].mxu1 %vm2673_vm3, %v13843_v10  ;;  %20386 = vmatpush3.bf16.msra.mxu0 %v23361_v48  ;;  %v2750_v10 = vld [vmem:[%s27373_s6 + $0x18] sm:$0xff] }
 0x874   : > { %20314 = vmatpush3.bf16.msra.mxu1 %v20313_v11  ;;  %16921 = vmatprep.mubr.msk.f32.mxu1 %vm22543_vm2, %v22544_v60 }
 0x875   : > { %20315 = vmatprep.subr.bf16.mxu1 %v22542_v32  ;;  %20387 = vmatprep.subr.bf16.mxu0 %v22542_v32 }
 0x877   : > { %20389 = vmatpush3.bf16.msra.mxu0 %v23367_v51 }
 0x878   : > { %20317 = vmatpush3.bf16.msra.mxu1 %v20316_v15  ;;  %20390 = vmatprep.subr.bf16.mxu0 %v22542_v32  ;;  %v20340_v15 = vpack.c.bf16 %v2750_v10, %v2749_v9  ;;  %v13873_v9 = vld [vmem:[%s27373_s6 + $0x150] sm:$0xff]  ;;  %v13874_v10 = vld [vmem:[%s27373_s6 + $0x158] sm:$0xff] }
 0x879   : > { %20318 = vmatprep.subr.bf16.mxu1 %v22542_v32 }
 0x87b   : > { %20392 = vmatpush3.bf16.msra.mxu0 %v23377_v55 }
 0x87c   : > { %20320 = vmatpush3.bf16.msra.mxu1 %v20319_v20  ;;  %20393 = vmatprep.subr.bf16.mxu0 %v22542_v32  ;;  %v20343_v20 = vpack.c.bf16 %v2752_v18, %v2751_v17  ;;  %v13877_v17 = vld [vmem:[%s27373_s6 + $0x170] sm:$0xff]  ;;  %v13878_v18 = vld [vmem:[%s27373_s6 + $0x178] sm:$0xff] }
 0x87d   : > { %20321 = vmatprep.subr.bf16.mxu1 %v22542_v32 }
 0x87f   : > { %20395 = vmatpush3.bf16.msra.mxu0 %v23387_v61 }
 0x880   : > { %20323 = vmatpush3.bf16.msra.mxu1 %v20322_v24  ;;  %20396 = vmatprep.subr.bf16.mxu0 %v22542_v32  ;;  %v20346_v24 = vpack.c.bf16 %v2754_v23, %v2753_v21  ;;  %v3168_v21 = vld [vmem:[%s27384_s17 + $0x50] sm:$0xff]  ;;  %v3169_v23 = vld [vmem:[%s27384_s17 + $0x58] sm:$0xff] }
 0x881   : > { %20324 = vmatprep.subr.bf16.mxu1 %v22542_v32 }
 0x883   : > { %20398 = vmatpush3.bf16.msra.mxu0 %v23397_v0 }
 0x884   : > { %20326 = vmatpush3.bf16.msra.mxu1 %v20325_v29  ;;  %20399 = vmatprep.subr.bf16.mxu0 %v22542_v32  ;;  %v20349_v29 = vpack.c.bf16 %v2756_v27, %v2755_v26  ;;  %v3171_v26 = vld [vmem:[%s27384_s17 + $0x68] sm:$0xff] }
 0x885   : > { %20327 = vmatprep.subr.bf16.mxu1 %v22542_v32 }
 0x888   : > { %20329 = vmatpush3.bf16.msra.mxu1 %v20328_v36  ;;  %v20352_v36 = vpack.c.bf16 %v2758_v34, %v2757_v30  ;;  %v3173_v30 = vld [vmem:[%s27384_s17 + $0x78] sm:$0xff] }
 0x889   : > { %20330 = vmatprep.subr.bf16.mxu1 %v22542_v32 }
 0x88c   : > { %20332 = vmatpush3.bf16.msra.mxu1 %v20331_v42  ;;  %v20355_v42 = vpack.c.bf16 %v2760_v40, %v2759_v39 }
 0x88d   : > { %20333 = vmatprep.subr.bf16.mxu1 %v22542_v32 }
 0x890   : > { %20335 = vmatpush3.bf16.msra.mxu1 %v20334_v45  ;;  %v20358_v45 = vpack.c.bf16 %v2762_v44, %v2761_v43 }
 0x891   : > { %20336 = vmatprep.subr.bf16.mxu1 %v22542_v32 }
 0x942   : > { %v2743_v3 = vpop.f32.mrb[28].mxu1 }
 0x943   : > { %v16883_v4 = vpop.f32.mrb[29].mxu1 }
 0x944   : > { %v23408_v6 = vpop.f32.mrb[4].mxu0  ;;  %v13872_v4 = vld [vmem:[%s27373_s6 + $0x148] sm:$0xff] }
 0x945   : > { %v16963_v11 = vpop.f32.mrb[5].mxu0 }
 0x946   : > { %v2834_v12 = vpop.f32.mrb[30].mxu1  ;;  %v20376_v11 = vpack.c.bf16 %v13874_v10, %v13873_v9 }
 0x947   : > { %v16888_v14 = vpop.f32.mrb[31].mxu1  ;;  %16922 = vmatmul.mubr.f32.vlgmr.msra.gmra.mrb[32].mxu1 %v2834_v12  ;;  %v13875_v12 = vld [vmem:[%s27373_s6 + $0x160] sm:$0xff] }
 0x948   : > { %20338 = vmatpush3.bf16.msra.mxu1 %v20337_v5  ;;  %16956 = vmatprep.mubr.msk.f32.mxu1 %vm22543_vm2, %v22544_v60  ;;  %v13876_v14 = vld [vmem:[%s27373_s6 + $0x168] sm:$0xff] }
 0x949   : > { %20339 = vmatprep.subr.bf16.mxu1 %v22542_v32 }
 0x94c   : > { %20341 = vmatpush3.bf16.msra.mxu1 %v20340_v15  ;;  %v20379_v15 = vpack.c.bf16 %v13876_v14, %v13875_v12 }
 0x94d   : > { %20342 = vmatprep.subr.bf16.mxu1 %v22542_v32 }
 0x950   : > { %20344 = vmatpush3.bf16.msra.mxu1 %v20343_v20  ;;  %v20382_v20 = vpack.c.bf16 %v13878_v18, %v13877_v17  ;;  %v23582_v17 = vld [vmem:[%s27374_s7] sm:$0xf] }
 0x951   : > { %20345 = vmatprep.subr.bf16.mxu1 %v22542_v32  ;;  %v13884_v18 = vld [vmem:[%s27375_s8 + $0x80] sm:$0xff] }
 0x954   : > { %20347 = vmatpush3.bf16.msra.mxu1 %v20346_v24  ;;  %v23529_v24 = vpack.c.bf16 %v3169_v23, %v3168_v21  ;;  %v23597_v21 = vld [vmem:[%s27374_s7 + $0x8] sm:$0xf]  ;;  %v23609_v23 = vld [vmem:[%s27374_s7 + $0x4] sm:$0xf] }
 0x955   : > { %20348 = vmatprep.subr.bf16.mxu1 %v22542_v32 }
 0x956   : > { %20401 = vmatpush3.bf16.msra.mxu0 %v23529_v24 }
 0x957   : > { %20402 = vmatprep.subr.bf16.mxu0 %v22542_v32 }
 0x958   : > { %20350 = vmatpush3.bf16.msra.mxu1 %v20349_v29  ;;  %v3172_v29 = vld [vmem:[%s27384_s17 + $0x70] sm:$0xff] }
 0x959   : > { %20351 = vmatprep.subr.bf16.mxu1 %v22542_v32  ;;  %v23549_v34 = vpack.c.bf16 %v3173_v30, %v3172_v29  ;;  %v13887_v29 = vld [vmem:[%s27375_s8 + $0x98] sm:$0xff] }
 0x95c   : > { %20353 = vmatpush3.bf16.msra.mxu1 %v20352_v36 }
 0x95d   : > { %20354 = vmatprep.subr.bf16.mxu1 %v22542_v32 }
 0x960   : > { %20356 = vmatpush3.bf16.msra.mxu1 %v20355_v42 }
 0x961   : > { %20357 = vmatprep.subr.bf16.mxu1 %v22542_v32 }
 0x964   : > { %20359 = vmatpush3.bf16.msra.mxu1 %v20358_v45 }
 0x965   : > { %20360 = vmatprep.subr.bf16.mxu1 %v22542_v32 }
 0x967   : > { %16957 = vmatmul.mubr.f32.vlgmr.msra.gmra.mrb[32].mxu1 %v2743_v3  ;;  %v13871_v3 = vld [vmem:[%s27373_s6 + $0x140] sm:$0xff] }
 0x968   : > { %20362 = vmatpush3.bf16.msra.mxu1 %v20361_v47  ;;  %16996 = vmatprep.mubr.msk.f32.mxu1 %vm22543_vm2, %v22544_v60  ;;  %v20373_v5 = vpack.c.bf16 %v13872_v4, %v13871_v3 }
 0x969   : > { %20363 = vmatprep.subr.bf16.mxu1 %v22542_v32 }
 0x96c   : > { %20365 = vmatpush3.bf16.msra.mxu1 %v20364_v54 }
 0x96d   : > { %20366 = vmatprep.subr.bf16.mxu1 %v22542_v32 }
 0x970   : > { %20368 = vmatpush3.bf16.msra.mxu1 %v20367_v62 }
 0x971   : > { %20369 = vmatprep.subr.bf16.mxu1 %v22542_v32 }
 0x974   : > { %20371 = vmatpush3.bf16.msra.mxu1 %v20370_v2 }
 0x975   : > { %20372 = vmatprep.subr.bf16.mxu1 %v22542_v32 }
 0x978   : > { %20374 = vmatpush3.bf16.msra.mxu1 %v20373_v5 }
 0x979   : > { %20375 = vmatprep.subr.bf16.mxu1 %v22542_v32 }
 0x97c   : > { %20377 = vmatpush3.bf16.msra.mxu1 %v20376_v11 }
 0x97d   : > { %20378 = vmatprep.subr.bf16.mxu1 %v22542_v32 }
 0x980   : > { %20380 = vmatpush3.bf16.msra.mxu1 %v20379_v15 }
 0x981   : > { %20381 = vmatprep.subr.bf16.mxu1 %v22542_v32 }
 0x984   : > { %20383 = vmatpush3.bf16.msra.mxu1 %v20382_v20  ;;  %v13885_v20 = vld [vmem:[%s27375_s8 + $0x88] sm:$0xff] }
 0x985   : > { %17149 = vmatprep.subr.mxu1 %v22544_v60 }
 0x987   : > { %16997 = vmatmul.mubr.f32.vlgmr.msra.gmra.mrb[32].mxu1 %v23408_v6  ;;  %v3170_v6 = vld [vmem:[%s27384_s17 + $0x60] sm:$0xff] }
 0x988   : > { %17151 = vmatprep.mubr.msk.f32.mxu1 %vm22543_vm2, %v22544_v60  ;;  %v23539_v27 = vpack.c.bf16 %v3171_v26, %v3170_v6  ;;  %v20433_v6 = vpack.c.bf16 %v13885_v20, %v13884_v18  ;;  %v13886_v26 = vld [vmem:[%s27375_s8 + $0x90] sm:$0xff] }
 0x989   : > { %v20436_v30 = vpack.c.bf16 %v13887_v29, %v13886_v26  ;;  %v3424_v26 = vld [vmem:[%s27375_s8 + $0x20] sm:$0xff]  ;;  %v3425_v29 = vld [vmem:[%s27375_s8 + $0x28] sm:$0xff] }
 0x98a   : > { %20404 = vmatpush3.bf16.msra.mxu0 %v23539_v27 }
 0x98b   : > { %20405 = vmatprep.subr.bf16.mxu0 %v22542_v32 }
 0x98e   : > { %20407 = vmatpush3.bf16.msra.mxu0 %v23549_v34 }
 0x98f   : > { %20408 = vmatprep.subr.bf16.mxu0 %v22542_v32 }
 0xa5a   : > { %v3153_v36 = vpop.f32.mrb[32].mxu1 }
 0xa5b   : > { %v3175_v39 = vsel %vm3174_vm4, %v3153_v36, 0.0  ;;  %v16998_v40 = vpop.f32.mrb[33].mxu1 }
 0xa5c   : > { %v3176_v42 = vrot.slane %v3175_v39, 4 }
 0xa5e   : > { %v3177_v43 = vadd.f32 %v3176_v42, %v3175_v39  ;;  %v13889_v39 = vld [vmem:[%s27375_s8 + $0xa8] sm:$0xff]  ;;  %v13890_v42 = vld [vmem:[%s27375_s8 + $0xb0] sm:$0xff] }
 0xa60   : > { %v3178_v44 = vrot.slane %v3177_v43, 2 }
 0xa62   : > { %v3179_v45 = vadd.f32 %v3178_v44, %v3177_v43  ;;  %v13891_v43 = vld [vmem:[%s27375_s8 + $0xb8] sm:$0xff] }
 0xa63   : > { %v20442_v44 = vpack.c.bf16 %v13891_v43, %v13890_v42  ;;  %v3428_v42 = vld [vmem:[%s27375_s8 + $0x40] sm:$0xff]  ;;  %v3429_v43 = vld [vmem:[%s27375_s8 + $0x48] sm:$0xff] }
 0xa64   : > { %v3180_v37 = vrot.slane %v3179_v45, 1 }
 0xa66   : > { %v3181_v46 = vadd.f32 %v3180_v37, %v3179_v45  ;;  %v13892_v45 = vld [vmem:[%s27375_s8 + $0xc0] sm:$0xff]  ;;  %v13893_v37 = vld [vmem:[%s27375_s8 + $0xc8] sm:$0xff] }
 0xa68   : > { %17032 = vmatmul.mubr.f32.vlgmr.msra.gmra.mrb[6].mxu0 %v3181_v46  ;;  %v20445_v46 = vpack.c.bf16 %v13893_v37, %v13892_v45  ;;  %v3430_v45 = vld [vmem:[%s27375_s8 + $0x50] sm:$0xff]  ;;  %v3431_v37 = vld [vmem:[%s27375_s8 + $0x58] sm:$0xff] }
 0xa69   : > { %20410 = vmatpush3.bf16.msra.mxu0 %v23361_v48  ;;  %17066 = vmatprep.mubr.msk.f32.mxu0 %vm22543_vm2, %v22544_v60 }
 0xa6a   : > { %20411 = vmatprep.subr.bf16.mxu0 %v22542_v32 }
 0xa6d   : > { %20413 = vmatpush3.bf16.msra.mxu0 %v23367_v51 }
 0xa6e   : > { %20414 = vmatprep.subr.bf16.mxu0 %v22542_v32 }
 0xa71   : > { %20416 = vmatpush3.bf16.msra.mxu0 %v23377_v55 }
 0xa72   : > { %20417 = vmatprep.subr.bf16.mxu0 %v22542_v32 }
 0xa75   : > { %20419 = vmatpush3.bf16.msra.mxu0 %v23387_v61 }
 0xa76   : > { %20420 = vmatprep.subr.bf16.mxu0 %v22542_v32 }
 0xa79   : > { %20422 = vmatpush3.bf16.msra.mxu0 %v23397_v0 }
 0xa7a   : > { %20423 = vmatprep.subr.bf16.mxu0 %v22542_v32 }
 0xa7d   : > { %20425 = vmatpush3.bf16.msra.mxu0 %v23529_v24 }
 0xa7e   : > { %20426 = vmatprep.subr.bf16.mxu0 %v22542_v32 }
 0xa81   : > { %20428 = vmatpush3.bf16.msra.mxu0 %v23539_v27 }
 0xa82   : > { %20429 = vmatprep.subr.bf16.mxu0 %v22542_v32 }
 0xa85   : > { %20431 = vmatpush3.bf16.msra.mxu0 %v23549_v34 }
 0xa86   : > { %17069 = vmatprep.subr.mxu0 %v22544_v60 }
 0xb3b   : > { %v3248_v47 = vpop.f32.mrb[6].mxu0 }
 0xb3c   : > { %v3255_v49 = vrot.slane %v3248_v47, %v22967_v8  ;;  %v17033_v52 = vpop.f32.mrb[7].mxu0  ;;  %v13894_v47 = vld [vmem:[%s27375_s8 + $0xd0] sm:$0xff] }
 0xb3e   : > { %v3256_v54 = vsub.f32 %v3153_v36, %v3255_v49  ;;  %v13888_v36 = vld [vmem:[%s27375_s8 + $0xa0] sm:$0xff]  ;;  %v13895_v49 = vld [vmem:[%s27375_s8 + $0xd8] sm:$0xff] }
 0xb3f   : > { %v20439_v40 = vpack.c.bf16 %v13889_v39, %v13888_v36  ;;  %v20448_v52 = vpack.c.bf16 %v13895_v49, %v13894_v47  ;;  %v3426_v36 = vld [vmem:[%s27375_s8 + $0x30] sm:$0xff]  ;;  %v3427_v39 = vld [vmem:[%s27375_s8 + $0x38] sm:$0xff]  ;;  %v3432_v47 = vld [vmem:[%s27375_s8 + $0x60] sm:$0xff] }
 0xb40   : > { %v3257_v57 = vmul.f32 %v3256_v54, %v3256_v54  ;;  %v3433_v49 = vld [vmem:[%s27375_s8 + $0x68] sm:$0xff] }
 0xb42   : > { %v3258_v58 = vsel %vm3174_vm4, %v3257_v57, 0.0  ;;  %v13897_v57 = vld [vmem:[%s27375_s8 + $0xe8] sm:$0xff] }
 0xb43   : > { %v3259_v62 = vrot.slane %v3258_v58, 4 }
 0xb45   : > { %v3260_v63 = vadd.f32 %v3259_v62, %v3258_v58  ;;  %v13898_v62 = vld [vmem:[%s27375_s8 + $0xf0] sm:$0xff] }
 0xb47   : > { %v3261_v1 = vrot.slane %v3260_v63, 2 }
 0xb49   : > { %v3262_v2 = vadd.f32 %v3261_v1, %v3260_v63  ;;  %v13899_v63 = vld [vmem:[%s27375_s8 + $0xf8] sm:$0xff] }
 0xb4a   : > { %v20454_v1 = vpack.c.bf16 %v13899_v63, %v13898_v62  ;;  %v13903_v62 = vld [vmem:[%s27375_s8 + $0x100] sm:$0xff]  ;;  %v13904_v63 = vld [vmem:[%s27375_s8 + $0x108] sm:$0xff] }
 0xb4b   : > { %v3263_v3 = vrot.slane %v3262_v2, 1 }
 0xb4d   : > { %v3264_v4 = vadd.f32 %v3263_v3, %v3262_v2  ;;  %v3420_v2 = vld [vmem:[%s27375_s8] sm:$0xff]  ;;  %v3421_v3 = vld [vmem:[%s27375_s8 + $0x8] sm:$0xff] }
 0xb4f   : > { %17067 = vmatmul.mubr.f32.vlgmr.msra.gmra.mrb[8].mxu0 %v3264_v4 }
 0xb50   : > { %17071 = vmatprep.mubr.msk.f32.mxu0 %vm22543_vm2, %v22544_v60 }
 0xc22   : > { %v3331_v5 = vpop.f32.mrb[8].mxu0 }
 0xc23   : > { %v3332_v9 = vadd.f32 1e-05, %v3331_v5  ;;  %v17068_v10 = vpop.f32.mrb[9].mxu0 }
 0xc25   : > { %22491 = vrsqrt.f32 %v3332_v9  ;;  %v20457_v9 = vpack.c.bf16 %v3421_v3, %v3420_v2  ;;  %v13905_v2 = vld [vmem:[%s27375_s8 + $0x110] sm:$0xff]  ;;  %v13906_v3 = vld [vmem:[%s27375_s8 + $0x118] sm:$0xff] }
 0xc2f   : > { %v22492_v11 = vpop.eup %22491 }
 0xc30   : > { %v3339_v12 = vrot.slane %v22492_v11, %v22967_v8  ;;  %v3422_v11 = vld [vmem:[%s27375_s8 + $0x10] sm:$0xff] }
 0xc32   : > { %v3340_v14 = vmul.f32 %v3339_v12, %v3256_v54  ;;  %v13896_v54 = vld [vmem:[%s27375_s8 + $0xe0] sm:$0xff]  ;;  %v3423_v12 = vld [vmem:[%s27375_s8 + $0x18] sm:$0xff] }
 0xc33   : > { %v20451_v58 = vpack.c.bf16 %v13897_v57, %v13896_v54  ;;  %v3434_v54 = vld [vmem:[%s27375_s8 + $0x70] sm:$0xff]  ;;  %v3435_v57 = vld [vmem:[%s27375_s8 + $0x78] sm:$0xff] }
 0xc34   : > { %v23577_v15 = vmax.f32 %v3340_v14, 0.0 }
 0xc36   : > { %17070 = vmatpush3.msk.msra.mxu0 %vm3174_vm4, %v23577_v15  ;;  %17150 = vmatpush3.msk.msra.mxu1 %vm3174_vm4, %v23577_v15 }
 0xc37   : > { %17072 = vmatmul.mubr.msk.f32.vlgmr.msra.gmra.mrb[10].mxu0 %vm3343_vm5, %v23582_v17  ;;  %17074 = vmatprep.subr.mxu0 %v22544_v60 }
 0xc38   : > { %17075 = vmatpush3.msk.msra.mxu0 %vm3174_vm4, %v23577_v15  ;;  %17076 = vmatprep.mubr.msk.f32.mxu0 %vm22543_vm2, %v22544_v60 }
 0xc39   : > { %17152 = vmatmul.mubr.msk.f32.vlgmr.msra.gmra.mrb[34].mxu1 %vm3343_vm5, %v23597_v21  ;;  %20432 = vmatprep.subr.bf16.mxu0 %v22542_v32 }
 0xc3a   : > { %20504 = vmatprep.subr.bf16.mxu1 %v22542_v32  ;;  %17221 = vmatprep.mubr.msk.f32.mxu1 %vm22543_vm2, %v22544_v60 }
 0xc3b   : > { %17077 = vmatmul.mubr.msk.f32.vlgmr.msra.gmra.mrb[12].mxu0 %vm3343_vm5, %v23609_v23  ;;  %20506 = vmatpush3.bf16.msra.mxu1 %v23361_v48 }
 0xc3c   : > { %20434 = vmatpush3.bf16.msra.mxu0 %v20433_v6  ;;  %17111 = vmatprep.mubr.msk.f32.mxu0 %vm22543_vm2, %v22544_v60  ;;  %v20460_v6 = vpack.c.bf16 %v3423_v12, %v3422_v11  ;;  %v13908_v11 = vld [vmem:[%s27375_s8 + $0x128] sm:$0xff] }
 0xc3d   : > { %20435 = vmatprep.subr.bf16.mxu0 %v22542_v32  ;;  %20507 = vmatprep.subr.bf16.mxu1 %v22542_v32 }
 0xc3f   : > { %20509 = vmatpush3.bf16.msra.mxu1 %v23367_v51 }
 0xc40   : > { %20437 = vmatpush3.bf16.msra.mxu0 %v20436_v30  ;;  %20510 = vmatprep.subr.bf16.mxu1 %v22542_v32  ;;  %v20463_v30 = vpack.c.bf16 %v3425_v29, %v3424_v26  ;;  %v13913_v29 = vld [vmem:[%s27375_s8 + $0x150] sm:$0xff] }
 0xc41   : > { %20438 = vmatprep.subr.bf16.mxu0 %v22542_v32 }
 0xc43   : > { %20512 = vmatpush3.bf16.msra.mxu1 %v23377_v55 }
 0xc44   : > { %20440 = vmatpush3.bf16.msra.mxu0 %v20439_v40  ;;  %20513 = vmatprep.subr.bf16.mxu1 %v22542_v32  ;;  %v20466_v40 = vpack.c.bf16 %v3427_v39, %v3426_v36  ;;  %v13915_v39 = vld [vmem:[%s27375_s8 + $0x160] sm:$0xff] }
 0xc45   : > { %20441 = vmatprep.subr.bf16.mxu0 %v22542_v32 }
 0xc47   : > { %20515 = vmatpush3.bf16.msra.mxu1 %v23387_v61 }
 0xc48   : > { %20443 = vmatpush3.bf16.msra.mxu0 %v20442_v44  ;;  %20516 = vmatprep.subr.bf16.mxu1 %v22542_v32  ;;  %v20469_v44 = vpack.c.bf16 %v3429_v43, %v3428_v42  ;;  %v13917_v43 = vld [vmem:[%s27375_s8 + $0x170] sm:$0xff] }
 0xc49   : > { %20444 = vmatprep.subr.bf16.mxu0 %v22542_v32 }
 0xc4b   : > { %20518 = vmatpush3.bf16.msra.mxu1 %v23397_v0 }
 0xc4c   : > { %20446 = vmatpush3.bf16.msra.mxu0 %v20445_v46  ;;  %20519 = vmatprep.subr.bf16.mxu1 %v22542_v32  ;;  %v20472_v46 = vpack.c.bf16 %v3431_v37, %v3430_v45 }
 0xc4d   : > { %20447 = vmatprep.subr.bf16.mxu0 %v22542_v32 }
 0xc4f   : > { %20521 = vmatpush3.bf16.msra.mxu1 %v23529_v24 }
 0xc50   : > { %20449 = vmatpush3.bf16.msra.mxu0 %v20448_v52  ;;  %20522 = vmatprep.subr.bf16.mxu1 %v22542_v32  ;;  %v20475_v52 = vpack.c.bf16 %v3433_v49, %v3432_v47 }
 0xc51   : > { %20450 = vmatprep.subr.bf16.mxu0 %v22542_v32 }
 0xc53   : > { %20524 = vmatpush3.bf16.msra.mxu1 %v23539_v27 }
 0xc54   : > { %20452 = vmatpush3.bf16.msra.mxu0 %v20451_v58  ;;  %20525 = vmatprep.subr.bf16.mxu1 %v22542_v32  ;;  %v20478_v58 = vpack.c.bf16 %v3435_v57, %v3434_v54 }
 0xc55   : > { %20453 = vmatprep.subr.bf16.mxu0 %v22542_v32 }
 0xc57   : > { %20527 = vmatpush3.bf16.msra.mxu1 %v23549_v34 }
 0xc58   : > { %20528 = vmatprep.subr.bf16.mxu1 %v22542_v32  ;;  %20455 = vmatpush3.bf16.msra.mxu0 %v20454_v1  ;;  %v20481_v1 = vpack.c.bf16 %v13904_v63, %v13903_v62 }
 0xc59   : > { %20456 = vmatprep.subr.bf16.mxu0 %v22542_v32 }
 0xd0a   : > { %v3416_v4 = vpop.f32.mrb[10].mxu0 }
 0xd0b   : > { %v17073_v5 = vpop.f32.mrb[11].mxu0 }
 0xd0c   : > { %v23693_v10 = vpop.f32.mrb[34].mxu1  ;;  %v20484_v5 = vpack.c.bf16 %v13906_v3, %v13905_v2 }
 0xd0d   : > { %v17153_v14 = vpop.f32.mrb[35].mxu1 }
 0xd0e   : > { %v3507_v18 = vpop.f32.mrb[12].mxu0  ;;  %v13910_v14 = vld [vmem:[%s27375_s8 + $0x138] sm:$0xff] }
 0xd0f   : > { %v17078_v20 = vpop.f32.mrb[13].mxu0  ;;  %17112 = vmatmul.mubr.f32.vlgmr.msra.gmra.mrb[14].mxu0 %v3507_v18 }
 0xd10   : > { %20458 = vmatpush3.bf16.msra.mxu0 %v20457_v9  ;;  %17146 = vmatprep.mubr.msk.f32.mxu0 %vm22543_vm2, %v22544_v60  ;;  %v13907_v9 = vld [vmem:[%s27375_s8 + $0x120] sm:$0xff] }
 0xd11   : > { %20459 = vmatprep.subr.bf16.mxu0 %v22542_v32  ;;  %v20487_v12 = vpack.c.bf16 %v13908_v11, %v13907_v9  ;;  %v13911_v20 = vld [vmem:[%s27375_s8 + $0x140] sm:$0xff] }
 0xd14   : > { %20461 = vmatpush3.bf16.msra.mxu0 %v20460_v6  ;;  %v13912_v6 = vld [vmem:[%s27375_s8 + $0x148] sm:$0xff] }
 0xd15   : > { %20462 = vmatprep.subr.bf16.mxu0 %v22542_v32  ;;  %v20493_v26 = vpack.c.bf16 %v13912_v6, %v13911_v20 }
 0xd18   : > { %20464 = vmatpush3.bf16.msra.mxu0 %v20463_v30  ;;  %v13914_v30 = vld [vmem:[%s27375_s8 + $0x158] sm:$0xff] }
 0xd19   : > { %20465 = vmatprep.subr.bf16.mxu0 %v22542_v32  ;;  %v20496_v36 = vpack.c.bf16 %v13914_v30, %v13913_v29 }
 0xd1c   : > { %20467 = vmatpush3.bf16.msra.mxu0 %v20466_v40  ;;  %v13916_v40 = vld [vmem:[%s27375_s8 + $0x168] sm:$0xff] }
 0xd1d   : > { %20468 = vmatprep.subr.bf16.mxu0 %v22542_v32  ;;  %v20499_v42 = vpack.c.bf16 %v13916_v40, %v13915_v39  ;;  %v13939_v40 = vld [vmem:[%s27375_s8 + $0x200] sm:$0xff] }
 0xd20   : > { %20470 = vmatpush3.bf16.msra.mxu0 %v20469_v44  ;;  %v13918_v44 = vld [vmem:[%s27375_s8 + $0x178] sm:$0xff] }
 0xd21   : > { %20471 = vmatprep.subr.bf16.mxu0 %v22542_v32  ;;  %v20502_v45 = vpack.c.bf16 %v13918_v44, %v13917_v43  ;;  %v13941_v44 = vld [vmem:[%s27375_s8 + $0x210] sm:$0xff] }
 0xd24   : > { %20473 = vmatpush3.bf16.msra.mxu0 %v20472_v46 }
 0xd25   : > { %20474 = vmatprep.subr.bf16.mxu0 %v22542_v32 }
 0xd28   : > { %20476 = vmatpush3.bf16.msra.mxu0 %v20475_v52 }
 0xd29   : > { %20477 = vmatprep.subr.bf16.mxu0 %v22542_v32 }
 0xd2c   : > { %20479 = vmatpush3.bf16.msra.mxu0 %v20478_v58 }
 0xd2d   : > { %20480 = vmatprep.subr.bf16.mxu0 %v22542_v32 }
 0xd2f   : > { %17147 = vmatmul.mubr.f32.vlgmr.msra.gmra.mrb[14].mxu0 %v3416_v4  ;;  %v13909_v4 = vld [vmem:[%s27375_s8 + $0x130] sm:$0xff] }
 0xd30   : > { %20482 = vmatpush3.bf16.msra.mxu0 %v20481_v1  ;;  %17186 = vmatprep.mubr.msk.f32.mxu0 %vm22543_vm2, %v22544_v60  ;;  %v20490_v18 = vpack.c.bf16 %v13910_v14, %v13909_v4 }
 0xd31   : > { %20483 = vmatprep.subr.bf16.mxu0 %v22542_v32 }
 0xd34   : > { %20485 = vmatpush3.bf16.msra.mxu0 %v20484_v5 }
 0xd35   : > { %20486 = vmatprep.subr.bf16.mxu0 %v22542_v32 }
 0xd38   : > { %20488 = vmatpush3.bf16.msra.mxu0 %v20487_v12 }
 0xd39   : > { %20489 = vmatprep.subr.bf16.mxu0 %v22542_v32 }
 0xd3c   : > { %20491 = vmatpush3.bf16.msra.mxu0 %v20490_v18 }
 0xd3d   : > { %20492 = vmatprep.subr.bf16.mxu0 %v22542_v32 }
 0xd40   : > { %20494 = vmatpush3.bf16.msra.mxu0 %v20493_v26 }
 0xd41   : > { %20495 = vmatprep.subr.bf16.mxu0 %v22542_v32 }
 0xd44   : > { %20497 = vmatpush3.bf16.msra.mxu0 %v20496_v36 }
 0xd45   : > { %20498 = vmatprep.subr.bf16.mxu0 %v22542_v32 }
 0xd48   : > { %20500 = vmatpush3.bf16.msra.mxu0 %v20499_v42  ;;  %v13940_v42 = vld [vmem:[%s27375_s8 + $0x208] sm:$0xff] }
 0xd49   : > { %20501 = vmatprep.subr.bf16.mxu0 %v22542_v32  ;;  %v20553_v43 = vpack.c.bf16 %v13940_v42, %v13939_v40 }
 0xd4c   : > { %20503 = vmatpush3.bf16.msra.mxu0 %v20502_v45  ;;  %v13942_v45 = vld [vmem:[%s27375_s8 + $0x218] sm:$0xff] }
 0xd4d   : > { %17339 = vmatprep.subr.mxu0 %v22544_v60 }
 0xd4f   : > { %17187 = vmatmul.mubr.f32.vlgmr.msra.gmra.mrb[14].mxu0 %v23693_v10 }
 0xd50   : > { %17341 = vmatprep.mubr.msk.f32.mxu0 %vm22543_vm2, %v22544_v60 }
 0xe22   : > { %v3826_v37 = vpop.f32.mrb[14].mxu0 }
 0xe23   : > { %v3831_v46 = vsel %vm3174_vm4, %v3826_v37, 0.0  ;;  %v17188_v47 = vpop.f32.mrb[15].mxu0 }
 0xe24   : > { %v3832_v49 = vrot.slane %v3831_v46, 4  ;;  %v13944_v47 = vld [vmem:[%s27375_s8 + $0x228] sm:$0xff] }
 0xe26   : > { %v3833_v52 = vadd.f32 %v3832_v49, %v3831_v46  ;;  %v13943_v46 = vld [vmem:[%s27375_s8 + $0x220] sm:$0xff] }
 0xe27   : > { %v20559_v49 = vpack.c.bf16 %v13944_v47, %v13943_v46  ;;  %v13927_v46 = vld [vmem:[%s27375_s8 + $0x1b0] sm:$0xff]  ;;  %v13928_v47 = vld [vmem:[%s27375_s8 + $0x1b8] sm:$0xff] }
 0xe28   : > { %v3834_v54 = vrot.slane %v3833_v52, 2 }
 0xe2a   : > { %v3835_v57 = vadd.f32 %v3834_v54, %v3833_v52  ;;  %v13945_v52 = vld [vmem:[%s27375_s8 + $0x230] sm:$0xff]  ;;  %v13946_v54 = vld [vmem:[%s27375_s8 + $0x238] sm:$0xff] }
 0xe2c   : > { %v3836_v58 = vrot.slane %v3835_v57, 1 }
 0xe2e   : > { %v3837_v62 = vadd.f32 %v3836_v58, %v3835_v57  ;;  %v20562_v57 = vpack.c.bf16 %v13946_v54, %v13945_v52  ;;  %v13947_v58 = vld [vmem:[%s27375_s8 + $0x240] sm:$0xff]  ;;  %v13930_v54 = vld [vmem:[%s27375_s8 + $0x1c8] sm:$0xff] }
 0xe2f   : > { %v13929_v52 = vld [vmem:[%s27375_s8 + $0x1c0] sm:$0xff] }
 0xe30   : > { %17222 = vmatmul.mubr.f32.vlgmr.msra.gmra.mrb[36].mxu1 %v3837_v62  ;;  %v13948_v62 = vld [vmem:[%s27375_s8 + $0x248] sm:$0xff] }
 0xe31   : > { %20530 = vmatpush3.bf16.msra.mxu1 %v23361_v48  ;;  %17256 = vmatprep.mubr.msk.f32.mxu1 %vm22543_vm2, %v22544_v60 }
 0xe32   : > { %20531 = vmatprep.subr.bf16.mxu1 %v22542_v32 }
 0xe35   : > { %20533 = vmatpush3.bf16.msra.mxu1 %v23367_v51 }
 0xe36   : > { %20534 = vmatprep.subr.bf16.mxu1 %v22542_v32 }
 0xe39   : > { %20536 = vmatpush3.bf16.msra.mxu1 %v23377_v55 }
 0xe3a   : > { %20537 = vmatprep.subr.bf16.mxu1 %v22542_v32 }
 0xe3d   : > { %20539 = vmatpush3.bf16.msra.mxu1 %v23387_v61 }
 0xe3e   : > { %20540 = vmatprep.subr.bf16.mxu1 %v22542_v32 }
 0xe41   : > { %20542 = vmatpush3.bf16.msra.mxu1 %v23397_v0 }
 0xe42   : > { %20543 = vmatprep.subr.bf16.mxu1 %v22542_v32 }
 0xe45   : > { %20545 = vmatpush3.bf16.msra.mxu1 %v23529_v24 }
 0xe46   : > { %20546 = vmatprep.subr.bf16.mxu1 %v22542_v32 }
 0xe49   : > { %20548 = vmatpush3.bf16.msra.mxu1 %v23539_v27 }
 0xe4a   : > { %20549 = vmatprep.subr.bf16.mxu1 %v22542_v32 }
 0xe4d   : > { %20551 = vmatpush3.bf16.msra.mxu1 %v23549_v34 }
 0xe4e   : > { %17259 = vmatprep.subr.mxu1 %v22544_v60 }
 0xf03   : > { %v3904_v10 = vpop.f32.mrb[36].mxu1 }
 0xf04   : > { %v3911_v63 = vrot.slane %v3904_v10, %v22967_v8  ;;  %v17223_v1 = vpop.f32.mrb[37].mxu1  ;;  %v20565_v10 = vpack.c.bf16 %v13948_v62, %v13947_v58  ;;  %v13931_v58 = vld [vmem:[%s27375_s8 + $0x1d0] sm:$0xff]  ;;  %v13932_v62 = vld [vmem:[%s27375_s8 + $0x1d8] sm:$0xff] }
 0xf05   : > { %v13950_v1 = vld [vmem:[%s27375_s8 + $0x258] sm:$0xff] }
 0xf06   : > { %v3912_v2 = vsub.f32 %v3826_v37, %v3911_v63  ;;  %v20556_v37 = vpack.c.bf16 %v13942_v45, %v13941_v44  ;;  %v13949_v63 = vld [vmem:[%s27375_s8 + $0x250] sm:$0xff]  ;;  %v13925_v44 = vld [vmem:[%s27375_s8 + $0x1a0] sm:$0xff]  ;;  %v13926_v45 = vld [vmem:[%s27375_s8 + $0x1a8] sm:$0xff] }
 0xf08   : > { %v3913_v3 = vmul.f32 %v3912_v2, %v3912_v2 }
 0xf0a   : > { %v3914_v5 = vsel %vm3174_vm4, %v3913_v3, 0.0  ;;  %v13951_v3 = vld [vmem:[%s27375_s8 + $0x260] sm:$0xff] }
 0xf0b   : > { %v3915_v9 = vrot.slane %v3914_v5, 4 }
 0xf0d   : > { %v3916_v11 = vadd.f32 %v3915_v9, %v3914_v5  ;;  %v13952_v5 = vld [vmem:[%s27375_s8 + $0x268] sm:$0xff] }
 0xf0e   : > { %v20571_v9 = vpack.c.bf16 %v13952_v5, %v13951_v3  ;;  %v13935_v3 = vld [vmem:[%s27375_s8 + $0x1f0] sm:$0xff]  ;;  %v13936_v5 = vld [vmem:[%s27375_s8 + $0x1f8] sm:$0xff] }
 0xf0f   : > { %v3917_v12 = vrot.slane %v3916_v11, 2 }
 0xf11   : > { %v3918_v4 = vadd.f32 %v3917_v12, %v3916_v11  ;;  %v13953_v11 = vld [vmem:[%s27375_s8 + $0x270] sm:$0xff]  ;;  %v13954_v12 = vld [vmem:[%s27375_s8 + $0x278] sm:$0xff] }
 0xf13   : > { %v3919_v14 = vrot.slane %v3918_v4, 1 }
 0xf15   : > { %v3920_v18 = vadd.f32 %v3919_v14, %v3918_v4  ;;  %v20574_v4 = vpack.c.bf16 %v13954_v12, %v13953_v11  ;;  %v13921_v14 = vld [vmem:[%s27375_s8 + $0x180] sm:$0xff]  ;;  %v13958_v12 = vld [vmem:[%s27375_s8 + $0x288] sm:$0xff] }
 0xf16   : > { %v13957_v11 = vld [vmem:[%s27375_s8 + $0x280] sm:$0xff] }
 0xf17   : > { %17257 = vmatmul.mubr.f32.vlgmr.msra.gmra.mrb[38].mxu1 %v3920_v18  ;;  %v13922_v18 = vld [vmem:[%s27375_s8 + $0x188] sm:$0xff] }
 0xf18   : > { %17261 = vmatprep.mubr.msk.f32.mxu1 %vm22543_vm2, %v22544_v60 }
 0xfea   : > { %v3987_v20 = vpop.f32.mrb[38].mxu1 }
 0xfeb   : > { %v3988_v6 = vadd.f32 1e-05, %v3987_v20  ;;  %v17258_v26 = vpop.f32.mrb[39].mxu1 }
 0xfec   : > { %v20577_v26 = vpack.c.bf16 %v13922_v18, %v13921_v14  ;;  %v13959_v14 = vld [vmem:[%s27375_s8 + $0x290] sm:$0xff]  ;;  %v13960_v18 = vld [vmem:[%s27375_s8 + $0x298] sm:$0xff] }
 0xfed   : > { %22493 = vrsqrt.f32 %v3988_v6 }
 0xff7   : > { %v22494_v29 = vpop.eup %22493 }
 0xff8   : > { %v3995_v30 = vrot.slane %v22494_v29, %v22967_v8 }
 0xffa   : > { %v3996_v36 = vmul.f32 %v3995_v30, %v3912_v2  ;;  %v20568_v2 = vpack.c.bf16 %v13950_v1, %v13949_v63  ;;  %v13923_v30 = vld [vmem:[%s27375_s8 + $0x190] sm:$0xff]  ;;  %v13933_v63 = vld [vmem:[%s27375_s8 + $0x1e0] sm:$0xff]  ;;  %v13934_v1 = vld [vmem:[%s27375_s8 + $0x1e8] sm:$0xff] }
 0xffc   : > { %v3997_v39 = vmax.f32 %v3996_v36, 0.0  ;;  %v13924_v36 = vld [vmem:[%s27375_s8 + $0x198] sm:$0xff] }
 0xffe   : > { %17260 = vmatpush3.msk.msra.mxu1 %vm3174_vm4, %v3997_v39  ;;  %17340 = vmatpush3.msk.msra.mxu0 %vm3174_vm4, %v3997_v39 }
 0xfff   : > { %17262 = vmatmul.mubr.msk.f32.vlgmr.msra.gmra.mrb[40].mxu1 %vm3343_vm5, %v23582_v17  ;;  %17264 = vmatprep.subr.mxu1 %v22544_v60 }
0x1000   : > { %17265 = vmatpush3.msk.msra.mxu1 %vm3174_vm4, %v3997_v39  ;;  %17266 = vmatprep.mubr.msk.f32.mxu1 %vm22543_vm2, %v22544_v60 }
0x1001   : > { %17342 = vmatmul.mubr.msk.f32.vlgmr.msra.gmra.mrb[16].mxu0 %vm3343_vm5, %v23597_v21  ;;  %20552 = vmatprep.subr.bf16.mxu1 %v22542_v32 }
0x1002   : > { %20624 = vmatprep.subr.bf16.mxu0 %v22542_v32  ;;  %17411 = vmatprep.mubr.msk.f32.mxu0 %vm22543_vm2, %v22544_v60 }
0x1003   : > { %17267 = vmatmul.mubr.msk.f32.vlgmr.msra.gmra.mrb[42].mxu1 %vm3343_vm5, %v23609_v23  ;;  %20626 = vmatpush3.bf16.msra.mxu0 %v23361_v48 }
0x1004   : > { %20554 = vmatpush3.bf16.msra.mxu1 %v20553_v43  ;;  %17301 = vmatprep.mubr.msk.f32.mxu1 %vm22543_vm2, %v22544_v60  ;;  %v20580_v43 = vpack.c.bf16 %v13924_v36, %v13923_v30  ;;  %v13962_v30 = vld [vmem:[%s27375_s8 + $0x2a8] sm:$0xff] }
0x1005   : > { %20555 = vmatprep.subr.bf16.mxu1 %v22542_v32  ;;  %20627 = vmatprep.subr.bf16.mxu0 %v22542_v32 }
0x1007   : > { %20629 = vmatpush3.bf16.msra.mxu0 %v23367_v51 }
0x1008   : > { %20557 = vmatpush3.bf16.msra.mxu1 %v20556_v37  ;;  %20630 = vmatprep.subr.bf16.mxu0 %v22542_v32  ;;  %v20583_v37 = vpack.c.bf16 %v13926_v45, %v13925_v44  ;;  %v13967_v45 = vld [vmem:[%s27375_s8 + $0x2d0] sm:$0xff] }
0x1009   : > { %20558 = vmatprep.subr.bf16.mxu1 %v22542_v32 }
0x100b   : > { %20632 = vmatpush3.bf16.msra.mxu0 %v23377_v55 }
0x100c   : > { %20560 = vmatpush3.bf16.msra.mxu1 %v20559_v49  ;;  %20633 = vmatprep.subr.bf16.mxu0 %v22542_v32  ;;  %v20586_v49 = vpack.c.bf16 %v13928_v47, %v13927_v46  ;;  %v13969_v47 = vld [vmem:[%s27375_s8 + $0x2e0] sm:$0xff] }
0x100d   : > { %20561 = vmatprep.subr.bf16.mxu1 %v22542_v32 }
0x100f   : > { %20635 = vmatpush3.bf16.msra.mxu0 %v23387_v61 }
0x1010   : > { %20563 = vmatpush3.bf16.msra.mxu1 %v20562_v57  ;;  %20636 = vmatprep.subr.bf16.mxu0 %v22542_v32  ;;  %v20589_v57 = vpack.c.bf16 %v13930_v54, %v13929_v52  ;;  %v13971_v54 = vld [vmem:[%s27375_s8 + $0x2f0] sm:$0xff] }
0x1011   : > { %20564 = vmatprep.subr.bf16.mxu1 %v22542_v32 }
0x1013   : > { %20638 = vmatpush3.bf16.msra.mxu0 %v23397_v0 }
0x1014   : > { %20566 = vmatpush3.bf16.msra.mxu1 %v20565_v10  ;;  %20639 = vmatprep.subr.bf16.mxu0 %v22542_v32  ;;  %v20592_v10 = vpack.c.bf16 %v13932_v62, %v13931_v58 }
0x1015   : > { %20567 = vmatprep.subr.bf16.mxu1 %v22542_v32 }
0x1017   : > { %20641 = vmatpush3.bf16.msra.mxu0 %v23529_v24 }
0x1018   : > { %20569 = vmatpush3.bf16.msra.mxu1 %v20568_v2  ;;  %20642 = vmatprep.subr.bf16.mxu0 %v22542_v32  ;;  %v20595_v2 = vpack.c.bf16 %v13934_v1, %v13933_v63 }
0x1019   : > { %20570 = vmatprep.subr.bf16.mxu1 %v22542_v32 }
0x101b   : > { %20644 = vmatpush3.bf16.msra.mxu0 %v23539_v27 }
0x101c   : > { %20572 = vmatpush3.bf16.msra.mxu1 %v20571_v9  ;;  %20645 = vmatprep.subr.bf16.mxu0 %v22542_v32  ;;  %v20598_v9 = vpack.c.bf16 %v13936_v5, %v13935_v3 }
0x101d   : > { %20573 = vmatprep.subr.bf16.mxu1 %v22542_v32 }
0x101f   : > { %20647 = vmatpush3.bf16.msra.mxu0 %v23549_v34 }
0x1020   : > { %20648 = vmatprep.subr.bf16.mxu0 %v22542_v32  ;;  %20575 = vmatpush3.bf16.msra.mxu1 %v20574_v4  ;;  %v20601_v4 = vpack.c.bf16 %v13958_v12, %v13957_v11 }
0x1021   : > { %20576 = vmatprep.subr.bf16.mxu1 %v22542_v32 }
0x10d2   : > { %v4067_v20 = vpop.f32.mrb[40].mxu1 }
0x10d3   : > { %v17263_v6 = vpop.f32.mrb[41].mxu1 }
0x10d4   : > { %v23928_v29 = vpop.f32.mrb[16].mxu0  ;;  %v20604_v6 = vpack.c.bf16 %v13960_v18, %v13959_v14 }
0x10d5   : > { %v17343_v39 = vpop.f32.mrb[17].mxu0 }
0x10d6   : > { %v4154_v40 = vpop.f32.mrb[42].mxu1  ;;  %v13964_v39 = vld [vmem:[%s27375_s8 + $0x2b8] sm:$0xff] }
0x10d7   : > { %v17268_v42 = vpop.f32.mrb[43].mxu1  ;;  %17302 = vmatmul.mubr.f32.vlgmr.msra.gmra.mrb[44].mxu1 %v4154_v40 }
0x10d8   : > { %20578 = vmatpush3.bf16.msra.mxu1 %v20577_v26  ;;  %17336 = vmatprep.mubr.msk.f32.mxu1 %vm22543_vm2, %v22544_v60  ;;  %v13961_v26 = vld [vmem:[%s27375_s8 + $0x2a0] sm:$0xff] }
0x10d9   : > { %20579 = vmatprep.subr.bf16.mxu1 %v22542_v32  ;;  %v20607_v36 = vpack.c.bf16 %v13962_v30, %v13961_v26  ;;  %v13965_v42 = vld [vmem:[%s27375_s8 + $0x2c0] sm:$0xff] }
0x10dc   : > { %20581 = vmatpush3.bf16.msra.mxu1 %v20580_v43  ;;  %v13966_v43 = vld [vmem:[%s27375_s8 + $0x2c8] sm:$0xff] }
0x10dd   : > { %20582 = vmatprep.subr.bf16.mxu1 %v22542_v32  ;;  %v20613_v44 = vpack.c.bf16 %v13966_v43, %v13965_v42 }
0x10e0   : > { %20584 = vmatpush3.bf16.msra.mxu1 %v20583_v37  ;;  %v13968_v37 = vld [vmem:[%s27375_s8 + $0x2d8] sm:$0xff] }
0x10e1   : > { %20585 = vmatprep.subr.bf16.mxu1 %v22542_v32  ;;  %v20616_v46 = vpack.c.bf16 %v13968_v37, %v13967_v45 }
0x10e4   : > { %20587 = vmatpush3.bf16.msra.mxu1 %v20586_v49  ;;  %v13970_v49 = vld [vmem:[%s27375_s8 + $0x2e8] sm:$0xff] }
0x10e5   : > { %20588 = vmatprep.subr.bf16.mxu1 %v22542_v32  ;;  %v20619_v52 = vpack.c.bf16 %v13970_v49, %v13969_v47  ;;  %v13993_v49 = vld [vmem:[%s27375_s8 + $0x380] sm:$0xff] }
0x10e8   : > { %20590 = vmatpush3.bf16.msra.mxu1 %v20589_v57  ;;  %v13972_v57 = vld [vmem:[%s27375_s8 + $0x2f8] sm:$0xff] }
0x10e9   : > { %20591 = vmatprep.subr.bf16.mxu1 %v22542_v32  ;;  %v20622_v58 = vpack.c.bf16 %v13972_v57, %v13971_v54  ;;  %v13995_v54 = vld [vmem:[%s27375_s8 + $0x390] sm:$0xff]  ;;  %v13997_v57 = vld [vmem:[%s27375_s8 + $0x3a0] sm:$0xff] }
0x10ec   : > { %20593 = vmatpush3.bf16.msra.mxu1 %v20592_v10 }
0x10ed   : > { %20594 = vmatprep.subr.bf16.mxu1 %v22542_v32 }
0x10f0   : > { %20596 = vmatpush3.bf16.msra.mxu1 %v20595_v2 }
0x10f1   : > { %20597 = vmatprep.subr.bf16.mxu1 %v22542_v32 }
0x10f4   : > { %20599 = vmatpush3.bf16.msra.mxu1 %v20598_v9 }
0x10f5   : > { %20600 = vmatprep.subr.bf16.mxu1 %v22542_v32 }
0x10f7   : > { %17337 = vmatmul.mubr.f32.vlgmr.msra.gmra.mrb[44].mxu1 %v4067_v20  ;;  %v13963_v20 = vld [vmem:[%s27375_s8 + $0x2b0] sm:$0xff] }
0x10f8   : > { %20602 = vmatpush3.bf16.msra.mxu1 %v20601_v4  ;;  %17376 = vmatprep.mubr.msk.f32.mxu1 %vm22543_vm2, %v22544_v60  ;;  %v20610_v40 = vpack.c.bf16 %v13964_v39, %v13963_v20 }
0x10f9   : > { %20603 = vmatprep.subr.bf16.mxu1 %v22542_v32 }
0x10fc   : > { %20605 = vmatpush3.bf16.msra.mxu1 %v20604_v6 }
0x10fd   : > { %20606 = vmatprep.subr.bf16.mxu1 %v22542_v32 }
0x1100   : > { %20608 = vmatpush3.bf16.msra.mxu1 %v20607_v36 }
0x1101   : > { %20609 = vmatprep.subr.bf16.mxu1 %v22542_v32 }
0x1104   : > { %20611 = vmatpush3.bf16.msra.mxu1 %v20610_v40 }
0x1105   : > { %20612 = vmatprep.subr.bf16.mxu1 %v22542_v32 }
0x1108   : > { %20614 = vmatpush3.bf16.msra.mxu1 %v20613_v44 }
0x1109   : > { %20615 = vmatprep.subr.bf16.mxu1 %v22542_v32 }
0x110c   : > { %20617 = vmatpush3.bf16.msra.mxu1 %v20616_v46 }
0x110d   : > { %20618 = vmatprep.subr.bf16.mxu1 %v22542_v32 }
0x1110   : > { %20620 = vmatpush3.bf16.msra.mxu1 %v20619_v52  ;;  %v13994_v52 = vld [vmem:[%s27375_s8 + $0x388] sm:$0xff] }
0x1111   : > { %20621 = vmatprep.subr.bf16.mxu1 %v22542_v32 }
0x1114   : > { %20623 = vmatpush3.bf16.msra.mxu1 %v20622_v58  ;;  %v13998_v58 = vld [vmem:[%s27375_s8 + $0x3a8] sm:$0xff] }
0x1115   : > { %17529 = vmatprep.subr.mxu1 %v22544_v60 }
0x1117   : > { %17377 = vmatmul.mubr.f32.vlgmr.msra.gmra.mrb[44].mxu1 %v23928_v29 }
0x1118   : > { %17531 = vmatprep.mubr.msk.f32.mxu1 %vm22543_vm2, %v22544_v60 }
0x11ea   : > { %v4468_v62 = vpop.f32.mrb[44].mxu1 }
0x11eb   : > { %v4473_v10 = vsel %vm3174_vm4, %v4468_v62, 0.0  ;;  %v17378_v63 = vpop.f32.mrb[45].mxu1 }
0x11ec   : > { %v4474_v1 = vrot.slane %v4473_v10, 4 }
0x11ee   : > { %v4475_v2 = vadd.f32 %v4474_v1, %v4473_v10  ;;  %v14000_v10 = vld [vmem:[%s27375_s8 + $0x3b8] sm:$0xff]  ;;  %v14001_v1 = vld [vmem:[%s27375_s8 + $0x3c0] sm:$0xff] }
0x11f0   : > { %v4476_v3 = vrot.slane %v4475_v2, 2 }
0x11f2   : > { %v4477_v5 = vadd.f32 %v4476_v3, %v4475_v2  ;;  %v14002_v2 = vld [vmem:[%s27375_s8 + $0x3c8] sm:$0xff] }
0x11f3   : > { %v20685_v3 = vpack.c.bf16 %v14002_v2, %v14001_v1  ;;  %v13987_v1 = vld [vmem:[%s27375_s8 + $0x360] sm:$0xff]  ;;  %v13988_v2 = vld [vmem:[%s27375_s8 + $0x368] sm:$0xff] }
0x11f4   : > { %v4478_v9 = vrot.slane %v4477_v5, 1 }
0x11f6   : > { %v4479_v11 = vadd.f32 %v4478_v9, %v4477_v5  ;;  %v14003_v5 = vld [vmem:[%s27375_s8 + $0x3d0] sm:$0xff]  ;;  %v14004_v9 = vld [vmem:[%s27375_s8 + $0x3d8] sm:$0xff] }
0x11f8   : > { %17412 = vmatmul.mubr.f32.vlgmr.msra.gmra.mrb[18].mxu0 %v4479_v11  ;;  %v20688_v11 = vpack.c.bf16 %v14004_v9, %v14003_v5  ;;  %v13989_v5 = vld [vmem:[%s27375_s8 + $0x370] sm:$0xff]  ;;  %v13990_v9 = vld [vmem:[%s27375_s8 + $0x378] sm:$0xff] }
0x11f9   : > { %20650 = vmatpush3.bf16.msra.mxu0 %v23361_v48  ;;  %17446 = vmatprep.mubr.msk.f32.mxu0 %vm22543_vm2, %v22544_v60 }
0x11fa   : > { %20651 = vmatprep.subr.bf16.mxu0 %v22542_v32 }
0x11fd   : > { %20653 = vmatpush3.bf16.msra.mxu0 %v23367_v51 }
0x11fe   : > { %20654 = vmatprep.subr.bf16.mxu0 %v22542_v32 }
0x1201   : > { %20656 = vmatpush3.bf16.msra.mxu0 %v23377_v55 }
0x1202   : > { %20657 = vmatprep.subr.bf16.mxu0 %v22542_v32 }
0x1205   : > { %20659 = vmatpush3.bf16.msra.mxu0 %v23387_v61 }
0x1206   : > { %20660 = vmatprep.subr.bf16.mxu0 %v22542_v32 }
0x1209   : > { %20662 = vmatpush3.bf16.msra.mxu0 %v23397_v0 }
0x120a   : > { %20663 = vmatprep.subr.bf16.mxu0 %v22542_v32 }
0x120d   : > { %20665 = vmatpush3.bf16.msra.mxu0 %v23529_v24 }
0x120e   : > { %20666 = vmatprep.subr.bf16.mxu0 %v22542_v32 }
0x1211   : > { %20668 = vmatpush3.bf16.msra.mxu0 %v23539_v27 }
0x1212   : > { %20669 = vmatprep.subr.bf16.mxu0 %v22542_v32 }
0x1215   : > { %20671 = vmatpush3.bf16.msra.mxu0 %v23549_v34 }
0x1216   : > { %17449 = vmatprep.subr.mxu0 %v22544_v60 }
0x12cb   : > { %v4546_v29 = vpop.f32.mrb[18].mxu0 }
0x12cc   : > { %v4553_v12 = vrot.slane %v4546_v29, %v22967_v8  ;;  %v17413_v4 = vpop.f32.mrb[19].mxu0  ;;  %v14005_v29 = vld [vmem:[%s27375_s8 + $0x3e0] sm:$0xff] }
0x12ce   : > { %v4554_v14 = vsub.f32 %v4468_v62, %v4553_v12  ;;  %v13999_v62 = vld [vmem:[%s27375_s8 + $0x3b0] sm:$0xff]  ;;  %v14006_v12 = vld [vmem:[%s27375_s8 + $0x3e8] sm:$0xff] }
0x12cf   : > { %v20682_v63 = vpack.c.bf16 %v14000_v10, %v13999_v62  ;;  %v20691_v4 = vpack.c.bf16 %v14006_v12, %v14005_v29  ;;  %v13985_v62 = vld [vmem:[%s27375_s8 + $0x350] sm:$0xff]  ;;  %v13986_v10 = vld [vmem:[%s27375_s8 + $0x358] sm:$0xff]  ;;  %v14011_v29 = vld [vmem:[%s27375_s8 + $0x400] sm:$0xff] }
0x12d0   : > { %v4555_v18 = vmul.f32 %v4554_v14, %v4554_v14  ;;  %v14012_v12 = vld [vmem:[%s27375_s8 + $0x408] sm:$0xff] }
0x12d2   : > { %v4556_v6 = vsel %vm3174_vm4, %v4555_v18, 0.0  ;;  %v14008_v18 = vld [vmem:[%s27375_s8 + $0x3f8] sm:$0xff] }
0x12d3   : > { %v4557_v26 = vrot.slane %v4556_v6, 4 }
0x12d5   : > { %v4558_v30 = vadd.f32 %v4557_v26, %v4556_v6  ;;  %v13975_v26 = vld [vmem:[%s27375_s8 + $0x300] sm:$0xff] }
0x12d7   : > { %v4559_v36 = vrot.slane %v4558_v30, 2 }
0x12d9   : > { %v4560_v20 = vadd.f32 %v4559_v36, %v4558_v30  ;;  %v13976_v30 = vld [vmem:[%s27375_s8 + $0x308] sm:$0xff] }
0x12db   : > { %v4561_v39 = vrot.slane %v4560_v20, 1 }
0x12dd   : > { %v4562_v40 = vadd.f32 %v4561_v39, %v4560_v20  ;;  %v20697_v39 = vpack.c.bf16 %v13976_v30, %v13975_v26  ;;  %v14015_v26 = vld [vmem:[%s27375_s8 + $0x420] sm:$0xff]  ;;  %v14016_v30 = vld [vmem:[%s27375_s8 + $0x428] sm:$0xff] }
0x12df   : > { %17447 = vmatmul.mubr.f32.vlgmr.msra.gmra.mrb[20].mxu0 %v4562_v40 }
0x12e0   : > { %17451 = vmatprep.mubr.msk.f32.mxu0 %vm22543_vm2, %v22544_v60 }
0x13b2   : > { %v4629_v42 = vpop.f32.mrb[20].mxu0 }
0x13b3   : > { %v4630_v43 = vadd.f32 1e-05, %v4629_v42  ;;  %v17448_v44 = vpop.f32.mrb[21].mxu0  ;;  %v13977_v42 = vld [vmem:[%s27375_s8 + $0x310] sm:$0xff] }
0x13b5   : > { %22495 = vrsqrt.f32 %v4630_v43  ;;  %v13978_v43 = vld [vmem:[%s27375_s8 + $0x318] sm:$0xff] }
0x13bf   : > { %v22496_v45 = vpop.eup %22495 }
0x13c0   : > { %v4637_v37 = vrot.slane %v22496_v45, %v22967_v8 }
0x13c2   : > { %v4638_v46 = vmul.f32 %v4637_v37, %v4554_v14  ;;  %v14007_v14 = vld [vmem:[%s27375_s8 + $0x3f0] sm:$0xff] }
0x13c3   : > { %v20694_v6 = vpack.c.bf16 %v14008_v18, %v14007_v14  ;;  %v14013_v14 = vld [vmem:[%s27375_s8 + $0x410] sm:$0xff]  ;;  %v14014_v18 = vld [vmem:[%s27375_s8 + $0x418] sm:$0xff] }
0x13c4   : > { %v24068_v47 = vadd.f32 %v4638_v46, %v23577_v15  ;;  %v20673_v15 = vpack.c.bf16 %v13994_v52, %v13993_v49  ;;  %v20700_v46 = vpack.c.bf16 %v13978_v43, %v13977_v42  ;;  %v13979_v49 = vld [vmem:[%s27375_s8 + $0x320] sm:$0xff]  ;;  %v13980_v52 = vld [vmem:[%s27375_s8 + $0x328] sm:$0xff] }
0x13c5   : > { %v14019_v43 = vld [vmem:[%s27375_s8 + $0x440] sm:$0xff] }
0x13c6   : > { %17450 = vmatpush3.msk.msra.mxu0 %vm3174_vm4, %v24068_v47  ;;  %17530 = vmatpush3.msk.msra.mxu1 %vm3174_vm4, %v24068_v47 }
0x13c7   : > { %17452 = vmatmul.mubr.msk.f32.vlgmr.msra.gmra.mrb[22].mxu0 %vm3343_vm5, %v23582_v17  ;;  %17454 = vmatprep.subr.mxu0 %v22544_v60  ;;  %v13996_v17 = vld [vmem:[%s27375_s8 + $0x398] sm:$0xff] }
0x13c8   : > { %17455 = vmatpush3.msk.msra.mxu0 %vm3174_vm4, %v24068_v47  ;;  %17456 = vmatprep.mubr.msk.f32.mxu0 %vm22543_vm2, %v22544_v60 }
0x13c9   : > { %17532 = vmatmul.mubr.msk.f32.vlgmr.msra.gmra.mrb[46].mxu1 %vm3343_vm5, %v23597_v21  ;;  %20672 = vmatprep.subr.bf16.mxu0 %v22542_v32  ;;  %v20676_v21 = vpack.c.bf16 %v13996_v17, %v13995_v54  ;;  %v13981_v54 = vld [vmem:[%s27375_s8 + $0x330] sm:$0xff]  ;;  %v13982_v17 = vld [vmem:[%s27375_s8 + $0x338] sm:$0xff] }
0x13ca   : > { %20744 = vmatprep.subr.bf16.mxu1 %v22542_v32  ;;  %17601 = vmatprep.mubr.msk.f32.mxu1 %vm22543_vm2, %v22544_v60 }
0x13cb   : > { %17457 = vmatmul.mubr.msk.f32.vlgmr.msra.gmra.mrb[24].mxu0 %vm3343_vm5, %v23609_v23  ;;  %20746 = vmatpush3.bf16.msra.mxu1 %v23361_v48  ;;  %v20679_v23 = vpack.c.bf16 %v13998_v58, %v13997_v57  ;;  %v13983_v57 = vld [vmem:[%s27375_s8 + $0x340] sm:$0xff]  ;;  %v13984_v58 = vld [vmem:[%s27375_s8 + $0x348] sm:$0xff] }
0x13cc   : > { %20674 = vmatpush3.bf16.msra.mxu0 %v20673_v15  ;;  %17491 = vmatprep.mubr.msk.f32.mxu0 %vm22543_vm2, %v22544_v60  ;;  %v20703_v15 = vpack.c.bf16 %v13980_v52, %v13979_v49  ;;  %v14023_v52 = vld [vmem:[%s27375_s8 + $0x460] sm:$0xff] }
0x13cd   : > { %20675 = vmatprep.subr.bf16.mxu0 %v22542_v32  ;;  %20747 = vmatprep.subr.bf16.mxu1 %v22542_v32 }
0x13cf   : > { %20749 = vmatpush3.bf16.msra.mxu1 %v23367_v51 }
0x13d0   : > { %20677 = vmatpush3.bf16.msra.mxu0 %v20676_v21  ;;  %20750 = vmatprep.subr.bf16.mxu1 %v22542_v32  ;;  %v20706_v21 = vpack.c.bf16 %v13982_v17, %v13981_v54  ;;  %v14025_v17 = vld [vmem:[%s27375_s8 + $0x470] sm:$0xff] }
0x13d1   : > { %20678 = vmatprep.subr.bf16.mxu0 %v22542_v32 }
0x13d3   : > { %20752 = vmatpush3.bf16.msra.mxu1 %v23377_v55 }
0x13d4   : > { %20680 = vmatpush3.bf16.msra.mxu0 %v20679_v23  ;;  %20753 = vmatprep.subr.bf16.mxu1 %v22542_v32  ;;  %v20709_v23 = vpack.c.bf16 %v13984_v58, %v13983_v57 }
0x13d5   : > { %20681 = vmatprep.subr.bf16.mxu0 %v22542_v32 }
0x13d7   : > { %20755 = vmatpush3.bf16.msra.mxu1 %v23387_v61 }
0x13d8   : > { %20683 = vmatpush3.bf16.msra.mxu0 %v20682_v63  ;;  %20756 = vmatprep.subr.bf16.mxu1 %v22542_v32  ;;  %v20712_v63 = vpack.c.bf16 %v13986_v10, %v13985_v62 }
0x13d9   : > { %20684 = vmatprep.subr.bf16.mxu0 %v22542_v32 }
0x13db   : > { %20758 = vmatpush3.bf16.msra.mxu1 %v23397_v0 }
0x13dc   : > { %20686 = vmatpush3.bf16.msra.mxu0 %v20685_v3  ;;  %20759 = vmatprep.subr.bf16.mxu1 %v22542_v32  ;;  %v20715_v3 = vpack.c.bf16 %v13988_v2, %v13987_v1 }
0x13dd   : > { %20687 = vmatprep.subr.bf16.mxu0 %v22542_v32 }
0x13df   : > { %20761 = vmatpush3.bf16.msra.mxu1 %v23529_v24 }
0x13e0   : > { %20689 = vmatpush3.bf16.msra.mxu0 %v20688_v11  ;;  %20762 = vmatprep.subr.bf16.mxu1 %v22542_v32  ;;  %v20718_v11 = vpack.c.bf16 %v13990_v9, %v13989_v5 }
0x13e1   : > { %20690 = vmatprep.subr.bf16.mxu0 %v22542_v32 }
0x13e3   : > { %20764 = vmatpush3.bf16.msra.mxu1 %v23539_v27 }
0x13e4   : > { %20692 = vmatpush3.bf16.msra.mxu0 %v20691_v4  ;;  %20765 = vmatprep.subr.bf16.mxu1 %v22542_v32  ;;  %v20721_v4 = vpack.c.bf16 %v14012_v12, %v14011_v29 }
0x13e5   : > { %20693 = vmatprep.subr.bf16.mxu0 %v22542_v32 }
0x13e7   : > { %20767 = vmatpush3.bf16.msra.mxu1 %v23549_v34 }
0x13e8   : > { %20768 = vmatprep.subr.bf16.mxu1 %v22542_v32  ;;  %20695 = vmatpush3.bf16.msra.mxu0 %v20694_v6  ;;  %v20724_v6 = vpack.c.bf16 %v14014_v18, %v14013_v14 }
0x13e9   : > { %20696 = vmatprep.subr.bf16.mxu0 %v22542_v32 }
0x149a   : > { %v4709_v36 = vpop.f32.mrb[22].mxu0 }
0x149b   : > { %v17453_v20 = vpop.f32.mrb[23].mxu0 }
0x149c   : > { %v24169_v40 = vpop.f32.mrb[46].mxu1  ;;  %v20727_v20 = vpack.c.bf16 %v14016_v30, %v14015_v26 }
0x149d   : > { %v17533_v44 = vpop.f32.mrb[47].mxu1 }
0x149e   : > { %v4796_v45 = vpop.f32.mrb[24].mxu0  ;;  %v14020_v44 = vld [vmem:[%s27375_s8 + $0x448] sm:$0xff] }
0x149f   : > { %v17458_v37 = vpop.f32.mrb[25].mxu0  ;;  %17492 = vmatmul.mubr.f32.vlgmr.msra.gmra.mrb[26].mxu0 %v4796_v45  ;;  %v20733_v45 = vpack.c.bf16 %v14020_v44, %v14019_v43 }
0x14a0   : > { %20698 = vmatpush3.bf16.msra.mxu0 %v20697_v39  ;;  %17526 = vmatprep.mubr.msk.f32.mxu0 %vm22543_vm2, %v22544_v60  ;;  %v14018_v39 = vld [vmem:[%s27375_s8 + $0x438] sm:$0xff]  ;;  %v14021_v37 = vld [vmem:[%s27375_s8 + $0x450] sm:$0xff] }
0x14a1   : > { %20699 = vmatprep.subr.bf16.mxu0 %v22542_v32 }
0x14a4   : > { %20701 = vmatpush3.bf16.msra.mxu0 %v20700_v46  ;;  %v14022_v46 = vld [vmem:[%s27375_s8 + $0x458] sm:$0xff] }
0x14a5   : > { %20702 = vmatprep.subr.bf16.mxu0 %v22542_v32  ;;  %v20736_v49 = vpack.c.bf16 %v14022_v46, %v14021_v37  ;;  %v14047_v46 = vld [vmem:[%s27375_s8 + $0x500] sm:$0xff] }
0x14a8   : > { %20704 = vmatpush3.bf16.msra.mxu0 %v20703_v15  ;;  %v14024_v15 = vld [vmem:[%s27375_s8 + $0x468] sm:$0xff] }
0x14a9   : > { %20705 = vmatprep.subr.bf16.mxu0 %v22542_v32  ;;  %v20739_v54 = vpack.c.bf16 %v14024_v15, %v14023_v52  ;;  %v24319_v52 = vld [vmem:[%s27374_s7] sm:$0xf] }
0x14ac   : > { %20707 = vmatpush3.bf16.msra.mxu0 %v20706_v21  ;;  %v14026_v21 = vld [vmem:[%s27375_s8 + $0x478] sm:$0xff] }
0x14ad   : > { %20708 = vmatprep.subr.bf16.mxu0 %v22542_v32  ;;  %v20742_v57 = vpack.c.bf16 %v14026_v21, %v14025_v17  ;;  %v14049_v17 = vld [vmem:[%s27375_s8 + $0x510] sm:$0xff]  ;;  %v14050_v21 = vld [vmem:[%s27375_s8 + $0x518] sm:$0xff] }
0x14b0   : > { %20710 = vmatpush3.bf16.msra.mxu0 %v20709_v23 }
0x14b1   : > { %20711 = vmatprep.subr.bf16.mxu0 %v22542_v32 }
0x14b4   : > { %20713 = vmatpush3.bf16.msra.mxu0 %v20712_v63 }
0x14b5   : > { %20714 = vmatprep.subr.bf16.mxu0 %v22542_v32 }
0x14b8   : > { %20716 = vmatpush3.bf16.msra.mxu0 %v20715_v3 }
0x14b9   : > { %20717 = vmatprep.subr.bf16.mxu0 %v22542_v32 }
0x14bc   : > { %20719 = vmatpush3.bf16.msra.mxu0 %v20718_v11 }
0x14bd   : > { %20720 = vmatprep.subr.bf16.mxu0 %v22542_v32 }
0x14bf   : > { %17527 = vmatmul.mubr.f32.vlgmr.msra.gmra.mrb[26].mxu0 %v4709_v36  ;;  %v14017_v36 = vld [vmem:[%s27375_s8 + $0x430] sm:$0xff] }
0x14c0   : > { %20722 = vmatpush3.bf16.msra.mxu0 %v20721_v4  ;;  %17566 = vmatprep.mubr.msk.f32.mxu0 %vm22543_vm2, %v22544_v60  ;;  %v20730_v42 = vpack.c.bf16 %v14018_v39, %v14017_v36 }
0x14c1   : > { %20723 = vmatprep.subr.bf16.mxu0 %v22542_v32 }
0x14c4   : > { %20725 = vmatpush3.bf16.msra.mxu0 %v20724_v6 }
0x14c5   : > { %20726 = vmatprep.subr.bf16.mxu0 %v22542_v32 }
0x14c8   : > { %20728 = vmatpush3.bf16.msra.mxu0 %v20727_v20 }
0x14c9   : > { %20729 = vmatprep.subr.bf16.mxu0 %v22542_v32 }
0x14cc   : > { %20731 = vmatpush3.bf16.msra.mxu0 %v20730_v42 }
0x14cd   : > { %20732 = vmatprep.subr.bf16.mxu0 %v22542_v32 }
0x14d0   : > { %20734 = vmatpush3.bf16.msra.mxu0 %v20733_v45 }
0x14d1   : > { %20735 = vmatprep.subr.bf16.mxu0 %v22542_v32 }
0x14d4   : > { %20737 = vmatpush3.bf16.msra.mxu0 %v20736_v49  ;;  %v14048_v49 = vld [vmem:[%s27375_s8 + $0x508] sm:$0xff] }
0x14d5   : > { %20738 = vmatprep.subr.bf16.mxu0 %v22542_v32  ;;  %v20793_v15 = vpack.c.bf16 %v14048_v49, %v14047_v46 }
0x14d8   : > { %20740 = vmatpush3.bf16.msra.mxu0 %v20739_v54  ;;  %v24330_v54 = vld [vmem:[%s27374_s7 + $0x8] sm:$0xf] }
0x14d9   : > { %20741 = vmatprep.subr.bf16.mxu0 %v22542_v32 }
0x14dc   : > { %20743 = vmatpush3.bf16.msra.mxu0 %v20742_v57  ;;  %v24347_v57 = vld [vmem:[%s27374_s7 + $0x4] sm:$0xf] }
0x14dd   : > { %17719 = vmatprep.subr.mxu0 %v22544_v60 }
0x14df   : > { %17567 = vmatmul.mubr.f32.vlgmr.msra.gmra.mrb[26].mxu0 %v24169_v40 }
0x14e0   : > { %17721 = vmatprep.mubr.msk.f32.mxu0 %vm22543_vm2, %v22544_v60 }
0x15b2   : > { %v5110_v58 = vpop.f32.mrb[26].mxu0 }
0x15b3   : > { %v5115_v23 = vsel %vm3174_vm4, %v5110_v58, 0.0  ;;  %v17568_v62 = vpop.f32.mrb[27].mxu0 }
0x15b4   : > { %v5116_v10 = vrot.slane %v5115_v23, 4  ;;  %v14052_v62 = vld [vmem:[%s27375_s8 + $0x528] sm:$0xff] }
0x15b6   : > { %v5117_v63 = vadd.f32 %v5116_v10, %v5115_v23  ;;  %v14051_v23 = vld [vmem:[%s27375_s8 + $0x520] sm:$0xff] }
0x15b7   : > { %v20799_v10 = vpack.c.bf16 %v14052_v62, %v14051_v23  ;;  %v14035_v23 = vld [vmem:[%s27375_s8 + $0x4b0] sm:$0xff]  ;;  %v14036_v62 = vld [vmem:[%s27375_s8 + $0x4b8] sm:$0xff] }
0x15b8   : > { %v5118_v1 = vrot.slane %v5117_v63, 2 }
0x15ba   : > { %v5119_v2 = vadd.f32 %v5118_v1, %v5117_v63  ;;  %v14053_v63 = vld [vmem:[%s27375_s8 + $0x530] sm:$0xff]  ;;  %v14054_v1 = vld [vmem:[%s27375_s8 + $0x538] sm:$0xff] }
0x15bc   : > { %v5120_v3 = vrot.slane %v5119_v2, 1 }
0x15be   : > { %v5121_v5 = vadd.f32 %v5120_v3, %v5119_v2  ;;  %v20802_v2 = vpack.c.bf16 %v14054_v1, %v14053_v63  ;;  %v14055_v3 = vld [vmem:[%s27375_s8 + $0x540] sm:$0xff]  ;;  %v14038_v1 = vld [vmem:[%s27375_s8 + $0x4c8] sm:$0xff] }
0x15bf   : > { %v14037_v63 = vld [vmem:[%s27375_s8 + $0x4c0] sm:$0xff] }
0x15c0   : > { %17602 = vmatmul.mubr.f32.vlgmr.msra.gmra.mrb[48].mxu1 %v5121_v5  ;;  %v14056_v5 = vld [vmem:[%s27375_s8 + $0x548] sm:$0xff] }
0x15c1   : > { %20770 = vmatpush3.bf16.msra.mxu1 %v23361_v48  ;;  %17636 = vmatprep.mubr.msk.f32.mxu1 %vm22543_vm2, %v22544_v60 }
0x15c2   : > { %20771 = vmatprep.subr.bf16.mxu1 %v22542_v32 }
0x15c5   : > { %20773 = vmatpush3.bf16.msra.mxu1 %v23367_v51 }
0x15c6   : > { %20774 = vmatprep.subr.bf16.mxu1 %v22542_v32 }
0x15c9   : > { %20776 = vmatpush3.bf16.msra.mxu1 %v23377_v55 }
0x15ca   : > { %20777 = vmatprep.subr.bf16.mxu1 %v22542_v32 }
0x15cd   : > { %20779 = vmatpush3.bf16.msra.mxu1 %v23387_v61 }
0x15ce   : > { %20780 = vmatprep.subr.bf16.mxu1 %v22542_v32 }
0x15d1   : > { %20782 = vmatpush3.bf16.msra.mxu1 %v23397_v0 }
0x15d2   : > { %20783 = vmatprep.subr.bf16.mxu1 %v22542_v32 }
0x15d5   : > { %20785 = vmatpush3.bf16.msra.mxu1 %v23529_v24 }
0x15d6   : > { %20786 = vmatprep.subr.bf16.mxu1 %v22542_v32 }
0x15d9   : > { %20788 = vmatpush3.bf16.msra.mxu1 %v23539_v27 }
0x15da   : > { %20789 = vmatprep.subr.bf16.mxu1 %v22542_v32 }
0x15dd   : > { %20791 = vmatpush3.bf16.msra.mxu1 %v23549_v34 }
0x15de   : > { %17639 = vmatprep.subr.mxu1 %v22544_v60 }
0x1693   : > { %v5188_v40 = vpop.f32.mrb[48].mxu1 }
0x1694   : > { %v5195_v9 = vrot.slane %v5188_v40, %v22967_v8  ;;  %v17603_v11 = vpop.f32.mrb[49].mxu1  ;;  %v20805_v40 = vpack.c.bf16 %v14056_v5, %v14055_v3  ;;  %v14039_v3 = vld [vmem:[%s27375_s8 + $0x4d0] sm:$0xff]  ;;  %v14040_v5 = vld [vmem:[%s27375_s8 + $0x4d8] sm:$0xff] }
0x1695   : > { %v14058_v11 = vld [vmem:[%s27375_s8 + $0x558] sm:$0xff] }
0x1696   : > { %v5196_v29 = vsub.f32 %v5110_v58, %v5195_v9  ;;  %v20796_v58 = vpack.c.bf16 %v14050_v21, %v14049_v17  ;;  %v14057_v9 = vld [vmem:[%s27375_s8 + $0x550] sm:$0xff]  ;;  %v14033_v17 = vld [vmem:[%s27375_s8 + $0x4a0] sm:$0xff]  ;;  %v14034_v21 = vld [vmem:[%s27375_s8 + $0x4a8] sm:$0xff] }
0x1698   : > { %v5197_v12 = vmul.f32 %v5196_v29, %v5196_v29 }
0x169a   : > { %v5198_v4 = vsel %vm3174_vm4, %v5197_v12, 0.0  ;;  %v14059_v12 = vld [vmem:[%s27375_s8 + $0x560] sm:$0xff] }
0x169b   : > { %v5199_v14 = vrot.slane %v5198_v4, 4 }
0x169d   : > { %v5200_v18 = vadd.f32 %v5199_v14, %v5198_v4  ;;  %v14060_v4 = vld [vmem:[%s27375_s8 + $0x568] sm:$0xff] }
0x169e   : > { %v20811_v14 = vpack.c.bf16 %v14060_v4, %v14059_v12  ;;  %v14043_v12 = vld [vmem:[%s27375_s8 + $0x4f0] sm:$0xff]  ;;  %v14044_v4 = vld [vmem:[%s27375_s8 + $0x4f8] sm:$0xff] }
0x169f   : > { %v5201_v6 = vrot.slane %v5200_v18, 2 }
0x16a1   : > { %v5202_v26 = vadd.f32 %v5201_v6, %v5200_v18  ;;  %v14061_v18 = vld [vmem:[%s27375_s8 + $0x570] sm:$0xff]  ;;  %v14062_v6 = vld [vmem:[%s27375_s8 + $0x578] sm:$0xff] }
0x16a3   : > { %v5203_v30 = vrot.slane %v5202_v26, 1 }
0x16a5   : > { %v5204_v20 = vadd.f32 %v5203_v30, %v5202_v26  ;;  %v20814_v26 = vpack.c.bf16 %v14062_v6, %v14061_v18  ;;  %v14029_v30 = vld [vmem:[%s27375_s8 + $0x480] sm:$0xff]  ;;  %v14066_v6 = vld [vmem:[%s27375_s8 + $0x588] sm:$0xff] }
0x16a6   : > { %v14065_v18 = vld [vmem:[%s27375_s8 + $0x580] sm:$0xff] }
0x16a7   : > { %17637 = vmatmul.mubr.f32.vlgmr.msra.gmra.mrb[50].mxu1 %v5204_v20  ;;  %v14030_v20 = vld [vmem:[%s27375_s8 + $0x488] sm:$0xff] }
0x16a8   : > { %17641 = vmatprep.mubr.msk.f32.mxu1 %vm22543_vm2, %v22544_v60 }
0x177a   : > { %v5271_v36 = vpop.f32.mrb[50].mxu1 }
0x177b   : > { %v5272_v39 = vadd.f32 1e-05, %v5271_v36  ;;  %v17638_v42 = vpop.f32.mrb[51].mxu1 }
0x177c   : > { %v20817_v42 = vpack.c.bf16 %v14030_v20, %v14029_v30  ;;  %v14067_v30 = vld [vmem:[%s27375_s8 + $0x590] sm:$0xff]  ;;  %v14068_v20 = vld [vmem:[%s27375_s8 + $0x598] sm:$0xff] }
0x177d   : > { %22497 = vrsqrt.f32 %v5272_v39 }
0x1787   : > { %v22498_v43 = vpop.eup %22497 }
0x1788   : > { %v5279_v44 = vrot.slane %v22498_v43, %v22967_v8 }
0x178a   : > { %v5280_v45 = vmul.f32 %v5279_v44, %v5196_v29  ;;  %v20808_v29 = vpack.c.bf16 %v14058_v11, %v14057_v9  ;;  %v14031_v44 = vld [vmem:[%s27375_s8 + $0x490] sm:$0xff]  ;;  %v14041_v9 = vld [vmem:[%s27375_s8 + $0x4e0] sm:$0xff]  ;;  %v14042_v11 = vld [vmem:[%s27375_s8 + $0x4e8] sm:$0xff] }
0x178c   : > { %v5281_v37 = vmax.f32 %v5280_v45, 0.0  ;;  %v14032_v45 = vld [vmem:[%s27375_s8 + $0x498] sm:$0xff] }
0x178e   : > { %17640 = vmatpush3.msk.msra.mxu1 %vm3174_vm4, %v5281_v37  ;;  %17720 = vmatpush3.msk.msra.mxu0 %vm3174_vm4, %v5281_v37 }
0x178f   : > { %17642 = vmatmul.mubr.msk.f32.vlgmr.msra.gmra.mrb[52].mxu1 %vm3343_vm5, %v24319_v52  ;;  %17644 = vmatprep.subr.mxu1 %v22544_v60 }
0x1790   : > { %17645 = vmatpush3.msk.msra.mxu1 %vm3174_vm4, %v5281_v37  ;;  %17646 = vmatprep.mubr.msk.f32.mxu1 %vm22543_vm2, %v22544_v60 }
0x1791   : > { %17722 = vmatmul.mubr.msk.f32.vlgmr.msra.gmra.mrb[28].mxu0 %vm3343_vm5, %v24330_v54  ;;  %20792 = vmatprep.subr.bf16.mxu1 %v22542_v32 }
0x1792   : > { %20864 = vmatprep.subr.bf16.mxu0 %v22542_v32  ;;  %17791 = vmatprep.mubr.msk.f32.mxu0 %vm22543_vm2, %v22544_v60 }
0x1793   : > { %17647 = vmatmul.mubr.msk.f32.vlgmr.msra.gmra.mrb[54].mxu1 %vm3343_vm5, %v24347_v57  ;;  %20866 = vmatpush3.bf16.msra.mxu0 %v23361_v48 }
0x1794   : > { %20794 = vmatpush3.bf16.msra.mxu1 %v20793_v15  ;;  %17681 = vmatprep.mubr.msk.f32.mxu1 %vm22543_vm2, %v22544_v60  ;;  %v20820_v15 = vpack.c.bf16 %v14032_v45, %v14031_v44  ;;  %v14070_v44 = vld [vmem:[%s27375_s8 + $0x5a8] sm:$0xff] }
0x1795   : > { %20795 = vmatprep.subr.bf16.mxu1 %v22542_v32  ;;  %20867 = vmatprep.subr.bf16.mxu0 %v22542_v32 }
0x1797   : > { %20869 = vmatpush3.bf16.msra.mxu0 %v23367_v51 }
0x1798   : > { %20797 = vmatpush3.bf16.msra.mxu1 %v20796_v58  ;;  %20870 = vmatprep.subr.bf16.mxu0 %v22542_v32  ;;  %v20823_v58 = vpack.c.bf16 %v14034_v21, %v14033_v17  ;;  %v14075_v21 = vld [vmem:[%s27375_s8 + $0x5d0] sm:$0xff] }
0x1799   : > { %20798 = vmatprep.subr.bf16.mxu1 %v22542_v32 }
0x179b   : > { %20872 = vmatpush3.bf16.msra.mxu0 %v23377_v55 }
0x179c   : > { %20800 = vmatpush3.bf16.msra.mxu1 %v20799_v10  ;;  %20873 = vmatprep.subr.bf16.mxu0 %v22542_v32  ;;  %v20826_v10 = vpack.c.bf16 %v14036_v62, %v14035_v23  ;;  %v14077_v62 = vld [vmem:[%s27375_s8 + $0x5e0] sm:$0xff] }
0x179d   : > { %20801 = vmatprep.subr.bf16.mxu1 %v22542_v32 }
0x179f   : > { %20875 = vmatpush3.bf16.msra.mxu0 %v23387_v61 }
0x17a0   : > { %20803 = vmatpush3.bf16.msra.mxu1 %v20802_v2  ;;  %20876 = vmatprep.subr.bf16.mxu0 %v22542_v32  ;;  %v20829_v2 = vpack.c.bf16 %v14038_v1, %v14037_v63  ;;  %v14079_v1 = vld [vmem:[%s27375_s8 + $0x5f0] sm:$0xff] }
0x17a1   : > { %20804 = vmatprep.subr.bf16.mxu1 %v22542_v32 }
0x17a3   : > { %20878 = vmatpush3.bf16.msra.mxu0 %v23397_v0 }
0x17a4   : > { %20806 = vmatpush3.bf16.msra.mxu1 %v20805_v40  ;;  %20879 = vmatprep.subr.bf16.mxu0 %v22542_v32  ;;  %v20832_v40 = vpack.c.bf16 %v14040_v5, %v14039_v3 }
0x17a5   : > { %20807 = vmatprep.subr.bf16.mxu1 %v22542_v32 }
0x17a7   : > { %20881 = vmatpush3.bf16.msra.mxu0 %v23529_v24 }
0x17a8   : > { %20809 = vmatpush3.bf16.msra.mxu1 %v20808_v29  ;;  %20882 = vmatprep.subr.bf16.mxu0 %v22542_v32  ;;  %v20835_v29 = vpack.c.bf16 %v14042_v11, %v14041_v9 }
0x17a9   : > { %20810 = vmatprep.subr.bf16.mxu1 %v22542_v32 }
0x17ab   : > { %20884 = vmatpush3.bf16.msra.mxu0 %v23539_v27 }
0x17ac   : > { %20812 = vmatpush3.bf16.msra.mxu1 %v20811_v14  ;;  %20885 = vmatprep.subr.bf16.mxu0 %v22542_v32  ;;  %v20838_v14 = vpack.c.bf16 %v14044_v4, %v14043_v12 }
0x17ad   : > { %20813 = vmatprep.subr.bf16.mxu1 %v22542_v32 }
0x17af   : > { %20887 = vmatpush3.bf16.msra.mxu0 %v23549_v34 }
0x17b0   : > { %20888 = vmatprep.subr.bf16.mxu0 %v22542_v32  ;;  %20815 = vmatpush3.bf16.msra.mxu1 %v20814_v26  ;;  %v20841_v26 = vpack.c.bf16 %v14066_v6, %v14065_v18 }
0x17b1   : > { %20816 = vmatprep.subr.bf16.mxu1 %v22542_v32 }
0x1862   : > { %v5351_v36 = vpop.f32.mrb[52].mxu1 }
0x1863   : > { %v17643_v39 = vpop.f32.mrb[53].mxu1 }
0x1864   : > { %v24419_v43 = vpop.f32.mrb[28].mxu0  ;;  %v20844_v39 = vpack.c.bf16 %v14068_v20, %v14067_v30 }
0x1865   : > { %v17723_v37 = vpop.f32.mrb[29].mxu0 }
0x1866   : > { %v5438_v46 = vpop.f32.mrb[54].mxu1  ;;  %v14072_v37 = vld [vmem:[%s27375_s8 + $0x5b8] sm:$0xff] }
0x1867   : > { %v17648_v49 = vpop.f32.mrb[55].mxu1  ;;  %17682 = vmatmul.mubr.f32.vlgmr.msra.gmra.mrb[56].mxu1 %v5438_v46 }
0x1868   : > { %20818 = vmatpush3.bf16.msra.mxu1 %v20817_v42  ;;  %17716 = vmatprep.mubr.msk.f32.mxu1 %vm22543_vm2, %v22544_v60  ;;  %v14069_v42 = vld [vmem:[%s27375_s8 + $0x5a0] sm:$0xff] }
0x1869   : > { %20819 = vmatprep.subr.bf16.mxu1 %v22542_v32  ;;  %v20847_v45 = vpack.c.bf16 %v14070_v44, %v14069_v42  ;;  %v14073_v49 = vld [vmem:[%s27375_s8 + $0x5c0] sm:$0xff] }
0x186c   : > { %20821 = vmatpush3.bf16.msra.mxu1 %v20820_v15  ;;  %v14074_v15 = vld [vmem:[%s27375_s8 + $0x5c8] sm:$0xff] }
0x186d   : > { %20822 = vmatprep.subr.bf16.mxu1 %v22542_v32  ;;  %v20853_v17 = vpack.c.bf16 %v14074_v15, %v14073_v49 }
0x1870   : > { %20824 = vmatpush3.bf16.msra.mxu1 %v20823_v58  ;;  %v14076_v58 = vld [vmem:[%s27375_s8 + $0x5d8] sm:$0xff] }
0x1871   : > { %20825 = vmatprep.subr.bf16.mxu1 %v22542_v32  ;;  %v20856_v23 = vpack.c.bf16 %v14076_v58, %v14075_v21 }
0x1874   : > { %20827 = vmatpush3.bf16.msra.mxu1 %v20826_v10  ;;  %v14078_v10 = vld [vmem:[%s27375_s8 + $0x5e8] sm:$0xff] }
0x1875   : > { %20828 = vmatprep.subr.bf16.mxu1 %v22542_v32  ;;  %v20859_v63 = vpack.c.bf16 %v14078_v10, %v14077_v62  ;;  %v14101_v10 = vld [vmem:[%s27375_s8 + $0x680] sm:$0xff] }
0x1878   : > { %20830 = vmatpush3.bf16.msra.mxu1 %v20829_v2  ;;  %v14080_v2 = vld [vmem:[%s27375_s8 + $0x5f8] sm:$0xff] }
0x1879   : > { %20831 = vmatprep.subr.bf16.mxu1 %v22542_v32  ;;  %v20862_v3 = vpack.c.bf16 %v14080_v2, %v14079_v1  ;;  %v14103_v1 = vld [vmem:[%s27375_s8 + $0x690] sm:$0xff]  ;;  %v14104_v2 = vld [vmem:[%s27375_s8 + $0x698] sm:$0xff] }
0x187c   : > { %20833 = vmatpush3.bf16.msra.mxu1 %v20832_v40 }
0x187d   : > { %20834 = vmatprep.subr.bf16.mxu1 %v22542_v32 }
0x1880   : > { %20836 = vmatpush3.bf16.msra.mxu1 %v20835_v29 }
0x1881   : > { %20837 = vmatprep.subr.bf16.mxu1 %v22542_v32 }
0x1884   : > { %20839 = vmatpush3.bf16.msra.mxu1 %v20838_v14 }
0x1885   : > { %20840 = vmatprep.subr.bf16.mxu1 %v22542_v32 }
0x1887   : > { %17717 = vmatmul.mubr.f32.vlgmr.msra.gmra.mrb[56].mxu1 %v5351_v36  ;;  %v14071_v36 = vld [vmem:[%s27375_s8 + $0x5b0] sm:$0xff] }
0x1888   : > { %20842 = vmatpush3.bf16.msra.mxu1 %v20841_v26  ;;  %17756 = vmatprep.mubr.msk.f32.mxu1 %vm22543_vm2, %v22544_v60  ;;  %v20850_v46 = vpack.c.bf16 %v14072_v37, %v14071_v36 }
0x1889   : > { %20843 = vmatprep.subr.bf16.mxu1 %v22542_v32 }
0x188c   : > { %20845 = vmatpush3.bf16.msra.mxu1 %v20844_v39 }
0x188d   : > { %20846 = vmatprep.subr.bf16.mxu1 %v22542_v32 }
0x1890   : > { %20848 = vmatpush3.bf16.msra.mxu1 %v20847_v45 }
0x1891   : > { %20849 = vmatprep.subr.bf16.mxu1 %v22542_v32 }
0x1894   : > { %20851 = vmatpush3.bf16.msra.mxu1 %v20850_v46 }
0x1895   : > { %20852 = vmatprep.subr.bf16.mxu1 %v22542_v32 }
0x1898   : > { %20854 = vmatpush3.bf16.msra.mxu1 %v20853_v17 }
0x1899   : > { %20855 = vmatprep.subr.bf16.mxu1 %v22542_v32 }
0x189c   : > { %20857 = vmatpush3.bf16.msra.mxu1 %v20856_v23 }
0x189d   : > { %20858 = vmatprep.subr.bf16.mxu1 %v22542_v32 }
0x18a0   : > { %20860 = vmatpush3.bf16.msra.mxu1 %v20859_v63  ;;  %v14102_v63 = vld [vmem:[%s27375_s8 + $0x688] sm:$0xff] }
0x18a1   : > { %20861 = vmatprep.subr.bf16.mxu1 %v22542_v32 }
0x18a4   : > { %20863 = vmatpush3.bf16.msra.mxu1 %v20862_v3  ;;  %v20916_v3 = vpack.c.bf16 %v14104_v2, %v14103_v1  ;;  %v14087_v1 = vld [vmem:[%s27375_s8 + $0x620] sm:$0xff]  ;;  %v14088_v2 = vld [vmem:[%s27375_s8 + $0x628] sm:$0xff] }
0x18a5   : > { %17909 = vmatprep.subr.mxu1 %v22544_v60 }
0x18a7   : > { %17757 = vmatmul.mubr.f32.vlgmr.msra.gmra.mrb[56].mxu1 %v24419_v43 }
0x18a8   : > { %17911 = vmatprep.mubr.msk.f32.mxu1 %vm22543_vm2, %v22544_v60 }
0x197a   : > { %v5752_v5 = vpop.f32.mrb[56].mxu1 }
0x197b   : > { %v5757_v40 = vsel %vm3174_vm4, %v5752_v5, 0.0  ;;  %v17758_v9 = vpop.f32.mrb[57].mxu1 }
0x197c   : > { %v5758_v11 = vrot.slane %v5757_v40, 4 }
0x197e   : > { %v5759_v29 = vadd.f32 %v5758_v11, %v5757_v40  ;;  %v14106_v40 = vld [vmem:[%s27375_s8 + $0x6a8] sm:$0xff]  ;;  %v14107_v11 = vld [vmem:[%s27375_s8 + $0x6b0] sm:$0xff] }
0x1980   : > { %v5760_v12 = vrot.slane %v5759_v29, 2 }
0x1982   : > { %v5761_v4 = vadd.f32 %v5760_v12, %v5759_v29  ;;  %v14108_v29 = vld [vmem:[%s27375_s8 + $0x6b8] sm:$0xff] }
0x1983   : > { %v20922_v12 = vpack.c.bf16 %v14108_v29, %v14107_v11  ;;  %v14091_v11 = vld [vmem:[%s27375_s8 + $0x640] sm:$0xff]  ;;  %v14092_v29 = vld [vmem:[%s27375_s8 + $0x648] sm:$0xff] }
0x1984   : > { %v5762_v14 = vrot.slane %v5761_v4, 1 }
0x1986   : > { %v5763_v18 = vadd.f32 %v5762_v14, %v5761_v4  ;;  %v14109_v4 = vld [vmem:[%s27375_s8 + $0x6c0] sm:$0xff]  ;;  %v14110_v14 = vld [vmem:[%s27375_s8 + $0x6c8] sm:$0xff] }
0x1988   : > { %17792 = vmatmul.mubr.f32.vlgmr.msra.gmra.mrb[30].mxu0 %v5763_v18  ;;  %v20925_v18 = vpack.c.bf16 %v14110_v14, %v14109_v4  ;;  %v14093_v4 = vld [vmem:[%s27375_s8 + $0x650] sm:$0xff]  ;;  %v14094_v14 = vld [vmem:[%s27375_s8 + $0x658] sm:$0xff] }
0x1989   : > { %20890 = vmatpush3.bf16.msra.mxu0 %v23361_v48  ;;  %17826 = vmatprep.mubr.msk.f32.mxu0 %vm22543_vm2, %v22544_v60 }
0x198a   : > { %20891 = vmatprep.subr.bf16.mxu0 %v22542_v32 }
0x198d   : > { %20893 = vmatpush3.bf16.msra.mxu0 %v23367_v51 }
0x198e   : > { %20894 = vmatprep.subr.bf16.mxu0 %v22542_v32 }
0x1991   : > { %20896 = vmatpush3.bf16.msra.mxu0 %v23377_v55 }
0x1992   : > { %20897 = vmatprep.subr.bf16.mxu0 %v22542_v32 }
0x1995   : > { %20899 = vmatpush3.bf16.msra.mxu0 %v23387_v61 }
0x1996   : > { %20900 = vmatprep.subr.bf16.mxu0 %v22542_v32 }
0x1999   : > { %20902 = vmatpush3.bf16.msra.mxu0 %v23397_v0 }
0x199a   : > { %20903 = vmatprep.subr.bf16.mxu0 %v22542_v32 }
0x199d   : > { %20905 = vmatpush3.bf16.msra.mxu0 %v23529_v24 }
0x199e   : > { %20906 = vmatprep.subr.bf16.mxu0 %v22542_v32 }
0x19a1   : > { %20908 = vmatpush3.bf16.msra.mxu0 %v23539_v27 }
0x19a2   : > { %20909 = vmatprep.subr.bf16.mxu0 %v22542_v32 }
0x19a5   : > { %20911 = vmatpush3.bf16.msra.mxu0 %v23549_v34 }
0x19a6   : > { %17829 = vmatprep.subr.mxu0 %v22544_v60 }
0x1a5b   : > { %v5830_v43 = vpop.f32.mrb[30].mxu0 }
0x1a5c   : > { %v5837_v6 = vrot.slane %v5830_v43, %v22967_v8  ;;  %v17793_v26 = vpop.f32.mrb[31].mxu0  ;;  %v14111_v43 = vld [vmem:[%s27375_s8 + $0x6d0] sm:$0xff] }
0x1a5e   : > { %v5838_v30 = vsub.f32 %v5752_v5, %v5837_v6  ;;  %v14105_v5 = vld [vmem:[%s27375_s8 + $0x6a0] sm:$0xff]  ;;  %v14112_v6 = vld [vmem:[%s27375_s8 + $0x6d8] sm:$0xff] }
0x1a5f   : > { %v20919_v9 = vpack.c.bf16 %v14106_v40, %v14105_v5  ;;  %v20928_v26 = vpack.c.bf16 %v14112_v6, %v14111_v43  ;;  %v14089_v5 = vld [vmem:[%s27375_s8 + $0x630] sm:$0xff]  ;;  %v14090_v40 = vld [vmem:[%s27375_s8 + $0x638] sm:$0xff]  ;;  %v14095_v43 = vld [vmem:[%s27375_s8 + $0x660] sm:$0xff] }
0x1a60   : > { %v5839_v20 = vmul.f32 %v5838_v30, %v5838_v30  ;;  %v14096_v6 = vld [vmem:[%s27375_s8 + $0x668] sm:$0xff] }
0x1a62   : > { %v5840_v39 = vsel %vm3174_vm4, %v5839_v20, 0.0  ;;  %v14114_v20 = vld [vmem:[%s27375_s8 + $0x6e8] sm:$0xff] }
0x1a63   : > { %v5841_v42 = vrot.slane %v5840_v39, 4 }
0x1a65   : > { %v5842_v44 = vadd.f32 %v5841_v42, %v5840_v39  ;;  %v14115_v42 = vld [vmem:[%s27375_s8 + $0x6f0] sm:$0xff] }
0x1a67   : > { %v5843_v45 = vrot.slane %v5842_v44, 2 }
0x1a69   : > { %v5844_v36 = vadd.f32 %v5843_v45, %v5842_v44  ;;  %v14116_v44 = vld [vmem:[%s27375_s8 + $0x6f8] sm:$0xff] }
0x1a6a   : > { %v20934_v45 = vpack.c.bf16 %v14116_v44, %v14115_v42  ;;  %v14119_v42 = vld [vmem:[%s27375_s8 + $0x700] sm:$0xff]  ;;  %v14120_v44 = vld [vmem:[%s27375_s8 + $0x708] sm:$0xff] }
0x1a6b   : > { %v5845_v37 = vrot.slane %v5844_v36, 1 }
0x1a6d   : > { %v5846_v46 = vadd.f32 %v5845_v37, %v5844_v36  ;;  %v14083_v36 = vld [vmem:[%s27375_s8 + $0x600] sm:$0xff]  ;;  %v14084_v37 = vld [vmem:[%s27375_s8 + $0x608] sm:$0xff] }
0x1a6f   : > { %17827 = vmatmul.mubr.f32.vlgmr.msra.gmra.mrb[32].mxu0 %v5846_v46 }
0x1a70   : > { %17831 = vmatprep.mubr.msk.f32.mxu0 %vm22543_vm2, %v22544_v60 }
0x1b42   : > { %v5913_v49 = vpop.f32.mrb[32].mxu0 }
0x1b43   : > { %v5914_v15 = vadd.f32 1e-05, %v5913_v49  ;;  %v17828_v17 = vpop.f32.mrb[33].mxu0 }
0x1b45   : > { %22499 = vrsqrt.f32 %v5914_v15  ;;  %v20937_v15 = vpack.c.bf16 %v14084_v37, %v14083_v36  ;;  %v14121_v36 = vld [vmem:[%s27375_s8 + $0x710] sm:$0xff]  ;;  %v14122_v37 = vld [vmem:[%s27375_s8 + $0x718] sm:$0xff] }
0x1b4f   : > { %v22500_v21 = vpop.eup %22499 }
0x1b50   : > { %v5921_v58 = vrot.slane %v22500_v21, %v22967_v8  ;;  %v14085_v21 = vld [vmem:[%s27375_s8 + $0x610] sm:$0xff] }
0x1b52   : > { %v5922_v23 = vmul.f32 %v5921_v58, %v5838_v30  ;;  %v14113_v30 = vld [vmem:[%s27375_s8 + $0x6e0] sm:$0xff]  ;;  %v14086_v58 = vld [vmem:[%s27375_s8 + $0x618] sm:$0xff] }
0x1b53   : > { %v20931_v39 = vpack.c.bf16 %v14114_v20, %v14113_v30  ;;  %v14097_v30 = vld [vmem:[%s27375_s8 + $0x670] sm:$0xff]  ;;  %v14098_v20 = vld [vmem:[%s27375_s8 + $0x678] sm:$0xff] }
0x1b54   : > { %v24559_v62 = vadd.f32 %v5922_v23, %v24068_v47  ;;  %v20913_v47 = vpack.c.bf16 %v14102_v63, %v14101_v10 }
0x1b56   : > { %17830 = vmatpush3.msk.msra.mxu0 %vm3174_vm4, %v24559_v62  ;;  %17910 = vmatpush3.msk.msra.mxu1 %vm3174_vm4, %v24559_v62 }
0x1b57   : > { %17832 = vmatmul.mubr.msk.f32.vlgmr.msra.gmra.mrb[34].mxu0 %vm3343_vm5, %v24319_v52  ;;  %17834 = vmatprep.subr.mxu0 %v22544_v60 }
0x1b58   : > { %17835 = vmatpush3.msk.msra.mxu0 %vm3174_vm4, %v24559_v62  ;;  %17836 = vmatprep.mubr.msk.f32.mxu0 %vm22543_vm2, %v22544_v60 }
0x1b59   : > { %17912 = vmatmul.mubr.msk.f32.vlgmr.msra.gmra.mrb[58].mxu1 %vm3343_vm5, %v24330_v54  ;;  %20912 = vmatprep.subr.bf16.mxu0 %v22542_v32 }
0x1b5a   : > { %20984 = vmatprep.subr.bf16.mxu1 %v22542_v32  ;;  %17981 = vmatprep.mubr.msk.f32.mxu1 %vm22543_vm2, %v22544_v60 }
0x1b5b   : > { %17837 = vmatmul.mubr.msk.f32.vlgmr.msra.gmra.mrb[36].mxu0 %vm3343_vm5, %v24347_v57  ;;  %20986 = vmatpush3.bf16.msra.mxu1 %v23361_v48 }
0x1b5c   : > { %20914 = vmatpush3.bf16.msra.mxu0 %v20913_v47  ;;  %17871 = vmatprep.mubr.msk.f32.mxu0 %vm22543_vm2, %v22544_v60  ;;  %v20940_v47 = vpack.c.bf16 %v14086_v58, %v14085_v21  ;;  %v14124_v21 = vld [vmem:[%s27375_s8 + $0x728] sm:$0xff] }
0x1b5d   : > { %20915 = vmatprep.subr.bf16.mxu0 %v22542_v32  ;;  %20987 = vmatprep.subr.bf16.mxu1 %v22542_v32 }
0x1b5f   : > { %20989 = vmatpush3.bf16.msra.mxu1 %v23367_v51 }
0x1b60   : > { %20917 = vmatpush3.bf16.msra.mxu0 %v20916_v3  ;;  %20990 = vmatprep.subr.bf16.mxu1 %v22542_v32  ;;  %v20943_v3 = vpack.c.bf16 %v14088_v2, %v14087_v1  ;;  %v14129_v2 = vld [vmem:[%s27375_s8 + $0x750] sm:$0xff] }
0x1b61   : > { %20918 = vmatprep.subr.bf16.mxu0 %v22542_v32 }
0x1b63   : > { %20992 = vmatpush3.bf16.msra.mxu1 %v23377_v55 }
0x1b64   : > { %20920 = vmatpush3.bf16.msra.mxu0 %v20919_v9  ;;  %20993 = vmatprep.subr.bf16.mxu1 %v22542_v32  ;;  %v20946_v9 = vpack.c.bf16 %v14090_v40, %v14089_v5  ;;  %v14131_v40 = vld [vmem:[%s27375_s8 + $0x760] sm:$0xff] }
0x1b65   : > { %20921 = vmatprep.subr.bf16.mxu0 %v22542_v32 }
0x1b67   : > { %20995 = vmatpush3.bf16.msra.mxu1 %v23387_v61 }
0x1b68   : > { %20923 = vmatpush3.bf16.msra.mxu0 %v20922_v12  ;;  %20996 = vmatprep.subr.bf16.mxu1 %v22542_v32  ;;  %v20949_v12 = vpack.c.bf16 %v14092_v29, %v14091_v11  ;;  %v14133_v29 = vld [vmem:[%s27375_s8 + $0x770] sm:$0xff] }
0x1b69   : > { %20924 = vmatprep.subr.bf16.mxu0 %v22542_v32 }
0x1b6b   : > { %20998 = vmatpush3.bf16.msra.mxu1 %v23397_v0 }
0x1b6c   : > { %20926 = vmatpush3.bf16.msra.mxu0 %v20925_v18  ;;  %20999 = vmatprep.subr.bf16.mxu1 %v22542_v32  ;;  %v20952_v18 = vpack.c.bf16 %v14094_v14, %v14093_v4 }
0x1b6d   : > { %20927 = vmatprep.subr.bf16.mxu0 %v22542_v32 }
0x1b6f   : > { %21001 = vmatpush3.bf16.msra.mxu1 %v23529_v24 }
0x1b70   : > { %20929 = vmatpush3.bf16.msra.mxu0 %v20928_v26  ;;  %21002 = vmatprep.subr.bf16.mxu1 %v22542_v32  ;;  %v20955_v26 = vpack.c.bf16 %v14096_v6, %v14095_v43 }
0x1b71   : > { %20930 = vmatprep.subr.bf16.mxu0 %v22542_v32 }
0x1b73   : > { %21004 = vmatpush3.bf16.msra.mxu1 %v23539_v27 }
0x1b74   : > { %20932 = vmatpush3.bf16.msra.mxu0 %v20931_v39  ;;  %21005 = vmatprep.subr.bf16.mxu1 %v22542_v32  ;;  %v20958_v39 = vpack.c.bf16 %v14098_v20, %v14097_v30 }
0x1b75   : > { %20933 = vmatprep.subr.bf16.mxu0 %v22542_v32 }
0x1b77   : > { %21007 = vmatpush3.bf16.msra.mxu1 %v23549_v34 }
0x1b78   : > { %21008 = vmatprep.subr.bf16.mxu1 %v22542_v32  ;;  %20935 = vmatpush3.bf16.msra.mxu0 %v20934_v45  ;;  %v20961_v45 = vpack.c.bf16 %v14120_v44, %v14119_v42 }
0x1b79   : > { %20936 = vmatprep.subr.bf16.mxu0 %v22542_v32 }
0x1c2a   : > { %v5993_v46 = vpop.f32.mrb[34].mxu0 }
0x1c2b   : > { %v17833_v49 = vpop.f32.mrb[35].mxu0 }
0x1c2c   : > { %v24660_v17 = vpop.f32.mrb[58].mxu1  ;;  %v20964_v49 = vpack.c.bf16 %v14122_v37, %v14121_v36 }
0x1c2d   : > { %v17913_v23 = vpop.f32.mrb[59].mxu1 }
0x1c2e   : > { %v6080_v10 = vpop.f32.mrb[36].mxu0  ;;  %v14126_v23 = vld [vmem:[%s27375_s8 + $0x738] sm:$0xff] }
0x1c2f   : > { %v17838_v63 = vpop.f32.mrb[37].mxu0  ;;  %17872 = vmatmul.mubr.f32.vlgmr.msra.gmra.mrb[38].mxu0 %v6080_v10 }
0x1c30   : > { %20938 = vmatpush3.bf16.msra.mxu0 %v20937_v15  ;;  %17906 = vmatprep.mubr.msk.f32.mxu0 %vm22543_vm2, %v22544_v60  ;;  %v14123_v15 = vld [vmem:[%s27375_s8 + $0x720] sm:$0xff] }
0x1c31   : > { %20939 = vmatprep.subr.bf16.mxu0 %v22542_v32  ;;  %v20967_v58 = vpack.c.bf16 %v14124_v21, %v14123_v15  ;;  %v14127_v63 = vld [vmem:[%s27375_s8 + $0x740] sm:$0xff] }
0x1c34   : > { %20941 = vmatpush3.bf16.msra.mxu0 %v20940_v47  ;;  %v14128_v47 = vld [vmem:[%s27375_s8 + $0x748] sm:$0xff] }
0x1c35   : > { %20942 = vmatprep.subr.bf16.mxu0 %v22542_v32  ;;  %v20973_v1 = vpack.c.bf16 %v14128_v47, %v14127_v63 }
0x1c38   : > { %20944 = vmatpush3.bf16.msra.mxu0 %v20943_v3  ;;  %v14130_v3 = vld [vmem:[%s27375_s8 + $0x758] sm:$0xff] }
0x1c39   : > { %20945 = vmatprep.subr.bf16.mxu0 %v22542_v32  ;;  %v20976_v5 = vpack.c.bf16 %v14130_v3, %v14129_v2 }
0x1c3c   : > { %20947 = vmatpush3.bf16.msra.mxu0 %v20946_v9  ;;  %v14132_v9 = vld [vmem:[%s27375_s8 + $0x768] sm:$0xff] }
0x1c3d   : > { %20948 = vmatprep.subr.bf16.mxu0 %v22542_v32  ;;  %v20979_v11 = vpack.c.bf16 %v14132_v9, %v14131_v40  ;;  %v14155_v9 = vld [vmem:[%s27375_s8 + $0x800] sm:$0xff] }
0x1c40   : > { %20950 = vmatpush3.bf16.msra.mxu0 %v20949_v12  ;;  %v14134_v12 = vld [vmem:[%s27375_s8 + $0x778] sm:$0xff] }
0x1c41   : > { %20951 = vmatprep.subr.bf16.mxu0 %v22542_v32  ;;  %v20982_v4 = vpack.c.bf16 %v14134_v12, %v14133_v29  ;;  %v14157_v12 = vld [vmem:[%s27375_s8 + $0x810] sm:$0xff] }
0x1c44   : > { %20953 = vmatpush3.bf16.msra.mxu0 %v20952_v18 }
0x1c45   : > { %20954 = vmatprep.subr.bf16.mxu0 %v22542_v32 }
0x1c48   : > { %20956 = vmatpush3.bf16.msra.mxu0 %v20955_v26 }
0x1c49   : > { %20957 = vmatprep.subr.bf16.mxu0 %v22542_v32 }
0x1c4c   : > { %20959 = vmatpush3.bf16.msra.mxu0 %v20958_v39 }
0x1c4d   : > { %20960 = vmatprep.subr.bf16.mxu0 %v22542_v32 }
0x1c4f   : > { %17907 = vmatmul.mubr.f32.vlgmr.msra.gmra.mrb[38].mxu0 %v5993_v46  ;;  %v14125_v46 = vld [vmem:[%s27375_s8 + $0x730] sm:$0xff] }
0x1c50   : > { %20962 = vmatpush3.bf16.msra.mxu0 %v20961_v45  ;;  %17946 = vmatprep.mubr.msk.f32.mxu0 %vm22543_vm2, %v22544_v60  ;;  %v20970_v10 = vpack.c.bf16 %v14126_v23, %v14125_v46 }
0x1c51   : > { %20963 = vmatprep.subr.bf16.mxu0 %v22542_v32 }
0x1c54   : > { %20965 = vmatpush3.bf16.msra.mxu0 %v20964_v49 }
0x1c55   : > { %20966 = vmatprep.subr.bf16.mxu0 %v22542_v32 }
0x1c58   : > { %20968 = vmatpush3.bf16.msra.mxu0 %v20967_v58 }
0x1c59   : > { %20969 = vmatprep.subr.bf16.mxu0 %v22542_v32 }
0x1c5c   : > { %20971 = vmatpush3.bf16.msra.mxu0 %v20970_v10 }
0x1c5d   : > { %20972 = vmatprep.subr.bf16.mxu0 %v22542_v32 }
0x1c60   : > { %20974 = vmatpush3.bf16.msra.mxu0 %v20973_v1 }
0x1c61   : > { %20975 = vmatprep.subr.bf16.mxu0 %v22542_v32 }
0x1c64   : > { %20977 = vmatpush3.bf16.msra.mxu0 %v20976_v5 }
0x1c65   : > { %20978 = vmatprep.subr.bf16.mxu0 %v22542_v32 }
0x1c68   : > { %20980 = vmatpush3.bf16.msra.mxu0 %v20979_v11  ;;  %v14156_v11 = vld [vmem:[%s27375_s8 + $0x808] sm:$0xff] }
0x1c69   : > { %20981 = vmatprep.subr.bf16.mxu0 %v22542_v32  ;;  %v21033_v29 = vpack.c.bf16 %v14156_v11, %v14155_v9  ;;  %v14141_v9 = vld [vmem:[%s27375_s8 + $0x7a0] sm:$0xff]  ;;  %v14142_v11 = vld [vmem:[%s27375_s8 + $0x7a8] sm:$0xff] }
0x1c6c   : > { %20983 = vmatpush3.bf16.msra.mxu0 %v20982_v4  ;;  %v14159_v4 = vld [vmem:[%s27375_s8 + $0x820] sm:$0xff] }
0x1c6d   : > { %18099 = vmatprep.subr.mxu0 %v22544_v60 }
0x1c6f   : > { %17947 = vmatmul.mubr.f32.vlgmr.msra.gmra.mrb[38].mxu0 %v24660_v17 }
0x1c70   : > { %18101 = vmatprep.mubr.msk.f32.mxu0 %vm22543_vm2, %v22544_v60 }
0x1d42   : > { %v6394_v14 = vpop.f32.mrb[38].mxu0 }
0x1d43   : > { %v6399_v18 = vsel %vm3174_vm4, %v6394_v14, 0.0  ;;  %v17948_v43 = vpop.f32.mrb[39].mxu0 }
0x1d44   : > { %v6400_v6 = vrot.slane %v6399_v18, 4  ;;  %v14162_v43 = vld [vmem:[%s27375_s8 + $0x838] sm:$0xff] }
0x1d46   : > { %v6401_v26 = vadd.f32 %v6400_v6, %v6399_v18  ;;  %v14161_v18 = vld [vmem:[%s27375_s8 + $0x830] sm:$0xff] }
0x1d47   : > { %v21042_v6 = vpack.c.bf16 %v14162_v43, %v14161_v18  ;;  %v14147_v18 = vld [vmem:[%s27375_s8 + $0x7d0] sm:$0xff]  ;;  %v14148_v43 = vld [vmem:[%s27375_s8 + $0x7d8] sm:$0xff] }
0x1d48   : > { %v6402_v30 = vrot.slane %v6401_v26, 2 }
0x1d4a   : > { %v6403_v20 = vadd.f32 %v6402_v30, %v6401_v26  ;;  %v14163_v26 = vld [vmem:[%s27375_s8 + $0x840] sm:$0xff]  ;;  %v14164_v30 = vld [vmem:[%s27375_s8 + $0x848] sm:$0xff] }
0x1d4c   : > { %v6404_v39 = vrot.slane %v6403_v20, 1 }
0x1d4e   : > { %v6405_v42 = vadd.f32 %v6404_v39, %v6403_v20  ;;  %v21045_v20 = vpack.c.bf16 %v14164_v30, %v14163_v26  ;;  %v14165_v39 = vld [vmem:[%s27375_s8 + $0x850] sm:$0xff]  ;;  %v14149_v26 = vld [vmem:[%s27375_s8 + $0x7e0] sm:$0xff]  ;;  %v14150_v30 = vld [vmem:[%s27375_s8 + $0x7e8] sm:$0xff] }
0x1d50   : > { %17982 = vmatmul.mubr.f32.vlgmr.msra.gmra.mrb[60].mxu1 %v6405_v42  ;;  %v14166_v42 = vld [vmem:[%s27375_s8 + $0x858] sm:$0xff] }
0x1d51   : > { %21010 = vmatpush3.bf16.msra.mxu1 %v23361_v48  ;;  %18016 = vmatprep.mubr.msk.f32.mxu1 %vm22543_vm2, %v22544_v60 }
0x1d52   : > { %21011 = vmatprep.subr.bf16.mxu1 %v22542_v32 }
0x1d55   : > { %21013 = vmatpush3.bf16.msra.mxu1 %v23367_v51 }
0x1d56   : > { %21014 = vmatprep.subr.bf16.mxu1 %v22542_v32 }
0x1d59   : > { %21016 = vmatpush3.bf16.msra.mxu1 %v23377_v55 }
0x1d5a   : > { %21017 = vmatprep.subr.bf16.mxu1 %v22542_v32 }
0x1d5d   : > { %21019 = vmatpush3.bf16.msra.mxu1 %v23387_v61 }
0x1d5e   : > { %21020 = vmatprep.subr.bf16.mxu1 %v22542_v32 }
0x1d61   : > { %21022 = vmatpush3.bf16.msra.mxu1 %v23397_v0 }
0x1d62   : > { %21023 = vmatprep.subr.bf16.mxu1 %v22542_v32 }
0x1d65   : > { %21025 = vmatpush3.bf16.msra.mxu1 %v23529_v24 }
0x1d66   : > { %21026 = vmatprep.subr.bf16.mxu1 %v22542_v32 }
0x1d69   : > { %21028 = vmatpush3.bf16.msra.mxu1 %v23539_v27 }
0x1d6a   : > { %21029 = vmatprep.subr.bf16.mxu1 %v22542_v32 }
0x1d6d   : > { %21031 = vmatpush3.bf16.msra.mxu1 %v23549_v34 }
0x1d6e   : > { %18019 = vmatprep.subr.mxu1 %v22544_v60 }
0x1e23   : > { %v6472_v17 = vpop.f32.mrb[60].mxu1 }
0x1e24   : > { %v6479_v44 = vrot.slane %v6472_v17, %v22967_v8  ;;  %v17983_v45 = vpop.f32.mrb[61].mxu1  ;;  %v21048_v17 = vpack.c.bf16 %v14166_v42, %v14165_v39  ;;  %v14151_v39 = vld [vmem:[%s27375_s8 + $0x7f0] sm:$0xff]  ;;  %v14152_v42 = vld [vmem:[%s27375_s8 + $0x7f8] sm:$0xff] }
0x1e25   : > { %v14168_v45 = vld [vmem:[%s27375_s8 + $0x868] sm:$0xff] }
0x1e26   : > { %v6480_v36 = vsub.f32 %v6394_v14, %v6479_v44  ;;  %v14160_v14 = vld [vmem:[%s27375_s8 + $0x828] sm:$0xff]  ;;  %v14167_v44 = vld [vmem:[%s27375_s8 + $0x860] sm:$0xff] }
0x1e28   : > { %v6481_v37 = vmul.f32 %v6480_v36, %v6480_v36 }
0x1e2a   : > { %v6482_v49 = vsel %vm3174_vm4, %v6481_v37, 0.0  ;;  %v14169_v37 = vld [vmem:[%s27375_s8 + $0x870] sm:$0xff] }
0x1e2b   : > { %v6483_v15 = vrot.slane %v6482_v49, 4 }
0x1e2d   : > { %v6484_v21 = vadd.f32 %v6483_v15, %v6482_v49  ;;  %v14170_v49 = vld [vmem:[%s27375_s8 + $0x878] sm:$0xff] }
0x1e2e   : > { %v21054_v15 = vpack.c.bf16 %v14170_v49, %v14169_v37  ;;  %v14175_v37 = vld [vmem:[%s27375_s8 + $0x890] sm:$0xff]  ;;  %v14176_v49 = vld [vmem:[%s27375_s8 + $0x898] sm:$0xff] }
0x1e2f   : > { %v6485_v58 = vrot.slane %v6484_v21, 2 }
0x1e31   : > { %v6486_v46 = vadd.f32 %v6485_v58, %v6484_v21  ;;  %v14137_v21 = vld [vmem:[%s27375_s8 + $0x780] sm:$0xff]  ;;  %v14138_v58 = vld [vmem:[%s27375_s8 + $0x788] sm:$0xff] }
0x1e33   : > { %v6487_v23 = vrot.slane %v6486_v46, 1 }
0x1e35   : > { %v6488_v10 = vadd.f32 %v6487_v23, %v6486_v46 }
0x1e37   : > { %18017 = vmatmul.mubr.f32.vlgmr.msra.gmra.mrb[62].mxu1 %v6488_v10  ;;  %v21057_v10 = vpack.c.bf16 %v14138_v58, %v14137_v21  ;;  %v14177_v21 = vld [vmem:[%s27375_s8 + $0x8a0] sm:$0xff]  ;;  %v14178_v58 = vld [vmem:[%s27375_s8 + $0x8a8] sm:$0xff] }
0x1e38   : > { %18021 = vmatprep.mubr.msk.f32.mxu1 %vm22543_vm2, %v22544_v60 }
0x1f0a   : > { %v6555_v63 = vpop.f32.mrb[62].mxu1 }
0x1f0b   : > { %v6556_v47 = vadd.f32 1e-05, %v6555_v63  ;;  %v18018_v1 = vpop.f32.mrb[63].mxu1 }
0x1f0c   : > { %v14140_v1 = vld [vmem:[%s27375_s8 + $0x798] sm:$0xff] }
0x1f0d   : > { %22501 = vrsqrt.f32 %v6556_v47  ;;  %v14139_v47 = vld [vmem:[%s27375_s8 + $0x790] sm:$0xff] }
0x1f17   : > { %v22502_v2 = vpop.eup %22501 }
0x1f18   : > { %v6563_v3 = vrot.slane %v22502_v2, %v22967_v8 }
0x1f1a   : > { %v6564_v5 = vmul.f32 %v6563_v3, %v6480_v36  ;;  %v21051_v36 = vpack.c.bf16 %v14168_v45, %v14167_v44  ;;  %v14173_v44 = vld [vmem:[%s27375_s8 + $0x880] sm:$0xff]  ;;  %v14174_v45 = vld [vmem:[%s27375_s8 + $0x888] sm:$0xff] }
0x1f1c   : > { %v6565_v40 = vmax.f32 %v6564_v5, 0.0 }
0x1f1e   : > { %18020 = vmatpush3.msk.msra.mxu1 %vm3174_vm4, %v6565_v40  ;;  %18100 = vmatpush3.msk.msra.mxu0 %vm3174_vm4, %v6565_v40 }
0x1f1f   : > { %18022 = vmatmul.mubr.msk.f32.vlgmr.msra.gmra.mrb[64].mxu1 %vm3343_vm5, %v24319_v52  ;;  %18024 = vmatprep.subr.mxu1 %v22544_v60  ;;  %v14158_v52 = vld [vmem:[%s27375_s8 + $0x818] sm:$0xff] }
0x1f20   : > { %18025 = vmatpush3.msk.msra.mxu1 %vm3174_vm4, %v6565_v40  ;;  %18026 = vmatprep.mubr.msk.f32.mxu1 %vm22543_vm2, %v22544_v60  ;;  %v21060_v40 = vpack.c.bf16 %v14140_v1, %v14139_v47  ;;  %v14181_v1 = vld [vmem:[%s27375_s8 + $0x8c0] sm:$0xff] }
0x1f21   : > { %18102 = vmatmul.mubr.msk.f32.vlgmr.msra.gmra.mrb[40].mxu0 %vm3343_vm5, %v24330_v54  ;;  %21032 = vmatprep.subr.bf16.mxu1 %v22542_v32  ;;  %v21036_v54 = vpack.c.bf16 %v14158_v52, %v14157_v12  ;;  %v14143_v12 = vld [vmem:[%s27375_s8 + $0x7b0] sm:$0xff]  ;;  %v14144_v52 = vld [vmem:[%s27375_s8 + $0x7b8] sm:$0xff] }
0x1f22   : > { %21104 = vmatprep.subr.bf16.mxu0 %v22542_v32  ;;  %18171 = vmatprep.mubr.msk.f32.mxu0 %vm22543_vm2, %v22544_v60 }
0x1f23   : > { %18027 = vmatmul.mubr.msk.f32.vlgmr.msra.gmra.mrb[66].mxu1 %vm3343_vm5, %v24347_v57  ;;  %21106 = vmatpush3.bf16.msra.mxu0 %v23361_v48  ;;  %v21039_v57 = vpack.c.bf16 %v14160_v14, %v14159_v4  ;;  %v14145_v4 = vld [vmem:[%s27375_s8 + $0x7c0] sm:$0xff]  ;;  %v14146_v14 = vld [vmem:[%s27375_s8 + $0x7c8] sm:$0xff] }
0x1f24   : > { %21034 = vmatpush3.bf16.msra.mxu1 %v21033_v29  ;;  %18061 = vmatprep.mubr.msk.f32.mxu1 %vm22543_vm2, %v22544_v60  ;;  %v21063_v29 = vpack.c.bf16 %v14142_v11, %v14141_v9  ;;  %v14185_v11 = vld [vmem:[%s27375_s8 + $0x8e0] sm:$0xff] }
0x1f25   : > { %21035 = vmatprep.subr.bf16.mxu1 %v22542_v32  ;;  %21107 = vmatprep.subr.bf16.mxu0 %v22542_v32 }
0x1f27   : > { %21109 = vmatpush3.bf16.msra.mxu0 %v23367_v51 }
0x1f28   : > { %21037 = vmatpush3.bf16.msra.mxu1 %v21036_v54  ;;  %21110 = vmatprep.subr.bf16.mxu0 %v22542_v32  ;;  %v21066_v54 = vpack.c.bf16 %v14144_v52, %v14143_v12  ;;  %v14187_v52 = vld [vmem:[%s27375_s8 + $0x8f0] sm:$0xff] }
0x1f29   : > { %21038 = vmatprep.subr.bf16.mxu1 %v22542_v32 }
0x1f2b   : > { %21112 = vmatpush3.bf16.msra.mxu0 %v23377_v55 }
0x1f2c   : > { %21040 = vmatpush3.bf16.msra.mxu1 %v21039_v57  ;;  %21113 = vmatprep.subr.bf16.mxu0 %v22542_v32  ;;  %v21069_v57 = vpack.c.bf16 %v14146_v14, %v14145_v4 }
0x1f2d   : > { %21041 = vmatprep.subr.bf16.mxu1 %v22542_v32 }
0x1f2f   : > { %21115 = vmatpush3.bf16.msra.mxu0 %v23387_v61 }
0x1f30   : > { %21043 = vmatpush3.bf16.msra.mxu1 %v21042_v6  ;;  %21116 = vmatprep.subr.bf16.mxu0 %v22542_v32  ;;  %v21072_v6 = vpack.c.bf16 %v14148_v43, %v14147_v18 }
0x1f31   : > { %21044 = vmatprep.subr.bf16.mxu1 %v22542_v32 }
0x1f33   : > { %21118 = vmatpush3.bf16.msra.mxu0 %v23397_v0 }
0x1f34   : > { %21046 = vmatpush3.bf16.msra.mxu1 %v21045_v20  ;;  %21119 = vmatprep.subr.bf16.mxu0 %v22542_v32  ;;  %v21075_v20 = vpack.c.bf16 %v14150_v30, %v14149_v26 }
0x1f35   : > { %21047 = vmatprep.subr.bf16.mxu1 %v22542_v32 }
0x1f37   : > { %21121 = vmatpush3.bf16.msra.mxu0 %v23529_v24 }
0x1f38   : > { %21049 = vmatpush3.bf16.msra.mxu1 %v21048_v17  ;;  %21122 = vmatprep.subr.bf16.mxu0 %v22542_v32  ;;  %v21078_v17 = vpack.c.bf16 %v14152_v42, %v14151_v39 }
0x1f39   : > { %21050 = vmatprep.subr.bf16.mxu1 %v22542_v32 }
0x1f3b   : > { %21124 = vmatpush3.bf16.msra.mxu0 %v23539_v27 }
0x1f3c   : > { %21052 = vmatpush3.bf16.msra.mxu1 %v21051_v36  ;;  %21125 = vmatprep.subr.bf16.mxu0 %v22542_v32  ;;  %v21081_v36 = vpack.c.bf16 %v14174_v45, %v14173_v44 }
0x1f3d   : > { %21053 = vmatprep.subr.bf16.mxu1 %v22542_v32 }
0x1f3f   : > { %21127 = vmatpush3.bf16.msra.mxu0 %v23549_v34 }
0x1f40   : > { %21128 = vmatprep.subr.bf16.mxu0 %v22542_v32  ;;  %21055 = vmatpush3.bf16.msra.mxu1 %v21054_v15  ;;  %v21084_v15 = vpack.c.bf16 %v14176_v49, %v14175_v37 }
0x1f41   : > { %21056 = vmatprep.subr.bf16.mxu1 %v22542_v32 }
0x1ff2   : > { %v6635_v46 = vpop.f32.mrb[64].mxu1 }
0x1ff3   : > { %v18023_v23 = vpop.f32.mrb[65].mxu1 }
0x1ff4   : > { %v24895_v63 = vpop.f32.mrb[40].mxu0  ;;  %v21087_v23 = vpack.c.bf16 %v14178_v58, %v14177_v21 }
0x1ff5   : > { %v18103_v2 = vpop.f32.mrb[41].mxu0 }
0x1ff6   : > { %v6722_v3 = vpop.f32.mrb[66].mxu1  ;;  %v14182_v2 = vld [vmem:[%s27375_s8 + $0x8c8] sm:$0xff] }
0x1ff7   : > { %v18028_v5 = vpop.f32.mrb[67].mxu1  ;;  %18062 = vmatmul.mubr.f32.vlgmr.msra.gmra.mrb[68].mxu1 %v6722_v3  ;;  %v21093_v3 = vpack.c.bf16 %v14182_v2, %v14181_v1 }
0x1ff8   : > { %21058 = vmatpush3.bf16.msra.mxu1 %v21057_v10  ;;  %18096 = vmatprep.mubr.msk.f32.mxu1 %vm22543_vm2, %v22544_v60  ;;  %v14180_v10 = vld [vmem:[%s27375_s8 + $0x8b8] sm:$0xff]  ;;  %v14183_v5 = vld [vmem:[%s27375_s8 + $0x8d0] sm:$0xff] }
0x1ff9   : > { %21059 = vmatprep.subr.bf16.mxu1 %v22542_v32 }
0x1ffc   : > { %21061 = vmatpush3.bf16.msra.mxu1 %v21060_v40  ;;  %v14184_v40 = vld [vmem:[%s27375_s8 + $0x8d8] sm:$0xff] }
0x1ffd   : > { %21062 = vmatprep.subr.bf16.mxu1 %v22542_v32  ;;  %v21096_v9 = vpack.c.bf16 %v14184_v40, %v14183_v5  ;;  %v14209_v40 = vld [vmem:[%s27375_s8 + $0x980] sm:$0xff] }
0x2000   : > { %21064 = vmatpush3.bf16.msra.mxu1 %v21063_v29  ;;  %v14186_v29 = vld [vmem:[%s27375_s8 + $0x8e8] sm:$0xff] }
0x2001   : > { %21065 = vmatprep.subr.bf16.mxu1 %v22542_v32  ;;  %v21099_v12 = vpack.c.bf16 %v14186_v29, %v14185_v11  ;;  %v25050_v11 = vld [vmem:[%s27374_s7] sm:$0xf]  ;;  %v25062_v29 = vld [vmem:[%s27374_s7 + $0x8] sm:$0xf] }
0x2004   : > { %21067 = vmatpush3.bf16.msra.mxu1 %v21066_v54  ;;  %v14188_v54 = vld [vmem:[%s27375_s8 + $0x8f8] sm:$0xff] }
0x2005   : > { %21068 = vmatprep.subr.bf16.mxu1 %v22542_v32  ;;  %v21102_v4 = vpack.c.bf16 %v14188_v54, %v14187_v52  ;;  %v14212_v52 = vld [vmem:[%s27375_s8 + $0x998] sm:$0xff]  ;;  %v25079_v54 = vld [vmem:[%s27374_s7 + $0x4] sm:$0xf] }
0x2008   : > { %21070 = vmatpush3.bf16.msra.mxu1 %v21069_v57 }
0x2009   : > { %21071 = vmatprep.subr.bf16.mxu1 %v22542_v32 }
0x200c   : > { %21073 = vmatpush3.bf16.msra.mxu1 %v21072_v6 }
0x200d   : > { %21074 = vmatprep.subr.bf16.mxu1 %v22542_v32 }
0x2010   : > { %21076 = vmatpush3.bf16.msra.mxu1 %v21075_v20 }
0x2011   : > { %21077 = vmatprep.subr.bf16.mxu1 %v22542_v32 }
0x2014   : > { %21079 = vmatpush3.bf16.msra.mxu1 %v21078_v17 }
0x2015   : > { %21080 = vmatprep.subr.bf16.mxu1 %v22542_v32 }
0x2017   : > { %18097 = vmatmul.mubr.f32.vlgmr.msra.gmra.mrb[68].mxu1 %v6635_v46  ;;  %v14179_v46 = vld [vmem:[%s27375_s8 + $0x8b0] sm:$0xff] }
0x2018   : > { %21082 = vmatpush3.bf16.msra.mxu1 %v21081_v36  ;;  %18136 = vmatprep.mubr.msk.f32.mxu1 %vm22543_vm2, %v22544_v60  ;;  %v21090_v47 = vpack.c.bf16 %v14180_v10, %v14179_v46 }
0x2019   : > { %21083 = vmatprep.subr.bf16.mxu1 %v22542_v32 }
0x201c   : > { %21085 = vmatpush3.bf16.msra.mxu1 %v21084_v15 }
0x201d   : > { %21086 = vmatprep.subr.bf16.mxu1 %v22542_v32 }
0x2020   : > { %21088 = vmatpush3.bf16.msra.mxu1 %v21087_v23 }
0x2021   : > { %21089 = vmatprep.subr.bf16.mxu1 %v22542_v32 }
0x2024   : > { %21091 = vmatpush3.bf16.msra.mxu1 %v21090_v47 }
0x2025   : > { %21092 = vmatprep.subr.bf16.mxu1 %v22542_v32 }
0x2028   : > { %21094 = vmatpush3.bf16.msra.mxu1 %v21093_v3 }
0x2029   : > { %21095 = vmatprep.subr.bf16.mxu1 %v22542_v32 }
0x202c   : > { %21097 = vmatpush3.bf16.msra.mxu1 %v21096_v9  ;;  %v14210_v9 = vld [vmem:[%s27375_s8 + $0x988] sm:$0xff] }
0x202d   : > { %21098 = vmatprep.subr.bf16.mxu1 %v22542_v32 }
0x2030   : > { %21100 = vmatpush3.bf16.msra.mxu1 %v21099_v12  ;;  %v14211_v12 = vld [vmem:[%s27375_s8 + $0x990] sm:$0xff] }
0x2031   : > { %21101 = vmatprep.subr.bf16.mxu1 %v22542_v32 }
0x2034   : > { %21103 = vmatpush3.bf16.msra.mxu1 %v21102_v4  ;;  %v21156_v4 = vpack.c.bf16 %v14212_v52, %v14211_v12  ;;  %v14195_v12 = vld [vmem:[%s27375_s8 + $0x920] sm:$0xff]  ;;  %v14196_v52 = vld [vmem:[%s27375_s8 + $0x928] sm:$0xff] }
0x2035   : > { %18289 = vmatprep.subr.mxu1 %v22544_v60 }
0x2037   : > { %18137 = vmatmul.mubr.f32.vlgmr.msra.gmra.mrb[68].mxu1 %v24895_v63 }
0x2038   : > { %18291 = vmatprep.mubr.msk.f32.mxu1 %vm22543_vm2, %v22544_v60 }
0x210a   : > { %v7036_v14 = vpop.f32.mrb[68].mxu1 }
0x210b   : > { %v7041_v57 = vsel %vm3174_vm4, %v7036_v14, 0.0  ;;  %v18138_v18 = vpop.f32.mrb[69].mxu1 }
0x210c   : > { %v7042_v43 = vrot.slane %v7041_v57, 4 }
0x210e   : > { %v7043_v6 = vadd.f32 %v7042_v43, %v7041_v57  ;;  %v14214_v57 = vld [vmem:[%s27375_s8 + $0x9a8] sm:$0xff]  ;;  %v14215_v43 = vld [vmem:[%s27375_s8 + $0x9b0] sm:$0xff] }
0x2110   : > { %v7044_v26 = vrot.slane %v7043_v6, 2 }
0x2112   : > { %v7045_v30 = vadd.f32 %v7044_v26, %v7043_v6  ;;  %v14216_v6 = vld [vmem:[%s27375_s8 + $0x9b8] sm:$0xff] }
0x2113   : > { %v21162_v26 = vpack.c.bf16 %v14216_v6, %v14215_v43  ;;  %v14199_v43 = vld [vmem:[%s27375_s8 + $0x940] sm:$0xff]  ;;  %v14200_v6 = vld [vmem:[%s27375_s8 + $0x948] sm:$0xff] }
0x2114   : > { %v7046_v20 = vrot.slane %v7045_v30, 1 }
0x2116   : > { %v7047_v39 = vadd.f32 %v7046_v20, %v7045_v30  ;;  %v14217_v30 = vld [vmem:[%s27375_s8 + $0x9c0] sm:$0xff]  ;;  %v14218_v20 = vld [vmem:[%s27375_s8 + $0x9c8] sm:$0xff] }
0x2118   : > { %18172 = vmatmul.mubr.f32.vlgmr.msra.gmra.mrb[42].mxu0 %v7047_v39  ;;  %v21165_v39 = vpack.c.bf16 %v14218_v20, %v14217_v30  ;;  %v14201_v30 = vld [vmem:[%s27375_s8 + $0x950] sm:$0xff]  ;;  %v14202_v20 = vld [vmem:[%s27375_s8 + $0x958] sm:$0xff] }
0x2119   : > { %21130 = vmatpush3.bf16.msra.mxu0 %v23361_v48  ;;  %18206 = vmatprep.mubr.msk.f32.mxu0 %vm22543_vm2, %v22544_v60 }
0x211a   : > { %21131 = vmatprep.subr.bf16.mxu0 %v22542_v32 }
0x211d   : > { %21133 = vmatpush3.bf16.msra.mxu0 %v23367_v51 }
0x211e   : > { %21134 = vmatprep.subr.bf16.mxu0 %v22542_v32 }
0x2121   : > { %21136 = vmatpush3.bf16.msra.mxu0 %v23377_v55 }
0x2122   : > { %21137 = vmatprep.subr.bf16.mxu0 %v22542_v32 }
0x2125   : > { %21139 = vmatpush3.bf16.msra.mxu0 %v23387_v61 }
0x2126   : > { %21140 = vmatprep.subr.bf16.mxu0 %v22542_v32 }
0x2129   : > { %21142 = vmatpush3.bf16.msra.mxu0 %v23397_v0 }
0x212a   : > { %21143 = vmatprep.subr.bf16.mxu0 %v22542_v32 }
0x212d   : > { %21145 = vmatpush3.bf16.msra.mxu0 %v23529_v24 }
0x212e   : > { %21146 = vmatprep.subr.bf16.mxu0 %v22542_v32 }
0x2131   : > { %21148 = vmatpush3.bf16.msra.mxu0 %v23539_v27 }
0x2132   : > { %21149 = vmatprep.subr.bf16.mxu0 %v22542_v32 }
0x2135   : > { %21151 = vmatpush3.bf16.msra.mxu0 %v23549_v34 }
0x2136   : > { %18209 = vmatprep.subr.mxu0 %v22544_v60 }
0x21eb   : > { %v7114_v63 = vpop.f32.mrb[42].mxu0 }
0x21ec   : > { %v7121_v42 = vrot.slane %v7114_v63, %v22967_v8  ;;  %v18173_v17 = vpop.f32.mrb[43].mxu0  ;;  %v14219_v63 = vld [vmem:[%s27375_s8 + $0x9d0] sm:$0xff] }
0x21ee   : > { %v7122_v44 = vsub.f32 %v7036_v14, %v7121_v42  ;;  %v14213_v14 = vld [vmem:[%s27375_s8 + $0x9a0] sm:$0xff]  ;;  %v14220_v42 = vld [vmem:[%s27375_s8 + $0x9d8] sm:$0xff] }
0x21ef   : > { %v21159_v18 = vpack.c.bf16 %v14214_v57, %v14213_v14  ;;  %v21168_v17 = vpack.c.bf16 %v14220_v42, %v14219_v63  ;;  %v14197_v14 = vld [vmem:[%s27375_s8 + $0x930] sm:$0xff]  ;;  %v14198_v57 = vld [vmem:[%s27375_s8 + $0x938] sm:$0xff]  ;;  %v14203_v63 = vld [vmem:[%s27375_s8 + $0x960] sm:$0xff] }
0x21f0   : > { %v7123_v45 = vmul.f32 %v7122_v44, %v7122_v44  ;;  %v14204_v42 = vld [vmem:[%s27375_s8 + $0x968] sm:$0xff] }
0x21f2   : > { %v7124_v36 = vsel %vm3174_vm4, %v7123_v45, 0.0  ;;  %v14222_v45 = vld [vmem:[%s27375_s8 + $0x9e8] sm:$0xff] }
0x21f3   : > { %v7125_v37 = vrot.slane %v7124_v36, 4 }
0x21f5   : > { %v7126_v49 = vadd.f32 %v7125_v37, %v7124_v36  ;;  %v14223_v37 = vld [vmem:[%s27375_s8 + $0x9f0] sm:$0xff] }
0x21f7   : > { %v7127_v15 = vrot.slane %v7126_v49, 2 }
0x21f9   : > { %v7128_v21 = vadd.f32 %v7127_v15, %v7126_v49  ;;  %v14224_v49 = vld [vmem:[%s27375_s8 + $0x9f8] sm:$0xff] }
0x21fa   : > { %v21174_v15 = vpack.c.bf16 %v14224_v49, %v14223_v37  ;;  %v14227_v37 = vld [vmem:[%s27375_s8 + $0xa00] sm:$0xff]  ;;  %v14228_v49 = vld [vmem:[%s27375_s8 + $0xa08] sm:$0xff] }
0x21fb   : > { %v7129_v58 = vrot.slane %v7128_v21, 1 }
0x21fd   : > { %v7130_v23 = vadd.f32 %v7129_v58, %v7128_v21  ;;  %v14191_v21 = vld [vmem:[%s27375_s8 + $0x900] sm:$0xff]  ;;  %v14192_v58 = vld [vmem:[%s27375_s8 + $0x908] sm:$0xff] }
0x21ff   : > { %18207 = vmatmul.mubr.f32.vlgmr.msra.gmra.mrb[44].mxu0 %v7130_v23 }
0x2200   : > { %18211 = vmatprep.mubr.msk.f32.mxu0 %vm22543_vm2, %v22544_v60 }
0x22d2   : > { %v7197_v46 = vpop.f32.mrb[44].mxu0 }
0x22d3   : > { %v7198_v10 = vadd.f32 1e-05, %v7197_v46  ;;  %v18208_v47 = vpop.f32.mrb[45].mxu0 }
0x22d5   : > { %22503 = vrsqrt.f32 %v7198_v10  ;;  %v21177_v10 = vpack.c.bf16 %v14192_v58, %v14191_v21  ;;  %v14229_v21 = vld [vmem:[%s27375_s8 + $0xa10] sm:$0xff]  ;;  %v14230_v58 = vld [vmem:[%s27375_s8 + $0xa18] sm:$0xff] }
0x22df   : > { %v22504_v1 = vpop.eup %22503 }
0x22e0   : > { %v7205_v2 = vrot.slane %v22504_v1, %v22967_v8  ;;  %v14193_v1 = vld [vmem:[%s27375_s8 + $0x910] sm:$0xff] }
0x22e2   : > { %v7206_v3 = vmul.f32 %v7205_v2, %v7122_v44  ;;  %v14221_v44 = vld [vmem:[%s27375_s8 + $0x9e0] sm:$0xff]  ;;  %v14194_v2 = vld [vmem:[%s27375_s8 + $0x918] sm:$0xff] }
0x22e3   : > { %v21171_v36 = vpack.c.bf16 %v14222_v45, %v14221_v44  ;;  %v14205_v44 = vld [vmem:[%s27375_s8 + $0x970] sm:$0xff]  ;;  %v14206_v45 = vld [vmem:[%s27375_s8 + $0x978] sm:$0xff] }
0x22e4   : > { %v25035_v5 = vadd.f32 %v7206_v3, %v24559_v62  ;;  %v21153_v62 = vpack.c.bf16 %v14210_v9, %v14209_v40 }
0x22e6   : > { %18210 = vmatpush3.msk.msra.mxu0 %vm3174_vm4, %v25035_v5  ;;  %18290 = vmatpush3.msk.msra.mxu1 %vm3174_vm4, %v25035_v5 }
0x22e7   : > { %18212 = vmatmul.mubr.msk.f32.vlgmr.msra.gmra.mrb[46].mxu0 %vm3343_vm5, %v25050_v11  ;;  %18214 = vmatprep.subr.mxu0 %v22544_v60 }
0x22e8   : > { %18215 = vmatpush3.msk.msra.mxu0 %vm3174_vm4, %v25035_v5  ;;  %18216 = vmatprep.mubr.msk.f32.mxu0 %vm22543_vm2, %v22544_v60 }
0x22e9   : > { %18292 = vmatmul.mubr.msk.f32.vlgmr.msra.gmra.mrb[70].mxu1 %vm3343_vm5, %v25062_v29  ;;  %21152 = vmatprep.subr.bf16.mxu0 %v22542_v32 }
0x22ea   : > { %21224 = vmatprep.subr.bf16.mxu1 %v22542_v32  ;;  %18361 = vmatprep.mubr.msk.f32.mxu1 %vm22543_vm2, %v22544_v60 }
0x22eb   : > { %18217 = vmatmul.mubr.msk.f32.vlgmr.msra.gmra.mrb[48].mxu0 %vm3343_vm5, %v25079_v54  ;;  %21226 = vmatpush3.bf16.msra.mxu1 %v23361_v48 }
0x22ec   : > { %21154 = vmatpush3.bf16.msra.mxu0 %v21153_v62  ;;  %18251 = vmatprep.mubr.msk.f32.mxu0 %vm22543_vm2, %v22544_v60  ;;  %v21180_v62 = vpack.c.bf16 %v14194_v2, %v14193_v1  ;;  %v14232_v1 = vld [vmem:[%s27375_s8 + $0xa28] sm:$0xff] }
0x22ed   : > { %21155 = vmatprep.subr.bf16.mxu0 %v22542_v32  ;;  %21227 = vmatprep.subr.bf16.mxu1 %v22542_v32 }
0x22ef   : > { %21229 = vmatpush3.bf16.msra.mxu1 %v23367_v51 }
0x22f0   : > { %21157 = vmatpush3.bf16.msra.mxu0 %v21156_v4  ;;  %21230 = vmatprep.subr.bf16.mxu1 %v22542_v32  ;;  %v21183_v4 = vpack.c.bf16 %v14196_v52, %v14195_v12  ;;  %v14237_v52 = vld [vmem:[%s27375_s8 + $0xa50] sm:$0xff] }
0x22f1   : > { %21158 = vmatprep.subr.bf16.mxu0 %v22542_v32 }
0x22f3   : > { %21232 = vmatpush3.bf16.msra.mxu1 %v23377_v55 }
0x22f4   : > { %21160 = vmatpush3.bf16.msra.mxu0 %v21159_v18  ;;  %21233 = vmatprep.subr.bf16.mxu1 %v22542_v32  ;;  %v21186_v18 = vpack.c.bf16 %v14198_v57, %v14197_v14  ;;  %v14239_v57 = vld [vmem:[%s27375_s8 + $0xa60] sm:$0xff] }
0x22f5   : > { %21161 = vmatprep.subr.bf16.mxu0 %v22542_v32 }
0x22f7   : > { %21235 = vmatpush3.bf16.msra.mxu1 %v23387_v61 }
0x22f8   : > { %21163 = vmatpush3.bf16.msra.mxu0 %v21162_v26  ;;  %21236 = vmatprep.subr.bf16.mxu1 %v22542_v32  ;;  %v21189_v26 = vpack.c.bf16 %v14200_v6, %v14199_v43  ;;  %v14241_v6 = vld [vmem:[%s27375_s8 + $0xa70] sm:$0xff] }
0x22f9   : > { %21164 = vmatprep.subr.bf16.mxu0 %v22542_v32 }
0x22fb   : > { %21238 = vmatpush3.bf16.msra.mxu1 %v23397_v0 }
0x22fc   : > { %21166 = vmatpush3.bf16.msra.mxu0 %v21165_v39  ;;  %21239 = vmatprep.subr.bf16.mxu1 %v22542_v32  ;;  %v21192_v39 = vpack.c.bf16 %v14202_v20, %v14201_v30 }
0x22fd   : > { %21167 = vmatprep.subr.bf16.mxu0 %v22542_v32 }
0x22ff   : > { %21241 = vmatpush3.bf16.msra.mxu1 %v23529_v24 }
0x2300   : > { %21169 = vmatpush3.bf16.msra.mxu0 %v21168_v17  ;;  %21242 = vmatprep.subr.bf16.mxu1 %v22542_v32  ;;  %v21195_v17 = vpack.c.bf16 %v14204_v42, %v14203_v63 }
0x2301   : > { %21170 = vmatprep.subr.bf16.mxu0 %v22542_v32 }
0x2303   : > { %21244 = vmatpush3.bf16.msra.mxu1 %v23539_v27 }
0x2304   : > { %21172 = vmatpush3.bf16.msra.mxu0 %v21171_v36  ;;  %21245 = vmatprep.subr.bf16.mxu1 %v22542_v32  ;;  %v21198_v36 = vpack.c.bf16 %v14206_v45, %v14205_v44 }
0x2305   : > { %21173 = vmatprep.subr.bf16.mxu0 %v22542_v32 }
0x2307   : > { %21247 = vmatpush3.bf16.msra.mxu1 %v23549_v34 }
0x2308   : > { %21248 = vmatprep.subr.bf16.mxu1 %v22542_v32  ;;  %21175 = vmatpush3.bf16.msra.mxu0 %v21174_v15  ;;  %v21201_v15 = vpack.c.bf16 %v14228_v49, %v14227_v37 }
0x2309   : > { %21176 = vmatprep.subr.bf16.mxu0 %v22542_v32 }
0x23ba   : > { %v7277_v23 = vpop.f32.mrb[46].mxu0 }
0x23bb   : > { %v18213_v46 = vpop.f32.mrb[47].mxu0 }
0x23bc   : > { %v25151_v47 = vpop.f32.mrb[70].mxu1  ;;  %v21204_v46 = vpack.c.bf16 %v14230_v58, %v14229_v21 }
0x23bd   : > { %v18293_v3 = vpop.f32.mrb[71].mxu1 }
0x23be   : > { %v7364_v40 = vpop.f32.mrb[48].mxu0  ;;  %v14234_v3 = vld [vmem:[%s27375_s8 + $0xa38] sm:$0xff] }
0x23bf   : > { %v18218_v9 = vpop.f32.mrb[49].mxu0  ;;  %18252 = vmatmul.mubr.f32.vlgmr.msra.gmra.mrb[50].mxu0 %v7364_v40 }
0x23c0   : > { %21178 = vmatpush3.bf16.msra.mxu0 %v21177_v10  ;;  %18286 = vmatprep.mubr.msk.f32.mxu0 %vm22543_vm2, %v22544_v60  ;;  %v14231_v10 = vld [vmem:[%s27375_s8 + $0xa20] sm:$0xff] }
0x23c1   : > { %21179 = vmatprep.subr.bf16.mxu0 %v22542_v32  ;;  %v21207_v2 = vpack.c.bf16 %v14232_v1, %v14231_v10  ;;  %v14235_v9 = vld [vmem:[%s27375_s8 + $0xa40] sm:$0xff] }
0x23c4   : > { %21181 = vmatpush3.bf16.msra.mxu0 %v21180_v62  ;;  %v14236_v62 = vld [vmem:[%s27375_s8 + $0xa48] sm:$0xff] }
0x23c5   : > { %21182 = vmatprep.subr.bf16.mxu0 %v22542_v32  ;;  %v21213_v12 = vpack.c.bf16 %v14236_v62, %v14235_v9 }
0x23c8   : > { %21184 = vmatpush3.bf16.msra.mxu0 %v21183_v4  ;;  %v14238_v4 = vld [vmem:[%s27375_s8 + $0xa58] sm:$0xff] }
0x23c9   : > { %21185 = vmatprep.subr.bf16.mxu0 %v22542_v32  ;;  %v21216_v14 = vpack.c.bf16 %v14238_v4, %v14237_v52 }
0x23cc   : > { %21187 = vmatpush3.bf16.msra.mxu0 %v21186_v18  ;;  %v14240_v18 = vld [vmem:[%s27375_s8 + $0xa68] sm:$0xff] }
0x23cd   : > { %21188 = vmatprep.subr.bf16.mxu0 %v22542_v32  ;;  %v21219_v43 = vpack.c.bf16 %v14240_v18, %v14239_v57  ;;  %v14263_v18 = vld [vmem:[%s27375_s8 + $0xb00] sm:$0xff] }
0x23d0   : > { %21190 = vmatpush3.bf16.msra.mxu0 %v21189_v26  ;;  %v14242_v26 = vld [vmem:[%s27375_s8 + $0xa78] sm:$0xff] }
0x23d1   : > { %21191 = vmatprep.subr.bf16.mxu0 %v22542_v32  ;;  %v21222_v30 = vpack.c.bf16 %v14242_v26, %v14241_v6  ;;  %v14265_v26 = vld [vmem:[%s27375_s8 + $0xb10] sm:$0xff] }
0x23d4   : > { %21193 = vmatpush3.bf16.msra.mxu0 %v21192_v39 }
0x23d5   : > { %21194 = vmatprep.subr.bf16.mxu0 %v22542_v32 }
0x23d8   : > { %21196 = vmatpush3.bf16.msra.mxu0 %v21195_v17 }
0x23d9   : > { %21197 = vmatprep.subr.bf16.mxu0 %v22542_v32 }
0x23dc   : > { %21199 = vmatpush3.bf16.msra.mxu0 %v21198_v36 }
0x23dd   : > { %21200 = vmatprep.subr.bf16.mxu0 %v22542_v32 }
0x23df   : > { %18287 = vmatmul.mubr.f32.vlgmr.msra.gmra.mrb[50].mxu0 %v7277_v23  ;;  %v14233_v23 = vld [vmem:[%s27375_s8 + $0xa30] sm:$0xff] }
0x23e0   : > { %21202 = vmatpush3.bf16.msra.mxu0 %v21201_v15  ;;  %18326 = vmatprep.mubr.msk.f32.mxu0 %vm22543_vm2, %v22544_v60  ;;  %v21210_v40 = vpack.c.bf16 %v14234_v3, %v14233_v23 }
0x23e1   : > { %21203 = vmatprep.subr.bf16.mxu0 %v22542_v32 }
0x23e4   : > { %21205 = vmatpush3.bf16.msra.mxu0 %v21204_v46 }
0x23e5   : > { %21206 = vmatprep.subr.bf16.mxu0 %v22542_v32 }
0x23e8   : > { %21208 = vmatpush3.bf16.msra.mxu0 %v21207_v2 }
0x23e9   : > { %21209 = vmatprep.subr.bf16.mxu0 %v22542_v32 }
0x23ec   : > { %21211 = vmatpush3.bf16.msra.mxu0 %v21210_v40 }
0x23ed   : > { %21212 = vmatprep.subr.bf16.mxu0 %v22542_v32 }
0x23f0   : > { %21214 = vmatpush3.bf16.msra.mxu0 %v21213_v12 }
0x23f1   : > { %21215 = vmatprep.subr.bf16.mxu0 %v22542_v32 }
0x23f4   : > { %21217 = vmatpush3.bf16.msra.mxu0 %v21216_v14 }
0x23f5   : > { %21218 = vmatprep.subr.bf16.mxu0 %v22542_v32 }
0x23f8   : > { %21220 = vmatpush3.bf16.msra.mxu0 %v21219_v43  ;;  %v14264_v43 = vld [vmem:[%s27375_s8 + $0xb08] sm:$0xff] }
0x23f9   : > { %21221 = vmatprep.subr.bf16.mxu0 %v22542_v32  ;;  %v21273_v6 = vpack.c.bf16 %v14264_v43, %v14263_v18 }
0x23fc   : > { %21223 = vmatpush3.bf16.msra.mxu0 %v21222_v30  ;;  %v14266_v30 = vld [vmem:[%s27375_s8 + $0xb18] sm:$0xff] }
0x23fd   : > { %18479 = vmatprep.subr.mxu0 %v22544_v60 }
0x23ff   : > { %18327 = vmatmul.mubr.f32.vlgmr.msra.gmra.mrb[50].mxu0 %v25151_v47 }
0x2400   : > { %18481 = vmatprep.mubr.msk.f32.mxu0 %vm22543_vm2, %v22544_v60 }
0x24d2   : > { %v7678_v20 = vpop.f32.mrb[50].mxu0 }
0x24d3   : > { %v7683_v39 = vsel %vm3174_vm4, %v7678_v20, 0.0  ;;  %v18328_v63 = vpop.f32.mrb[51].mxu0 }
0x24d4   : > { %v7684_v42 = vrot.slane %v7683_v39, 4  ;;  %v14268_v63 = vld [vmem:[%s27375_s8 + $0xb28] sm:$0xff] }
0x24d6   : > { %v7685_v17 = vadd.f32 %v7684_v42, %v7683_v39  ;;  %v14267_v39 = vld [vmem:[%s27375_s8 + $0xb20] sm:$0xff] }
0x24d7   : > { %v21279_v42 = vpack.c.bf16 %v14268_v63, %v14267_v39  ;;  %v14251_v39 = vld [vmem:[%s27375_s8 + $0xab0] sm:$0xff]  ;;  %v14252_v63 = vld [vmem:[%s27375_s8 + $0xab8] sm:$0xff] }
0x24d8   : > { %v7686_v44 = vrot.slane %v7685_v17, 2 }
0x24da   : > { %v7687_v45 = vadd.f32 %v7686_v44, %v7685_v17  ;;  %v14269_v17 = vld [vmem:[%s27375_s8 + $0xb30] sm:$0xff]  ;;  %v14270_v44 = vld [vmem:[%s27375_s8 + $0xb38] sm:$0xff] }
0x24dc   : > { %v7688_v36 = vrot.slane %v7687_v45, 1 }
0x24de   : > { %v7689_v37 = vadd.f32 %v7688_v36, %v7687_v45  ;;  %v21282_v45 = vpack.c.bf16 %v14270_v44, %v14269_v17  ;;  %v14271_v36 = vld [vmem:[%s27375_s8 + $0xb40] sm:$0xff]  ;;  %v14254_v44 = vld [vmem:[%s27375_s8 + $0xac8] sm:$0xff] }
0x24df   : > { %v14253_v17 = vld [vmem:[%s27375_s8 + $0xac0] sm:$0xff] }
0x24e0   : > { %18362 = vmatmul.mubr.f32.vlgmr.msra.gmra.mrb[72].mxu1 %v7689_v37  ;;  %v14272_v37 = vld [vmem:[%s27375_s8 + $0xb48] sm:$0xff] }
0x24e1   : > { %21250 = vmatpush3.bf16.msra.mxu1 %v23361_v48  ;;  %18396 = vmatprep.mubr.msk.f32.mxu1 %vm22543_vm2, %v22544_v60 }
0x24e2   : > { %21251 = vmatprep.subr.bf16.mxu1 %v22542_v32 }
0x24e5   : > { %21253 = vmatpush3.bf16.msra.mxu1 %v23367_v51 }
0x24e6   : > { %21254 = vmatprep.subr.bf16.mxu1 %v22542_v32 }
0x24e9   : > { %21256 = vmatpush3.bf16.msra.mxu1 %v23377_v55 }
0x24ea   : > { %21257 = vmatprep.subr.bf16.mxu1 %v22542_v32 }
0x24ed   : > { %21259 = vmatpush3.bf16.msra.mxu1 %v23387_v61 }
0x24ee   : > { %21260 = vmatprep.subr.bf16.mxu1 %v22542_v32 }
0x24f1   : > { %21262 = vmatpush3.bf16.msra.mxu1 %v23397_v0 }
0x24f2   : > { %21263 = vmatprep.subr.bf16.mxu1 %v22542_v32 }
0x24f5   : > { %21265 = vmatpush3.bf16.msra.mxu1 %v23529_v24 }
0x24f6   : > { %21266 = vmatprep.subr.bf16.mxu1 %v22542_v32 }
0x24f9   : > { %21268 = vmatpush3.bf16.msra.mxu1 %v23539_v27 }
0x24fa   : > { %21269 = vmatprep.subr.bf16.mxu1 %v22542_v32 }
0x24fd   : > { %21271 = vmatpush3.bf16.msra.mxu1 %v23549_v34 }
0x24fe   : > { %18399 = vmatprep.subr.mxu1 %v22544_v60 }
0x25b3   : > { %v7756_v47 = vpop.f32.mrb[72].mxu1 }
0x25b4   : > { %v7763_v49 = vrot.slane %v7756_v47, %v22967_v8  ;;  %v18363_v15 = vpop.f32.mrb[73].mxu1  ;;  %v21285_v47 = vpack.c.bf16 %v14272_v37, %v14271_v36  ;;  %v14255_v36 = vld [vmem:[%s27375_s8 + $0xad0] sm:$0xff]  ;;  %v14256_v37 = vld [vmem:[%s27375_s8 + $0xad8] sm:$0xff] }
0x25b5   : > { %v14274_v15 = vld [vmem:[%s27375_s8 + $0xb58] sm:$0xff] }
0x25b6   : > { %v7764_v21 = vsub.f32 %v7678_v20, %v7763_v49  ;;  %v21276_v20 = vpack.c.bf16 %v14266_v30, %v14265_v26  ;;  %v14273_v49 = vld [vmem:[%s27375_s8 + $0xb50] sm:$0xff]  ;;  %v14249_v26 = vld [vmem:[%s27375_s8 + $0xaa0] sm:$0xff]  ;;  %v14250_v30 = vld [vmem:[%s27375_s8 + $0xaa8] sm:$0xff] }
0x25b8   : > { %v7765_v58 = vmul.f32 %v7764_v21, %v7764_v21 }
0x25ba   : > { %v7766_v46 = vsel %vm3174_vm4, %v7765_v58, 0.0  ;;  %v14275_v58 = vld [vmem:[%s27375_s8 + $0xb60] sm:$0xff] }
0x25bb   : > { %v7767_v10 = vrot.slane %v7766_v46, 4 }
0x25bd   : > { %v7768_v1 = vadd.f32 %v7767_v10, %v7766_v46  ;;  %v14276_v46 = vld [vmem:[%s27375_s8 + $0xb68] sm:$0xff] }
0x25be   : > { %v21291_v10 = vpack.c.bf16 %v14276_v46, %v14275_v58  ;;  %v14259_v58 = vld [vmem:[%s27375_s8 + $0xaf0] sm:$0xff]  ;;  %v14260_v46 = vld [vmem:[%s27375_s8 + $0xaf8] sm:$0xff] }
0x25bf   : > { %v7769_v2 = vrot.slane %v7768_v1, 2 }
0x25c1   : > { %v7770_v23 = vadd.f32 %v7769_v2, %v7768_v1  ;;  %v14277_v1 = vld [vmem:[%s27375_s8 + $0xb70] sm:$0xff]  ;;  %v14278_v2 = vld [vmem:[%s27375_s8 + $0xb78] sm:$0xff] }
0x25c3   : > { %v7771_v3 = vrot.slane %v7770_v23, 1 }
0x25c5   : > { %v7772_v40 = vadd.f32 %v7771_v3, %v7770_v23  ;;  %v21294_v23 = vpack.c.bf16 %v14278_v2, %v14277_v1  ;;  %v14245_v3 = vld [vmem:[%s27375_s8 + $0xa80] sm:$0xff]  ;;  %v14282_v2 = vld [vmem:[%s27375_s8 + $0xb88] sm:$0xff] }
0x25c6   : > { %v14281_v1 = vld [vmem:[%s27375_s8 + $0xb80] sm:$0xff] }
0x25c7   : > { %18397 = vmatmul.mubr.f32.vlgmr.msra.gmra.mrb[74].mxu1 %v7772_v40  ;;  %v14246_v40 = vld [vmem:[%s27375_s8 + $0xa88] sm:$0xff] }
0x25c8   : > { %18401 = vmatprep.mubr.msk.f32.mxu1 %vm22543_vm2, %v22544_v60 }
0x269a   : > { %v7839_v9 = vpop.f32.mrb[74].mxu1 }
0x269b   : > { %v7840_v62 = vadd.f32 1e-05, %v7839_v9  ;;  %v18398_v12 = vpop.f32.mrb[75].mxu1 }
0x269c   : > { %v21297_v12 = vpack.c.bf16 %v14246_v40, %v14245_v3  ;;  %v14283_v3 = vld [vmem:[%s27375_s8 + $0xb90] sm:$0xff]  ;;  %v14284_v40 = vld [vmem:[%s27375_s8 + $0xb98] sm:$0xff] }
0x269d   : > { %22505 = vrsqrt.f32 %v7840_v62 }
0x26a7   : > { %v22506_v52 = vpop.eup %22505 }
0x26a8   : > { %v7847_v4 = vrot.slane %v22506_v52, %v22967_v8 }
0x26aa   : > { %v7848_v14 = vmul.f32 %v7847_v4, %v7764_v21  ;;  %v21288_v21 = vpack.c.bf16 %v14274_v15, %v14273_v49  ;;  %v14247_v4 = vld [vmem:[%s27375_s8 + $0xa90] sm:$0xff]  ;;  %v14257_v49 = vld [vmem:[%s27375_s8 + $0xae0] sm:$0xff]  ;;  %v14258_v15 = vld [vmem:[%s27375_s8 + $0xae8] sm:$0xff] }
0x26ac   : > { %v7849_v57 = vmax.f32 %v7848_v14, 0.0  ;;  %v14248_v14 = vld [vmem:[%s27375_s8 + $0xa98] sm:$0xff] }
0x26ae   : > { %18400 = vmatpush3.msk.msra.mxu1 %vm3174_vm4, %v7849_v57  ;;  %18480 = vmatpush3.msk.msra.mxu0 %vm3174_vm4, %v7849_v57 }
0x26af   : > { %18402 = vmatmul.mubr.msk.f32.vlgmr.msra.gmra.mrb[76].mxu1 %vm3343_vm5, %v25050_v11  ;;  %18404 = vmatprep.subr.mxu1 %v22544_v60 }
0x26b0   : > { %18405 = vmatpush3.msk.msra.mxu1 %vm3174_vm4, %v7849_v57  ;;  %18406 = vmatprep.mubr.msk.f32.mxu1 %vm22543_vm2, %v22544_v60 }
0x26b1   : > { %18482 = vmatmul.mubr.msk.f32.vlgmr.msra.gmra.mrb[52].mxu0 %vm3343_vm5, %v25062_v29  ;;  %21272 = vmatprep.subr.bf16.mxu1 %v22542_v32 }
0x26b2   : > { %21344 = vmatprep.subr.bf16.mxu0 %v22542_v32  ;;  %18551 = vmatprep.mubr.msk.f32.mxu0 %vm22543_vm2, %v22544_v60 }
0x26b3   : > { %18407 = vmatmul.mubr.msk.f32.vlgmr.msra.gmra.mrb[78].mxu1 %vm3343_vm5, %v25079_v54  ;;  %21346 = vmatpush3.bf16.msra.mxu0 %v23361_v48 }
0x26b4   : > { %21274 = vmatpush3.bf16.msra.mxu1 %v21273_v6  ;;  %18441 = vmatprep.mubr.msk.f32.mxu1 %vm22543_vm2, %v22544_v60  ;;  %v21300_v6 = vpack.c.bf16 %v14248_v14, %v14247_v4  ;;  %v14286_v4 = vld [vmem:[%s27375_s8 + $0xba8] sm:$0xff] }
0x26b5   : > { %21275 = vmatprep.subr.bf16.mxu1 %v22542_v32  ;;  %21347 = vmatprep.subr.bf16.mxu0 %v22542_v32 }
0x26b7   : > { %21349 = vmatpush3.bf16.msra.mxu0 %v23367_v51 }
0x26b8   : > { %21277 = vmatpush3.bf16.msra.mxu1 %v21276_v20  ;;  %21350 = vmatprep.subr.bf16.mxu0 %v22542_v32  ;;  %v21303_v20 = vpack.c.bf16 %v14250_v30, %v14249_v26  ;;  %v14291_v30 = vld [vmem:[%s27375_s8 + $0xbd0] sm:$0xff] }
0x26b9   : > { %21278 = vmatprep.subr.bf16.mxu1 %v22542_v32 }
0x26bb   : > { %21352 = vmatpush3.bf16.msra.mxu0 %v23377_v55 }
0x26bc   : > { %21280 = vmatpush3.bf16.msra.mxu1 %v21279_v42  ;;  %21353 = vmatprep.subr.bf16.mxu0 %v22542_v32  ;;  %v21306_v42 = vpack.c.bf16 %v14252_v63, %v14251_v39  ;;  %v14293_v63 = vld [vmem:[%s27375_s8 + $0xbe0] sm:$0xff] }
0x26bd   : > { %21281 = vmatprep.subr.bf16.mxu1 %v22542_v32 }
0x26bf   : > { %21355 = vmatpush3.bf16.msra.mxu0 %v23387_v61 }
0x26c0   : > { %21283 = vmatpush3.bf16.msra.mxu1 %v21282_v45  ;;  %21356 = vmatprep.subr.bf16.mxu0 %v22542_v32  ;;  %v21309_v45 = vpack.c.bf16 %v14254_v44, %v14253_v17  ;;  %v14295_v44 = vld [vmem:[%s27375_s8 + $0xbf0] sm:$0xff] }
0x26c1   : > { %21284 = vmatprep.subr.bf16.mxu1 %v22542_v32 }
0x26c3   : > { %21358 = vmatpush3.bf16.msra.mxu0 %v23397_v0 }
0x26c4   : > { %21286 = vmatpush3.bf16.msra.mxu1 %v21285_v47  ;;  %21359 = vmatprep.subr.bf16.mxu0 %v22542_v32  ;;  %v21312_v47 = vpack.c.bf16 %v14256_v37, %v14255_v36 }
0x26c5   : > { %21287 = vmatprep.subr.bf16.mxu1 %v22542_v32 }
0x26c7   : > { %21361 = vmatpush3.bf16.msra.mxu0 %v23529_v24 }
0x26c8   : > { %21289 = vmatpush3.bf16.msra.mxu1 %v21288_v21  ;;  %21362 = vmatprep.subr.bf16.mxu0 %v22542_v32  ;;  %v21315_v21 = vpack.c.bf16 %v14258_v15, %v14257_v49 }
0x26c9   : > { %21290 = vmatprep.subr.bf16.mxu1 %v22542_v32 }
0x26cb   : > { %21364 = vmatpush3.bf16.msra.mxu0 %v23539_v27 }
0x26cc   : > { %21292 = vmatpush3.bf16.msra.mxu1 %v21291_v10  ;;  %21365 = vmatprep.subr.bf16.mxu0 %v22542_v32  ;;  %v21318_v10 = vpack.c.bf16 %v14260_v46, %v14259_v58 }
0x26cd   : > { %21293 = vmatprep.subr.bf16.mxu1 %v22542_v32 }
0x26cf   : > { %21367 = vmatpush3.bf16.msra.mxu0 %v23549_v34 }
0x26d0   : > { %21368 = vmatprep.subr.bf16.mxu0 %v22542_v32  ;;  %21295 = vmatpush3.bf16.msra.mxu1 %v21294_v23  ;;  %v21321_v23 = vpack.c.bf16 %v14282_v2, %v14281_v1 }
0x26d1   : > { %21296 = vmatprep.subr.bf16.mxu1 %v22542_v32 }
0x2782   : > { %v7919_v9 = vpop.f32.mrb[76].mxu1 }
0x2783   : > { %v18403_v62 = vpop.f32.mrb[77].mxu1 }
0x2784   : > { %v25386_v52 = vpop.f32.mrb[52].mxu0  ;;  %v21324_v62 = vpack.c.bf16 %v14284_v40, %v14283_v3 }
0x2785   : > { %v18483_v57 = vpop.f32.mrb[53].mxu0 }
0x2786   : > { %v8006_v18 = vpop.f32.mrb[78].mxu1  ;;  %v14288_v57 = vld [vmem:[%s27375_s8 + $0xbb8] sm:$0xff] }
0x2787   : > { %v18408_v43 = vpop.f32.mrb[79].mxu1  ;;  %18442 = vmatmul.mubr.f32.vlgmr.msra.gmra.mrb[80].mxu1 %v8006_v18 }
0x2788   : > { %21298 = vmatpush3.bf16.msra.mxu1 %v21297_v12  ;;  %18476 = vmatprep.mubr.msk.f32.mxu1 %vm22543_vm2, %v22544_v60  ;;  %v14285_v12 = vld [vmem:[%s27375_s8 + $0xba0] sm:$0xff] }
0x2789   : > { %21299 = vmatprep.subr.bf16.mxu1 %v22542_v32  ;;  %v21327_v14 = vpack.c.bf16 %v14286_v4, %v14285_v12  ;;  %v14289_v43 = vld [vmem:[%s27375_s8 + $0xbc0] sm:$0xff] }
0x278c   : > { %21301 = vmatpush3.bf16.msra.mxu1 %v21300_v6  ;;  %v14290_v6 = vld [vmem:[%s27375_s8 + $0xbc8] sm:$0xff] }
0x278d   : > { %21302 = vmatprep.subr.bf16.mxu1 %v22542_v32  ;;  %v21333_v26 = vpack.c.bf16 %v14290_v6, %v14289_v43 }
0x2790   : > { %21304 = vmatpush3.bf16.msra.mxu1 %v21303_v20  ;;  %v14292_v20 = vld [vmem:[%s27375_s8 + $0xbd8] sm:$0xff] }
0x2791   : > { %21305 = vmatprep.subr.bf16.mxu1 %v22542_v32  ;;  %v21336_v39 = vpack.c.bf16 %v14292_v20, %v14291_v30 }
0x2794   : > { %21307 = vmatpush3.bf16.msra.mxu1 %v21306_v42  ;;  %v14294_v42 = vld [vmem:[%s27375_s8 + $0xbe8] sm:$0xff] }
0x2795   : > { %21308 = vmatprep.subr.bf16.mxu1 %v22542_v32  ;;  %v21339_v17 = vpack.c.bf16 %v14294_v42, %v14293_v63  ;;  %v14317_v42 = vld [vmem:[%s27375_s8 + $0xc80] sm:$0xff] }
0x2798   : > { %21310 = vmatpush3.bf16.msra.mxu1 %v21309_v45  ;;  %v14296_v45 = vld [vmem:[%s27375_s8 + $0xbf8] sm:$0xff] }
0x2799   : > { %21311 = vmatprep.subr.bf16.mxu1 %v22542_v32  ;;  %v21342_v36 = vpack.c.bf16 %v14296_v45, %v14295_v44  ;;  %v14319_v44 = vld [vmem:[%s27375_s8 + $0xc90] sm:$0xff]  ;;  %v14321_v45 = vld [vmem:[%s27375_s8 + $0xca0] sm:$0xff] }
0x279c   : > { %21313 = vmatpush3.bf16.msra.mxu1 %v21312_v47 }
0x279d   : > { %21314 = vmatprep.subr.bf16.mxu1 %v22542_v32 }
0x27a0   : > { %21316 = vmatpush3.bf16.msra.mxu1 %v21315_v21 }
0x27a1   : > { %21317 = vmatprep.subr.bf16.mxu1 %v22542_v32 }
0x27a4   : > { %21319 = vmatpush3.bf16.msra.mxu1 %v21318_v10 }
0x27a5   : > { %21320 = vmatprep.subr.bf16.mxu1 %v22542_v32 }
0x27a7   : > { %18477 = vmatmul.mubr.f32.vlgmr.msra.gmra.mrb[80].mxu1 %v7919_v9  ;;  %v14287_v9 = vld [vmem:[%s27375_s8 + $0xbb0] sm:$0xff] }
0x27a8   : > { %21322 = vmatpush3.bf16.msra.mxu1 %v21321_v23  ;;  %18516 = vmatprep.mubr.msk.f32.mxu1 %vm22543_vm2, %v22544_v60  ;;  %v21330_v18 = vpack.c.bf16 %v14288_v57, %v14287_v9 }
0x27a9   : > { %21323 = vmatprep.subr.bf16.mxu1 %v22542_v32 }
0x27ac   : > { %21325 = vmatpush3.bf16.msra.mxu1 %v21324_v62 }
0x27ad   : > { %21326 = vmatprep.subr.bf16.mxu1 %v22542_v32 }
0x27b0   : > { %21328 = vmatpush3.bf16.msra.mxu1 %v21327_v14 }
0x27b1   : > { %21329 = vmatprep.subr.bf16.mxu1 %v22542_v32 }
0x27b4   : > { %21331 = vmatpush3.bf16.msra.mxu1 %v21330_v18 }
0x27b5   : > { %21332 = vmatprep.subr.bf16.mxu1 %v22542_v32 }
0x27b8   : > { %21334 = vmatpush3.bf16.msra.mxu1 %v21333_v26 }
0x27b9   : > { %21335 = vmatprep.subr.bf16.mxu1 %v22542_v32 }
0x27bc   : > { %21337 = vmatpush3.bf16.msra.mxu1 %v21336_v39 }
0x27bd   : > { %21338 = vmatprep.subr.bf16.mxu1 %v22542_v32 }
0x27c0   : > { %21340 = vmatpush3.bf16.msra.mxu1 %v21339_v17  ;;  %v14318_v17 = vld [vmem:[%s27375_s8 + $0xc88] sm:$0xff] }
0x27c1   : > { %21341 = vmatprep.subr.bf16.mxu1 %v22542_v32 }
0x27c4   : > { %21343 = vmatpush3.bf16.msra.mxu1 %v21342_v36  ;;  %v14322_v36 = vld [vmem:[%s27375_s8 + $0xca8] sm:$0xff] }
0x27c5   : > { %18669 = vmatprep.subr.mxu1 %v22544_v60 }
0x27c7   : > { %18517 = vmatmul.mubr.f32.vlgmr.msra.gmra.mrb[80].mxu1 %v25386_v52 }
0x27c8   : > { %18671 = vmatprep.mubr.msk.f32.mxu1 %vm22543_vm2, %v22544_v60 }
0x289a   : > { %v8320_v37 = vpop.f32.mrb[80].mxu1 }
0x289b   : > { %v8325_v47 = vsel %vm3174_vm4, %v8320_v37, 0.0  ;;  %v18518_v49 = vpop.f32.mrb[81].mxu1 }
0x289c   : > { %v8326_v15 = vrot.slane %v8325_v47, 4 }
0x289e   : > { %v8327_v21 = vadd.f32 %v8326_v15, %v8325_v47  ;;  %v14324_v47 = vld [vmem:[%s27375_s8 + $0xcb8] sm:$0xff]  ;;  %v14325_v15 = vld [vmem:[%s27375_s8 + $0xcc0] sm:$0xff] }
0x28a0   : > { %v8328_v58 = vrot.slane %v8327_v21, 2 }
0x28a2   : > { %v8329_v46 = vadd.f32 %v8328_v58, %v8327_v21  ;;  %v14326_v21 = vld [vmem:[%s27375_s8 + $0xcc8] sm:$0xff] }
0x28a3   : > { %v21405_v58 = vpack.c.bf16 %v14326_v21, %v14325_v15  ;;  %v14311_v15 = vld [vmem:[%s27375_s8 + $0xc60] sm:$0xff]  ;;  %v14312_v21 = vld [vmem:[%s27375_s8 + $0xc68] sm:$0xff] }
0x28a4   : > { %v8330_v10 = vrot.slane %v8329_v46, 1 }
0x28a6   : > { %v8331_v1 = vadd.f32 %v8330_v10, %v8329_v46  ;;  %v14327_v46 = vld [vmem:[%s27375_s8 + $0xcd0] sm:$0xff]  ;;  %v14328_v10 = vld [vmem:[%s27375_s8 + $0xcd8] sm:$0xff] }
0x28a8   : > { %18552 = vmatmul.mubr.f32.vlgmr.msra.gmra.mrb[54].mxu0 %v8331_v1  ;;  %v21408_v1 = vpack.c.bf16 %v14328_v10, %v14327_v46  ;;  %v14313_v46 = vld [vmem:[%s27375_s8 + $0xc70] sm:$0xff]  ;;  %v14314_v10 = vld [vmem:[%s27375_s8 + $0xc78] sm:$0xff] }
0x28a9   : > { %21370 = vmatpush3.bf16.msra.mxu0 %v23361_v48  ;;  %18586 = vmatprep.mubr.msk.f32.mxu0 %vm22543_vm2, %v22544_v60 }
0x28aa   : > { %21371 = vmatprep.subr.bf16.mxu0 %v22542_v32 }
0x28ad   : > { %21373 = vmatpush3.bf16.msra.mxu0 %v23367_v51 }
0x28ae   : > { %21374 = vmatprep.subr.bf16.mxu0 %v22542_v32 }
0x28b1   : > { %21376 = vmatpush3.bf16.msra.mxu0 %v23377_v55 }
0x28b2   : > { %21377 = vmatprep.subr.bf16.mxu0 %v22542_v32 }
0x28b5   : > { %21379 = vmatpush3.bf16.msra.mxu0 %v23387_v61 }
0x28b6   : > { %21380 = vmatprep.subr.bf16.mxu0 %v22542_v32 }
0x28b9   : > { %21382 = vmatpush3.bf16.msra.mxu0 %v23397_v0 }
0x28ba   : > { %21383 = vmatprep.subr.bf16.mxu0 %v22542_v32 }
0x28bd   : > { %21385 = vmatpush3.bf16.msra.mxu0 %v23529_v24 }
0x28be   : > { %21386 = vmatprep.subr.bf16.mxu0 %v22542_v32 }
0x28c1   : > { %21388 = vmatpush3.bf16.msra.mxu0 %v23539_v27 }
0x28c2   : > { %21389 = vmatprep.subr.bf16.mxu0 %v22542_v32 }
0x28c5   : > { %21391 = vmatpush3.bf16.msra.mxu0 %v23549_v34 }
0x28c6   : > { %18589 = vmatprep.subr.mxu0 %v22544_v60 }
0x297b   : > { %v8398_v52 = vpop.f32.mrb[54].mxu0 }
0x297c   : > { %v8405_v2 = vrot.slane %v8398_v52, %v22967_v8  ;;  %v18553_v23 = vpop.f32.mrb[55].mxu0  ;;  %v14329_v52 = vld [vmem:[%s27375_s8 + $0xce0] sm:$0xff] }
0x297e   : > { %v8406_v3 = vsub.f32 %v8320_v37, %v8405_v2  ;;  %v14323_v37 = vld [vmem:[%s27375_s8 + $0xcb0] sm:$0xff]  ;;  %v14330_v2 = vld [vmem:[%s27375_s8 + $0xce8] sm:$0xff] }
0x297f   : > { %v21402_v49 = vpack.c.bf16 %v14324_v47, %v14323_v37  ;;  %v21411_v23 = vpack.c.bf16 %v14330_v2, %v14329_v52  ;;  %v14309_v37 = vld [vmem:[%s27375_s8 + $0xc50] sm:$0xff]  ;;  %v14310_v47 = vld [vmem:[%s27375_s8 + $0xc58] sm:$0xff]  ;;  %v14335_v52 = vld [vmem:[%s27375_s8 + $0xd00] sm:$0xff] }
0x2980   : > { %v8407_v40 = vmul.f32 %v8406_v3, %v8406_v3  ;;  %v14336_v2 = vld [vmem:[%s27375_s8 + $0xd08] sm:$0xff] }
0x2982   : > { %v8408_v62 = vsel %vm3174_vm4, %v8407_v40, 0.0  ;;  %v14332_v40 = vld [vmem:[%s27375_s8 + $0xcf8] sm:$0xff] }
0x2983   : > { %v8409_v12 = vrot.slane %v8408_v62, 4 }
0x2985   : > { %v8410_v4 = vadd.f32 %v8409_v12, %v8408_v62  ;;  %v14299_v12 = vld [vmem:[%s27375_s8 + $0xc00] sm:$0xff] }
0x2987   : > { %v8411_v14 = vrot.slane %v8410_v4, 2 }
0x2989   : > { %v8412_v9 = vadd.f32 %v8411_v14, %v8410_v4  ;;  %v14300_v4 = vld [vmem:[%s27375_s8 + $0xc08] sm:$0xff] }
0x298b   : > { %v8413_v57 = vrot.slane %v8412_v9, 1 }
0x298d   : > { %v8414_v18 = vadd.f32 %v8413_v57, %v8412_v9  ;;  %v21417_v57 = vpack.c.bf16 %v14300_v4, %v14299_v12  ;;  %v14339_v12 = vld [vmem:[%s27375_s8 + $0xd20] sm:$0xff]  ;;  %v14340_v4 = vld [vmem:[%s27375_s8 + $0xd28] sm:$0xff] }
0x298f   : > { %18587 = vmatmul.mubr.f32.vlgmr.msra.gmra.mrb[56].mxu0 %v8414_v18 }
0x2990   : > { %18591 = vmatprep.mubr.msk.f32.mxu0 %vm22543_vm2, %v22544_v60 }
0x2a62   : > { %v8481_v43 = vpop.f32.mrb[56].mxu0 }
0x2a63   : > { %v8482_v6 = vadd.f32 1e-05, %v8481_v43  ;;  %v18588_v26 = vpop.f32.mrb[57].mxu0  ;;  %v14301_v43 = vld [vmem:[%s27375_s8 + $0xc10] sm:$0xff] }
0x2a65   : > { %22507 = vrsqrt.f32 %v8482_v6  ;;  %v14302_v6 = vld [vmem:[%s27375_s8 + $0xc18] sm:$0xff] }
0x2a6f   : > { %v22508_v30 = vpop.eup %22507 }
0x2a70   : > { %v8489_v20 = vrot.slane %v22508_v30, %v22967_v8 }
0x2a72   : > { %v8490_v39 = vmul.f32 %v8489_v20, %v8406_v3  ;;  %v14331_v3 = vld [vmem:[%s27375_s8 + $0xcf0] sm:$0xff] }
0x2a73   : > { %v21414_v62 = vpack.c.bf16 %v14332_v40, %v14331_v3  ;;  %v14337_v3 = vld [vmem:[%s27375_s8 + $0xd10] sm:$0xff]  ;;  %v14338_v40 = vld [vmem:[%s27375_s8 + $0xd18] sm:$0xff] }
0x2a74   : > { %v25526_v63 = vadd.f32 %v8490_v39, %v25035_v5  ;;  %v21393_v5 = vpack.c.bf16 %v14318_v17, %v14317_v42  ;;  %v21420_v39 = vpack.c.bf16 %v14302_v6, %v14301_v43  ;;  %v14303_v42 = vld [vmem:[%s27375_s8 + $0xc20] sm:$0xff]  ;;  %v14304_v17 = vld [vmem:[%s27375_s8 + $0xc28] sm:$0xff] }
0x2a75   : > { %v14343_v6 = vld [vmem:[%s27375_s8 + $0xd40] sm:$0xff] }
0x2a76   : > { %18590 = vmatpush3.msk.msra.mxu0 %vm3174_vm4, %v25526_v63  ;;  %18670 = vmatpush3.msk.msra.mxu1 %vm3174_vm4, %v25526_v63 }
0x2a77   : > { %18592 = vmatmul.mubr.msk.f32.vlgmr.msra.gmra.mrb[58].mxu0 %vm3343_vm5, %v25050_v11  ;;  %18594 = vmatprep.subr.mxu0 %v22544_v60  ;;  %v14320_v11 = vld [vmem:[%s27375_s8 + $0xc98] sm:$0xff] }
0x2a78   : > { %18595 = vmatpush3.msk.msra.mxu0 %vm3174_vm4, %v25526_v63  ;;  %18596 = vmatprep.mubr.msk.f32.mxu0 %vm22543_vm2, %v22544_v60 }
0x2a79   : > { %18672 = vmatmul.mubr.msk.f32.vlgmr.msra.gmra.mrb[82].mxu1 %vm3343_vm5, %v25062_v29  ;;  %21392 = vmatprep.subr.bf16.mxu0 %v22542_v32  ;;  %v21396_v29 = vpack.c.bf16 %v14320_v11, %v14319_v44  ;;  %v14305_v44 = vld [vmem:[%s27375_s8 + $0xc30] sm:$0xff]  ;;  %v14306_v11 = vld [vmem:[%s27375_s8 + $0xc38] sm:$0xff] }
0x2a7a   : > { %21464 = vmatprep.subr.bf16.mxu1 %v22542_v32  ;;  %18741 = vmatprep.mubr.msk.f32.mxu1 %vm22543_vm2, %v22544_v60 }
0x2a7b   : > { %18597 = vmatmul.mubr.msk.f32.vlgmr.msra.gmra.mrb[60].mxu0 %vm3343_vm5, %v25079_v54  ;;  %21466 = vmatpush3.bf16.msra.mxu1 %v23361_v48  ;;  %v21399_v54 = vpack.c.bf16 %v14322_v36, %v14321_v45  ;;  %v14307_v45 = vld [vmem:[%s27375_s8 + $0xc40] sm:$0xff]  ;;  %v14308_v36 = vld [vmem:[%s27375_s8 + $0xc48] sm:$0xff] }
0x2a7c   : > { %21394 = vmatpush3.bf16.msra.mxu0 %v21393_v5  ;;  %18631 = vmatprep.mubr.msk.f32.mxu0 %vm22543_vm2, %v22544_v60  ;;  %v21423_v5 = vpack.c.bf16 %v14304_v17, %v14303_v42  ;;  %v14347_v17 = vld [vmem:[%s27375_s8 + $0xd60] sm:$0xff] }
0x2a7d   : > { %21395 = vmatprep.subr.bf16.mxu0 %v22542_v32  ;;  %21467 = vmatprep.subr.bf16.mxu1 %v22542_v32 }
0x2a7f   : > { %21469 = vmatpush3.bf16.msra.mxu1 %v23367_v51 }
0x2a80   : > { %21397 = vmatpush3.bf16.msra.mxu0 %v21396_v29  ;;  %21470 = vmatprep.subr.bf16.mxu1 %v22542_v32  ;;  %v21426_v29 = vpack.c.bf16 %v14306_v11, %v14305_v44  ;;  %v14349_v11 = vld [vmem:[%s27375_s8 + $0xd70] sm:$0xff] }
0x2a81   : > { %21398 = vmatprep.subr.bf16.mxu0 %v22542_v32 }
0x2a83   : > { %21472 = vmatpush3.bf16.msra.mxu1 %v23377_v55 }
0x2a84   : > { %21400 = vmatpush3.bf16.msra.mxu0 %v21399_v54  ;;  %21473 = vmatprep.subr.bf16.mxu1 %v22542_v32  ;;  %v21429_v54 = vpack.c.bf16 %v14308_v36, %v14307_v45 }
0x2a85   : > { %21401 = vmatprep.subr.bf16.mxu0 %v22542_v32 }
0x2a87   : > { %21475 = vmatpush3.bf16.msra.mxu1 %v23387_v61 }
0x2a88   : > { %21403 = vmatpush3.bf16.msra.mxu0 %v21402_v49  ;;  %21476 = vmatprep.subr.bf16.mxu1 %v22542_v32  ;;  %v21432_v49 = vpack.c.bf16 %v14310_v47, %v14309_v37 }
0x2a89   : > { %21404 = vmatprep.subr.bf16.mxu0 %v22542_v32 }
0x2a8b   : > { %21478 = vmatpush3.bf16.msra.mxu1 %v23397_v0 }
0x2a8c   : > { %21406 = vmatpush3.bf16.msra.mxu0 %v21405_v58  ;;  %21479 = vmatprep.subr.bf16.mxu1 %v22542_v32  ;;  %v21435_v58 = vpack.c.bf16 %v14312_v21, %v14311_v15 }
0x2a8d   : > { %21407 = vmatprep.subr.bf16.mxu0 %v22542_v32 }
0x2a8f   : > { %21481 = vmatpush3.bf16.msra.mxu1 %v23529_v24 }
0x2a90   : > { %21409 = vmatpush3.bf16.msra.mxu0 %v21408_v1  ;;  %21482 = vmatprep.subr.bf16.mxu1 %v22542_v32  ;;  %v21438_v1 = vpack.c.bf16 %v14314_v10, %v14313_v46 }
0x2a91   : > { %21410 = vmatprep.subr.bf16.mxu0 %v22542_v32 }
0x2a93   : > { %21484 = vmatpush3.bf16.msra.mxu1 %v23539_v27 }
0x2a94   : > { %21412 = vmatpush3.bf16.msra.mxu0 %v21411_v23  ;;  %21485 = vmatprep.subr.bf16.mxu1 %v22542_v32  ;;  %v21441_v23 = vpack.c.bf16 %v14336_v2, %v14335_v52 }
0x2a95   : > { %21413 = vmatprep.subr.bf16.mxu0 %v22542_v32 }
0x2a97   : > { %21487 = vmatpush3.bf16.msra.mxu1 %v23549_v34 }
0x2a98   : > { %21488 = vmatprep.subr.bf16.mxu1 %v22542_v32  ;;  %21415 = vmatpush3.bf16.msra.mxu0 %v21414_v62  ;;  %v21444_v62 = vpack.c.bf16 %v14338_v40, %v14337_v3 }
0x2a99   : > { %21416 = vmatprep.subr.bf16.mxu0 %v22542_v32 }
0x2b4a   : > { %v8561_v14 = vpop.f32.mrb[58].mxu0 }
0x2b4b   : > { %v18593_v9 = vpop.f32.mrb[59].mxu0 }
0x2b4c   : > { %v25627_v18 = vpop.f32.mrb[82].mxu1  ;;  %v21447_v9 = vpack.c.bf16 %v14340_v4, %v14339_v12 }
0x2b4d   : > { %v18673_v26 = vpop.f32.mrb[83].mxu1 }
0x2b4e   : > { %v8648_v30 = vpop.f32.mrb[60].mxu0  ;;  %v14344_v26 = vld [vmem:[%s27375_s8 + $0xd48] sm:$0xff] }
0x2b4f   : > { %v18598_v20 = vpop.f32.mrb[61].mxu0  ;;  %18632 = vmatmul.mubr.f32.vlgmr.msra.gmra.mrb[62].mxu0 %v8648_v30  ;;  %v21453_v30 = vpack.c.bf16 %v14344_v26, %v14343_v6 }
0x2b50   : > { %21418 = vmatpush3.bf16.msra.mxu0 %v21417_v57  ;;  %18666 = vmatprep.mubr.msk.f32.mxu0 %vm22543_vm2, %v22544_v60  ;;  %v14342_v57 = vld [vmem:[%s27375_s8 + $0xd38] sm:$0xff]  ;;  %v14345_v20 = vld [vmem:[%s27375_s8 + $0xd50] sm:$0xff] }
0x2b51   : > { %21419 = vmatprep.subr.bf16.mxu0 %v22542_v32 }
0x2b54   : > { %21421 = vmatpush3.bf16.msra.mxu0 %v21420_v39  ;;  %v14346_v39 = vld [vmem:[%s27375_s8 + $0xd58] sm:$0xff] }
0x2b55   : > { %21422 = vmatprep.subr.bf16.mxu0 %v22542_v32  ;;  %v21456_v42 = vpack.c.bf16 %v14346_v39, %v14345_v20  ;;  %v14371_v39 = vld [vmem:[%s27375_s8 + $0xe00] sm:$0xff] }
0x2b58   : > { %21424 = vmatpush3.bf16.msra.mxu0 %v21423_v5  ;;  %v14348_v5 = vld [vmem:[%s27375_s8 + $0xd68] sm:$0xff] }
0x2b59   : > { %21425 = vmatprep.subr.bf16.mxu0 %v22542_v32  ;;  %v21459_v44 = vpack.c.bf16 %v14348_v5, %v14347_v17  ;;  %v25777_v17 = vld [vmem:[%s27374_s7] sm:$0xf] }
0x2b5c   : > { %21427 = vmatpush3.bf16.msra.mxu0 %v21426_v29  ;;  %v14350_v29 = vld [vmem:[%s27375_s8 + $0xd78] sm:$0xff] }
0x2b5d   : > { %21428 = vmatprep.subr.bf16.mxu0 %v22542_v32  ;;  %v21462_v45 = vpack.c.bf16 %v14350_v29, %v14349_v11  ;;  %v14373_v11 = vld [vmem:[%s27375_s8 + $0xe10] sm:$0xff]  ;;  %v14374_v29 = vld [vmem:[%s27375_s8 + $0xe18] sm:$0xff] }
0x2b60   : > { %21430 = vmatpush3.bf16.msra.mxu0 %v21429_v54 }
0x2b61   : > { %21431 = vmatprep.subr.bf16.mxu0 %v22542_v32 }
0x2b64   : > { %21433 = vmatpush3.bf16.msra.mxu0 %v21432_v49 }
0x2b65   : > { %21434 = vmatprep.subr.bf16.mxu0 %v22542_v32 }
0x2b68   : > { %21436 = vmatpush3.bf16.msra.mxu0 %v21435_v58 }
0x2b69   : > { %21437 = vmatprep.subr.bf16.mxu0 %v22542_v32 }
0x2b6c   : > { %21439 = vmatpush3.bf16.msra.mxu0 %v21438_v1 }
0x2b6d   : > { %21440 = vmatprep.subr.bf16.mxu0 %v22542_v32 }
0x2b6f   : > { %18667 = vmatmul.mubr.f32.vlgmr.msra.gmra.mrb[62].mxu0 %v8561_v14  ;;  %v14341_v14 = vld [vmem:[%s27375_s8 + $0xd30] sm:$0xff] }
0x2b70   : > { %21442 = vmatpush3.bf16.msra.mxu0 %v21441_v23  ;;  %18706 = vmatprep.mubr.msk.f32.mxu0 %vm22543_vm2, %v22544_v60  ;;  %v21450_v43 = vpack.c.bf16 %v14342_v57, %v14341_v14 }
0x2b71   : > { %21443 = vmatprep.subr.bf16.mxu0 %v22542_v32 }
0x2b74   : > { %21445 = vmatpush3.bf16.msra.mxu0 %v21444_v62 }
0x2b75   : > { %21446 = vmatprep.subr.bf16.mxu0 %v22542_v32 }
0x2b78   : > { %21448 = vmatpush3.bf16.msra.mxu0 %v21447_v9 }
0x2b79   : > { %21449 = vmatprep.subr.bf16.mxu0 %v22542_v32 }
0x2b7c   : > { %21451 = vmatpush3.bf16.msra.mxu0 %v21450_v43 }
0x2b7d   : > { %21452 = vmatprep.subr.bf16.mxu0 %v22542_v32 }
0x2b80   : > { %21454 = vmatpush3.bf16.msra.mxu0 %v21453_v30 }
0x2b81   : > { %21455 = vmatprep.subr.bf16.mxu0 %v22542_v32 }
0x2b84   : > { %21457 = vmatpush3.bf16.msra.mxu0 %v21456_v42  ;;  %v14372_v42 = vld [vmem:[%s27375_s8 + $0xe08] sm:$0xff] }
0x2b85   : > { %21458 = vmatprep.subr.bf16.mxu0 %v22542_v32  ;;  %v21513_v5 = vpack.c.bf16 %v14372_v42, %v14371_v39 }
0x2b88   : > { %21460 = vmatpush3.bf16.msra.mxu0 %v21459_v44  ;;  %v25788_v44 = vld [vmem:[%s27374_s7 + $0x8] sm:$0xf] }
0x2b89   : > { %21461 = vmatprep.subr.bf16.mxu0 %v22542_v32 }
0x2b8c   : > { %21463 = vmatpush3.bf16.msra.mxu0 %v21462_v45  ;;  %v25805_v45 = vld [vmem:[%s27374_s7 + $0x4] sm:$0xf] }
0x2b8d   : > { %18859 = vmatprep.subr.mxu0 %v22544_v60 }
0x2b8f   : > { %18707 = vmatmul.mubr.f32.vlgmr.msra.gmra.mrb[62].mxu0 %v25627_v18 }
0x2b90   : > { %18861 = vmatprep.mubr.msk.f32.mxu0 %vm22543_vm2, %v22544_v60 }
0x2c62   : > { %v8962_v36 = vpop.f32.mrb[62].mxu0 }
0x2c63   : > { %v8967_v54 = vsel %vm3174_vm4, %v8962_v36, 0.0  ;;  %v18708_v37 = vpop.f32.mrb[63].mxu0 }
0x2c64   : > { %v8968_v47 = vrot.slane %v8967_v54, 4  ;;  %v14376_v37 = vld [vmem:[%s27375_s8 + $0xe28] sm:$0xff] }
0x2c66   : > { %v8969_v49 = vadd.f32 %v8968_v47, %v8967_v54  ;;  %v14375_v54 = vld [vmem:[%s27375_s8 + $0xe20] sm:$0xff] }
0x2c67   : > { %v21519_v47 = vpack.c.bf16 %v14376_v37, %v14375_v54  ;;  %v14359_v54 = vld [vmem:[%s27375_s8 + $0xdb0] sm:$0xff]  ;;  %v14360_v37 = vld [vmem:[%s27375_s8 + $0xdb8] sm:$0xff] }
0x2c68   : > { %v8970_v15 = vrot.slane %v8969_v49, 2 }
0x2c6a   : > { %v8971_v21 = vadd.f32 %v8970_v15, %v8969_v49  ;;  %v14377_v49 = vld [vmem:[%s27375_s8 + $0xe30] sm:$0xff]  ;;  %v14378_v15 = vld [vmem:[%s27375_s8 + $0xe38] sm:$0xff] }
0x2c6c   : > { %v8972_v58 = vrot.slane %v8971_v21, 1 }
0x2c6e   : > { %v8973_v46 = vadd.f32 %v8972_v58, %v8971_v21  ;;  %v21522_v21 = vpack.c.bf16 %v14378_v15, %v14377_v49  ;;  %v14379_v58 = vld [vmem:[%s27375_s8 + $0xe40] sm:$0xff]  ;;  %v14362_v15 = vld [vmem:[%s27375_s8 + $0xdc8] sm:$0xff] }
0x2c6f   : > { %v14361_v49 = vld [vmem:[%s27375_s8 + $0xdc0] sm:$0xff] }
0x2c70   : > { %18742 = vmatmul.mubr.f32.vlgmr.msra.gmra.mrb[84].mxu1 %v8973_v46  ;;  %v14380_v46 = vld [vmem:[%s27375_s8 + $0xe48] sm:$0xff] }
0x2c71   : > { %21490 = vmatpush3.bf16.msra.mxu1 %v23361_v48  ;;  %18776 = vmatprep.mubr.msk.f32.mxu1 %vm22543_vm2, %v22544_v60 }
0x2c72   : > { %21491 = vmatprep.subr.bf16.mxu1 %v22542_v32 }
0x2c75   : > { %21493 = vmatpush3.bf16.msra.mxu1 %v23367_v51 }
0x2c76   : > { %21494 = vmatprep.subr.bf16.mxu1 %v22542_v32 }
0x2c79   : > { %21496 = vmatpush3.bf16.msra.mxu1 %v23377_v55 }
0x2c7a   : > { %21497 = vmatprep.subr.bf16.mxu1 %v22542_v32 }
0x2c7d   : > { %21499 = vmatpush3.bf16.msra.mxu1 %v23387_v61 }
0x2c7e   : > { %21500 = vmatprep.subr.bf16.mxu1 %v22542_v32 }
0x2c81   : > { %21502 = vmatpush3.bf16.msra.mxu1 %v23397_v0 }
0x2c82   : > { %21503 = vmatprep.subr.bf16.mxu1 %v22542_v32 }
0x2c85   : > { %21505 = vmatpush3.bf16.msra.mxu1 %v23529_v24 }
0x2c86   : > { %21506 = vmatprep.subr.bf16.mxu1 %v22542_v32 }
0x2c89   : > { %21508 = vmatpush3.bf16.msra.mxu1 %v23539_v27 }
0x2c8a   : > { %21509 = vmatprep.subr.bf16.mxu1 %v22542_v32 }
0x2c8d   : > { %21511 = vmatpush3.bf16.msra.mxu1 %v23549_v34 }
0x2c8e   : > { %18779 = vmatprep.subr.mxu1 %v22544_v60 }
0x2d43   : > { %v9040_v18 = vpop.f32.mrb[84].mxu1 }
0x2d44   : > { %v9047_v10 = vrot.slane %v9040_v18, %v22967_v8  ;;  %v18743_v1 = vpop.f32.mrb[85].mxu1  ;;  %v21525_v18 = vpack.c.bf16 %v14380_v46, %v14379_v58  ;;  %v14363_v58 = vld [vmem:[%s27375_s8 + $0xdd0] sm:$0xff]  ;;  %v14364_v46 = vld [vmem:[%s27375_s8 + $0xdd8] sm:$0xff] }
0x2d45   : > { %v14382_v1 = vld [vmem:[%s27375_s8 + $0xe58] sm:$0xff] }
0x2d46   : > { %v9048_v52 = vsub.f32 %v8962_v36, %v9047_v10  ;;  %v21516_v36 = vpack.c.bf16 %v14374_v29, %v14373_v11  ;;  %v14381_v10 = vld [vmem:[%s27375_s8 + $0xe50] sm:$0xff]  ;;  %v14357_v11 = vld [vmem:[%s27375_s8 + $0xda0] sm:$0xff]  ;;  %v14358_v29 = vld [vmem:[%s27375_s8 + $0xda8] sm:$0xff] }
0x2d48   : > { %v9049_v2 = vmul.f32 %v9048_v52, %v9048_v52 }
0x2d4a   : > { %v9050_v23 = vsel %vm3174_vm4, %v9049_v2, 0.0  ;;  %v14383_v2 = vld [vmem:[%s27375_s8 + $0xe60] sm:$0xff] }
0x2d4b   : > { %v9051_v3 = vrot.slane %v9050_v23, 4 }
0x2d4d   : > { %v9052_v40 = vadd.f32 %v9051_v3, %v9050_v23  ;;  %v14384_v23 = vld [vmem:[%s27375_s8 + $0xe68] sm:$0xff] }
0x2d4e   : > { %v21531_v3 = vpack.c.bf16 %v14384_v23, %v14383_v2  ;;  %v14367_v2 = vld [vmem:[%s27375_s8 + $0xdf0] sm:$0xff]  ;;  %v14368_v23 = vld [vmem:[%s27375_s8 + $0xdf8] sm:$0xff] }
0x2d4f   : > { %v9053_v62 = vrot.slane %v9052_v40, 2 }
0x2d51   : > { %v9054_v12 = vadd.f32 %v9053_v62, %v9052_v40  ;;  %v14385_v40 = vld [vmem:[%s27375_s8 + $0xe70] sm:$0xff]  ;;  %v14386_v62 = vld [vmem:[%s27375_s8 + $0xe78] sm:$0xff] }
0x2d53   : > { %v9055_v4 = vrot.slane %v9054_v12, 1 }
0x2d55   : > { %v9056_v9 = vadd.f32 %v9055_v4, %v9054_v12  ;;  %v21534_v12 = vpack.c.bf16 %v14386_v62, %v14385_v40  ;;  %v14353_v4 = vld [vmem:[%s27375_s8 + $0xd80] sm:$0xff]  ;;  %v14390_v62 = vld [vmem:[%s27375_s8 + $0xe88] sm:$0xff] }
0x2d56   : > { %v14389_v40 = vld [vmem:[%s27375_s8 + $0xe80] sm:$0xff] }
0x2d57   : > { %18777 = vmatmul.mubr.f32.vlgmr.msra.gmra.mrb[86].mxu1 %v9056_v9  ;;  %v14354_v9 = vld [vmem:[%s27375_s8 + $0xd88] sm:$0xff] }
0x2d58   : > { %18781 = vmatprep.mubr.msk.f32.mxu1 %vm22543_vm2, %v22544_v60 }
0x2e2a   : > { %v9123_v14 = vpop.f32.mrb[86].mxu1 }
0x2e2b   : > { %v9124_v57 = vadd.f32 1e-05, %v9123_v14  ;;  %v18778_v43 = vpop.f32.mrb[87].mxu1 }
0x2e2c   : > { %v21537_v43 = vpack.c.bf16 %v14354_v9, %v14353_v4  ;;  %v14391_v4 = vld [vmem:[%s27375_s8 + $0xe90] sm:$0xff]  ;;  %v14392_v9 = vld [vmem:[%s27375_s8 + $0xe98] sm:$0xff] }
0x2e2d   : > { %22509 = vrsqrt.f32 %v9124_v57 }
0x2e37   : > { %v22510_v6 = vpop.eup %22509 }
0x2e38   : > { %v9131_v26 = vrot.slane %v22510_v6, %v22967_v8 }
0x2e3a   : > { %v9132_v30 = vmul.f32 %v9131_v26, %v9048_v52  ;;  %v21528_v52 = vpack.c.bf16 %v14382_v1, %v14381_v10  ;;  %v14355_v26 = vld [vmem:[%s27375_s8 + $0xd90] sm:$0xff]  ;;  %v14365_v10 = vld [vmem:[%s27375_s8 + $0xde0] sm:$0xff]  ;;  %v14366_v1 = vld [vmem:[%s27375_s8 + $0xde8] sm:$0xff] }
0x2e3c   : > { %v9133_v20 = vmax.f32 %v9132_v30, 0.0  ;;  %v14356_v30 = vld [vmem:[%s27375_s8 + $0xd98] sm:$0xff] }
0x2e3e   : > { %18780 = vmatpush3.msk.msra.mxu1 %vm3174_vm4, %v9133_v20  ;;  %18860 = vmatpush3.msk.msra.mxu0 %vm3174_vm4, %v9133_v20 }
0x2e3f   : > { %18782 = vmatmul.mubr.msk.f32.vlgmr.msra.gmra.mrb[88].mxu1 %vm3343_vm5, %v25777_v17  ;;  %18784 = vmatprep.subr.mxu1 %v22544_v60 }
0x2e40   : > { %18785 = vmatpush3.msk.msra.mxu1 %vm3174_vm4, %v9133_v20  ;;  %18786 = vmatprep.mubr.msk.f32.mxu1 %vm22543_vm2, %v22544_v60 }
0x2e41   : > { %18862 = vmatmul.mubr.msk.f32.vlgmr.msra.gmra.mrb[64].mxu0 %vm3343_vm5, %v25788_v44  ;;  %21512 = vmatprep.subr.bf16.mxu1 %v22542_v32 }
0x2e42   : > { %21584 = vmatprep.subr.bf16.mxu0 %v22542_v32  ;;  %18931 = vmatprep.mubr.msk.f32.mxu0 %vm22543_vm2, %v22544_v60 }
0x2e43   : > { %18787 = vmatmul.mubr.msk.f32.vlgmr.msra.gmra.mrb[90].mxu1 %vm3343_vm5, %v25805_v45  ;;  %21586 = vmatpush3.bf16.msra.mxu0 %v23361_v48 }
0x2e44   : > { %21514 = vmatpush3.bf16.msra.mxu1 %v21513_v5  ;;  %18821 = vmatprep.mubr.msk.f32.mxu1 %vm22543_vm2, %v22544_v60  ;;  %v21540_v5 = vpack.c.bf16 %v14356_v30, %v14355_v26  ;;  %v14394_v26 = vld [vmem:[%s27375_s8 + $0xea8] sm:$0xff] }
0x2e45   : > { %21515 = vmatprep.subr.bf16.mxu1 %v22542_v32  ;;  %21587 = vmatprep.subr.bf16.mxu0 %v22542_v32 }
0x2e47   : > { %21589 = vmatpush3.bf16.msra.mxu0 %v23367_v51 }
0x2e48   : > { %21517 = vmatpush3.bf16.msra.mxu1 %v21516_v36  ;;  %21590 = vmatprep.subr.bf16.mxu0 %v22542_v32  ;;  %v21543_v36 = vpack.c.bf16 %v14358_v29, %v14357_v11  ;;  %v14399_v29 = vld [vmem:[%s27375_s8 + $0xed0] sm:$0xff] }
0x2e49   : > { %21518 = vmatprep.subr.bf16.mxu1 %v22542_v32 }
0x2e4b   : > { %21592 = vmatpush3.bf16.msra.mxu0 %v23377_v55 }
0x2e4c   : > { %21520 = vmatpush3.bf16.msra.mxu1 %v21519_v47  ;;  %21593 = vmatprep.subr.bf16.mxu0 %v22542_v32  ;;  %v21546_v47 = vpack.c.bf16 %v14360_v37, %v14359_v54  ;;  %v14401_v37 = vld [vmem:[%s27375_s8 + $0xee0] sm:$0xff] }
0x2e4d   : > { %21521 = vmatprep.subr.bf16.mxu1 %v22542_v32 }
0x2e4f   : > { %21595 = vmatpush3.bf16.msra.mxu0 %v23387_v61 }
0x2e50   : > { %21523 = vmatpush3.bf16.msra.mxu1 %v21522_v21  ;;  %21596 = vmatprep.subr.bf16.mxu0 %v22542_v32  ;;  %v21549_v21 = vpack.c.bf16 %v14362_v15, %v14361_v49  ;;  %v14403_v15 = vld [vmem:[%s27375_s8 + $0xef0] sm:$0xff] }
0x2e51   : > { %21524 = vmatprep.subr.bf16.mxu1 %v22542_v32 }
0x2e53   : > { %21598 = vmatpush3.bf16.msra.mxu0 %v23397_v0 }
0x2e54   : > { %21526 = vmatpush3.bf16.msra.mxu1 %v21525_v18  ;;  %21599 = vmatprep.subr.bf16.mxu0 %v22542_v32  ;;  %v21552_v18 = vpack.c.bf16 %v14364_v46, %v14363_v58 }
0x2e55   : > { %21527 = vmatprep.subr.bf16.mxu1 %v22542_v32 }
0x2e57   : > { %21601 = vmatpush3.bf16.msra.mxu0 %v23529_v24 }
0x2e58   : > { %21529 = vmatpush3.bf16.msra.mxu1 %v21528_v52  ;;  %21602 = vmatprep.subr.bf16.mxu0 %v22542_v32  ;;  %v21555_v52 = vpack.c.bf16 %v14366_v1, %v14365_v10 }
0x2e59   : > { %21530 = vmatprep.subr.bf16.mxu1 %v22542_v32 }
0x2e5b   : > { %21604 = vmatpush3.bf16.msra.mxu0 %v23539_v27 }
0x2e5c   : > { %21532 = vmatpush3.bf16.msra.mxu1 %v21531_v3  ;;  %21605 = vmatprep.subr.bf16.mxu0 %v22542_v32  ;;  %v21558_v3 = vpack.c.bf16 %v14368_v23, %v14367_v2 }
0x2e5d   : > { %21533 = vmatprep.subr.bf16.mxu1 %v22542_v32 }
0x2e5f   : > { %21607 = vmatpush3.bf16.msra.mxu0 %v23549_v34 }
0x2e60   : > { %21608 = vmatprep.subr.bf16.mxu0 %v22542_v32  ;;  %21535 = vmatpush3.bf16.msra.mxu1 %v21534_v12  ;;  %v21561_v12 = vpack.c.bf16 %v14390_v62, %v14389_v40 }
0x2e61   : > { %21536 = vmatprep.subr.bf16.mxu1 %v22542_v32 }
0x2f12   : > { %v9203_v14 = vpop.f32.mrb[88].mxu1 }
0x2f13   : > { %v18783_v57 = vpop.f32.mrb[89].mxu1 }
0x2f14   : > { %v25877_v6 = vpop.f32.mrb[64].mxu0  ;;  %v21564_v57 = vpack.c.bf16 %v14392_v9, %v14391_v4 }
0x2f15   : > { %v18863_v20 = vpop.f32.mrb[65].mxu0 }
0x2f16   : > { %v9290_v39 = vpop.f32.mrb[90].mxu1  ;;  %v14396_v20 = vld [vmem:[%s27375_s8 + $0xeb8] sm:$0xff] }
0x2f17   : > { %v18788_v42 = vpop.f32.mrb[91].mxu1  ;;  %18822 = vmatmul.mubr.f32.vlgmr.msra.gmra.mrb[92].mxu1 %v9290_v39 }
0x2f18   : > { %21538 = vmatpush3.bf16.msra.mxu1 %v21537_v43  ;;  %18856 = vmatprep.mubr.msk.f32.mxu1 %vm22543_vm2, %v22544_v60  ;;  %v14393_v43 = vld [vmem:[%s27375_s8 + $0xea0] sm:$0xff] }
0x2f19   : > { %21539 = vmatprep.subr.bf16.mxu1 %v22542_v32  ;;  %v21567_v30 = vpack.c.bf16 %v14394_v26, %v14393_v43  ;;  %v14397_v42 = vld [vmem:[%s27375_s8 + $0xec0] sm:$0xff] }
0x2f1c   : > { %21541 = vmatpush3.bf16.msra.mxu1 %v21540_v5  ;;  %v14398_v5 = vld [vmem:[%s27375_s8 + $0xec8] sm:$0xff] }
0x2f1d   : > { %21542 = vmatprep.subr.bf16.mxu1 %v22542_v32  ;;  %v21573_v11 = vpack.c.bf16 %v14398_v5, %v14397_v42 }
0x2f20   : > { %21544 = vmatpush3.bf16.msra.mxu1 %v21543_v36  ;;  %v14400_v36 = vld [vmem:[%s27375_s8 + $0xed8] sm:$0xff] }
0x2f21   : > { %21545 = vmatprep.subr.bf16.mxu1 %v22542_v32  ;;  %v21576_v54 = vpack.c.bf16 %v14400_v36, %v14399_v29 }
0x2f24   : > { %21547 = vmatpush3.bf16.msra.mxu1 %v21546_v47  ;;  %v14402_v47 = vld [vmem:[%s27375_s8 + $0xee8] sm:$0xff] }
0x2f25   : > { %21548 = vmatprep.subr.bf16.mxu1 %v22542_v32  ;;  %v21579_v49 = vpack.c.bf16 %v14402_v47, %v14401_v37  ;;  %v14425_v47 = vld [vmem:[%s27375_s8 + $0xf80] sm:$0xff] }
0x2f28   : > { %21550 = vmatpush3.bf16.msra.mxu1 %v21549_v21  ;;  %v14404_v21 = vld [vmem:[%s27375_s8 + $0xef8] sm:$0xff] }
0x2f29   : > { %21551 = vmatprep.subr.bf16.mxu1 %v22542_v32  ;;  %v21582_v58 = vpack.c.bf16 %v14404_v21, %v14403_v15  ;;  %v14427_v15 = vld [vmem:[%s27375_s8 + $0xf90] sm:$0xff]  ;;  %v14428_v21 = vld [vmem:[%s27375_s8 + $0xf98] sm:$0xff] }
0x2f2c   : > { %21553 = vmatpush3.bf16.msra.mxu1 %v21552_v18 }
0x2f2d   : > { %21554 = vmatprep.subr.bf16.mxu1 %v22542_v32 }
0x2f30   : > { %21556 = vmatpush3.bf16.msra.mxu1 %v21555_v52 }
0x2f31   : > { %21557 = vmatprep.subr.bf16.mxu1 %v22542_v32 }
0x2f34   : > { %21559 = vmatpush3.bf16.msra.mxu1 %v21558_v3 }
0x2f35   : > { %21560 = vmatprep.subr.bf16.mxu1 %v22542_v32 }
0x2f37   : > { %18857 = vmatmul.mubr.f32.vlgmr.msra.gmra.mrb[92].mxu1 %v9203_v14  ;;  %v14395_v14 = vld [vmem:[%s27375_s8 + $0xeb0] sm:$0xff] }
0x2f38   : > { %21562 = vmatpush3.bf16.msra.mxu1 %v21561_v12  ;;  %18896 = vmatprep.mubr.msk.f32.mxu1 %vm22543_vm2, %v22544_v60  ;;  %v21570_v39 = vpack.c.bf16 %v14396_v20, %v14395_v14 }
0x2f39   : > { %21563 = vmatprep.subr.bf16.mxu1 %v22542_v32 }
0x2f3c   : > { %21565 = vmatpush3.bf16.msra.mxu1 %v21564_v57 }
0x2f3d   : > { %21566 = vmatprep.subr.bf16.mxu1 %v22542_v32 }
0x2f40   : > { %21568 = vmatpush3.bf16.msra.mxu1 %v21567_v30 }
0x2f41   : > { %21569 = vmatprep.subr.bf16.mxu1 %v22542_v32 }
0x2f44   : > { %21571 = vmatpush3.bf16.msra.mxu1 %v21570_v39 }
0x2f45   : > { %21572 = vmatprep.subr.bf16.mxu1 %v22542_v32 }
0x2f48   : > { %21574 = vmatpush3.bf16.msra.mxu1 %v21573_v11 }
0x2f49   : > { %21575 = vmatprep.subr.bf16.mxu1 %v22542_v32 }
0x2f4c   : > { %21577 = vmatpush3.bf16.msra.mxu1 %v21576_v54 }
0x2f4d   : > { %21578 = vmatprep.subr.bf16.mxu1 %v22542_v32 }
0x2f50   : > { %21580 = vmatpush3.bf16.msra.mxu1 %v21579_v49  ;;  %v14426_v49 = vld [vmem:[%s27375_s8 + $0xf88] sm:$0xff] }
0x2f51   : > { %21581 = vmatprep.subr.bf16.mxu1 %v22542_v32 }
0x2f54   : > { %21583 = vmatpush3.bf16.msra.mxu1 %v21582_v58  ;;  %v21636_v58 = vpack.c.bf16 %v14428_v21, %v14427_v15  ;;  %v14411_v15 = vld [vmem:[%s27375_s8 + $0xf20] sm:$0xff]  ;;  %v14412_v21 = vld [vmem:[%s27375_s8 + $0xf28] sm:$0xff] }
0x2f55   : > { %19049 = vmatprep.subr.mxu1 %v22544_v60 }
0x2f57   : > { %18897 = vmatmul.mubr.f32.vlgmr.msra.gmra.mrb[92].mxu1 %v25877_v6 }
0x2f58   : > { %19051 = vmatprep.mubr.msk.f32.mxu1 %vm22543_vm2, %v22544_v60 }
0x302a   : > { %v9604_v46 = vpop.f32.mrb[92].mxu1 }
0x302b   : > { %v9609_v18 = vsel %vm3174_vm4, %v9604_v46, 0.0  ;;  %v18898_v10 = vpop.f32.mrb[93].mxu1 }
0x302c   : > { %v9610_v1 = vrot.slane %v9609_v18, 4 }
0x302e   : > { %v9611_v52 = vadd.f32 %v9610_v1, %v9609_v18  ;;  %v14430_v18 = vld [vmem:[%s27375_s8 + $0xfa8] sm:$0xff]  ;;  %v14431_v1 = vld [vmem:[%s27375_s8 + $0xfb0] sm:$0xff] }
0x3030   : > { %v9612_v2 = vrot.slane %v9611_v52, 2 }
0x3032   : > { %v9613_v23 = vadd.f32 %v9612_v2, %v9611_v52  ;;  %v14432_v52 = vld [vmem:[%s27375_s8 + $0xfb8] sm:$0xff] }
0x3033   : > { %v21642_v2 = vpack.c.bf16 %v14432_v52, %v14431_v1  ;;  %v14415_v1 = vld [vmem:[%s27375_s8 + $0xf40] sm:$0xff]  ;;  %v14416_v52 = vld [vmem:[%s27375_s8 + $0xf48] sm:$0xff] }
0x3034   : > { %v9614_v3 = vrot.slane %v9613_v23, 1 }
0x3036   : > { %v9615_v40 = vadd.f32 %v9614_v3, %v9613_v23  ;;  %v14433_v23 = vld [vmem:[%s27375_s8 + $0xfc0] sm:$0xff]  ;;  %v14434_v3 = vld [vmem:[%s27375_s8 + $0xfc8] sm:$0xff] }
0x3038   : > { %18932 = vmatmul.mubr.f32.vlgmr.msra.gmra.mrb[66].mxu0 %v9615_v40  ;;  %v21645_v40 = vpack.c.bf16 %v14434_v3, %v14433_v23  ;;  %v14417_v23 = vld [vmem:[%s27375_s8 + $0xf50] sm:$0xff]  ;;  %v14418_v3 = vld [vmem:[%s27375_s8 + $0xf58] sm:$0xff] }
0x3039   : > { %21610 = vmatpush3.bf16.msra.mxu0 %v23361_v48  ;;  %18966 = vmatprep.mubr.msk.f32.mxu0 %vm22543_vm2, %v22544_v60 }
0x303a   : > { %21611 = vmatprep.subr.bf16.mxu0 %v22542_v32 }
0x303d   : > { %21613 = vmatpush3.bf16.msra.mxu0 %v23367_v51 }
0x303e   : > { %21614 = vmatprep.subr.bf16.mxu0 %v22542_v32 }
0x3041   : > { %21616 = vmatpush3.bf16.msra.mxu0 %v23377_v55 }
0x3042   : > { %21617 = vmatprep.subr.bf16.mxu0 %v22542_v32 }
0x3045   : > { %21619 = vmatpush3.bf16.msra.mxu0 %v23387_v61 }
0x3046   : > { %21620 = vmatprep.subr.bf16.mxu0 %v22542_v32 }
0x3049   : > { %21622 = vmatpush3.bf16.msra.mxu0 %v23397_v0 }
0x304a   : > { %21623 = vmatprep.subr.bf16.mxu0 %v22542_v32 }
0x304d   : > { %21625 = vmatpush3.bf16.msra.mxu0 %v23529_v24 }
0x304e   : > { %21626 = vmatprep.subr.bf16.mxu0 %v22542_v32 }
0x3051   : > { %21628 = vmatpush3.bf16.msra.mxu0 %v23539_v27 }
0x3052   : > { %21629 = vmatprep.subr.bf16.mxu0 %v22542_v32 }
0x3055   : > { %21631 = vmatpush3.bf16.msra.mxu0 %v23549_v34 }
0x3056   : > { %18969 = vmatprep.subr.mxu0 %v22544_v60 }
0x310b   : > { %v9682_v6 = vpop.f32.mrb[66].mxu0 }
0x310c   : > { %v9689_v62 = vrot.slane %v9682_v6, %v22967_v8  ;;  %v18933_v12 = vpop.f32.mrb[67].mxu0  ;;  %v14435_v6 = vld [vmem:[%s27375_s8 + $0xfd0] sm:$0xff] }
0x310e   : > { %v9690_v4 = vsub.f32 %v9604_v46, %v9689_v62  ;;  %v14429_v46 = vld [vmem:[%s27375_s8 + $0xfa0] sm:$0xff]  ;;  %v14436_v62 = vld [vmem:[%s27375_s8 + $0xfd8] sm:$0xff] }
0x310f   : > { %v21639_v10 = vpack.c.bf16 %v14430_v18, %v14429_v46  ;;  %v21648_v12 = vpack.c.bf16 %v14436_v62, %v14435_v6  ;;  %v14413_v46 = vld [vmem:[%s27375_s8 + $0xf30] sm:$0xff]  ;;  %v14414_v18 = vld [vmem:[%s27375_s8 + $0xf38] sm:$0xff]  ;;  %v14419_v6 = vld [vmem:[%s27375_s8 + $0xf60] sm:$0xff] }
0x3110   : > { %v9691_v9 = vmul.f32 %v9690_v4, %v9690_v4  ;;  %v14420_v62 = vld [vmem:[%s27375_s8 + $0xf68] sm:$0xff] }
0x3112   : > { %v9692_v57 = vsel %vm3174_vm4, %v9691_v9, 0.0  ;;  %v14438_v9 = vld [vmem:[%s27375_s8 + $0xfe8] sm:$0xff] }
0x3113   : > { %v9693_v43 = vrot.slane %v9692_v57, 4 }
0x3115   : > { %v9694_v26 = vadd.f32 %v9693_v43, %v9692_v57  ;;  %v14439_v43 = vld [vmem:[%s27375_s8 + $0xff0] sm:$0xff] }
0x3117   : > { %v9695_v30 = vrot.slane %v9694_v26, 2 }
0x3119   : > { %v9696_v14 = vadd.f32 %v9695_v30, %v9694_v26  ;;  %v14440_v26 = vld [vmem:[%s27375_s8 + $0xff8] sm:$0xff] }
0x311a   : > { %v21654_v30 = vpack.c.bf16 %v14440_v26, %v14439_v43  ;;  %v14443_v43 = vld [vmem:[%s27375_s8 + $0x1000] sm:$0xff]  ;;  %v14444_v26 = vld [vmem:[%s27375_s8 + $0x1008] sm:$0xff] }
0x311b   : > { %v9697_v20 = vrot.slane %v9696_v14, 1 }
0x311d   : > { %v9698_v39 = vadd.f32 %v9697_v20, %v9696_v14  ;;  %v14407_v14 = vld [vmem:[%s27375_s8 + $0xf00] sm:$0xff]  ;;  %v14408_v20 = vld [vmem:[%s27375_s8 + $0xf08] sm:$0xff] }
0x311f   : > { %18967 = vmatmul.mubr.f32.vlgmr.msra.gmra.mrb[68].mxu0 %v9698_v39 }
0x3120   : > { %18971 = vmatprep.mubr.msk.f32.mxu0 %vm22543_vm2, %v22544_v60 }
0x31f2   : > { %v9765_v42 = vpop.f32.mrb[68].mxu0 }
0x31f3   : > { %v9766_v5 = vadd.f32 1e-05, %v9765_v42  ;;  %v18968_v11 = vpop.f32.mrb[69].mxu0 }
0x31f5   : > { %22511 = vrsqrt.f32 %v9766_v5  ;;  %v21657_v5 = vpack.c.bf16 %v14408_v20, %v14407_v14  ;;  %v14445_v14 = vld [vmem:[%s27375_s8 + $0x1010] sm:$0xff]  ;;  %v14446_v20 = vld [vmem:[%s27375_s8 + $0x1018] sm:$0xff] }
0x31ff   : > { %v22512_v29 = vpop.eup %22511 }
0x3200   : > { %v9773_v36 = vrot.slane %v22512_v29, %v22967_v8  ;;  %v14409_v29 = vld [vmem:[%s27375_s8 + $0xf10] sm:$0xff] }
0x3202   : > { %v9774_v54 = vmul.f32 %v9773_v36, %v9690_v4  ;;  %v14437_v4 = vld [vmem:[%s27375_s8 + $0xfe0] sm:$0xff]  ;;  %v14410_v36 = vld [vmem:[%s27375_s8 + $0xf18] sm:$0xff] }
0x3203   : > { %v21651_v57 = vpack.c.bf16 %v14438_v9, %v14437_v4  ;;  %v14421_v4 = vld [vmem:[%s27375_s8 + $0xf70] sm:$0xff]  ;;  %v14422_v9 = vld [vmem:[%s27375_s8 + $0xf78] sm:$0xff] }
0x3204   : > { %v26017_v37 = vadd.f32 %v9774_v54, %v25526_v63  ;;  %v21633_v63 = vpack.c.bf16 %v14426_v49, %v14425_v47 }
0x3206   : > { %18970 = vmatpush3.msk.msra.mxu0 %vm3174_vm4, %v26017_v37  ;;  %19050 = vmatpush3.msk.msra.mxu1 %vm3174_vm4, %v26017_v37 }
0x3207   : > { %18972 = vmatmul.mubr.msk.f32.vlgmr.msra.gmra.mrb[70].mxu0 %vm3343_vm5, %v25777_v17  ;;  %18974 = vmatprep.subr.mxu0 %v22544_v60 }
0x3208   : > { %18975 = vmatpush3.msk.msra.mxu0 %vm3174_vm4, %v26017_v37  ;;  %18976 = vmatprep.mubr.msk.f32.mxu0 %vm22543_vm2, %v22544_v60 }
0x3209   : > { %19052 = vmatmul.mubr.msk.f32.vlgmr.msra.gmra.mrb[94].mxu1 %vm3343_vm5, %v25788_v44  ;;  %21632 = vmatprep.subr.bf16.mxu0 %v22542_v32 }
0x320a   : > { %21704 = vmatprep.subr.bf16.mxu1 %v22542_v32  ;;  %19121 = vmatprep.mubr.msk.f32.mxu1 %vm22543_vm2, %v22544_v60 }
0x320b   : > { %18977 = vmatmul.mubr.msk.f32.vlgmr.msra.gmra.mrb[72].mxu0 %vm3343_vm5, %v25805_v45  ;;  %21706 = vmatpush3.bf16.msra.mxu1 %v23361_v48 }
0x320c   : > { %21634 = vmatpush3.bf16.msra.mxu0 %v21633_v63  ;;  %19011 = vmatprep.mubr.msk.f32.mxu0 %vm22543_vm2, %v22544_v60  ;;  %v21660_v63 = vpack.c.bf16 %v14410_v36, %v14409_v29  ;;  %v14448_v29 = vld [vmem:[%s27375_s8 + $0x1028] sm:$0xff] }
0x320d   : > { %21635 = vmatprep.subr.bf16.mxu0 %v22542_v32  ;;  %21707 = vmatprep.subr.bf16.mxu1 %v22542_v32 }
0x320f   : > { %21709 = vmatpush3.bf16.msra.mxu1 %v23367_v51 }
0x3210   : > { %21637 = vmatpush3.bf16.msra.mxu0 %v21636_v58  ;;  %21710 = vmatprep.subr.bf16.mxu1 %v22542_v32  ;;  %v21663_v58 = vpack.c.bf16 %v14412_v21, %v14411_v15  ;;  %v14453_v21 = vld [vmem:[%s27375_s8 + $0x1050] sm:$0xff] }
0x3211   : > { %21638 = vmatprep.subr.bf16.mxu0 %v22542_v32 }
0x3213   : > { %21712 = vmatpush3.bf16.msra.mxu1 %v23377_v55 }
0x3214   : > { %21640 = vmatpush3.bf16.msra.mxu0 %v21639_v10  ;;  %21713 = vmatprep.subr.bf16.mxu1 %v22542_v32  ;;  %v21666_v10 = vpack.c.bf16 %v14414_v18, %v14413_v46  ;;  %v14455_v18 = vld [vmem:[%s27375_s8 + $0x1060] sm:$0xff] }
0x3215   : > { %21641 = vmatprep.subr.bf16.mxu0 %v22542_v32 }
0x3217   : > { %21715 = vmatpush3.bf16.msra.mxu1 %v23387_v61 }
0x3218   : > { %21643 = vmatpush3.bf16.msra.mxu0 %v21642_v2  ;;  %21716 = vmatprep.subr.bf16.mxu1 %v22542_v32  ;;  %v21669_v2 = vpack.c.bf16 %v14416_v52, %v14415_v1  ;;  %v14457_v52 = vld [vmem:[%s27375_s8 + $0x1070] sm:$0xff] }
0x3219   : > { %21644 = vmatprep.subr.bf16.mxu0 %v22542_v32 }
0x321b   : > { %21718 = vmatpush3.bf16.msra.mxu1 %v23397_v0 }
0x321c   : > { %21646 = vmatpush3.bf16.msra.mxu0 %v21645_v40  ;;  %21719 = vmatprep.subr.bf16.mxu1 %v22542_v32  ;;  %v21672_v40 = vpack.c.bf16 %v14418_v3, %v14417_v23 }
0x321d   : > { %21647 = vmatprep.subr.bf16.mxu0 %v22542_v32 }
0x321f   : > { %21721 = vmatpush3.bf16.msra.mxu1 %v23529_v24 }
0x3220   : > { %21649 = vmatpush3.bf16.msra.mxu0 %v21648_v12  ;;  %21722 = vmatprep.subr.bf16.mxu1 %v22542_v32  ;;  %v21675_v12 = vpack.c.bf16 %v14420_v62, %v14419_v6 }
0x3221   : > { %21650 = vmatprep.subr.bf16.mxu0 %v22542_v32 }
0x3223   : > { %21724 = vmatpush3.bf16.msra.mxu1 %v23539_v27 }
0x3224   : > { %21652 = vmatpush3.bf16.msra.mxu0 %v21651_v57  ;;  %21725 = vmatprep.subr.bf16.mxu1 %v22542_v32  ;;  %v21678_v57 = vpack.c.bf16 %v14422_v9, %v14421_v4 }
0x3225   : > { %21653 = vmatprep.subr.bf16.mxu0 %v22542_v32 }
0x3227   : > { %21727 = vmatpush3.bf16.msra.mxu1 %v23549_v34 }
0x3228   : > { %21728 = vmatprep.subr.bf16.mxu1 %v22542_v32  ;;  %21655 = vmatpush3.bf16.msra.mxu0 %v21654_v30  ;;  %v21681_v30 = vpack.c.bf16 %v14444_v26, %v14443_v43 }
0x3229   : > { %21656 = vmatprep.subr.bf16.mxu0 %v22542_v32 }
0x32da   : > { %v9845_v39 = vpop.f32.mrb[70].mxu0 }
0x32db   : > { %v18973_v42 = vpop.f32.mrb[71].mxu0 }
0x32dc   : > { %v26118_v11 = vpop.f32.mrb[94].mxu1  ;;  %v21684_v42 = vpack.c.bf16 %v14446_v20, %v14445_v14 }
0x32dd   : > { %v19053_v54 = vpop.f32.mrb[95].mxu1 }
0x32de   : > { %v9932_v47 = vpop.f32.mrb[72].mxu0  ;;  %v14450_v54 = vld [vmem:[%s27375_s8 + $0x1038] sm:$0xff] }
0x32df   : > { %v18978_v49 = vpop.f32.mrb[73].mxu0  ;;  %19012 = vmatmul.mubr.f32.vlgmr.msra.gmra.mrb[74].mxu0 %v9932_v47 }
0x32e0   : > { %21658 = vmatpush3.bf16.msra.mxu0 %v21657_v5  ;;  %19046 = vmatprep.mubr.msk.f32.mxu0 %vm22543_vm2, %v22544_v60  ;;  %v14447_v5 = vld [vmem:[%s27375_s8 + $0x1020] sm:$0xff] }
0x32e1   : > { %21659 = vmatprep.subr.bf16.mxu0 %v22542_v32  ;;  %v21687_v36 = vpack.c.bf16 %v14448_v29, %v14447_v5  ;;  %v14451_v49 = vld [vmem:[%s27375_s8 + $0x1040] sm:$0xff] }
0x32e4   : > { %21661 = vmatpush3.bf16.msra.mxu0 %v21660_v63  ;;  %v14452_v63 = vld [vmem:[%s27375_s8 + $0x1048] sm:$0xff] }
0x32e5   : > { %21662 = vmatprep.subr.bf16.mxu0 %v22542_v32  ;;  %v21693_v15 = vpack.c.bf16 %v14452_v63, %v14451_v49 }
0x32e8   : > { %21664 = vmatpush3.bf16.msra.mxu0 %v21663_v58  ;;  %v14454_v58 = vld [vmem:[%s27375_s8 + $0x1058] sm:$0xff] }
0x32e9   : > { %21665 = vmatprep.subr.bf16.mxu0 %v22542_v32  ;;  %v21696_v46 = vpack.c.bf16 %v14454_v58, %v14453_v21 }
0x32ec   : > { %21667 = vmatpush3.bf16.msra.mxu0 %v21666_v10  ;;  %v14456_v10 = vld [vmem:[%s27375_s8 + $0x1068] sm:$0xff] }
0x32ed   : > { %21668 = vmatprep.subr.bf16.mxu0 %v22542_v32  ;;  %v21699_v1 = vpack.c.bf16 %v14456_v10, %v14455_v18  ;;  %v14479_v10 = vld [vmem:[%s27375_s8 + $0x1100] sm:$0xff] }
0x32f0   : > { %21670 = vmatpush3.bf16.msra.mxu0 %v21669_v2  ;;  %v14458_v2 = vld [vmem:[%s27375_s8 + $0x1078] sm:$0xff] }
0x32f1   : > { %21671 = vmatprep.subr.bf16.mxu0 %v22542_v32  ;;  %v21702_v23 = vpack.c.bf16 %v14458_v2, %v14457_v52  ;;  %v14481_v2 = vld [vmem:[%s27375_s8 + $0x1110] sm:$0xff] }
0x32f4   : > { %21673 = vmatpush3.bf16.msra.mxu0 %v21672_v40 }
0x32f5   : > { %21674 = vmatprep.subr.bf16.mxu0 %v22542_v32 }
0x32f8   : > { %21676 = vmatpush3.bf16.msra.mxu0 %v21675_v12 }
0x32f9   : > { %21677 = vmatprep.subr.bf16.mxu0 %v22542_v32 }
0x32fc   : > { %21679 = vmatpush3.bf16.msra.mxu0 %v21678_v57 }
0x32fd   : > { %21680 = vmatprep.subr.bf16.mxu0 %v22542_v32 }
0x32ff   : > { %19047 = vmatmul.mubr.f32.vlgmr.msra.gmra.mrb[74].mxu0 %v9845_v39  ;;  %v14449_v39 = vld [vmem:[%s27375_s8 + $0x1030] sm:$0xff] }
0x3300   : > { %21682 = vmatpush3.bf16.msra.mxu0 %v21681_v30  ;;  %19086 = vmatprep.mubr.msk.f32.mxu0 %vm22543_vm2, %v22544_v60  ;;  %v21690_v47 = vpack.c.bf16 %v14450_v54, %v14449_v39 }
0x3301   : > { %21683 = vmatprep.subr.bf16.mxu0 %v22542_v32 }
0x3304   : > { %21685 = vmatpush3.bf16.msra.mxu0 %v21684_v42 }
0x3305   : > { %21686 = vmatprep.subr.bf16.mxu0 %v22542_v32 }
0x3308   : > { %21688 = vmatpush3.bf16.msra.mxu0 %v21687_v36 }
0x3309   : > { %21689 = vmatprep.subr.bf16.mxu0 %v22542_v32 }
0x330c   : > { %21691 = vmatpush3.bf16.msra.mxu0 %v21690_v47 }
0x330d   : > { %21692 = vmatprep.subr.bf16.mxu0 %v22542_v32 }
0x3310   : > { %21694 = vmatpush3.bf16.msra.mxu0 %v21693_v15 }
0x3311   : > { %21695 = vmatprep.subr.bf16.mxu0 %v22542_v32 }
0x3314   : > { %21697 = vmatpush3.bf16.msra.mxu0 %v21696_v46 }
0x3315   : > { %21698 = vmatprep.subr.bf16.mxu0 %v22542_v32 }
0x3318   : > { %21700 = vmatpush3.bf16.msra.mxu0 %v21699_v1  ;;  %v14480_v1 = vld [vmem:[%s27375_s8 + $0x1108] sm:$0xff] }
0x3319   : > { %21701 = vmatprep.subr.bf16.mxu0 %v22542_v32  ;;  %v21753_v52 = vpack.c.bf16 %v14480_v1, %v14479_v10  ;;  %v14465_v10 = vld [vmem:[%s27375_s8 + $0x10a0] sm:$0xff]  ;;  %v14466_v1 = vld [vmem:[%s27375_s8 + $0x10a8] sm:$0xff] }
0x331c   : > { %21703 = vmatpush3.bf16.msra.mxu0 %v21702_v23  ;;  %v14483_v23 = vld [vmem:[%s27375_s8 + $0x1120] sm:$0xff] }
0x331d   : > { %19239 = vmatprep.subr.mxu0 %v22544_v60 }
0x331f   : > { %19087 = vmatmul.mubr.f32.vlgmr.msra.gmra.mrb[74].mxu0 %v26118_v11 }
0x3320   : > { %19241 = vmatprep.mubr.msk.f32.mxu0 %vm22543_vm2, %v22544_v60 }
0x33f2   : > { %v10246_v3 = vpop.f32.mrb[74].mxu0 }
0x33f3   : > { %v10251_v40 = vsel %vm3174_vm4, %v10246_v3, 0.0  ;;  %v19088_v6 = vpop.f32.mrb[75].mxu0 }
0x33f4   : > { %v10252_v62 = vrot.slane %v10251_v40, 4  ;;  %v14486_v6 = vld [vmem:[%s27375_s8 + $0x1138] sm:$0xff] }
0x33f6   : > { %v10253_v12 = vadd.f32 %v10252_v62, %v10251_v40  ;;  %v14485_v40 = vld [vmem:[%s27375_s8 + $0x1130] sm:$0xff] }
0x33f7   : > { %v21762_v62 = vpack.c.bf16 %v14486_v6, %v14485_v40  ;;  %v14471_v40 = vld [vmem:[%s27375_s8 + $0x10d0] sm:$0xff]  ;;  %v14472_v6 = vld [vmem:[%s27375_s8 + $0x10d8] sm:$0xff] }
0x33f8   : > { %v10254_v4 = vrot.slane %v10253_v12, 2 }
0x33fa   : > { %v10255_v9 = vadd.f32 %v10254_v4, %v10253_v12  ;;  %v14487_v12 = vld [vmem:[%s27375_s8 + $0x1140] sm:$0xff]  ;;  %v14488_v4 = vld [vmem:[%s27375_s8 + $0x1148] sm:$0xff] }
0x33fc   : > { %v10256_v57 = vrot.slane %v10255_v9, 1 }
0x33fe   : > { %v10257_v43 = vadd.f32 %v10256_v57, %v10255_v9  ;;  %v21765_v9 = vpack.c.bf16 %v14488_v4, %v14487_v12  ;;  %v14489_v57 = vld [vmem:[%s27375_s8 + $0x1150] sm:$0xff]  ;;  %v14473_v12 = vld [vmem:[%s27375_s8 + $0x10e0] sm:$0xff]  ;;  %v14474_v4 = vld [vmem:[%s27375_s8 + $0x10e8] sm:$0xff] }
0x3400   : > { %19122 = vmatmul.mubr.f32.vlgmr.msra.gmra.mrb[96].mxu1 %v10257_v43  ;;  %v14490_v43 = vld [vmem:[%s27375_s8 + $0x1158] sm:$0xff] }
0x3401   : > { %21730 = vmatpush3.bf16.msra.mxu1 %v23361_v48  ;;  %19156 = vmatprep.mubr.msk.f32.mxu1 %vm22543_vm2, %v22544_v60 }
0x3402   : > { %21731 = vmatprep.subr.bf16.mxu1 %v22542_v32 }
0x3405   : > { %21733 = vmatpush3.bf16.msra.mxu1 %v23367_v51 }
0x3406   : > { %21734 = vmatprep.subr.bf16.mxu1 %v22542_v32 }
0x3409   : > { %21736 = vmatpush3.bf16.msra.mxu1 %v23377_v55 }
0x340a   : > { %21737 = vmatprep.subr.bf16.mxu1 %v22542_v32 }
0x340d   : > { %21739 = vmatpush3.bf16.msra.mxu1 %v23387_v61 }
0x340e   : > { %21740 = vmatprep.subr.bf16.mxu1 %v22542_v32 }
0x3411   : > { %21742 = vmatpush3.bf16.msra.mxu1 %v23397_v0 }
0x3412   : > { %21743 = vmatprep.subr.bf16.mxu1 %v22542_v32 }
0x3415   : > { %21745 = vmatpush3.bf16.msra.mxu1 %v23529_v24 }
0x3416   : > { %21746 = vmatprep.subr.bf16.mxu1 %v22542_v32 }
0x3419   : > { %21748 = vmatpush3.bf16.msra.mxu1 %v23539_v27 }
0x341a   : > { %21749 = vmatprep.subr.bf16.mxu1 %v22542_v32 }
0x341d   : > { %21751 = vmatpush3.bf16.msra.mxu1 %v23549_v34 }
0x341e   : > { %19159 = vmatprep.subr.mxu1 %v22544_v60 }
0x34d3   : > { %v10324_v11 = vpop.f32.mrb[96].mxu1 }
0x34d4   : > { %v10331_v26 = vrot.slane %v10324_v11, %v22967_v8  ;;  %v19123_v30 = vpop.f32.mrb[97].mxu1  ;;  %v21768_v11 = vpack.c.bf16 %v14490_v43, %v14489_v57  ;;  %v14475_v57 = vld [vmem:[%s27375_s8 + $0x10f0] sm:$0xff]  ;;  %v14476_v43 = vld [vmem:[%s27375_s8 + $0x10f8] sm:$0xff] }
0x34d5   : > { %v14492_v30 = vld [vmem:[%s27375_s8 + $0x1168] sm:$0xff] }
0x34d6   : > { %v10332_v14 = vsub.f32 %v10246_v3, %v10331_v26  ;;  %v14484_v3 = vld [vmem:[%s27375_s8 + $0x1128] sm:$0xff]  ;;  %v14491_v26 = vld [vmem:[%s27375_s8 + $0x1160] sm:$0xff] }
0x34d8   : > { %v10333_v20 = vmul.f32 %v10332_v14, %v10332_v14 }
0x34da   : > { %v10334_v42 = vsel %vm3174_vm4, %v10333_v20, 0.0  ;;  %v14493_v20 = vld [vmem:[%s27375_s8 + $0x1170] sm:$0xff] }
0x34db   : > { %v10335_v5 = vrot.slane %v10334_v42, 4 }
0x34dd   : > { %v10336_v29 = vadd.f32 %v10335_v5, %v10334_v42  ;;  %v14494_v42 = vld [vmem:[%s27375_s8 + $0x1178] sm:$0xff] }
0x34de   : > { %v21774_v5 = vpack.c.bf16 %v14494_v42, %v14493_v20  ;;  %v14499_v20 = vld [vmem:[%s27375_s8 + $0x1190] sm:$0xff]  ;;  %v14500_v42 = vld [vmem:[%s27375_s8 + $0x1198] sm:$0xff] }
0x34df   : > { %v10337_v36 = vrot.slane %v10336_v29, 2 }
0x34e1   : > { %v10338_v39 = vadd.f32 %v10337_v36, %v10336_v29  ;;  %v14461_v29 = vld [vmem:[%s27375_s8 + $0x1080] sm:$0xff]  ;;  %v14462_v36 = vld [vmem:[%s27375_s8 + $0x1088] sm:$0xff] }
0x34e3   : > { %v10339_v54 = vrot.slane %v10338_v39, 1 }
0x34e5   : > { %v10340_v47 = vadd.f32 %v10339_v54, %v10338_v39 }
0x34e7   : > { %19157 = vmatmul.mubr.f32.vlgmr.msra.gmra.mrb[98].mxu1 %v10340_v47  ;;  %v21777_v47 = vpack.c.bf16 %v14462_v36, %v14461_v29  ;;  %v14501_v29 = vld [vmem:[%s27375_s8 + $0x11a0] sm:$0xff]  ;;  %v14502_v36 = vld [vmem:[%s27375_s8 + $0x11a8] sm:$0xff] }
0x34e8   : > { %19161 = vmatprep.mubr.msk.f32.mxu1 %vm22543_vm2, %v22544_v60 }
0x35ba   : > { %v10407_v49 = vpop.f32.mrb[98].mxu1 }
0x35bb   : > { %v10408_v63 = vadd.f32 1e-05, %v10407_v49  ;;  %v19158_v15 = vpop.f32.mrb[99].mxu1 }
0x35bc   : > { %v14464_v15 = vld [vmem:[%s27375_s8 + $0x1098] sm:$0xff] }
0x35bd   : > { %22513 = vrsqrt.f32 %v10408_v63  ;;  %v14463_v63 = vld [vmem:[%s27375_s8 + $0x1090] sm:$0xff] }
0x35c7   : > { %v22514_v21 = vpop.eup %22513 }
0x35c8   : > { %v10415_v58 = vrot.slane %v22514_v21, %v22967_v8 }
0x35ca   : > { %v10416_v46 = vmul.f32 %v10415_v58, %v10332_v14  ;;  %v21771_v14 = vpack.c.bf16 %v14492_v30, %v14491_v26  ;;  %v14497_v26 = vld [vmem:[%s27375_s8 + $0x1180] sm:$0xff]  ;;  %v14498_v30 = vld [vmem:[%s27375_s8 + $0x1188] sm:$0xff] }
0x35cc   : > { %v10417_v18 = vmax.f32 %v10416_v46, 0.0 }
0x35ce   : > { %19160 = vmatpush3.msk.msra.mxu1 %vm3174_vm4, %v10417_v18  ;;  %19240 = vmatpush3.msk.msra.mxu0 %vm3174_vm4, %v10417_v18 }
0x35cf   : > { %19162 = vmatmul.mubr.msk.f32.vlgmr.msra.gmra.mrb[100].mxu1 %vm3343_vm5, %v25777_v17  ;;  %19164 = vmatprep.subr.mxu1 %v22544_v60  ;;  %v14482_v17 = vld [vmem:[%s27375_s8 + $0x1118] sm:$0xff] }
0x35d0   : > { %19165 = vmatpush3.msk.msra.mxu1 %vm3174_vm4, %v10417_v18  ;;  %19166 = vmatprep.mubr.msk.f32.mxu1 %vm22543_vm2, %v22544_v60  ;;  %v21780_v18 = vpack.c.bf16 %v14464_v15, %v14463_v63  ;;  %v14505_v15 = vld [vmem:[%s27375_s8 + $0x11c0] sm:$0xff] }
0x35d1   : > { %19242 = vmatmul.mubr.msk.f32.vlgmr.msra.gmra.mrb[76].mxu0 %vm3343_vm5, %v25788_v44  ;;  %21752 = vmatprep.subr.bf16.mxu1 %v22542_v32  ;;  %v21756_v44 = vpack.c.bf16 %v14482_v17, %v14481_v2  ;;  %v14467_v2 = vld [vmem:[%s27375_s8 + $0x10b0] sm:$0xff]  ;;  %v14468_v17 = vld [vmem:[%s27375_s8 + $0x10b8] sm:$0xff] }
0x35d2   : > { %21824 = vmatprep.subr.bf16.mxu0 %v22542_v32  ;;  %19311 = vmatprep.mubr.msk.f32.mxu0 %vm22543_vm2, %v22544_v60 }
0x35d3   : > { %19167 = vmatmul.mubr.msk.f32.vlgmr.msra.gmra.mrb[102].mxu1 %vm3343_vm5, %v25805_v45  ;;  %21826 = vmatpush3.bf16.msra.mxu0 %v23361_v48  ;;  %v21759_v45 = vpack.c.bf16 %v14484_v3, %v14483_v23  ;;  %v14469_v23 = vld [vmem:[%s27375_s8 + $0x10c0] sm:$0xff]  ;;  %v14470_v3 = vld [vmem:[%s27375_s8 + $0x10c8] sm:$0xff] }
0x35d4   : > { %21754 = vmatpush3.bf16.msra.mxu1 %v21753_v52  ;;  %19201 = vmatprep.mubr.msk.f32.mxu1 %vm22543_vm2, %v22544_v60  ;;  %v21783_v52 = vpack.c.bf16 %v14466_v1, %v14465_v10  ;;  %v14509_v1 = vld [vmem:[%s27375_s8 + $0x11e0] sm:$0xff] }
0x35d5   : > { %21755 = vmatprep.subr.bf16.mxu1 %v22542_v32  ;;  %21827 = vmatprep.subr.bf16.mxu0 %v22542_v32 }
0x35d7   : > { %21829 = vmatpush3.bf16.msra.mxu0 %v23367_v51 }
0x35d8   : > { %21757 = vmatpush3.bf16.msra.mxu1 %v21756_v44  ;;  %21830 = vmatprep.subr.bf16.mxu0 %v22542_v32  ;;  %v21786_v44 = vpack.c.bf16 %v14468_v17, %v14467_v2  ;;  %v14511_v17 = vld [vmem:[%s27375_s8 + $0x11f0] sm:$0xff] }
0x35d9   : > { %21758 = vmatprep.subr.bf16.mxu1 %v22542_v32 }
0x35db   : > { %21832 = vmatpush3.bf16.msra.mxu0 %v23377_v55 }
0x35dc   : > { %21760 = vmatpush3.bf16.msra.mxu1 %v21759_v45  ;;  %21833 = vmatprep.subr.bf16.mxu0 %v22542_v32  ;;  %v21789_v45 = vpack.c.bf16 %v14470_v3, %v14469_v23 }
0x35dd   : > { %21761 = vmatprep.subr.bf16.mxu1 %v22542_v32 }
0x35df   : > { %21835 = vmatpush3.bf16.msra.mxu0 %v23387_v61 }
0x35e0   : > { %21763 = vmatpush3.bf16.msra.mxu1 %v21762_v62  ;;  %21836 = vmatprep.subr.bf16.mxu0 %v22542_v32  ;;  %v21792_v62 = vpack.c.bf16 %v14472_v6, %v14471_v40 }
0x35e1   : > { %21764 = vmatprep.subr.bf16.mxu1 %v22542_v32 }
0x35e3   : > { %21838 = vmatpush3.bf16.msra.mxu0 %v23397_v0 }
0x35e4   : > { %21766 = vmatpush3.bf16.msra.mxu1 %v21765_v9  ;;  %21839 = vmatprep.subr.bf16.mxu0 %v22542_v32  ;;  %v21795_v9 = vpack.c.bf16 %v14474_v4, %v14473_v12 }
0x35e5   : > { %21767 = vmatprep.subr.bf16.mxu1 %v22542_v32 }
0x35e7   : > { %21841 = vmatpush3.bf16.msra.mxu0 %v23529_v24 }
0x35e8   : > { %21769 = vmatpush3.bf16.msra.mxu1 %v21768_v11  ;;  %21842 = vmatprep.subr.bf16.mxu0 %v22542_v32  ;;  %v21798_v11 = vpack.c.bf16 %v14476_v43, %v14475_v57 }
0x35e9   : > { %21770 = vmatprep.subr.bf16.mxu1 %v22542_v32 }
0x35eb   : > { %21844 = vmatpush3.bf16.msra.mxu0 %v23539_v27 }
0x35ec   : > { %21772 = vmatpush3.bf16.msra.mxu1 %v21771_v14  ;;  %21845 = vmatprep.subr.bf16.mxu0 %v22542_v32  ;;  %v21801_v14 = vpack.c.bf16 %v14498_v30, %v14497_v26 }
0x35ed   : > { %21773 = vmatprep.subr.bf16.mxu1 %v22542_v32 }
0x35ef   : > { %21847 = vmatpush3.bf16.msra.mxu0 %v23549_v34 }
0x35f0   : > { %21848 = vmatprep.subr.bf16.mxu0 %v22542_v32  ;;  %21775 = vmatpush3.bf16.msra.mxu1 %v21774_v5  ;;  %v21804_v5 = vpack.c.bf16 %v14500_v42, %v14499_v20 }
0x35f1   : > { %21776 = vmatprep.subr.bf16.mxu1 %v22542_v32 }
0x36a2   : > { %v10487_v39 = vpop.f32.mrb[100].mxu1 }
0x36a3   : > { %v19163_v54 = vpop.f32.mrb[101].mxu1 }
0x36a4   : > { %v26353_v49 = vpop.f32.mrb[76].mxu0  ;;  %v21807_v54 = vpack.c.bf16 %v14502_v36, %v14501_v29 }
0x36a5   : > { %v19243_v21 = vpop.f32.mrb[77].mxu0 }
0x36a6   : > { %v10574_v58 = vpop.f32.mrb[102].mxu1  ;;  %v14506_v21 = vld [vmem:[%s27375_s8 + $0x11c8] sm:$0xff] }
0x36a7   : > { %v19168_v46 = vpop.f32.mrb[103].mxu1  ;;  %19202 = vmatmul.mubr.f32.vlgmr.msra.gmra.mrb[104].mxu1 %v10574_v58  ;;  %v21813_v58 = vpack.c.bf16 %v14506_v21, %v14505_v15  ;;  %v14520_v21 = vld [vmem:[%s27377_s10 + $0x90] sm:$0xff] }
0x36a8   : > { %21778 = vmatpush3.bf16.msra.mxu1 %v21777_v47  ;;  %19236 = vmatprep.mubr.msk.f32.mxu1 %vm22543_vm2, %v22544_v60  ;;  %v14504_v47 = vld [vmem:[%s27375_s8 + $0x11b8] sm:$0xff]  ;;  %v14507_v46 = vld [vmem:[%s27375_s8 + $0x11d0] sm:$0xff] }
0x36a9   : > { %21779 = vmatprep.subr.bf16.mxu1 %v22542_v32 }
0x36ac   : > { %21781 = vmatpush3.bf16.msra.mxu1 %v21780_v18  ;;  %v14508_v18 = vld [vmem:[%s27375_s8 + $0x11d8] sm:$0xff] }
0x36ad   : > { %21782 = vmatprep.subr.bf16.mxu1 %v22542_v32  ;;  %v21816_v10 = vpack.c.bf16 %v14508_v18, %v14507_v46  ;;  %v14522_v18 = vld [vmem:[%s27377_s10 + $0xa0] sm:$0xff] }
0x36b0   : > { %21784 = vmatpush3.bf16.msra.mxu1 %v21783_v52  ;;  %v14510_v52 = vld [vmem:[%s27375_s8 + $0x11e8] sm:$0xff] }
0x36b1   : > { %21785 = vmatprep.subr.bf16.mxu1 %v22542_v32  ;;  %v21819_v2 = vpack.c.bf16 %v14510_v52, %v14509_v1  ;;  %v14524_v52 = vld [vmem:[%s27377_s10 + $0xb0] sm:$0xff] }
0x36b4   : > { %21787 = vmatpush3.bf16.msra.mxu1 %v21786_v44  ;;  %v14512_v44 = vld [vmem:[%s27375_s8 + $0x11f8] sm:$0xff] }
0x36b5   : > { %21788 = vmatprep.subr.bf16.mxu1 %v22542_v32  ;;  %v21822_v23 = vpack.c.bf16 %v14512_v44, %v14511_v17  ;;  %v14526_v44 = vld [vmem:[%s27377_s10 + $0xc0] sm:$0xff] }
0x36b8   : > { %21790 = vmatpush3.bf16.msra.mxu1 %v21789_v45 }
0x36b9   : > { %21791 = vmatprep.subr.bf16.mxu1 %v22542_v32 }
0x36bc   : > { %21793 = vmatpush3.bf16.msra.mxu1 %v21792_v62 }
0x36bd   : > { %21794 = vmatprep.subr.bf16.mxu1 %v22542_v32 }
0x36c0   : > { %21796 = vmatpush3.bf16.msra.mxu1 %v21795_v9 }
0x36c1   : > { %21797 = vmatprep.subr.bf16.mxu1 %v22542_v32 }
0x36c4   : > { %21799 = vmatpush3.bf16.msra.mxu1 %v21798_v11 }
0x36c5   : > { %21800 = vmatprep.subr.bf16.mxu1 %v22542_v32 }
0x36c7   : > { %19237 = vmatmul.mubr.f32.vlgmr.msra.gmra.mrb[104].mxu1 %v10487_v39  ;;  %v14503_v39 = vld [vmem:[%s27375_s8 + $0x11b0] sm:$0xff] }
0x36c8   : > { %21802 = vmatpush3.bf16.msra.mxu1 %v21801_v14  ;;  %19276 = vmatprep.mubr.msk.f32.mxu1 %vm22543_vm2, %v22544_v60  ;;  %v21810_v63 = vpack.c.bf16 %v14504_v47, %v14503_v39  ;;  %v14518_v39 = vld [vmem:[%s27377_s10 + $0x80] sm:$0xff]  ;;  %v14519_v47 = vld [vmem:[%s27377_s10 + $0x88] sm:$0xff] }
0x36c9   : > { %21803 = vmatprep.subr.bf16.mxu1 %v22542_v32  ;;  %v21873_v15 = vpack.c.bf16 %v14519_v47, %v14518_v39  ;;  %v11146_v39 = vld [vmem:[%s27377_s10 + $0x48] sm:$0xff] }
0x36cc   : > { %21805 = vmatpush3.bf16.msra.mxu1 %v21804_v5 }
0x36cd   : > { %21806 = vmatprep.subr.bf16.mxu1 %v22542_v32 }
0x36d0   : > { %21808 = vmatpush3.bf16.msra.mxu1 %v21807_v54  ;;  %v11060_v54 = vld [vmem:[%s27376_s9] sm:$0xff] }
0x36d1   : > { %21809 = vmatprep.subr.bf16.mxu1 %v22542_v32 }
0x36d4   : > { %21811 = vmatpush3.bf16.msra.mxu1 %v21810_v63  ;;  %v14515_v63 = vld [vmem:[%s27376_s9 + $0x8] sm:$0xff] }
0x36d5   : > { %21812 = vmatprep.subr.bf16.mxu1 %v22542_v32 }
0x36d8   : > { %21814 = vmatpush3.bf16.msra.mxu1 %v21813_v58  ;;  %v14521_v58 = vld [vmem:[%s27377_s10 + $0x98] sm:$0xff] }
0x36d9   : > { %21815 = vmatprep.subr.bf16.mxu1 %v22542_v32  ;;  %v21876_v46 = vpack.c.bf16 %v14521_v58, %v14520_v21  ;;  %v11149_v21 = vld [vmem:[%s27377_s10 + $0x60] sm:$0xff]  ;;  %v11150_v58 = vld [vmem:[%s27377_s10 + $0x68] sm:$0xff] }
0x36dc   : > { %21817 = vmatpush3.bf16.msra.mxu1 %v21816_v10  ;;  %v14523_v10 = vld [vmem:[%s27377_s10 + $0xa8] sm:$0xff] }
0x36dd   : > { %21818 = vmatprep.subr.bf16.mxu1 %v22542_v32  ;;  %v21879_v1 = vpack.c.bf16 %v14523_v10, %v14522_v18  ;;  %v11151_v18 = vld [vmem:[%s27377_s10 + $0x70] sm:$0xff]  ;;  %v11152_v10 = vld [vmem:[%s27377_s10 + $0x78] sm:$0xff] }
0x36e0   : > { %21820 = vmatpush3.bf16.msra.mxu1 %v21819_v2  ;;  %v14525_v2 = vld [vmem:[%s27377_s10 + $0xb8] sm:$0xff] }
0x36e1   : > { %21821 = vmatprep.subr.bf16.mxu1 %v22542_v32  ;;  %v21882_v17 = vpack.c.bf16 %v14525_v2, %v14524_v52  ;;  %v14537_v52 = vld [vmem:[%s27377_s10 + $0x100] sm:$0xff]  ;;  %v14538_v2 = vld [vmem:[%s27377_s10 + $0x108] sm:$0xff] }
0x36e4   : > { %21823 = vmatpush3.bf16.msra.mxu1 %v21822_v23  ;;  %v14527_v23 = vld [vmem:[%s27377_s10 + $0xc8] sm:$0xff] }
0x36e5   : > { %19429 = vmatprep.subr.mxu1 %v22544_v60 }
0x36e7   : > { %19277 = vmatmul.mubr.f32.vlgmr.msra.gmra.mrb[104].mxu1 %v26353_v49 }
0x36e8   : > { %19431 = vmatprep.mubr.msk.f32.mxu1 %vm22543_vm2, %v22544_v60 }
0x37ba   : > { %v10888_v3 = vpop.f32.mrb[104].mxu1 }
0x37bb   : > { %v10893_v45 = vsel %vm3174_vm4, %v10888_v3, 0.0  ;;  %v19278_v40 = vpop.f32.mrb[105].mxu1 }
0x37bc   : > { %v10894_v6 = vrot.slane %v10893_v45, 4  ;;  %v14529_v40 = vld [vmem:[%s27377_s10 + $0xd8] sm:$0xff] }
0x37be   : > { %v10895_v62 = vadd.f32 %v10894_v6, %v10893_v45  ;;  %v14528_v45 = vld [vmem:[%s27377_s10 + $0xd0] sm:$0xff] }
0x37bf   : > { %v21888_v6 = vpack.c.bf16 %v14529_v40, %v14528_v45  ;;  %v14541_v45 = vld [vmem:[%s27377_s10 + $0x120] sm:$0xff]  ;;  %v14542_v40 = vld [vmem:[%s27377_s10 + $0x128] sm:$0xff] }
0x37c0   : > { %v10896_v12 = vrot.slane %v10895_v62, 2 }
0x37c2   : > { %v10897_v4 = vadd.f32 %v10896_v12, %v10895_v62  ;;  %v14530_v62 = vld [vmem:[%s27377_s10 + $0xe0] sm:$0xff]  ;;  %v14531_v12 = vld [vmem:[%s27377_s10 + $0xe8] sm:$0xff] }
0x37c4   : > { %v10898_v9 = vrot.slane %v10897_v4, 1 }
0x37c6   : > { %v10899_v57 = vadd.f32 %v10898_v9, %v10897_v4  ;;  %v21891_v4 = vpack.c.bf16 %v14531_v12, %v14530_v62  ;;  %v14532_v9 = vld [vmem:[%s27377_s10 + $0xf0] sm:$0xff]  ;;  %v14544_v12 = vld [vmem:[%s27377_s10 + $0x138] sm:$0xff] }
0x37c7   : > { %v14543_v62 = vld [vmem:[%s27377_s10 + $0x130] sm:$0xff] }
0x37c8   : > { %19312 = vmatmul.mubr.f32.vlgmr.msra.gmra.mrb[78].mxu0 %v10899_v57  ;;  %v14533_v57 = vld [vmem:[%s27377_s10 + $0xf8] sm:$0xff] }
0x37c9   : > { %21850 = vmatpush3.bf16.msra.mxu0 %v23361_v48  ;;  %19346 = vmatprep.mubr.msk.f32.mxu0 %vm22543_vm2, %v22544_v60 }
0x37ca   : > { %21851 = vmatprep.subr.bf16.mxu0 %v22542_v32 }
0x37cd   : > { %21853 = vmatpush3.bf16.msra.mxu0 %v23367_v51 }
0x37ce   : > { %21854 = vmatprep.subr.bf16.mxu0 %v22542_v32 }
0x37d1   : > { %21856 = vmatpush3.bf16.msra.mxu0 %v23377_v55 }
0x37d2   : > { %21857 = vmatprep.subr.bf16.mxu0 %v22542_v32 }
0x37d5   : > { %21859 = vmatpush3.bf16.msra.mxu0 %v23387_v61 }
0x37d6   : > { %21860 = vmatprep.subr.bf16.mxu0 %v22542_v32 }
0x37d9   : > { %21862 = vmatpush3.bf16.msra.mxu0 %v23397_v0 }
0x37da   : > { %21863 = vmatprep.subr.bf16.mxu0 %v22542_v32 }
0x37dd   : > { %21865 = vmatpush3.bf16.msra.mxu0 %v23529_v24 }
0x37de   : > { %21866 = vmatprep.subr.bf16.mxu0 %v22542_v32 }
0x37e1   : > { %21868 = vmatpush3.bf16.msra.mxu0 %v23539_v27 }
0x37e2   : > { %21869 = vmatprep.subr.bf16.mxu0 %v22542_v32 }
0x37e5   : > { %21871 = vmatpush3.bf16.msra.mxu0 %v23549_v34 }
0x37e6   : > { %19349 = vmatprep.subr.mxu0 %v22544_v60 }
0x389b   : > { %v10966_v48 = vpop.f32.mrb[78].mxu0 }
0x389c   : > { %v10973_v51 = vrot.slane %v10966_v48, %v22967_v8  ;;  %v19313_v55 = vpop.f32.mrb[79].mxu0  ;;  %v21894_v48 = vpack.c.bf16 %v14533_v57, %v14532_v9  ;;  %v14545_v9 = vld [vmem:[%s27377_s10 + $0x140] sm:$0xff]  ;;  %v14546_v57 = vld [vmem:[%s27377_s10 + $0x148] sm:$0xff] }
0x389d   : > { %v11138_v55 = vld [vmem:[%s27377_s10 + $0x8] sm:$0xff] }
0x389e   : > { %v10974_v61 = vsub.f32 %v10888_v3, %v10973_v51  ;;  %v21885_v3 = vpack.c.bf16 %v14527_v23, %v14526_v44  ;;  %v11137_v51 = vld [vmem:[%s27377_s10] sm:$0xff]  ;;  %v14539_v44 = vld [vmem:[%s27377_s10 + $0x110] sm:$0xff]  ;;  %v14540_v23 = vld [vmem:[%s27377_s10 + $0x118] sm:$0xff] }
0x38a0   : > { %v10975_v0 = vmul.f32 %v10974_v61, %v10974_v61 }
0x38a2   : > { %v10976_v49 = vsel %vm3174_vm4, %v10975_v0, 0.0 }
0x38a3   : > { %v10977_v43 = vrot.slane %v10976_v49, 4 }
0x38a5   : > { %v10978_v24 = vadd.f32 %v10977_v43, %v10976_v49  ;;  %v21897_v49 = vpack.c.bf16 %v11138_v55, %v11137_v51  ;;  %v14547_v51 = vld [vmem:[%s27377_s10 + $0x150] sm:$0xff]  ;;  %v14548_v55 = vld [vmem:[%s27377_s10 + $0x158] sm:$0xff] }
0x38a7   : > { %v10979_v11 = vrot.slane %v10978_v24, 2 }
0x38a9   : > { %v10980_v26 = vadd.f32 %v10979_v11, %v10978_v24  ;;  %v11139_v24 = vld [vmem:[%s27377_s10 + $0x10] sm:$0xff]  ;;  %v11140_v11 = vld [vmem:[%s27377_s10 + $0x18] sm:$0xff] }
0x38ab   : > { %v10981_v30 = vrot.slane %v10980_v26, 1 }
0x38ad   : > { %v10982_v27 = vadd.f32 %v10981_v30, %v10980_v26 }
0x38af   : > { %19347 = vmatmul.mubr.f32.vlgmr.msra.gmra.mrb[80].mxu0 %v10982_v27 }
0x38b0   : > { %19351 = vmatprep.mubr.msk.f32.mxu0 %vm22543_vm2, %v22544_v60 }
0x3982   : > { %v11049_v34 = vpop.f32.mrb[80].mxu0 }
0x3983   : > { %v11050_v14 = vadd.f32 1e-05, %v11049_v34  ;;  %v19348_v20 = vpop.f32.mrb[81].mxu0  ;;  %v21900_v34 = vpack.c.bf16 %v11140_v11, %v11139_v24  ;;  %v14551_v11 = vld [vmem:[%s27377_s10 + $0x170] sm:$0xff] }
0x3984   : > { %v11142_v20 = vld [vmem:[%s27377_s10 + $0x28] sm:$0xff] }
0x3985   : > { %22515 = vrsqrt.f32 %v11050_v14  ;;  %v11141_v14 = vld [vmem:[%s27377_s10 + $0x20] sm:$0xff] }
0x398f   : > { %v22516_v42 = vpop.eup %22515 }
0x3990   : > { %v11057_v5 = vrot.slane %v22516_v42, %v22967_v8  ;;  %v21903_v42 = vpack.c.bf16 %v11142_v20, %v11141_v14 }
0x3992   : > { %v11058_v29 = vmul.f32 %v11057_v5, %v10974_v61  ;;  %v11143_v5 = vld [vmem:[%s27377_s10 + $0x30] sm:$0xff] }
0x3994   : > { %v11059_v36 = vadd.f32 %v11058_v29, %v26017_v37  ;;  %v14534_v37 = vld [vmem:[%s27376_s9 + $0x10] sm:$0xff]  ;;  %v11144_v29 = vld [vmem:[%s27377_s10 + $0x38] sm:$0xff] }
0x3996   : > { %19350 = vmatpush3.msk.msra.mxu0 %vm3174_vm4, %v11059_v36  ;;  %19430 = vmatpush3.msk.msra.mxu1 %vm3174_vm4, %v11059_v36 }
0x3997   : > { %19352 = vmatmul.mubr.msk.f32.vlgmr.msra.gmra.mrb[82].mxu0 %vm3343_vm5, %v11060_v54  ;;  %19354 = vmatprep.subr.mxu0 %v22544_v60  ;;  %v11145_v54 = vld [vmem:[%s27377_s10 + $0x40] sm:$0xff] }
0x3998   : > { %19355 = vmatpush3.msk.msra.mxu0 %vm3174_vm4, %v11059_v36  ;;  %19356 = vmatprep.mubr.msk.f32.mxu0 %vm22543_vm2, %v22544_v60  ;;  %v21906_v36 = vpack.c.bf16 %v11144_v29, %v11143_v5  ;;  %v21909_v47 = vpack.c.bf16 %v11146_v39, %v11145_v54 }
0x3999   : > { %19432 = vmatmul.mubr.msk.f32.vlgmr.msra.gmra.mrb[106].mxu1 %vm3343_vm5, %v14534_v37  ;;  %21872 = vmatprep.subr.bf16.mxu0 %v22542_v32  ;;  %v11147_v37 = vld [vmem:[%s27377_s10 + $0x50] sm:$0xff] }
0x399a   : > { %21944 = vmatprep.subr.bf16.mxu1 %v22542_v32  ;;  %19501 = vmatprep.mubr.msk.f32.mxu1 %vm22543_vm2, %v22544_v60 }
0x399b   : > { %19357 = vmatmul.mubr.msk.f32.vlgmr.msra.gmra.mrb[84].mxu0 %vm3343_vm5, %v14515_v63  ;;  %21946 = vmatpush3.bf16.msra.mxu1 %v23177_v7  ;;  %v11148_v63 = vld [vmem:[%s27377_s10 + $0x58] sm:$0xff] }
0x399c   : > { %21874 = vmatpush3.bf16.msra.mxu0 %v21873_v15  ;;  %19391 = vmatprep.mubr.msk.f32.mxu0 %vm22543_vm2, %v22544_v60  ;;  %v21912_v15 = vpack.c.bf16 %v11148_v63, %v11147_v37 }
0x399d   : > { %21875 = vmatprep.subr.bf16.mxu0 %v22542_v32  ;;  %21947 = vmatprep.subr.bf16.mxu1 %v22542_v32 }
0x399f   : > { %21949 = vmatpush3.bf16.msra.mxu1 %v23186_v13 }
0x39a0   : > { %21877 = vmatpush3.bf16.msra.mxu0 %v21876_v46  ;;  %21950 = vmatprep.subr.bf16.mxu1 %v22542_v32  ;;  %v21915_v46 = vpack.c.bf16 %v11150_v58, %v11149_v21 }
0x39a1   : > { %21878 = vmatprep.subr.bf16.mxu0 %v22542_v32 }
0x39a3   : > { %21952 = vmatpush3.bf16.msra.mxu1 %v23198_v16 }
0x39a4   : > { %21880 = vmatpush3.bf16.msra.mxu0 %v21879_v1  ;;  %21953 = vmatprep.subr.bf16.mxu1 %v22542_v32  ;;  %v21918_v1 = vpack.c.bf16 %v11152_v10, %v11151_v18  ;;  %v14559_v10 = vld [vmem:[%s27379_s12 + $0x80] sm:$0xff] }
0x39a5   : > { %21881 = vmatprep.subr.bf16.mxu0 %v22542_v32 }
0x39a7   : > { %21955 = vmatpush3.bf16.msra.mxu1 %v23208_v19 }
0x39a8   : > { %21883 = vmatpush3.bf16.msra.mxu0 %v21882_v17  ;;  %21956 = vmatprep.subr.bf16.mxu1 %v22542_v32  ;;  %v21921_v17 = vpack.c.bf16 %v14538_v2, %v14537_v52  ;;  %v11714_v2 = vld [vmem:[%s27378_s11 + $0x8] sm:$0xff] }
0x39a9   : > { %21884 = vmatprep.subr.bf16.mxu0 %v22542_v32 }
0x39ab   : > { %21958 = vmatpush3.bf16.msra.mxu1 %v23218_v22 }
0x39ac   : > { %21886 = vmatpush3.bf16.msra.mxu0 %v21885_v3  ;;  %21959 = vmatprep.subr.bf16.mxu1 %v22542_v32  ;;  %v21924_v3 = vpack.c.bf16 %v14540_v23, %v14539_v44  ;;  %v14576_v23 = vld [vmem:[%s27378_s11 + $0x28] sm:$0xff] }
0x39ad   : > { %21887 = vmatprep.subr.bf16.mxu0 %v22542_v32 }
0x39af   : > { %21961 = vmatpush3.bf16.msra.mxu1 %v23229_v25 }
0x39b0   : > { %21889 = vmatpush3.bf16.msra.mxu0 %v21888_v6  ;;  %21962 = vmatprep.subr.bf16.mxu1 %v22542_v32  ;;  %v21927_v6 = vpack.c.bf16 %v14542_v40, %v14541_v45  ;;  %v14562_v45 = vld [vmem:[%s27379_s12 + $0x98] sm:$0xff] }
0x39b1   : > { %21890 = vmatprep.subr.bf16.mxu0 %v22542_v32  ;;  %v14556_v40 = vld [vmem:[%s27378_s11 + $0x18] sm:$0xff] }
0x39b3   : > { %21964 = vmatpush3.bf16.msra.mxu1 %v23239_v28 }
0x39b4   : > { %21892 = vmatpush3.bf16.msra.mxu0 %v21891_v4  ;;  %21965 = vmatprep.subr.bf16.mxu1 %v22542_v32  ;;  %v21930_v4 = vpack.c.bf16 %v14544_v12, %v14543_v62  ;;  %v14563_v62 = vld [vmem:[%s27379_s12 + $0xa0] sm:$0xff]  ;;  %v14564_v12 = vld [vmem:[%s27379_s12 + $0xa8] sm:$0xff] }
0x39b5   : > { %21893 = vmatprep.subr.bf16.mxu0 %v22542_v32 }
0x39b7   : > { %21967 = vmatpush3.bf16.msra.mxu1 %v23249_v31 }
0x39b8   : > { %21968 = vmatprep.subr.bf16.mxu1 %v22542_v32  ;;  %21895 = vmatpush3.bf16.msra.mxu0 %v21894_v48  ;;  %v21933_v48 = vpack.c.bf16 %v14546_v57, %v14545_v9  ;;  %v14565_v9 = vld [vmem:[%s27379_s12 + $0xb0] sm:$0xff]  ;;  %v14566_v57 = vld [vmem:[%s27379_s12 + $0xb8] sm:$0xff] }
0x39b9   : > { %21896 = vmatprep.subr.bf16.mxu0 %v22542_v32 }
0x3a6a   : > { %v11133_v61 = vpop.f32.mrb[82].mxu0 }
0x3a6b   : > { %v19353_v0 = vpop.f32.mrb[83].mxu0 }
0x3a6c   : > { %v26595_v43 = vpop.f32.mrb[106].mxu1  ;;  %v14549_v0 = vld [vmem:[%s27377_s10 + $0x160] sm:$0xff] }
0x3a6d   : > { %v19433_v26 = vpop.f32.mrb[107].mxu1 }
0x3a6e   : > { %v11224_v30 = vpop.f32.mrb[84].mxu0  ;;  %v14552_v26 = vld [vmem:[%s27377_s10 + $0x178] sm:$0xff] }
0x3a6f   : > { %v19358_v27 = vpop.f32.mrb[85].mxu0  ;;  %19392 = vmatmul.mubr.f32.vlgmr.msra.gmra.mrb[86].mxu0 %v11224_v30  ;;  %v21942_v30 = vpack.c.bf16 %v14552_v26, %v14551_v11  ;;  %v14571_v11 = vld [vmem:[%s27379_s12 + $0xe0] sm:$0xff]  ;;  %v14572_v26 = vld [vmem:[%s27379_s12 + $0xe8] sm:$0xff] }
0x3a70   : > { %21898 = vmatpush3.bf16.msra.mxu0 %v21897_v49  ;;  %19426 = vmatprep.mubr.msk.f32.mxu0 %vm22543_vm2, %v22544_v60  ;;  %v14550_v49 = vld [vmem:[%s27377_s10 + $0x168] sm:$0xff] }
0x3a71   : > { %21899 = vmatprep.subr.bf16.mxu0 %v22542_v32  ;;  %v21939_v24 = vpack.c.bf16 %v14550_v49, %v14549_v0  ;;  %v14569_v0 = vld [vmem:[%s27379_s12 + $0xd0] sm:$0xff]  ;;  %v14570_v49 = vld [vmem:[%s27379_s12 + $0xd8] sm:$0xff] }
0x3a74   : > { %21901 = vmatpush3.bf16.msra.mxu0 %v21900_v34 }
0x3a75   : > { %21902 = vmatprep.subr.bf16.mxu0 %v22542_v32 }
0x3a78   : > { %21904 = vmatpush3.bf16.msra.mxu0 %v21903_v42 }
0x3a79   : > { %21905 = vmatprep.subr.bf16.mxu0 %v22542_v32 }
0x3a7c   : > { %21907 = vmatpush3.bf16.msra.mxu0 %v21906_v36 }
0x3a7d   : > { %21908 = vmatprep.subr.bf16.mxu0 %v22542_v32 }
0x3a80   : > { %21910 = vmatpush3.bf16.msra.mxu0 %v21909_v47 }
0x3a81   : > { %21911 = vmatprep.subr.bf16.mxu0 %v22542_v32 }
0x3a84   : > { %21913 = vmatpush3.bf16.msra.mxu0 %v21912_v15 }
0x3a85   : > { %21914 = vmatprep.subr.bf16.mxu0 %v22542_v32 }
0x3a88   : > { %21916 = vmatpush3.bf16.msra.mxu0 %v21915_v46 }
0x3a89   : > { %21917 = vmatprep.subr.bf16.mxu0 %v22542_v32 }
0x3a8c   : > { %21919 = vmatpush3.bf16.msra.mxu0 %v21918_v1  ;;  %v14560_v1 = vld [vmem:[%s27379_s12 + $0x88] sm:$0xff] }
0x3a8d   : > { %21920 = vmatprep.subr.bf16.mxu0 %v22542_v32  ;;  %v21992_v44 = vpack.c.bf16 %v14560_v1, %v14559_v10  ;;  %v11808_v10 = vld [vmem:[%s27379_s12 + $0x60] sm:$0xff]  ;;  %v11809_v1 = vld [vmem:[%s27379_s12 + $0x68] sm:$0xff] }
0x3a8f   : > { %19427 = vmatmul.mubr.f32.vlgmr.msra.gmra.mrb[86].mxu0 %v11133_v61  ;;  %v21936_v61 = vpack.c.bf16 %v14548_v55, %v14547_v51  ;;  %v14567_v51 = vld [vmem:[%s27379_s12 + $0xc0] sm:$0xff]  ;;  %v14568_v55 = vld [vmem:[%s27379_s12 + $0xc8] sm:$0xff] }
0x3a90   : > { %21922 = vmatpush3.bf16.msra.mxu0 %v21921_v17  ;;  %19466 = vmatprep.mubr.msk.f32.mxu0 %vm22543_vm2, %v22544_v60  ;;  %v14555_v17 = vld [vmem:[%s27378_s11 + $0x10] sm:$0xff] }
0x3a91   : > { %21923 = vmatprep.subr.bf16.mxu0 %v22542_v32 }
0x3a94   : > { %21925 = vmatpush3.bf16.msra.mxu0 %v21924_v3  ;;  %v14561_v3 = vld [vmem:[%s27379_s12 + $0x90] sm:$0xff] }
0x3a95   : > { %21926 = vmatprep.subr.bf16.mxu0 %v22542_v32 }
0x3a98   : > { %21928 = vmatpush3.bf16.msra.mxu0 %v21927_v6  ;;  %v21996_v6 = vpack.c.bf16 %v14562_v45, %v14561_v3  ;;  %v14580_v3 = vld [vmem:[%s27379_s12 + $0x108] sm:$0xff] }
0x3a99   : > { %21929 = vmatprep.subr.bf16.mxu0 %v22542_v32 }
0x3a9c   : > { %21931 = vmatpush3.bf16.msra.mxu0 %v21930_v4  ;;  %v22000_v4 = vpack.c.bf16 %v14564_v12, %v14563_v62  ;;  %v14583_v12 = vld [vmem:[%s27379_s12 + $0x120] sm:$0xff] }
0x3a9d   : > { %21932 = vmatprep.subr.bf16.mxu0 %v22542_v32 }
0x3aa0   : > { %21934 = vmatpush3.bf16.msra.mxu0 %v21933_v48  ;;  %v22004_v48 = vpack.c.bf16 %v14566_v57, %v14565_v9  ;;  %v14585_v57 = vld [vmem:[%s27379_s12 + $0x130] sm:$0xff] }
0x3aa1   : > { %21935 = vmatprep.subr.bf16.mxu0 %v22542_v32 }
0x3aa4   : > { %21937 = vmatpush3.bf16.msra.mxu0 %v21936_v61  ;;  %v22008_v61 = vpack.c.bf16 %v14568_v55, %v14567_v51  ;;  %v14587_v55 = vld [vmem:[%s27379_s12 + $0x140] sm:$0xff] }
0x3aa5   : > { %21938 = vmatprep.subr.bf16.mxu0 %v22542_v32 }
0x3aa8   : > { %21940 = vmatpush3.bf16.msra.mxu0 %v21939_v24  ;;  %v22012_v24 = vpack.c.bf16 %v14570_v49, %v14569_v0  ;;  %v14589_v49 = vld [vmem:[%s27379_s12 + $0x150] sm:$0xff] }
0x3aa9   : > { %21941 = vmatprep.subr.bf16.mxu0 %v22542_v32 }
0x3aac   : > { %21943 = vmatpush3.bf16.msra.mxu0 %v21942_v30  ;;  %v22016_v30 = vpack.c.bf16 %v14572_v26, %v14571_v11  ;;  %v14591_v26 = vld [vmem:[%s27379_s12 + $0x160] sm:$0xff] }
0x3aaf   : > { %19467 = vmatmul.mubr.f32.vlgmr.msra.gmra.mrb[86].mxu0 %v26595_v43 }
0x3b82   : > { %v11543_v27 = vpop.f32.mrb[86].mxu0 }
0x3b83   : > { %v11548_v34 = vrot.slane %v11543_v27, 4  ;;  %v19468_v14 = vpop.f32.mrb[87].mxu0 }
0x3b85   : > { %v11549_v20 = vadd.f32 %v11548_v34, %v11543_v27  ;;  %v14574_v34 = vld [vmem:[%s27379_s12 + $0xf8] sm:$0xff] }
0x3b87   : > { %v11550_v42 = vrot.slane %v11549_v20, 2 }
0x3b89   : > { %v11551_v5 = vadd.f32 %v11550_v42, %v11549_v20  ;;  %v11796_v20 = vld [vmem:[%s27379_s12] sm:$0xff]  ;;  %v11797_v42 = vld [vmem:[%s27379_s12 + $0x8] sm:$0xff] }
0x3b8b   : > { %v11552_v29 = vrot.slane %v11551_v5, 1 }
0x3b8d   : > { %v11553_v36 = vadd.f32 %v11552_v29, %v11551_v5  ;;  %v22024_v5 = vpack.c.bf16 %v11797_v42, %v11796_v20 }
0x3b8f   : > { %19502 = vmatmul.mubr.f32.vlgmr.msra.gmra.mrb[108].mxu1 %v11553_v36 }
0x3b90   : > { %21970 = vmatpush3.bf16.msra.mxu1 %v23177_v7  ;;  %19536 = vmatprep.mubr.msk.f32.mxu1 %vm22543_vm2, %v22544_v60 }
0x3b91   : > { %21971 = vmatprep.subr.bf16.mxu1 %v22542_v32 }
0x3b94   : > { %21973 = vmatpush3.bf16.msra.mxu1 %v23186_v13 }
0x3b95   : > { %21974 = vmatprep.subr.bf16.mxu1 %v22542_v32 }
0x3b98   : > { %21976 = vmatpush3.bf16.msra.mxu1 %v23198_v16 }
0x3b99   : > { %21977 = vmatprep.subr.bf16.mxu1 %v22542_v32 }
0x3b9c   : > { %21979 = vmatpush3.bf16.msra.mxu1 %v23208_v19 }
0x3b9d   : > { %21980 = vmatprep.subr.bf16.mxu1 %v22542_v32 }
0x3ba0   : > { %21982 = vmatpush3.bf16.msra.mxu1 %v23218_v22 }
0x3ba1   : > { %21983 = vmatprep.subr.bf16.mxu1 %v22542_v32 }
0x3ba4   : > { %21985 = vmatpush3.bf16.msra.mxu1 %v23229_v25 }
0x3ba5   : > { %21986 = vmatprep.subr.bf16.mxu1 %v22542_v32 }
0x3ba8   : > { %21988 = vmatpush3.bf16.msra.mxu1 %v23239_v28  ;;  %v11713_v28 = vld [vmem:[%s27378_s11] sm:$0xff] }
0x3ba9   : > { %21989 = vmatprep.subr.bf16.mxu1 %v22542_v32 }
0x3bac   : > { %21991 = vmatpush3.bf16.msra.mxu1 %v23249_v31  ;;  %v14575_v31 = vld [vmem:[%s27378_s11 + $0x20] sm:$0xff] }
0x3bad   : > { %19621 = vmatprep.mubr.msk.f32.mxu0 %vm2673_vm3, %v14575_v31 }
0x3c62   : > { %v11620_v7 = vpop.f32.mrb[108].mxu1 }
0x3c63   : > { %v11627_v13 = vrot.slane %v11620_v7, %v22967_v8  ;;  %v19503_v16 = vpop.f32.mrb[109].mxu1  ;;  %v11798_v7 = vld [vmem:[%s27379_s12 + $0x10] sm:$0xff] }
0x3c65   : > { %v11628_v19 = vsub.f32 %v11543_v27, %v11627_v13  ;;  %v14573_v27 = vld [vmem:[%s27379_s12 + $0xf0] sm:$0xff]  ;;  %v11799_v13 = vld [vmem:[%s27379_s12 + $0x18] sm:$0xff] }
0x3c66   : > { %v22020_v14 = vpack.c.bf16 %v14574_v34, %v14573_v27  ;;  %v14593_v34 = vld [vmem:[%s27379_s12 + $0x170] sm:$0xff] }
0x3c67   : > { %v11629_v43 = vmul.f32 %v11628_v19, %v11628_v19 }
0x3c69   : > { %v11630_v54 = vrot.slane %v11629_v43, 4 }
0x3c6b   : > { %v11631_v22 = vadd.f32 %v11630_v54, %v11629_v43 }
0x3c6d   : > { %v11632_v39 = vrot.slane %v11631_v22, 2 }
0x3c6f   : > { %v11633_v47 = vadd.f32 %v11632_v39, %v11631_v22  ;;  %v22028_v22 = vpack.c.bf16 %v11799_v13, %v11798_v7  ;;  %v11800_v39 = vld [vmem:[%s27379_s12 + $0x20] sm:$0xff] }
0x3c71   : > { %v11634_v37 = vrot.slane %v11633_v47, 1 }
0x3c73   : > { %v11635_v25 = vadd.f32 %v11634_v37, %v11633_v47  ;;  %v11801_v47 = vld [vmem:[%s27379_s12 + $0x28] sm:$0xff] }
0x3c74   : > { %v22032_v37 = vpack.c.bf16 %v11801_v47, %v11800_v39 }
0x3c75   : > { %19537 = vmatmul.mubr.f32.vlgmr.msra.gmra.mrb[110].mxu1 %v11635_v25  ;;  %v11802_v25 = vld [vmem:[%s27379_s12 + $0x30] sm:$0xff] }
0x3c76   : > { %19541 = vmatprep.mubr.msk.f32.mxu1 %vm2673_vm3, %v11713_v28  ;;  %v11803_v28 = vld [vmem:[%s27379_s12 + $0x38] sm:$0xff] }
0x3c77   : > { %v22036_v31 = vpack.c.bf16 %v11803_v28, %v11802_v25 }
0x3d48   : > { %v11702_v63 = vpop.f32.mrb[110].mxu1 }
0x3d49   : > { %v11703_v15 = vadd.f32 1e-05, %v11702_v63  ;;  %v19538_v21 = vpop.f32.mrb[111].mxu1  ;;  %v11804_v63 = vld [vmem:[%s27379_s12 + $0x40] sm:$0xff] }
0x3d4b   : > { %22517 = vrsqrt.f32 %v11703_v15  ;;  %v11805_v15 = vld [vmem:[%s27379_s12 + $0x48] sm:$0xff] }
0x3d4c   : > { %v22040_v21 = vpack.c.bf16 %v11805_v15, %v11804_v63 }
0x3d55   : > { %v22518_v58 = vpop.eup %22517 }
0x3d56   : > { %v11710_v46 = vrot.slane %v22518_v58, %v22967_v8  ;;  %v11806_v58 = vld [vmem:[%s27379_s12 + $0x50] sm:$0xff] }
0x3d58   : > { %v11711_v18 = vmul.f32 %v11710_v46, %v11628_v19  ;;  %v11807_v46 = vld [vmem:[%s27379_s12 + $0x58] sm:$0xff] }
0x3d5a   : > { %v11712_v52 = vmax.f32 %v11711_v18, 0.0  ;;  %v22044_v18 = vpack.c.bf16 %v11807_v46, %v11806_v58 }
0x3d5c   : > { %19539 = vmatprep.subr.mxu1 %v11712_v52  ;;  %19619 = vmatprep.subr.mxu0 %v11712_v52 }
0x3d5d   : > { %19540 = vmatpush3.msra.mxu1 %v11712_v52  ;;  %19620 = vmatpush3.msra.mxu0 %v11712_v52 }
0x3d5e   : > { %19542 = vmatmul.mubr.msk.f32.vlgmr.msra.gmra.mrb[112].mxu1 %vm2673_vm3, %v11714_v2  ;;  %19544 = vmatprep.subr.mxu1 %v11712_v52  ;;  %v11810_v2 = vld [vmem:[%s27379_s12 + $0x70] sm:$0xff] }
0x3d5f   : > { %19545 = vmatpush3.msra.mxu1 %v11712_v52  ;;  %19546 = vmatprep.mubr.msk.f32.mxu1 %vm2673_vm3, %v14555_v17  ;;  %v22048_v52 = vpack.c.bf16 %v11809_v1, %v11808_v10  ;;  %v11811_v17 = vld [vmem:[%s27379_s12 + $0x78] sm:$0xff] }
0x3d60   : > { %19622 = vmatmul.mubr.msk.f32.vlgmr.msra.gmra.mrb[88].mxu0 %vm2673_vm3, %v14576_v23  ;;  %21993 = vmatprep.subr.bf16.mxu1 %v21992_v44  ;;  %v14579_v23 = vld [vmem:[%s27379_s12 + $0x100] sm:$0xff] }
0x3d61   : > { %22088 = vmatprep.subr.bf16.mxu0 %v22542_v32  ;;  %19691 = vmatprep.mubr.msk.f32.mxu0 %vm22543_vm2, %v22544_v60  ;;  %v22056_v45 = vpack.c.bf16 %v14580_v3, %v14579_v23  ;;  %v14637_v3 = vld [vmem:[%s27380_s13 + $0x30] sm:$0xff] }
0x3d62   : > { %19547 = vmatmul.mubr.msk.f32.vlgmr.msra.gmra.mrb[114].mxu1 %vm2673_vm3, %v14556_v40  ;;  %22090 = vmatpush3.bf16.msra.mxu0 %v22751_v33  ;;  %v14581_v40 = vld [vmem:[%s27379_s12 + $0x110] sm:$0xff] }
0x3d63   : > { %21995 = vmatpush3.bf16.msra.mxu1 %v21992_v44  ;;  %22091 = vmatprep.subr.bf16.mxu0 %v22542_v32  ;;  %v22052_v44 = vpack.c.bf16 %v11811_v17, %v11810_v2  ;;  %v14602_v2 = vld [vmem:[%s27381_s14 + $0x88] sm:$0xff] }
0x3d64   : > { %21997 = vmatprep.subr.bf16.mxu1 %v21996_v6  ;;  %v14618_v17 = vld [vmem:[%s27380_s13 + $0x28] sm:$0xff] }
0x3d66   : > { %22093 = vmatpush3.bf16.msra.mxu0 %v22757_v35 }
0x3d67   : > { %21999 = vmatpush3.bf16.msra.mxu1 %v21996_v6  ;;  %22094 = vmatprep.subr.bf16.mxu0 %v22542_v32  ;;  %v14582_v6 = vld [vmem:[%s27379_s12 + $0x118] sm:$0xff] }
0x3d68   : > { %22001 = vmatprep.subr.bf16.mxu1 %v22000_v4  ;;  %v22060_v62 = vpack.c.bf16 %v14582_v6, %v14581_v40  ;;  %v14604_v40 = vld [vmem:[%s27381_s14 + $0x98] sm:$0xff] }
0x3d69   : > { %v14598_v6 = vld [vmem:[%s27380_s13 + $0x18] sm:$0xff] }
0x3d6a   : > { %22096 = vmatpush3.bf16.msra.mxu0 %v22767_v38 }
0x3d6b   : > { %22003 = vmatpush3.bf16.msra.mxu1 %v22000_v4  ;;  %22097 = vmatprep.subr.bf16.mxu0 %v22542_v32  ;;  %v14584_v4 = vld [vmem:[%s27379_s12 + $0x128] sm:$0xff] }
0x3d6c   : > { %22005 = vmatprep.subr.bf16.mxu1 %v22004_v48  ;;  %v22064_v9 = vpack.c.bf16 %v14584_v4, %v14583_v12  ;;  %v14657_v12 = vld [vmem:[%s27380_s13 + $0x40] sm:$0xff] }
0x3d6e   : > { %22099 = vmatpush3.bf16.msra.mxu0 %v22777_v41 }
0x3d6f   : > { %22007 = vmatpush3.bf16.msra.mxu1 %v22004_v48  ;;  %22100 = vmatprep.subr.bf16.mxu0 %v22542_v32  ;;  %v14586_v48 = vld [vmem:[%s27379_s12 + $0x138] sm:$0xff] }
0x3d70   : > { %22009 = vmatprep.subr.bf16.mxu1 %v22008_v61  ;;  %v22068_v51 = vpack.c.bf16 %v14586_v48, %v14585_v57  ;;  %v14606_v57 = vld [vmem:[%s27381_s14 + $0xa8] sm:$0xff] }
0x3d71   : > { %v14658_v48 = vld [vmem:[%s27380_s13 + $0x48] sm:$0xff] }
0x3d72   : > { %22102 = vmatpush3.bf16.msra.mxu0 %v22911_v50 }
0x3d73   : > { %22011 = vmatpush3.bf16.msra.mxu1 %v22008_v61  ;;  %22103 = vmatprep.subr.bf16.mxu0 %v22542_v32  ;;  %v14588_v61 = vld [vmem:[%s27379_s12 + $0x148] sm:$0xff] }
0x3d74   : > { %22013 = vmatprep.subr.bf16.mxu1 %v22012_v24  ;;  %v22072_v0 = vpack.c.bf16 %v14588_v61, %v14587_v55  ;;  %v14607_v61 = vld [vmem:[%s27381_s14 + $0xb0] sm:$0xff] }
0x3d76   : > { %22105 = vmatpush3.bf16.msra.mxu0 %v22921_v53 }
0x3d77   : > { %22015 = vmatpush3.bf16.msra.mxu1 %v22012_v24  ;;  %22106 = vmatprep.subr.bf16.mxu0 %v22542_v32  ;;  %v14590_v24 = vld [vmem:[%s27379_s12 + $0x158] sm:$0xff] }
0x3d78   : > { %22017 = vmatprep.subr.bf16.mxu1 %v22016_v30  ;;  %v22076_v11 = vpack.c.bf16 %v14590_v24, %v14589_v49  ;;  %v14678_v49 = vld [vmem:[%s27380_s13 + $0x58] sm:$0xff]  ;;  %v14697_v24 = vld [vmem:[%s27380_s13 + $0x60] sm:$0xff] }
0x3d7a   : > { %22108 = vmatpush3.bf16.msra.mxu0 %v22931_v56 }
0x3d7b   : > { %22019 = vmatpush3.bf16.msra.mxu1 %v22016_v30  ;;  %22109 = vmatprep.subr.bf16.mxu0 %v22542_v32  ;;  %v14592_v30 = vld [vmem:[%s27379_s12 + $0x168] sm:$0xff] }
0x3d7c   : > { %22021 = vmatprep.subr.bf16.mxu1 %v22020_v14  ;;  %v22080_v27 = vpack.c.bf16 %v14592_v30, %v14591_v26  ;;  %v14609_v26 = vld [vmem:[%s27381_s14 + $0xc0] sm:$0xff]  ;;  %v14610_v30 = vld [vmem:[%s27381_s14 + $0xc8] sm:$0xff] }
0x3d7e   : > { %22111 = vmatpush3.bf16.msra.mxu0 %v22941_v59 }
0x3d7f   : > { %22112 = vmatprep.subr.bf16.mxu0 %v22542_v32  ;;  %22023 = vmatpush3.bf16.msra.mxu1 %v22020_v14  ;;  %v14594_v14 = vld [vmem:[%s27379_s12 + $0x178] sm:$0xff] }
0x3d80   : > { %22025 = vmatprep.subr.bf16.mxu1 %v22024_v5  ;;  %v22084_v20 = vpack.c.bf16 %v14594_v14, %v14593_v34  ;;  %v22160_v34 = vpack.c.bf16 %v14610_v30, %v14609_v26  ;;  %v14611_v14 = vld [vmem:[%s27381_s14 + $0xd0] sm:$0xff]  ;;  %v14632_v30 = vld [vmem:[%s27381_s14 + $0x158] sm:$0xff] }
0x3d81   : > { %v14631_v26 = vld [vmem:[%s27381_s14 + $0x150] sm:$0xff] }
0x3e31   : > { %v19543_v29 = vpop.f32.mrb[112].mxu1 }
0x3e32   : > { %v11787_v36 = vpop.f32.mrb[113].mxu1 }
0x3e33   : > { %v26829_v16 = vpop.f32.mrb[88].mxu0 }
0x3e34   : > { %v12138_v19 = vpop.f32.mrb[89].mxu0 }
0x3e35   : > { %v19548_v43 = vpop.f32.mrb[114].mxu1 }
0x3e36   : > { %v11887_v54 = vpop.f32.mrb[115].mxu1 }
0x3e37   : > { %19581 = vmatprep.mubr.f32.mxu1 %v11887_v54 }
0x3e38   : > { %19582 = vmatmul.mubr.f32.vlgmr.msra.gmra.mrb[116].mxu1 %v19548_v43 }
0x3e39   : > { %22027 = vmatpush3.bf16.msra.mxu1 %v22024_v5  ;;  %19616 = vmatprep.mubr.f32.mxu1 %v11787_v36 }
0x3e3a   : > { %22029 = vmatprep.subr.bf16.mxu1 %v22028_v22 }
0x3e3d   : > { %22031 = vmatpush3.bf16.msra.mxu1 %v22028_v22 }
0x3e3e   : > { %22033 = vmatprep.subr.bf16.mxu1 %v22032_v37 }
0x3e41   : > { %22035 = vmatpush3.bf16.msra.mxu1 %v22032_v37 }
0x3e42   : > { %22037 = vmatprep.subr.bf16.mxu1 %v22036_v31 }
0x3e45   : > { %22039 = vmatpush3.bf16.msra.mxu1 %v22036_v31 }
0x3e46   : > { %22041 = vmatprep.subr.bf16.mxu1 %v22040_v21 }
0x3e49   : > { %22043 = vmatpush3.bf16.msra.mxu1 %v22040_v21 }
0x3e4a   : > { %22045 = vmatprep.subr.bf16.mxu1 %v22044_v18 }
0x3e4d   : > { %22047 = vmatpush3.bf16.msra.mxu1 %v22044_v18 }
0x3e4e   : > { %22049 = vmatprep.subr.bf16.mxu1 %v22048_v52 }
0x3e51   : > { %22051 = vmatpush3.bf16.msra.mxu1 %v22048_v52  ;;  %v14601_v52 = vld [vmem:[%s27381_s14 + $0x80] sm:$0xff] }
0x3e52   : > { %22053 = vmatprep.subr.bf16.mxu1 %v22052_v44  ;;  %v22144_v23 = vpack.c.bf16 %v14602_v2, %v14601_v52  ;;  %v12507_v52 = vld [vmem:[%s27381_s14 + $0x60] sm:$0xff]  ;;  %v12508_v2 = vld [vmem:[%s27381_s14 + $0x68] sm:$0xff] }
0x3e55   : > { %22055 = vmatpush3.bf16.msra.mxu1 %v22052_v44  ;;  %v14597_v44 = vld [vmem:[%s27380_s13 + $0x10] sm:$0xff] }
0x3e56   : > { %22057 = vmatprep.subr.bf16.mxu1 %v22056_v45 }
0x3e58   : > { %19617 = vmatmul.mubr.f32.vlgmr.msra.gmra.mrb[116].mxu1 %v19543_v29 }
0x3e59   : > { %22059 = vmatpush3.bf16.msra.mxu1 %v22056_v45  ;;  %19656 = vmatprep.mubr.f32.mxu1 %v12138_v19  ;;  %v14603_v45 = vld [vmem:[%s27381_s14 + $0x90] sm:$0xff] }
0x3e5a   : > { %22061 = vmatprep.subr.bf16.mxu1 %v22060_v62  ;;  %v22148_v4 = vpack.c.bf16 %v14604_v40, %v14603_v45  ;;  %v14622_v45 = vld [vmem:[%s27381_s14 + $0x108] sm:$0xff] }
0x3e5d   : > { %22063 = vmatpush3.bf16.msra.mxu1 %v22060_v62  ;;  %v14638_v62 = vld [vmem:[%s27380_s13 + $0x38] sm:$0xff] }
0x3e5e   : > { %22065 = vmatprep.subr.bf16.mxu1 %v22064_v9 }
0x3e61   : > { %22067 = vmatpush3.bf16.msra.mxu1 %v22064_v9  ;;  %v14605_v9 = vld [vmem:[%s27381_s14 + $0xa0] sm:$0xff] }
0x3e62   : > { %22069 = vmatprep.subr.bf16.mxu1 %v22068_v51  ;;  %v22152_v55 = vpack.c.bf16 %v14606_v57, %v14605_v9  ;;  %v14625_v57 = vld [vmem:[%s27381_s14 + $0x120] sm:$0xff] }
0x3e65   : > { %22071 = vmatpush3.bf16.msra.mxu1 %v22068_v51  ;;  %v14677_v51 = vld [vmem:[%s27380_s13 + $0x50] sm:$0xff] }
0x3e66   : > { %22073 = vmatprep.subr.bf16.mxu1 %v22072_v0 }
0x3e69   : > { %22075 = vmatpush3.bf16.msra.mxu1 %v22072_v0  ;;  %v14608_v0 = vld [vmem:[%s27381_s14 + $0xb8] sm:$0xff] }
0x3e6a   : > { %22077 = vmatprep.subr.bf16.mxu1 %v22076_v11 }
0x3e6d   : > { %22079 = vmatpush3.bf16.msra.mxu1 %v22076_v11  ;;  %v22156_v11 = vpack.c.bf16 %v14608_v0, %v14607_v61  ;;  %v14628_v61 = vld [vmem:[%s27381_s14 + $0x138] sm:$0xff] }
0x3e6e   : > { %22081 = vmatprep.subr.bf16.mxu1 %v22080_v27 }
0x3e71   : > { %22083 = vmatpush3.bf16.msra.mxu1 %v22080_v27  ;;  %v14698_v27 = vld [vmem:[%s27380_s13 + $0x68] sm:$0xff] }
0x3e72   : > { %22085 = vmatprep.subr.bf16.mxu1 %v22084_v20 }
0x3e75   : > { %22087 = vmatpush3.bf16.msra.mxu1 %v22084_v20  ;;  %v14612_v20 = vld [vmem:[%s27381_s14 + $0xd8] sm:$0xff] }
0x3e78   : > { %19657 = vmatmul.mubr.f32.vlgmr.msra.gmra.mrb[116].mxu1 %v26829_v16 }
0x3f4b   : > { %v19658_v42 = vpop.f32.mrb[116].mxu1 }
0x3f4c   : > { %v12230_v5 = vpop.f32.mrb[117].mxu1 }
0x3f4d   : > { %v12241_v29 = vadd.f32 %v19658_v42, %v12230_v5 }
0x3f4f   : > { %v12242_v36 = vrot.slane %v12241_v29, 4 }
0x3f51   : > { %v12243_v7 = vadd.f32 %v12242_v36, %v12241_v29  ;;  %v14614_v29 = vld [vmem:[%s27381_s14 + $0xe8] sm:$0xff] }
0x3f53   : > { %v12244_v13 = vrot.slane %v12243_v7, 2 }
0x3f55   : > { %v12245_v19 = vadd.f32 %v12244_v13, %v12243_v7  ;;  %v14615_v7 = vld [vmem:[%s27381_s14 + $0xf0] sm:$0xff]  ;;  %v14616_v13 = vld [vmem:[%s27381_s14 + $0xf8] sm:$0xff] }
0x3f57   : > { %v12246_v43 = vrot.slane %v12245_v19, 1 }
0x3f59   : > { %v12247_v54 = vadd.f32 %v12246_v43, %v12245_v19  ;;  %v22172_v19 = vpack.c.bf16 %v14616_v13, %v14615_v7  ;;  %v12495_v43 = vld [vmem:[%s27381_s14] sm:$0xff]  ;;  %v14642_v7 = vld [vmem:[%s27381_s14 + $0x188] sm:$0xff] }
0x3f5b   : > { %19692 = vmatmul.mubr.f32.vlgmr.msra.gmra.mrb[90].mxu0 %v12247_v54  ;;  %v12496_v54 = vld [vmem:[%s27381_s14 + $0x8] sm:$0xff] }
0x3f5c   : > { %22114 = vmatpush3.bf16.msra.mxu0 %v22751_v33  ;;  %19726 = vmatprep.mubr.msk.f32.mxu0 %vm22543_vm2, %v22544_v60 }
0x3f5d   : > { %22115 = vmatprep.subr.bf16.mxu0 %v22542_v32 }
0x3f60   : > { %22117 = vmatpush3.bf16.msra.mxu0 %v22757_v35 }
0x3f61   : > { %22118 = vmatprep.subr.bf16.mxu0 %v22542_v32 }
0x3f64   : > { %22120 = vmatpush3.bf16.msra.mxu0 %v22767_v38 }
0x3f65   : > { %22121 = vmatprep.subr.bf16.mxu0 %v22542_v32 }
0x3f68   : > { %22123 = vmatpush3.bf16.msra.mxu0 %v22777_v41 }
0x3f69   : > { %22124 = vmatprep.subr.bf16.mxu0 %v22542_v32 }
0x3f6c   : > { %22126 = vmatpush3.bf16.msra.mxu0 %v22911_v50 }
0x3f6d   : > { %22127 = vmatprep.subr.bf16.mxu0 %v22542_v32 }
0x3f70   : > { %22129 = vmatpush3.bf16.msra.mxu0 %v22921_v53 }
0x3f71   : > { %22130 = vmatprep.subr.bf16.mxu0 %v22542_v32 }
0x3f74   : > { %22132 = vmatpush3.bf16.msra.mxu0 %v22931_v56  ;;  %v14617_v56 = vld [vmem:[%s27380_s13 + $0x20] sm:$0xff] }
0x3f75   : > { %22133 = vmatprep.subr.bf16.mxu0 %v22542_v32  ;;  %v12412_v32 = vld [vmem:[%s27380_s13] sm:$0xff]  ;;  %19817 = vmatprep.mubr.msk.f32.mxu1 %vm607_vm0, %v14617_v56 }
0x3f78   : > { %22135 = vmatpush3.bf16.msra.mxu0 %v22941_v59 }
0x402e   : > { %v12314_v33 = vpop.f32.mrb[90].mxu0 }
0x402f   : > { %v12321_v35 = vrot.slane %v12314_v33, %v22967_v8  ;;  %v19693_v38 = vpop.f32.mrb[91].mxu0  ;;  %v22176_v33 = vpack.c.bf16 %v12496_v54, %v12495_v43  ;;  %v14643_v43 = vld [vmem:[%s27381_s14 + $0x190] sm:$0xff]  ;;  %v14644_v54 = vld [vmem:[%s27381_s14 + $0x198] sm:$0xff] }
0x4031   : > { %v12322_v41 = vsub.f32 %v12230_v5, %v12321_v35  ;;  %v12323_v60 = vsub.f32 %v19658_v42, %v12321_v35  ;;  %v22164_v42 = vpack.c.bf16 %v14612_v20, %v14611_v14  ;;  %v14613_v5 = vld [vmem:[%s27381_s14 + $0xe0] sm:$0xff]  ;;  %v14634_v14 = vld [vmem:[%s27381_s14 + $0x168] sm:$0xff] }
0x4032   : > { %v22168_v36 = vpack.c.bf16 %v14614_v29, %v14613_v5  ;;  %v14636_v5 = vld [vmem:[%s27381_s14 + $0x178] sm:$0xff] }
0x4033   : > { %v12324_v16 = vmul.f32 %v12322_v41, %v12322_v41  ;;  %v12325_v50 = vmul.f32 %v12323_v60, %v12323_v60 }
0x4035   : > { %v12326_v22 = vadd.f32 %v12325_v50, %v12324_v16  ;;  %v12497_v16 = vld [vmem:[%s27381_s14 + $0x10] sm:$0xff]  ;;  %v12498_v50 = vld [vmem:[%s27381_s14 + $0x18] sm:$0xff] }
0x4037   : > { %v12327_v39 = vrot.slane %v12326_v22, 4 }
0x4039   : > { %v12328_v47 = vadd.f32 %v12327_v39, %v12326_v22 }
0x403b   : > { %v12329_v53 = vrot.slane %v12328_v47, 2 }
0x403d   : > { %v12330_v37 = vadd.f32 %v12329_v53, %v12328_v47  ;;  %v22180_v53 = vpack.c.bf16 %v12498_v50, %v12497_v16  ;;  %v14647_v50 = vld [vmem:[%s27381_s14 + $0x1b0] sm:$0xff] }
0x403f   : > { %v12331_v25 = vrot.slane %v12330_v37, 1 }
0x4041   : > { %v12332_v28 = vadd.f32 %v12331_v25, %v12330_v37  ;;  %v12499_v25 = vld [vmem:[%s27381_s14 + $0x20] sm:$0xff] }
0x4043   : > { %19727 = vmatmul.mubr.f32.vlgmr.msra.gmra.mrb[92].mxu0 %v12332_v28  ;;  %v12500_v28 = vld [vmem:[%s27381_s14 + $0x28] sm:$0xff] }
0x4044   : > { %19733 = vmatprep.mubr.msk.f32.mxu0 %vm607_vm0, %v12412_v32  ;;  %v22184_v56 = vpack.c.bf16 %v12500_v28, %v12499_v25  ;;  %v14651_v25 = vld [vmem:[%s27381_s14 + $0x1d0] sm:$0xff]  ;;  %v14652_v28 = vld [vmem:[%s27381_s14 + $0x1d8] sm:$0xff] }
0x4116   : > { %v12399_v59 = vpop.f32.mrb[92].mxu0 }
0x4117   : > { %v12400_v31 = vadd.f32 1e-05, %v12399_v59  ;;  %v19728_v63 = vpop.f32.mrb[93].mxu0 }
0x4118   : > { %v12502_v63 = vld [vmem:[%s27381_s14 + $0x38] sm:$0xff] }
0x4119   : > { %22519 = vrsqrt.f32 %v12400_v31  ;;  %v12501_v31 = vld [vmem:[%s27381_s14 + $0x30] sm:$0xff] }
0x4123   : > { %v22520_v15 = vpop.eup %22519 }
0x4124   : > { %v12407_v21 = vrot.slane %v22520_v15, %v22967_v8  ;;  %v12413_v8 = vld [vmem:[%s27380_s13 + $0x8] sm:$0xff]  ;;  %v22188_v15 = vpack.c.bf16 %v12502_v63, %v12501_v31  ;;  %v14653_v31 = vld [vmem:[%s27381_s14 + $0x1e0] sm:$0xff] }
0x4125   : > { %v14654_v63 = vld [vmem:[%s27381_s14 + $0x1e8] sm:$0xff] }
0x4126   : > { %v12408_v58 = vmul.f32 %v12407_v21, %v12322_v41  ;;  %v12409_v46 = vmul.f32 %v12407_v21, %v12323_v60  ;;  %v12503_v21 = vld [vmem:[%s27381_s14 + $0x40] sm:$0xff] }
0x4128   : > { %v12410_v18 = vmax.f32 %v12408_v58, 0.0  ;;  %v12411_v10 = vmax.f32 %v12409_v46, 0.0  ;;  %v12504_v58 = vld [vmem:[%s27381_s14 + $0x48] sm:$0xff] }
0x4129   : > { %v22192_v46 = vpack.c.bf16 %v12504_v58, %v12503_v21  ;;  %v14655_v21 = vld [vmem:[%s27381_s14 + $0x1f0] sm:$0xff]  ;;  %v14656_v58 = vld [vmem:[%s27381_s14 + $0x1f8] sm:$0xff] }
0x412a   : > { %v22136_v1 = vpack.c.bf16 %v12411_v10, %v12410_v18  ;;  %v12505_v18 = vld [vmem:[%s27381_s14 + $0x50] sm:$0xff]  ;;  %v12506_v10 = vld [vmem:[%s27381_s14 + $0x58] sm:$0xff] }
0x412c   : > { %22137 = vmatprep.subr.bf16.mxu0 %v22136_v1  ;;  %22209 = vmatprep.subr.bf16.mxu1 %v22136_v1 }
0x412d   : > { %22139 = vmatpush3.bf16.msra.mxu0 %v22136_v1  ;;  %22211 = vmatpush3.bf16.msra.mxu1 %v22136_v1 }
0x412e   : > { %22141 = vmatprep.subr.bf16.mxu0 %v22136_v1  ;;  %22245 = vmatprep.subr.bf16.mxu1 %v22136_v1 }
0x4130   : > { %19734 = vmatmul.mubr.msk.f32.vlgmr.msra.gmra.mrb[94].mxu0 %vm607_vm0, %v12413_v8  ;;  %19818 = vmatmul.mubr.msk.f32.vlgmr.msra.gmra.mrb[118].mxu1 %vm607_vm0, %v14618_v17  ;;  %v22200_v8 = vpack.c.bf16 %v12508_v2, %v12507_v52  ;;  %v12509_v17 = vld [vmem:[%s27381_s14 + $0x70] sm:$0xff]  ;;  %v14664_v2 = vld [vmem:[%s27381_s14 + $0x218] sm:$0xff] }
0x4131   : > { %22143 = vmatpush3.bf16.msra.mxu0 %v22136_v1  ;;  %22247 = vmatpush3.bf16.msra.mxu1 %v22136_v1  ;;  %v14663_v52 = vld [vmem:[%s27381_s14 + $0x210] sm:$0xff] }
0x4132   : > { %22281 = vmatprep.subr.bf16.mxu1 %v22136_v1  ;;  %19740 = vmatprep.mubr.msk.f32.mxu0 %vm607_vm0, %v14597_v44  ;;  %v12510_v44 = vld [vmem:[%s27381_s14 + $0x78] sm:$0xff] }
0x4133   : > { %19859 = vmatprep.mubr.msk.f32.mxu1 %vm607_vm0, %v14637_v3  ;;  %22145 = vmatprep.subr.bf16.mxu0 %v22144_v23  ;;  %v14621_v3 = vld [vmem:[%s27381_s14 + $0x100] sm:$0xff] }
0x4134   : > { %19741 = vmatmul.mubr.msk.f32.vlgmr.msra.gmra.mrb[96].mxu0 %vm607_vm0, %v14598_v6  ;;  %19860 = vmatmul.mubr.msk.f32.vlgmr.msra.gmra.mrb[120].mxu1 %vm607_vm0, %v14638_v62  ;;  %v22212_v40 = vpack.c.bf16 %v14622_v45, %v14621_v3  ;;  %v14623_v6 = vld [vmem:[%s27381_s14 + $0x110] sm:$0xff]  ;;  %v14624_v62 = vld [vmem:[%s27381_s14 + $0x118] sm:$0xff] }
0x4135   : > { %22283 = vmatpush3.bf16.msra.mxu1 %v22136_v1  ;;  %19901 = vmatprep.mubr.msk.f32.mxu1 %vm607_vm0, %v14657_v12  ;;  %v14667_v3 = vld [vmem:[%s27381_s14 + $0x230] sm:$0xff]  ;;  %v14668_v45 = vld [vmem:[%s27381_s14 + $0x238] sm:$0xff] }
0x4136   : > { %22317 = vmatprep.subr.bf16.mxu1 %v22136_v1  ;;  %22147 = vmatpush3.bf16.msra.mxu0 %v22144_v23  ;;  %v22204_v23 = vpack.c.bf16 %v12510_v44, %v12509_v17  ;;  %v14665_v17 = vld [vmem:[%s27381_s14 + $0x220] sm:$0xff]  ;;  %v14666_v44 = vld [vmem:[%s27381_s14 + $0x228] sm:$0xff] }
0x4137   : > { %22149 = vmatprep.subr.bf16.mxu0 %v22148_v4 }
0x4138   : > { %19902 = vmatmul.mubr.msk.f32.vlgmr.msra.gmra.mrb[122].mxu1 %vm607_vm0, %v14658_v48  ;;  %v14626_v48 = vld [vmem:[%s27381_s14 + $0x128] sm:$0xff] }
0x4139   : > { %22319 = vmatpush3.bf16.msra.mxu1 %v22136_v1  ;;  %19943 = vmatprep.mubr.msk.f32.mxu1 %vm607_vm0, %v14677_v51  ;;  %v22220_v51 = vpack.c.bf16 %v14626_v48, %v14625_v57  ;;  %v14673_v48 = vld [vmem:[%s27381_s14 + $0x260] sm:$0xff] }
0x413a   : > { %22353 = vmatprep.subr.bf16.mxu1 %v22136_v1  ;;  %22151 = vmatpush3.bf16.msra.mxu0 %v22148_v4  ;;  %v22216_v4 = vpack.c.bf16 %v14624_v62, %v14623_v6  ;;  %v14671_v62 = vld [vmem:[%s27381_s14 + $0x250] sm:$0xff] }
0x413b   : > { %22153 = vmatprep.subr.bf16.mxu0 %v22152_v55 }
0x413c   : > { %19944 = vmatmul.mubr.msk.f32.vlgmr.msra.gmra.mrb[124].mxu1 %vm607_vm0, %v14678_v49  ;;  %v14629_v49 = vld [vmem:[%s27381_s14 + $0x140] sm:$0xff] }
0x413d   : > { %22355 = vmatpush3.bf16.msra.mxu1 %v22136_v1  ;;  %19985 = vmatprep.mubr.msk.f32.mxu1 %vm607_vm0, %v14697_v24  ;;  %v22196_v1 = vpack.c.bf16 %v12506_v10, %v12505_v18  ;;  %v14630_v24 = vld [vmem:[%s27381_s14 + $0x148] sm:$0xff]  ;;  %v14661_v18 = vld [vmem:[%s27381_s14 + $0x200] sm:$0xff] }
0x413e   : > { %22155 = vmatpush3.bf16.msra.mxu0 %v22152_v55  ;;  %v14627_v55 = vld [vmem:[%s27381_s14 + $0x130] sm:$0xff]  ;;  %v14662_v10 = vld [vmem:[%s27381_s14 + $0x208] sm:$0xff] }
0x413f   : > { %22157 = vmatprep.subr.bf16.mxu0 %v22156_v11  ;;  %v22224_v0 = vpack.c.bf16 %v14628_v61, %v14627_v55  ;;  %v14675_v61 = vld [vmem:[%s27381_s14 + $0x270] sm:$0xff] }
0x4140   : > { %19986 = vmatmul.mubr.msk.f32.vlgmr.msra.gmra.mrb[126].mxu1 %vm607_vm0, %v14698_v27  ;;  %v22232_v27 = vpack.c.bf16 %v14632_v30, %v14631_v26  ;;  %v14683_v30 = vld [vmem:[%s27381_s14 + $0x290] sm:$0xff] }
0x4142   : > { %22159 = vmatpush3.bf16.msra.mxu0 %v22156_v11  ;;  %v22228_v11 = vpack.c.bf16 %v14630_v24, %v14629_v49  ;;  %v14681_v24 = vld [vmem:[%s27381_s14 + $0x280] sm:$0xff] }
0x4143   : > { %22161 = vmatprep.subr.bf16.mxu0 %v22160_v34 }
0x4146   : > { %22163 = vmatpush3.bf16.msra.mxu0 %v22160_v34  ;;  %v14633_v34 = vld [vmem:[%s27381_s14 + $0x160] sm:$0xff] }
0x4147   : > { %22165 = vmatprep.subr.bf16.mxu0 %v22164_v42  ;;  %v22236_v20 = vpack.c.bf16 %v14634_v14, %v14633_v34  ;;  %v14685_v14 = vld [vmem:[%s27381_s14 + $0x2a0] sm:$0xff] }
0x414a   : > { %22167 = vmatpush3.bf16.msra.mxu0 %v22164_v42  ;;  %v14635_v42 = vld [vmem:[%s27381_s14 + $0x170] sm:$0xff] }
0x414b   : > { %22169 = vmatprep.subr.bf16.mxu0 %v22168_v36  ;;  %v22240_v29 = vpack.c.bf16 %v14636_v5, %v14635_v42  ;;  %v14687_v5 = vld [vmem:[%s27381_s14 + $0x2b0] sm:$0xff] }
0x414e   : > { %22171 = vmatpush3.bf16.msra.mxu0 %v22168_v36  ;;  %v14641_v36 = vld [vmem:[%s27381_s14 + $0x180] sm:$0xff] }
0x414f   : > { %22173 = vmatprep.subr.bf16.mxu0 %v22172_v19  ;;  %v22248_v13 = vpack.c.bf16 %v14642_v7, %v14641_v36 }
0x4152   : > { %22175 = vmatpush3.bf16.msra.mxu0 %v22172_v19 }
0x4153   : > { %22177 = vmatprep.subr.bf16.mxu0 %v22176_v33 }
0x4203   : > { %v19735_v35 = vpop.f32.mrb[94].mxu0  ;;  %v27045_v38 = vpop.f32.mrb[118].mxu1 }
0x4204   : > { %v12486_v41 = vpop.f32.mrb[95].mxu0  ;;  %v12837_v60 = vpop.f32.mrb[119].mxu1 }
0x4207   : > { %v19742_v22 = vpop.f32.mrb[96].mxu0  ;;  %v27053_v39 = vpop.f32.mrb[120].mxu1 }
0x4208   : > { %v12586_v47 = vpop.f32.mrb[97].mxu0  ;;  %v27055_v37 = vpop.f32.mrb[121].mxu1 }
0x4209   : > { %19775 = vmatprep.mubr.f32.mxu0 %v12586_v47 }
0x420a   : > { %19776 = vmatmul.mubr.f32.vlgmr.msra.gmra.mrb[98].mxu0 %v19742_v22  ;;  %v14648_v22 = vld [vmem:[%s27381_s14 + $0x1b8] sm:$0xff] }
0x420b   : > { %22179 = vmatpush3.bf16.msra.mxu0 %v22176_v33  ;;  %19810 = vmatprep.mubr.f32.mxu0 %v12486_v41  ;;  %v27063_v32 = vpop.f32.mrb[122].mxu1  ;;  %v14645_v41 = vld [vmem:[%s27381_s14 + $0x1a0] sm:$0xff]  ;;  %v22260_v47 = vpack.c.bf16 %v14648_v22, %v14647_v50  ;;  %v14696_v50 = vld [vmem:[%s27381_s14 + $0x2f8] sm:$0xff] }
0x420c   : > { %22181 = vmatprep.subr.bf16.mxu0 %v22180_v53  ;;  %v27065_v59 = vpop.f32.mrb[123].mxu1 }
0x420f   : > { %22183 = vmatpush3.bf16.msra.mxu0 %v22180_v53  ;;  %v27109_v12 = vpop.f32.mrb[124].mxu1  ;;  %v14650_v53 = vld [vmem:[%s27381_s14 + $0x1c8] sm:$0xff] }
0x4210   : > { %22185 = vmatprep.subr.bf16.mxu0 %v22184_v56  ;;  %v27111_v9 = vpop.f32.mrb[125].mxu1 }
0x4213   : > { %22187 = vmatpush3.bf16.msra.mxu0 %v22184_v56  ;;  %v27155_v19 = vpop.f32.mrb[126].mxu1  ;;  %v22268_v56 = vpack.c.bf16 %v14652_v28, %v14651_v25  ;;  %v14704_v25 = vld [vmem:[%s27381_s14 + $0x318] sm:$0xff] }
0x4214   : > { %22189 = vmatprep.subr.bf16.mxu0 %v22188_v15  ;;  %v27163_v33 = vpop.f32.mrb[127].mxu1 }
0x4217   : > { %22191 = vmatpush3.bf16.msra.mxu0 %v22188_v15  ;;  %v22272_v15 = vpack.c.bf16 %v14654_v63, %v14653_v31  ;;  %v14706_v31 = vld [vmem:[%s27381_s14 + $0x328] sm:$0xff] }
0x4218   : > { %22193 = vmatprep.subr.bf16.mxu0 %v22192_v46 }
0x421b   : > { %22195 = vmatpush3.bf16.msra.mxu0 %v22192_v46  ;;  %v22276_v46 = vpack.c.bf16 %v14656_v58, %v14655_v21  ;;  %v14708_v21 = vld [vmem:[%s27381_s14 + $0x338] sm:$0xff] }
0x421c   : > { %22197 = vmatprep.subr.bf16.mxu0 %v22196_v1 }
0x421f   : > { %22199 = vmatpush3.bf16.msra.mxu0 %v22196_v1  ;;  %v22284_v1 = vpack.c.bf16 %v14662_v10, %v14661_v18  ;;  %v14711_v18 = vld [vmem:[%s27381_s14 + $0x350] sm:$0xff]  ;;  %v14712_v10 = vld [vmem:[%s27381_s14 + $0x358] sm:$0xff] }
0x4220   : > { %22201 = vmatprep.subr.bf16.mxu0 %v22200_v8 }
0x4223   : > { %22203 = vmatpush3.bf16.msra.mxu0 %v22200_v8  ;;  %v22288_v8 = vpack.c.bf16 %v14664_v2, %v14663_v52  ;;  %v14713_v52 = vld [vmem:[%s27381_s14 + $0x360] sm:$0xff]  ;;  %v14714_v2 = vld [vmem:[%s27381_s14 + $0x368] sm:$0xff] }
0x4224   : > { %22205 = vmatprep.subr.bf16.mxu0 %v22204_v23 }
0x4227   : > { %22207 = vmatpush3.bf16.msra.mxu0 %v22204_v23  ;;  %v22292_v23 = vpack.c.bf16 %v14666_v44, %v14665_v17  ;;  %v14715_v17 = vld [vmem:[%s27381_s14 + $0x370] sm:$0xff]  ;;  %v14716_v44 = vld [vmem:[%s27381_s14 + $0x378] sm:$0xff] }
0x4228   : > { %22213 = vmatprep.subr.bf16.mxu0 %v22212_v40 }
0x422a   : > { %19811 = vmatmul.mubr.f32.vlgmr.msra.gmra.mrb[98].mxu0 %v19735_v35  ;;  %v22252_v35 = vpack.c.bf16 %v14644_v54, %v14643_v43  ;;  %v14692_v43 = vld [vmem:[%s27381_s14 + $0x2d8] sm:$0xff] }
0x422b   : > { %22215 = vmatpush3.bf16.msra.mxu0 %v22212_v40  ;;  %19852 = vmatprep.mubr.f32.mxu0 %v12837_v60  ;;  %v14646_v60 = vld [vmem:[%s27381_s14 + $0x1a8] sm:$0xff]  ;;  %v22296_v40 = vpack.c.bf16 %v14668_v45, %v14667_v3  ;;  %v14717_v3 = vld [vmem:[%s27385_s18] ss:$0 sm:$0xff] }
0x422c   : > { %22217 = vmatprep.subr.bf16.mxu0 %v22216_v4  ;;  %v22256_v16 = vpack.c.bf16 %v14646_v60, %v14645_v41  ;;  %v14694_v41 = vld [vmem:[%s27381_s14 + $0x2e8] sm:$0xff] }
0x422f   : > { %22219 = vmatpush3.bf16.msra.mxu0 %v22216_v4  ;;  %v14672_v4 = vld [vmem:[%s27381_s14 + $0x258] sm:$0xff] }
0x4230   : > { %22221 = vmatprep.subr.bf16.mxu0 %v22220_v51  ;;  %v22304_v57 = vpack.c.bf16 %v14672_v4, %v14671_v62 }
0x4233   : > { %22223 = vmatpush3.bf16.msra.mxu0 %v22220_v51  ;;  %v14674_v51 = vld [vmem:[%s27381_s14 + $0x268] sm:$0xff] }
0x4234   : > { %22225 = vmatprep.subr.bf16.mxu0 %v22224_v0  ;;  %v22308_v55 = vpack.c.bf16 %v14674_v51, %v14673_v48 }
0x4237   : > { %22227 = vmatpush3.bf16.msra.mxu0 %v22224_v0  ;;  %v14676_v0 = vld [vmem:[%s27381_s14 + $0x278] sm:$0xff] }
0x4238   : > { %22229 = vmatprep.subr.bf16.mxu0 %v22228_v11  ;;  %v22312_v49 = vpack.c.bf16 %v14676_v0, %v14675_v61 }
0x423b   : > { %22231 = vmatpush3.bf16.msra.mxu0 %v22228_v11  ;;  %v14682_v11 = vld [vmem:[%s27381_s14 + $0x288] sm:$0xff] }
0x423c   : > { %22233 = vmatprep.subr.bf16.mxu0 %v22232_v27  ;;  %v22320_v26 = vpack.c.bf16 %v14682_v11, %v14681_v24 }
0x423f   : > { %22235 = vmatpush3.bf16.msra.mxu0 %v22232_v27  ;;  %v14684_v27 = vld [vmem:[%s27381_s14 + $0x298] sm:$0xff] }
0x4240   : > { %22237 = vmatprep.subr.bf16.mxu0 %v22236_v20  ;;  %v22324_v34 = vpack.c.bf16 %v14684_v27, %v14683_v30 }
0x4243   : > { %22239 = vmatpush3.bf16.msra.mxu0 %v22236_v20  ;;  %v14686_v20 = vld [vmem:[%s27381_s14 + $0x2a8] sm:$0xff] }
0x4244   : > { %22241 = vmatprep.subr.bf16.mxu0 %v22240_v29  ;;  %v22328_v42 = vpack.c.bf16 %v14686_v20, %v14685_v14 }
0x4247   : > { %22243 = vmatpush3.bf16.msra.mxu0 %v22240_v29  ;;  %v14688_v29 = vld [vmem:[%s27381_s14 + $0x2b8] sm:$0xff] }
0x4248   : > { %22249 = vmatprep.subr.bf16.mxu0 %v22248_v13  ;;  %v22332_v36 = vpack.c.bf16 %v14688_v29, %v14687_v5 }
0x424a   : > { %19853 = vmatmul.mubr.f32.vlgmr.msra.gmra.mrb[98].mxu0 %v27045_v38  ;;  %v14649_v38 = vld [vmem:[%s27381_s14 + $0x1c0] sm:$0xff] }
0x424b   : > { %22251 = vmatpush3.bf16.msra.mxu0 %v22248_v13  ;;  %19894 = vmatprep.mubr.f32.mxu0 %v27055_v37  ;;  %v22264_v37 = vpack.c.bf16 %v14650_v53, %v14649_v38  ;;  %v14691_v13 = vld [vmem:[%s27381_s14 + $0x2d0] sm:$0xff]  ;;  %v14702_v38 = vld [vmem:[%s27381_s14 + $0x308] sm:$0xff] }
0x424c   : > { %22253 = vmatprep.subr.bf16.mxu0 %v22252_v35  ;;  %v22340_v54 = vpack.c.bf16 %v14692_v43, %v14691_v13 }
0x424f   : > { %22255 = vmatpush3.bf16.msra.mxu0 %v22252_v35  ;;  %v14693_v35 = vld [vmem:[%s27381_s14 + $0x2e0] sm:$0xff] }
0x4250   : > { %22257 = vmatprep.subr.bf16.mxu0 %v22256_v16  ;;  %v22344_v60 = vpack.c.bf16 %v14694_v41, %v14693_v35 }
0x4253   : > { %22259 = vmatpush3.bf16.msra.mxu0 %v22256_v16  ;;  %v14695_v16 = vld [vmem:[%s27381_s14 + $0x2f0] sm:$0xff] }
0x4254   : > { %22261 = vmatprep.subr.bf16.mxu0 %v22260_v47  ;;  %v22348_v22 = vpack.c.bf16 %v14696_v50, %v14695_v16 }
0x4257   : > { %22263 = vmatpush3.bf16.msra.mxu0 %v22260_v47  ;;  %v14701_v47 = vld [vmem:[%s27381_s14 + $0x300] sm:$0xff] }
0x4258   : > { %22265 = vmatprep.subr.bf16.mxu0 %v22264_v37  ;;  %v22356_v53 = vpack.c.bf16 %v14702_v38, %v14701_v47 }
0x425b   : > { %22267 = vmatpush3.bf16.msra.mxu0 %v22264_v37  ;;  %v14703_v37 = vld [vmem:[%s27381_s14 + $0x310] sm:$0xff] }
0x425c   : > { %22269 = vmatprep.subr.bf16.mxu0 %v22268_v56  ;;  %v22360_v28 = vpack.c.bf16 %v14704_v25, %v14703_v37 }
0x425f   : > { %22271 = vmatpush3.bf16.msra.mxu0 %v22268_v56  ;;  %v14705_v56 = vld [vmem:[%s27381_s14 + $0x320] sm:$0xff] }
0x4260   : > { %22273 = vmatprep.subr.bf16.mxu0 %v22272_v15  ;;  %v22364_v63 = vpack.c.bf16 %v14706_v31, %v14705_v56 }
0x4263   : > { %22275 = vmatpush3.bf16.msra.mxu0 %v22272_v15  ;;  %v14707_v15 = vld [vmem:[%s27381_s14 + $0x330] sm:$0xff] }
0x4264   : > { %22277 = vmatprep.subr.bf16.mxu0 %v22276_v46  ;;  %v22368_v58 = vpack.c.bf16 %v14708_v21, %v14707_v15 }
0x4267   : > { %22279 = vmatpush3.bf16.msra.mxu0 %v22276_v46 }
0x4268   : > { %22285 = vmatprep.subr.bf16.mxu0 %v22284_v1 }
0x426a   : > { %19895 = vmatmul.mubr.f32.vlgmr.msra.gmra.mrb[98].mxu0 %v27053_v39  ;;  %v14669_v39 = vld [vmem:[%s27381_s14 + $0x240] sm:$0xff] }
0x426b   : > { %22287 = vmatpush3.bf16.msra.mxu0 %v22284_v1  ;;  %19936 = vmatprep.mubr.f32.mxu0 %v27065_v59  ;;  %v14670_v59 = vld [vmem:[%s27381_s14 + $0x248] sm:$0xff]  ;;  %v22376_v1 = vpack.c.bf16 %v14712_v10, %v14711_v18 }
0x426c   : > { %22289 = vmatprep.subr.bf16.mxu0 %v22288_v8  ;;  %v22300_v6 = vpack.c.bf16 %v14670_v59, %v14669_v39 }
0x426f   : > { %22291 = vmatpush3.bf16.msra.mxu0 %v22288_v8  ;;  %v22380_v8 = vpack.c.bf16 %v14714_v2, %v14713_v52 }
0x4270   : > { %22293 = vmatprep.subr.bf16.mxu0 %v22292_v23 }
0x4273   : > { %22295 = vmatpush3.bf16.msra.mxu0 %v22292_v23  ;;  %v22384_v23 = vpack.c.bf16 %v14716_v44, %v14715_v17 }
0x4274   : > { %22297 = vmatprep.subr.bf16.mxu0 %v22296_v40 }
0x4277   : > { %22299 = vmatpush3.bf16.msra.mxu0 %v22296_v40 }
0x4278   : > { %22301 = vmatprep.subr.bf16.mxu0 %v22300_v6 }
0x427b   : > { %22303 = vmatpush3.bf16.msra.mxu0 %v22300_v6 }
0x427c   : > { %22305 = vmatprep.subr.bf16.mxu0 %v22304_v57 }
0x427f   : > { %22307 = vmatpush3.bf16.msra.mxu0 %v22304_v57 }
0x4280   : > { %22309 = vmatprep.subr.bf16.mxu0 %v22308_v55 }
0x4283   : > { %22311 = vmatpush3.bf16.msra.mxu0 %v22308_v55 }
0x4284   : > { %22313 = vmatprep.subr.bf16.mxu0 %v22312_v49 }
0x4287   : > { %22315 = vmatpush3.bf16.msra.mxu0 %v22312_v49 }
0x4288   : > { %22321 = vmatprep.subr.bf16.mxu0 %v22320_v26 }
0x428a   : > { %19937 = vmatmul.mubr.f32.vlgmr.msra.gmra.mrb[98].mxu0 %v27063_v32  ;;  %v14689_v32 = vld [vmem:[%s27381_s14 + $0x2c0] sm:$0xff] }
0x428b   : > { %22323 = vmatpush3.bf16.msra.mxu0 %v22320_v26  ;;  %19978 = vmatprep.mubr.f32.mxu0 %v27111_v9  ;;  %v14690_v9 = vld [vmem:[%s27381_s14 + $0x2c8] sm:$0xff] }
0x428c   : > { %22325 = vmatprep.subr.bf16.mxu0 %v22324_v34  ;;  %v22336_v7 = vpack.c.bf16 %v14690_v9, %v14689_v32 }
0x428f   : > { %22327 = vmatpush3.bf16.msra.mxu0 %v22324_v34 }
0x4290   : > { %22329 = vmatprep.subr.bf16.mxu0 %v22328_v42 }
0x4293   : > { %22331 = vmatpush3.bf16.msra.mxu0 %v22328_v42 }
0x4294   : > { %22333 = vmatprep.subr.bf16.mxu0 %v22332_v36 }
0x4297   : > { %22335 = vmatpush3.bf16.msra.mxu0 %v22332_v36 }
0x4298   : > { %22337 = vmatprep.subr.bf16.mxu0 %v22336_v7 }
0x429b   : > { %22339 = vmatpush3.bf16.msra.mxu0 %v22336_v7 }
0x429c   : > { %22341 = vmatprep.subr.bf16.mxu0 %v22340_v54 }
0x429f   : > { %22343 = vmatpush3.bf16.msra.mxu0 %v22340_v54 }
0x42a0   : > { %22345 = vmatprep.subr.bf16.mxu0 %v22344_v60 }
0x42a3   : > { %22347 = vmatpush3.bf16.msra.mxu0 %v22344_v60 }
0x42a4   : > { %22349 = vmatprep.subr.bf16.mxu0 %v22348_v22 }
0x42a7   : > { %22351 = vmatpush3.bf16.msra.mxu0 %v22348_v22 }
0x42a8   : > { %22357 = vmatprep.subr.bf16.mxu0 %v22356_v53 }
0x42aa   : > { %19979 = vmatmul.mubr.f32.vlgmr.msra.gmra.mrb[98].mxu0 %v27109_v12  ;;  %v14709_v12 = vld [vmem:[%s27381_s14 + $0x340] sm:$0xff] }
0x42ab   : > { %22359 = vmatpush3.bf16.msra.mxu0 %v22356_v53  ;;  %20020 = vmatprep.mubr.f32.mxu0 %v27163_v33  ;;  %v14710_v33 = vld [vmem:[%s27381_s14 + $0x348] sm:$0xff] }
0x42ac   : > { %22361 = vmatprep.subr.bf16.mxu0 %v22360_v28  ;;  %v22372_v46 = vpack.c.bf16 %v14710_v33, %v14709_v12 }
0x42af   : > { %22363 = vmatpush3.bf16.msra.mxu0 %v22360_v28 }
0x42b0   : > { %22365 = vmatprep.subr.bf16.mxu0 %v22364_v63 }
0x42b3   : > { %22367 = vmatpush3.bf16.msra.mxu0 %v22364_v63 }
0x42b4   : > { %22369 = vmatprep.subr.bf16.mxu0 %v22368_v58 }
0x42b7   : > { %22371 = vmatpush3.bf16.msra.mxu0 %v22368_v58 }
0x42b8   : > { %22373 = vmatprep.subr.bf16.mxu0 %v22372_v46 }
0x42bb   : > { %22375 = vmatpush3.bf16.msra.mxu0 %v22372_v46 }
0x42bc   : > { %22377 = vmatprep.subr.bf16.mxu0 %v22376_v1 }
0x42bf   : > { %22379 = vmatpush3.bf16.msra.mxu0 %v22376_v1 }
0x42c0   : > { %22381 = vmatprep.subr.bf16.mxu0 %v22380_v8 }
0x42c3   : > { %22383 = vmatpush3.bf16.msra.mxu0 %v22380_v8 }
0x42c4   : > { %22385 = vmatprep.subr.bf16.mxu0 %v22384_v23 }
0x42c7   : > { %22387 = vmatpush3.bf16.msra.mxu0 %v22384_v23 }
0x42ca   : > { %20021 = vmatmul.mubr.f32.vlgmr.msra.gmra.mrb[98].mxu0 %v27155_v19 }
0x439d   : > { %v20022_v45 = vpop.f32.mrb[98].mxu0 }
0x439e   : > { %v13660_v40 = vadd.f32 %v20022_v45, %v14717_v3  ;;  %v13641_v39 = vpop.f32.mrb[99].mxu0 }
0x439f   : > { %v13659_v59 = vadd.f32 %v14717_v3, %v13641_v39 }
0x43a0   : > { %22521 = vtanh.f32 %v13660_v40 }
0x43a1   : > { %22523 = vtanh.f32 %v13659_v59 }
0x43aa   : > { %v22522_v6 = vpop.eup %22521 }
0x43ab   : > { %v22524_v62 = vpop.eup %22523  ;;  %13664 = vst.msk [vmem:[%s602_s21 + $0x8] sm:$0xff] %vm786_vm1, %v22522_v6 }
0x43ac   : > { %13663 = vst.msk [vmem:[%s602_s21] sm:$0xff] %vm786_vm1, %v22524_v62 }
0x43ad PF: > { %s27402_s2 = sld [smem:[#allocation2_spill]] }
0x43b3   : > { %s29_s0 = sadd.s32 1, %s27402_s2  }
0x43b4   : > { %p26_p4 = scmp.ge.s32.totalorder %s29_s0, 4  }
0x43b6   :  { %28 = sbr.rel (!%p26_p4) target bundleno = 6 (0x6), region = 203 }

</bundles_post_ra>
